<compile_context>
chip_gen: v5e
topology: v5e:2x2
jax: 0.10.0
libtpu: 0.0.40
codegen_flags: <defaults>
</compile_context>

<pallas_src>
import functools

import jax
import jax.numpy as jnp
from jax.experimental import pallas as pl
from jax.experimental.pallas import tpu as pltpu

# ---- scaled-down module hyperparameters (same structure as the PyTorch GPT) ----
EMBED_SIZE = 128          # module default: 384
SEQ_LEN = 128             # module default: 256
NUM_HEADS = 4             # module default: 6
NUM_LAYERS = 2            # module default: 6
VOCAB_SIZE = 128
HEAD_SIZE = EMBED_SIZE // NUM_HEADS
LN_EPS = 1e-5
TM = 128                  # row tile for the final ln_f + lm_head kernel
MLP_CHUNK = 128           # lane-chunk of the 4C hidden dim (128 keeps <=40 vregs live)


# --------------------------- in-kernel helpers ---------------------------------
def _ln(x, g, b):
    """Row-wise LayerNorm in f32.  x: (rows, C); g,b: (1, C)."""
    mu = jnp.mean(x, axis=-1, keepdims=True)
    var = jnp.mean(jnp.square(x - mu), axis=-1, keepdims=True)
    return (x - mu) * jax.lax.rsqrt(var + LN_EPS) * g + b


# --------------------------- fused transformer-block kernel ---------------------
def _block_kernel(x_ref, g1_ref, b1_ref, wqkv_ref, wp_ref, bp_ref,
                  g2_ref, b2_ref, w1_ref, bf1_ref, w2_ref, bf2_ref,
                  o_ref, qkv_scr, *, num_heads, head_size):
    """One batch element per grid step:
         x1 = x + proj(mha(ln1(x)));  out = x1 + fc2(relu(fc1(ln2(x1))))."""
    T = x_ref.shape[1]
    C = num_heads * head_size

    # ---- ln1 + fused QKV projection (chunked, results stored bf16 in VMEM) ----
    x = x_ref[0].astype(jnp.float32)                                  # (T, C) f32
    h1 = _ln(x, g1_ref[...], b1_ref[...]).astype(jnp.bfloat16)        # (T, C) bf16
    for c in range(3):                                                # q | k | v chunks
        qkv_scr[:, c * C:(c + 1) * C] = jnp.dot(
            h1, wqkv_ref[:, c * C:(c + 1) * C],
            preferred_element_type=jnp.float32).astype(jnp.bfloat16)

    # ---- causal multi-head attention (softmax scale pre-folded into wq) ----
    row = jax.lax.broadcasted_iota(jnp.int32, (T, T), 0)
    col = jax.lax.broadcasted_iota(jnp.int32, (T, T), 1)
    causal = col <= row
    outs = []
    for h in range(num_heads):                                        # static loop (4)
        lo = h * head_size
        q = qkv_scr[:, lo:lo + head_size]                             # bf16 (T, hs)
        k = qkv_scr[:, C + lo:C + lo + head_size]
        v = qkv_scr[:, 2 * C + lo:2 * C + lo + head_size]
        s = jax.lax.dot_general(q, k, (((1,), (1,)), ((), ())),
                                preferred_element_type=jnp.float32)   # q @ k.T, (T, T) f32
        s = jnp.where(causal, s, -jnp.inf)
        m = jnp.max(s, axis=-1, keepdims=True)
        p = jnp.exp(s - m)
        l = jnp.sum(p, axis=-1, keepdims=True)
        p = p * pl.reciprocal(l, approx=True)                         # divide on the EUP
        outs.append(jnp.dot(p.astype(jnp.bfloat16), v,
                            preferred_element_type=jnp.float32).astype(jnp.bfloat16))
    attn = jnp.concatenate(outs, axis=-1)                             # (T, C) bf16

    # ---- output projection + bias + residual ----
    x1 = (jnp.dot(attn, wp_ref[...], preferred_element_type=jnp.float32)
          + bp_ref[...] + x_ref[0].astype(jnp.float32))               # (T, C) f32

    # ---- ln2 + MLP (chunked over the 4C hidden dim) + residual ----
    h2 = _ln(x1, g2_ref[...], b2_ref[...]).astype(jnp.bfloat16)       # (T, C) bf16
    acc = x1 + bf2_ref[...]                                           # residual + fc2 bias
    H = w1_ref.shape[1]
    for c in range(H // MLP_CHUNK):                                   # static loop (4)
        lo = c * MLP_CHUNK
        f = jnp.dot(h2, w1_ref[:, lo:lo + MLP_CHUNK],
                    preferred_element_type=jnp.float32) + bf1_ref[:, lo:lo + MLP_CHUNK]
        f = jnp.maximum(f, 0.0)
        acc = acc + jnp.dot(f.astype(jnp.bfloat16), w2_ref[lo:lo + MLP_CHUNK, :],
                            preferred_element_type=jnp.float32)
    o_ref[0] = acc.astype(o_ref.dtype)


def transformer_block(x, blk, *, num_heads=NUM_HEADS, head_size=HEAD_SIZE):
    """x: (B, T, C) bf16 -> (B, T, C) bf16, one full transformer block."""
    B, T, C = x.shape
    H = blk["fc1_w"].shape[1]
    kernel = functools.partial(_block_kernel, num_heads=num_heads, head_size=head_size)
    # NOTE(v7x): grid=(B,) gives one step per TensorCore at B=2; when batch grows,
    # keep >=2 steps per core for DMA/compute overlap (do not shrink the T tile).
    return pl.pallas_call(
        kernel,
        out_shape=jax.ShapeDtypeStruct((B, T, C), jnp.bfloat16),
        grid_spec=pltpu.PrefetchScalarGridSpec(
            num_scalar_prefetch=0,
            grid=(B,),
            in_specs=[
                pl.BlockSpec((1, T, C), lambda i: (i, 0, 0)),    # x
                pl.BlockSpec((1, C), lambda i: (0, 0)),          # ln1 gamma
                pl.BlockSpec((1, C), lambda i: (0, 0)),          # ln1 beta
                pl.BlockSpec((C, 3 * C), lambda i: (0, 0)),      # wqkv (bf16)
                pl.BlockSpec((C, C), lambda i: (0, 0)),          # proj_w (bf16)
                pl.BlockSpec((1, C), lambda i: (0, 0)),          # proj_b
                pl.BlockSpec((1, C), lambda i: (0, 0)),          # ln2 gamma
                pl.BlockSpec((1, C), lambda i: (0, 0)),          # ln2 beta
                pl.BlockSpec((C, H), lambda i: (0, 0)),          # fc1_w (bf16)
                pl.BlockSpec((1, H), lambda i: (0, 0)),          # fc1_b
                pl.BlockSpec((H, C), lambda i: (0, 0)),          # fc2_w (bf16)
                pl.BlockSpec((1, C), lambda i: (0, 0)),          # fc2_b
            ],
            out_specs=pl.BlockSpec((1, T, C), lambda i: (i, 0, 0)),
            scratch_shapes=[pltpu.VMEM((T, 3 * C), jnp.bfloat16)],   # qkv scratch
        ),
        compiler_params=pltpu.CompilerParams(dimension_semantics=("parallel",)),
    )(x, blk["ln1_g"], blk["ln1_b"], blk["wqkv"], blk["proj_w"], blk["proj_b"],
      blk["ln2_g"], blk["ln2_b"], blk["fc1_w"], blk["fc1_b"], blk["fc2_w"], blk["fc2_b"])


# --------------------------- final ln_f + lm_head kernel -------------------------
def _ln_head_kernel(x_ref, g_ref, b_ref, w_ref, wb_ref, o_ref):
    x = x_ref[...].astype(jnp.float32)
    h = _ln(x, g_ref[...], b_ref[...]).astype(jnp.bfloat16)
    y = jnp.dot(h, w_ref[...], preferred_element_type=jnp.float32) + wb_ref[...]
    o_ref[...] = y.astype(o_ref.dtype)


def ln_head(x, g, b, w, bias, *, tm=TM):
    M, C = x.shape
    V = w.shape[1]
    tm = min(tm, M)
    assert M % tm == 0, "B*T must be a multiple of the row tile"
    # TODO(synk): for a real vocab size (and v7x 64 MiB VMEM) tile the V dimension too.
    return pl.pallas_call(
        _ln_head_kernel,
        out_shape=jax.ShapeDtypeStruct((M, V), jnp.float32),
        grid_spec=pltpu.PrefetchScalarGridSpec(
            num_scalar_prefetch=0,
            grid=(M // tm,),
            in_specs=[
                pl.BlockSpec((tm, C), lambda i: (i, 0)),
                pl.BlockSpec((1, C), lambda i: (0, 0)),
                pl.BlockSpec((1, C), lambda i: (0, 0)),
                pl.BlockSpec((C, V), lambda i: (0, 0)),
                pl.BlockSpec((1, V), lambda i: (0, 0)),
            ],
            out_specs=pl.BlockSpec((tm, V), lambda i: (i, 0)),
        ),
        compiler_params=pltpu.CompilerParams(dimension_semantics=("parallel",)),
    )(x, g, b, w, bias)


# --------------------------- parameters ----------------------------------------
def init_params(key, vocab_size):
    keys = iter(jax.random.split(key, 8 + 8 * NUM_LAYERS))

    def normal(shape):
        return 0.02 * jax.random.normal(next(keys), shape, dtype=jnp.float32)

    C = EMBED_SIZE
    ones_r = jnp.ones((1, C), jnp.float32)
    zeros_r = jnp.zeros((1, C), jnp.float32)
    qscale = 1.0 / (HEAD_SIZE ** 0.5)   # softmax scale folded into the q weight columns

    params = {
        "tok_emb": normal((vocab_size, C)),
        "pos_emb": normal((SEQ_LEN, C)),
        "blocks": [],
        "ln_f_g": ones_r,
        "ln_f_b": zeros_r,
    }
    for _ in range(NUM_LAYERS):
        # per-head q/k/v columns stacked along the output dim (torch.cat head order),
        # then q|k|v concatenated into one fused (C, 3C) weight.
        wq = normal((C, C)) * qscale
        wk = normal((C, C))
        wv = normal((C, C))
        blk = {
            "ln1_g": ones_r, "ln1_b": zeros_r,
            "wqkv": jnp.concatenate([wq, wk, wv], axis=1).astype(jnp.bfloat16),
            "proj_w": normal((C, C)).astype(jnp.bfloat16),
            "proj_b": zeros_r,
            "ln2_g": ones_r, "ln2_b": zeros_r,
            "fc1_w": normal((C, 4 * C)).astype(jnp.bfloat16),
            "fc1_b": jnp.zeros((1, 4 * C), jnp.float32),
            "fc2_w": normal((4 * C, C)).astype(jnp.bfloat16),
            "fc2_b": zeros_r,
        }
        params["blocks"].append(blk)
    params["lm_head_w"] = normal((C, vocab_size)).astype(jnp.bfloat16)
    params["lm_head_b"] = jnp.zeros((1, vocab_size), jnp.float32)
    return params


# --------------------------- forward pass ---------------------------------------
def gpt_forward(params, idx):
    """Equivalent of GPT.forward(idx, targets=None) -> (logits, None)."""
    B, T = idx.shape
    C = EMBED_SIZE

    tok = jnp.take(params["tok_emb"], idx, axis=0)       # (B, T, C) -- XLA gather glue
    pos = params["pos_emb"][:T]                          # (T, C)
    x = (tok + pos[None]).astype(jnp.bfloat16)           # bf16 residual stream

    for blk in params["blocks"]:
        x = transformer_block(x, blk)                    # one pallas_call per block

    logits = ln_head(x.reshape(B * T, C), params["ln_f_g"], params["ln_f_b"],
                     params["lm_head_w"], params["lm_head_b"])
    return logits.reshape(B, T, -1), None                # targets=None -> loss=None


# --------------------------- driver ---------------------------------------------
if __name__ == "__main__":
    key = jax.random.PRNGKey(0)
    pkey, ikey = jax.random.split(key)
    params = init_params(pkey, VOCAB_SIZE)

    B, T = 2, SEQ_LEN
    idx = jax.random.randint(ikey, (B, T), 0, VOCAB_SIZE, dtype=jnp.int32)

    logits, loss = jax.jit(gpt_forward)(params, idx)
    jax.block_until_ready(logits)

    assert logits.shape == (B, T, VOCAB_SIZE), logits.shape
    assert loss is None
    assert bool(jnp.all(jnp.isfinite(logits)))
    print("KERNEL_OK")
</pallas_src>

<mosaic_0001>
module attributes {stable_mosaic.version = 11 : i64} {
  func.func @_block_kernel(%arg0: i32, %arg1: memref<1x128x128xbf16, #tpu.memory_space<vmem>>, %arg2: memref<1x128xf32, #tpu.memory_space<vmem>>, %arg3: memref<1x128xf32, #tpu.memory_space<vmem>>, %arg4: memref<128x384xbf16, #tpu.memory_space<vmem>>, %arg5: memref<128x128xbf16, #tpu.memory_space<vmem>>, %arg6: memref<1x128xf32, #tpu.memory_space<vmem>>, %arg7: memref<1x128xf32, #tpu.memory_space<vmem>>, %arg8: memref<1x128xf32, #tpu.memory_space<vmem>>, %arg9: memref<128x512xbf16, #tpu.memory_space<vmem>>, %arg10: memref<1x512xf32, #tpu.memory_space<vmem>>, %arg11: memref<512x128xbf16, #tpu.memory_space<vmem>>, %arg12: memref<1x128xf32, #tpu.memory_space<vmem>>, %arg13: memref<1x128x128xbf16, #tpu.memory_space<vmem>>, %arg14: memref<128x384xbf16, #tpu.memory_space<vmem>>) attributes {dimension_semantics = [#tpu.dimension_semantics<parallel>], iteration_bounds = array<i64: 2>, scalar_prefetch = 0 : i64, scratch_operands = 1 : i64, tpu.core_type = #tpu.core_type<tc>, window_params = [{transform_indices = @transform_0, window_bounds = array<i64: 1, 128, 128>}, {pipeline_mode = #tpu.pipeline_mode<synchronous>, transform_indices = @transform_1, window_bounds = array<i64: 1, 128>}, {pipeline_mode = #tpu.pipeline_mode<synchronous>, transform_indices = @transform_2, window_bounds = array<i64: 1, 128>}, {pipeline_mode = #tpu.pipeline_mode<synchronous>, transform_indices = @transform_3, window_bounds = array<i64: 128, 384>}, {pipeline_mode = #tpu.pipeline_mode<synchronous>, transform_indices = @transform_4, window_bounds = array<i64: 128, 128>}, {pipeline_mode = #tpu.pipeline_mode<synchronous>, transform_indices = @transform_5, window_bounds = array<i64: 1, 128>}, {pipeline_mode = #tpu.pipeline_mode<synchronous>, transform_indices = @transform_6, window_bounds = array<i64: 1, 128>}, {pipeline_mode = #tpu.pipeline_mode<synchronous>, transform_indices = @transform_7, window_bounds = array<i64: 1, 128>}, {pipeline_mode = #tpu.pipeline_mode<synchronous>, transform_indices = @transform_8, window_bounds = array<i64: 128, 512>}, {pipeline_mode = #tpu.pipeline_mode<synchronous>, transform_indices = @transform_9, window_bounds = array<i64: 1, 512>}, {pipeline_mode = #tpu.pipeline_mode<synchronous>, transform_indices = @transform_10, window_bounds = array<i64: 512, 128>}, {pipeline_mode = #tpu.pipeline_mode<synchronous>, transform_indices = @transform_11, window_bounds = array<i64: 1, 128>}, {transform_indices = @transform_12, window_bounds = array<i64: 1, 128, 128>}]} {
    %c0 = arith.constant 0 : index
    %c0_0 = arith.constant 0 : index
    %c0_1 = arith.constant 0 : index
    %0 = vector.load %arg1[%c0, %c0_0, %c0_1] : memref<1x128x128xbf16, #tpu.memory_space<vmem>>, vector<1x128x128xbf16>
    %1 = vector.shape_cast %0 : vector<1x128x128xbf16> to vector<128x128xbf16>
    %2 = arith.extf %1 : vector<128x128xbf16> to vector<128x128xf32>
    %c0_2 = arith.constant 0 : index
    %c0_3 = arith.constant 0 : index
    %3 = vector.load %arg2[%c0_2, %c0_3] : memref<1x128xf32, #tpu.memory_space<vmem>>, vector<1x128xf32>
    %c0_4 = arith.constant 0 : index
    %c0_5 = arith.constant 0 : index
    %4 = vector.load %arg3[%c0_4, %c0_5] : memref<1x128xf32, #tpu.memory_space<vmem>>, vector<1x128xf32>
    %cst = arith.constant dense<0.000000e+00> : vector<128xf32>
    %5 = vector.multi_reduction <add>, %2, %cst [1] : vector<128x128xf32> to vector<128xf32>
    %6 = vector.shape_cast %5 : vector<128xf32> to vector<128x1xf32>
    %cst_6 = arith.constant 1.280000e+02 : f32
    %7 = vector.broadcast %cst_6 : f32 to vector<128x1xf32>
    %8 = arith.divf %6, %7 : vector<128x1xf32>
    %9 = vector.broadcast %8 : vector<128x1xf32> to vector<128x128xf32>
    %10 = arith.subf %2, %9 : vector<128x128xf32>
    %11 = arith.mulf %10, %10 : vector<128x128xf32>
    %cst_7 = arith.constant dense<0.000000e+00> : vector<128xf32>
    %12 = vector.multi_reduction <add>, %11, %cst_7 [1] : vector<128x128xf32> to vector<128xf32>
    %13 = vector.shape_cast %12 : vector<128xf32> to vector<128x1xf32>
    %cst_8 = arith.constant 1.280000e+02 : f32
    %14 = vector.broadcast %cst_8 : f32 to vector<128x1xf32>
    %15 = arith.divf %13, %14 : vector<128x1xf32>
    %16 = vector.broadcast %8 : vector<128x1xf32> to vector<128x128xf32>
    %17 = arith.subf %2, %16 : vector<128x128xf32>
    %cst_9 = arith.constant 9.99999974E-6 : f32
    %18 = vector.broadcast %cst_9 : f32 to vector<128x1xf32>
    %19 = arith.addf %15, %18 : vector<128x1xf32>
    %20 = math.rsqrt %19 : vector<128x1xf32>
    %21 = vector.broadcast %20 : vector<128x1xf32> to vector<128x128xf32>
    %22 = arith.mulf %17, %21 : vector<128x128xf32>
    %23 = vector.broadcast %3 : vector<1x128xf32> to vector<128x128xf32>
    %24 = arith.mulf %22, %23 : vector<128x128xf32>
    %25 = vector.broadcast %4 : vector<1x128xf32> to vector<128x128xf32>
    %26 = arith.addf %24, %25 : vector<128x128xf32>
    %27 = arith.truncf %26 : vector<128x128xf32> to vector<128x128xbf16>
    %c0_10 = arith.constant 0 : index
    %c0_11 = arith.constant 0 : index
    %28 = vector.load %arg4[%c0_10, %c0_11] : memref<128x384xbf16, #tpu.memory_space<vmem>>, vector<128x128xbf16>
    %cst_12 = arith.constant dense<0.000000e+00> : vector<128x128xf32>
    %29 = tpu.matmul %27, %28, %cst_12 {dimension_numbers = #tpu.dot_dimension_numbers<[1], [0], [0], [1], [0, 0, 1, 1], [], []>} : vector<128x128xbf16>, vector<128x128xbf16>, vector<128x128xf32> -> vector<128x128xf32>
    %30 = arith.truncf %29 : vector<128x128xf32> to vector<128x128xbf16>
    %c0_13 = arith.constant 0 : index
    %c0_14 = arith.constant 0 : index
    %31 = vector.load %arg14[%c0_13, %c0_14] : memref<128x384xbf16, #tpu.memory_space<vmem>>, vector<128x128xbf16>
    tpu.vector_store %arg14[%c0_13, %c0_14], %30 {strides = array<i32>} : memref<128x384xbf16, #tpu.memory_space<vmem>>, vector<128x128xbf16>,
    %c0_15 = arith.constant 0 : index
    %c128 = arith.constant 128 : index
    %32 = vector.load %arg4[%c0_15, %c128] : memref<128x384xbf16, #tpu.memory_space<vmem>>, vector<128x128xbf16>
    %cst_16 = arith.constant dense<0.000000e+00> : vector<128x128xf32>
    %33 = tpu.matmul %27, %32, %cst_16 {dimension_numbers = #tpu.dot_dimension_numbers<[1], [0], [0], [1], [0, 0, 1, 1], [], []>} : vector<128x128xbf16>, vector<128x128xbf16>, vector<128x128xf32> -> vector<128x128xf32>
    %34 = arith.truncf %33 : vector<128x128xf32> to vector<128x128xbf16>
    %c0_17 = arith.constant 0 : index
    %c128_18 = arith.constant 128 : index
    %35 = vector.load %arg14[%c0_17, %c128_18] : memref<128x384xbf16, #tpu.memory_space<vmem>>, vector<128x128xbf16>
    tpu.vector_store %arg14[%c0_17, %c128_18], %34 {strides = array<i32>} : memref<128x384xbf16, #tpu.memory_space<vmem>>, vector<128x128xbf16>,
    %c0_19 = arith.constant 0 : index
    %c256 = arith.constant 256 : index
    %36 = vector.load %arg4[%c0_19, %c256] : memref<128x384xbf16, #tpu.memory_space<vmem>>, vector<128x128xbf16>
    %cst_20 = arith.constant dense<0.000000e+00> : vector<128x128xf32>
    %37 = tpu.matmul %27, %36, %cst_20 {dimension_numbers = #tpu.dot_dimension_numbers<[1], [0], [0], [1], [0, 0, 1, 1], [], []>} : vector<128x128xbf16>, vector<128x128xbf16>, vector<128x128xf32> -> vector<128x128xf32>
    %38 = arith.truncf %37 : vector<128x128xf32> to vector<128x128xbf16>
    %c0_21 = arith.constant 0 : index
    %c256_22 = arith.constant 256 : index
    %39 = vector.load %arg14[%c0_21, %c256_22] : memref<128x384xbf16, #tpu.memory_space<vmem>>, vector<128x128xbf16>
    tpu.vector_store %arg14[%c0_21, %c256_22], %38 {strides = array<i32>} : memref<128x384xbf16, #tpu.memory_space<vmem>>, vector<128x128xbf16>,
    %40 = tpu.iota {dimensions = array<i32: 0>} : vector<128x128xi32>
    %41 = tpu.iota {dimensions = array<i32: 1>} : vector<128x128xi32>
    %42 = arith.cmpi sle, %41, %40 : vector<128x128xi32>
    %c0_23 = arith.constant 0 : index
    %c0_24 = arith.constant 0 : index
    %43 = vector.load %arg14[%c0_23, %c0_24] : memref<128x384xbf16, #tpu.memory_space<vmem>>, vector<128x32xbf16>
    %c0_25 = arith.constant 0 : index
    %c128_26 = arith.constant 128 : index
    %44 = vector.load %arg14[%c0_25, %c128_26] : memref<128x384xbf16, #tpu.memory_space<vmem>>, vector<128x32xbf16>
    %c0_27 = arith.constant 0 : index
    %c256_28 = arith.constant 256 : index
    %45 = vector.load %arg14[%c0_27, %c256_28] : memref<128x384xbf16, #tpu.memory_space<vmem>>, vector<128x32xbf16>
    %cst_29 = arith.constant dense<0.000000e+00> : vector<128x128xf32>
    %46 = tpu.matmul %43, %44, %cst_29 {dimension_numbers = #tpu.dot_dimension_numbers<[1], [1], [0], [0], [0, 0, 1, 0], [], []>} : vector<128x32xbf16>, vector<128x32xbf16>, vector<128x128xf32> -> vector<128x128xf32>
    %cst_30 = arith.constant 0xFF800000 : f32
    %47 = vector.broadcast %cst_30 : f32 to vector<128x128xf32>
    %48 = arith.select %42, %46, %47 : vector<128x128xi1>, vector<128x128xf32>
    %cst_31 = arith.constant dense<0xFF800000> : vector<128xf32>
    %49 = vector.multi_reduction <maximumf>, %48, %cst_31 [1] : vector<128x128xf32> to vector<128xf32>
    %50 = vector.shape_cast %49 : vector<128xf32> to vector<128x1xf32>
    %51 = vector.broadcast %50 : vector<128x1xf32> to vector<128x128xf32>
    %52 = arith.subf %48, %51 : vector<128x128xf32>
    %53 = math.exp %52 : vector<128x128xf32>
    %cst_32 = arith.constant dense<0.000000e+00> : vector<128xf32>
    %54 = vector.multi_reduction <add>, %53, %cst_32 [1] : vector<128x128xf32> to vector<128xf32>
    %55 = vector.shape_cast %54 : vector<128xf32> to vector<128x1xf32>
    %56 = tpu.reciprocal %55 {approx = true} : vector<128x1xf32> -> vector<128x1xf32>
    %57 = vector.broadcast %56 : vector<128x1xf32> to vector<128x128xf32>
    %58 = arith.mulf %53, %57 : vector<128x128xf32>
    %59 = arith.truncf %58 : vector<128x128xf32> to vector<128x128xbf16>
    %cst_33 = arith.constant dense<0.000000e+00> : vector<128x32xf32>
    %60 = tpu.matmul %59, %45, %cst_33 {dimension_numbers = #tpu.dot_dimension_numbers<[1], [0], [0], [1], [0, 0, 1, 1], [], []>} : vector<128x128xbf16>, vector<128x32xbf16>, vector<128x32xf32> -> vector<128x32xf32>
    %61 = arith.truncf %60 : vector<128x32xf32> to vector<128x32xbf16>
    %c0_34 = arith.constant 0 : index
    %c32 = arith.constant 32 : index
    %62 = vector.load %arg14[%c0_34, %c32] : memref<128x384xbf16, #tpu.memory_space<vmem>>, vector<128x32xbf16>
    %c0_35 = arith.constant 0 : index
    %c160 = arith.constant 160 : index
    %63 = vector.load %arg14[%c0_35, %c160] : memref<128x384xbf16, #tpu.memory_space<vmem>>, vector<128x32xbf16>
    %c0_36 = arith.constant 0 : index
    %c288 = arith.constant 288 : index
    %64 = vector.load %arg14[%c0_36, %c288] : memref<128x384xbf16, #tpu.memory_space<vmem>>, vector<128x32xbf16>
    %cst_37 = arith.constant dense<0.000000e+00> : vector<128x128xf32>
    %65 = tpu.matmul %62, %63, %cst_37 {dimension_numbers = #tpu.dot_dimension_numbers<[1], [1], [0], [0], [0, 0, 1, 0], [], []>} : vector<128x32xbf16>, vector<128x32xbf16>, vector<128x128xf32> -> vector<128x128xf32>
    %cst_38 = arith.constant 0xFF800000 : f32
    %66 = vector.broadcast %cst_38 : f32 to vector<128x128xf32>
    %67 = arith.select %42, %65, %66 : vector<128x128xi1>, vector<128x128xf32>
    %cst_39 = arith.constant dense<0xFF800000> : vector<128xf32>
    %68 = vector.multi_reduction <maximumf>, %67, %cst_39 [1] : vector<128x128xf32> to vector<128xf32>
    %69 = vector.shape_cast %68 : vector<128xf32> to vector<128x1xf32>
    %70 = vector.broadcast %69 : vector<128x1xf32> to vector<128x128xf32>
    %71 = arith.subf %67, %70 : vector<128x128xf32>
    %72 = math.exp %71 : vector<128x128xf32>
    %cst_40 = arith.constant dense<0.000000e+00> : vector<128xf32>
    %73 = vector.multi_reduction <add>, %72, %cst_40 [1] : vector<128x128xf32> to vector<128xf32>
    %74 = vector.shape_cast %73 : vector<128xf32> to vector<128x1xf32>
    %75 = tpu.reciprocal %74 {approx = true} : vector<128x1xf32> -> vector<128x1xf32>
    %76 = vector.broadcast %75 : vector<128x1xf32> to vector<128x128xf32>
    %77 = arith.mulf %72, %76 : vector<128x128xf32>
    %78 = arith.truncf %77 : vector<128x128xf32> to vector<128x128xbf16>
    %cst_41 = arith.constant dense<0.000000e+00> : vector<128x32xf32>
    %79 = tpu.matmul %78, %64, %cst_41 {dimension_numbers = #tpu.dot_dimension_numbers<[1], [0], [0], [1], [0, 0, 1, 1], [], []>} : vector<128x128xbf16>, vector<128x32xbf16>, vector<128x32xf32> -> vector<128x32xf32>
    %80 = arith.truncf %79 : vector<128x32xf32> to vector<128x32xbf16>
    %c0_42 = arith.constant 0 : index
    %c64 = arith.constant 64 : index
    %81 = vector.load %arg14[%c0_42, %c64] : memref<128x384xbf16, #tpu.memory_space<vmem>>, vector<128x32xbf16>
    %c0_43 = arith.constant 0 : index
    %c192 = arith.constant 192 : index
    %82 = vector.load %arg14[%c0_43, %c192] : memref<128x384xbf16, #tpu.memory_space<vmem>>, vector<128x32xbf16>
    %c0_44 = arith.constant 0 : index
    %c320 = arith.constant 320 : index
    %83 = vector.load %arg14[%c0_44, %c320] : memref<128x384xbf16, #tpu.memory_space<vmem>>, vector<128x32xbf16>
    %cst_45 = arith.constant dense<0.000000e+00> : vector<128x128xf32>
    %84 = tpu.matmul %81, %82, %cst_45 {dimension_numbers = #tpu.dot_dimension_numbers<[1], [1], [0], [0], [0, 0, 1, 0], [], []>} : vector<128x32xbf16>, vector<128x32xbf16>, vector<128x128xf32> -> vector<128x128xf32>
    %cst_46 = arith.constant 0xFF800000 : f32
    %85 = vector.broadcast %cst_46 : f32 to vector<128x128xf32>
    %86 = arith.select %42, %84, %85 : vector<128x128xi1>, vector<128x128xf32>
    %cst_47 = arith.constant dense<0xFF800000> : vector<128xf32>
    %87 = vector.multi_reduction <maximumf>, %86, %cst_47 [1] : vector<128x128xf32> to vector<128xf32>
    %88 = vector.shape_cast %87 : vector<128xf32> to vector<128x1xf32>
    %89 = vector.broadcast %88 : vector<128x1xf32> to vector<128x128xf32>
    %90 = arith.subf %86, %89 : vector<128x128xf32>
    %91 = math.exp %90 : vector<128x128xf32>
    %cst_48 = arith.constant dense<0.000000e+00> : vector<128xf32>
    %92 = vector.multi_reduction <add>, %91, %cst_48 [1] : vector<128x128xf32> to vector<128xf32>
    %93 = vector.shape_cast %92 : vector<128xf32> to vector<128x1xf32>
    %94 = tpu.reciprocal %93 {approx = true} : vector<128x1xf32> -> vector<128x1xf32>
    %95 = vector.broadcast %94 : vector<128x1xf32> to vector<128x128xf32>
    %96 = arith.mulf %91, %95 : vector<128x128xf32>
    %97 = arith.truncf %96 : vector<128x128xf32> to vector<128x128xbf16>
    %cst_49 = arith.constant dense<0.000000e+00> : vector<128x32xf32>
    %98 = tpu.matmul %97, %83, %cst_49 {dimension_numbers = #tpu.dot_dimension_numbers<[1], [0], [0], [1], [0, 0, 1, 1], [], []>} : vector<128x128xbf16>, vector<128x32xbf16>, vector<128x32xf32> -> vector<128x32xf32>
    %99 = arith.truncf %98 : vector<128x32xf32> to vector<128x32xbf16>
    %c0_50 = arith.constant 0 : index
    %c96 = arith.constant 96 : index
    %100 = vector.load %arg14[%c0_50, %c96] : memref<128x384xbf16, #tpu.memory_space<vmem>>, vector<128x32xbf16>
    %c0_51 = arith.constant 0 : index
    %c224 = arith.constant 224 : index
    %101 = vector.load %arg14[%c0_51, %c224] : memref<128x384xbf16, #tpu.memory_space<vmem>>, vector<128x32xbf16>
    %c0_52 = arith.constant 0 : index
    %c352 = arith.constant 352 : index
    %102 = vector.load %arg14[%c0_52, %c352] : memref<128x384xbf16, #tpu.memory_space<vmem>>, vector<128x32xbf16>
    %cst_53 = arith.constant dense<0.000000e+00> : vector<128x128xf32>
    %103 = tpu.matmul %100, %101, %cst_53 {dimension_numbers = #tpu.dot_dimension_numbers<[1], [1], [0], [0], [0, 0, 1, 0], [], []>} : vector<128x32xbf16>, vector<128x32xbf16>, vector<128x128xf32> -> vector<128x128xf32>
    %cst_54 = arith.constant 0xFF800000 : f32
    %104 = vector.broadcast %cst_54 : f32 to vector<128x128xf32>
    %105 = arith.select %42, %103, %104 : vector<128x128xi1>, vector<128x128xf32>
    %cst_55 = arith.constant dense<0xFF800000> : vector<128xf32>
    %106 = vector.multi_reduction <maximumf>, %105, %cst_55 [1] : vector<128x128xf32> to vector<128xf32>
    %107 = vector.shape_cast %106 : vector<128xf32> to vector<128x1xf32>
    %108 = vector.broadcast %107 : vector<128x1xf32> to vector<128x128xf32>
    %109 = arith.subf %105, %108 : vector<128x128xf32>
    %110 = math.exp %109 : vector<128x128xf32>
    %cst_56 = arith.constant dense<0.000000e+00> : vector<128xf32>
    %111 = vector.multi_reduction <add>, %110, %cst_56 [1] : vector<128x128xf32> to vector<128xf32>
    %112 = vector.shape_cast %111 : vector<128xf32> to vector<128x1xf32>
    %113 = tpu.reciprocal %112 {approx = true} : vector<128x1xf32> -> vector<128x1xf32>
    %114 = vector.broadcast %113 : vector<128x1xf32> to vector<128x128xf32>
    %115 = arith.mulf %110, %114 : vector<128x128xf32>
    %116 = arith.truncf %115 : vector<128x128xf32> to vector<128x128xbf16>
    %cst_57 = arith.constant dense<0.000000e+00> : vector<128x32xf32>
    %117 = tpu.matmul %116, %102, %cst_57 {dimension_numbers = #tpu.dot_dimension_numbers<[1], [0], [0], [1], [0, 0, 1, 1], [], []>} : vector<128x128xbf16>, vector<128x32xbf16>, vector<128x32xf32> -> vector<128x32xf32>
    %118 = arith.truncf %117 : vector<128x32xf32> to vector<128x32xbf16>
    %119 = tpu.concatenate %61, %80, %99, %118 in 1 : vector<128x32xbf16>, vector<128x32xbf16>, vector<128x32xbf16>, vector<128x32xbf16> -> vector<128x128xbf16>
    %c0_58 = arith.constant 0 : index
    %c0_59 = arith.constant 0 : index
    %120 = vector.load %arg5[%c0_58, %c0_59] : memref<128x128xbf16, #tpu.memory_space<vmem>>, vector<128x128xbf16>
    %cst_60 = arith.constant dense<0.000000e+00> : vector<128x128xf32>
    %121 = tpu.matmul %119, %120, %cst_60 {dimension_numbers = #tpu.dot_dimension_numbers<[1], [0], [0], [1], [0, 0, 1, 1], [], []>} : vector<128x128xbf16>, vector<128x128xbf16>, vector<128x128xf32> -> vector<128x128xf32>
    %c0_61 = arith.constant 0 : index
    %c0_62 = arith.constant 0 : index
    %122 = vector.load %arg6[%c0_61, %c0_62] : memref<1x128xf32, #tpu.memory_space<vmem>>, vector<1x128xf32>
    %123 = vector.broadcast %122 : vector<1x128xf32> to vector<128x128xf32>
    %124 = arith.addf %121, %123 : vector<128x128xf32>
    %c0_63 = arith.constant 0 : index
    %c0_64 = arith.constant 0 : index
    %c0_65 = arith.constant 0 : index
    %125 = vector.load %arg1[%c0_63, %c0_64, %c0_65] : memref<1x128x128xbf16, #tpu.memory_space<vmem>>, vector<1x128x128xbf16>
    %126 = vector.shape_cast %125 : vector<1x128x128xbf16> to vector<128x128xbf16>
    %127 = arith.extf %126 : vector<128x128xbf16> to vector<128x128xf32>
    %128 = arith.addf %124, %127 : vector<128x128xf32>
    %c0_66 = arith.constant 0 : index
    %c0_67 = arith.constant 0 : index
    %129 = vector.load %arg7[%c0_66, %c0_67] : memref<1x128xf32, #tpu.memory_space<vmem>>, vector<1x128xf32>
    %c0_68 = arith.constant 0 : index
    %c0_69 = arith.constant 0 : index
    %130 = vector.load %arg8[%c0_68, %c0_69] : memref<1x128xf32, #tpu.memory_space<vmem>>, vector<1x128xf32>
    %cst_70 = arith.constant dense<0.000000e+00> : vector<128xf32>
    %131 = vector.multi_reduction <add>, %128, %cst_70 [1] : vector<128x128xf32> to vector<128xf32>
    %132 = vector.shape_cast %131 : vector<128xf32> to vector<128x1xf32>
    %cst_71 = arith.constant 1.280000e+02 : f32
    %133 = vector.broadcast %cst_71 : f32 to vector<128x1xf32>
    %134 = arith.divf %132, %133 : vector<128x1xf32>
    %135 = vector.broadcast %134 : vector<128x1xf32> to vector<128x128xf32>
    %136 = arith.subf %128, %135 : vector<128x128xf32>
    %137 = arith.mulf %136, %136 : vector<128x128xf32>
    %cst_72 = arith.constant dense<0.000000e+00> : vector<128xf32>
    %138 = vector.multi_reduction <add>, %137, %cst_72 [1] : vector<128x128xf32> to vector<128xf32>
    %139 = vector.shape_cast %138 : vector<128xf32> to vector<128x1xf32>
    %cst_73 = arith.constant 1.280000e+02 : f32
    %140 = vector.broadcast %cst_73 : f32 to vector<128x1xf32>
    %141 = arith.divf %139, %140 : vector<128x1xf32>
    %142 = vector.broadcast %134 : vector<128x1xf32> to vector<128x128xf32>
    %143 = arith.subf %128, %142 : vector<128x128xf32>
    %cst_74 = arith.constant 9.99999974E-6 : f32
    %144 = vector.broadcast %cst_74 : f32 to vector<128x1xf32>
    %145 = arith.addf %141, %144 : vector<128x1xf32>
    %146 = math.rsqrt %145 : vector<128x1xf32>
    %147 = vector.broadcast %146 : vector<128x1xf32> to vector<128x128xf32>
    %148 = arith.mulf %143, %147 : vector<128x128xf32>
    %149 = vector.broadcast %129 : vector<1x128xf32> to vector<128x128xf32>
    %150 = arith.mulf %148, %149 : vector<128x128xf32>
    %151 = vector.broadcast %130 : vector<1x128xf32> to vector<128x128xf32>
    %152 = arith.addf %150, %151 : vector<128x128xf32>
    %153 = arith.truncf %152 : vector<128x128xf32> to vector<128x128xbf16>
    %c0_75 = arith.constant 0 : index
    %c0_76 = arith.constant 0 : index
    %154 = vector.load %arg12[%c0_75, %c0_76] : memref<1x128xf32, #tpu.memory_space<vmem>>, vector<1x128xf32>
    %155 = vector.broadcast %154 : vector<1x128xf32> to vector<128x128xf32>
    %156 = arith.addf %128, %155 : vector<128x128xf32>
    %c0_77 = arith.constant 0 : index
    %c0_78 = arith.constant 0 : index
    %157 = vector.load %arg9[%c0_77, %c0_78] : memref<128x512xbf16, #tpu.memory_space<vmem>>, vector<128x128xbf16>
    %cst_79 = arith.constant dense<0.000000e+00> : vector<128x128xf32>
    %158 = tpu.matmul %153, %157, %cst_79 {dimension_numbers = #tpu.dot_dimension_numbers<[1], [0], [0], [1], [0, 0, 1, 1], [], []>} : vector<128x128xbf16>, vector<128x128xbf16>, vector<128x128xf32> -> vector<128x128xf32>
    %c0_80 = arith.constant 0 : index
    %c0_81 = arith.constant 0 : index
    %159 = vector.load %arg10[%c0_80, %c0_81] : memref<1x512xf32, #tpu.memory_space<vmem>>, vector<1x128xf32>
    %160 = vector.broadcast %159 : vector<1x128xf32> to vector<128x128xf32>
    %161 = arith.addf %158, %160 : vector<128x128xf32>
    %cst_82 = arith.constant 0.000000e+00 : f32
    %162 = vector.broadcast %cst_82 : f32 to vector<128x128xf32>
    %163 = arith.maximumf %161, %162 : vector<128x128xf32>
    %164 = arith.truncf %163 : vector<128x128xf32> to vector<128x128xbf16>
    %c0_83 = arith.constant 0 : index
    %c0_84 = arith.constant 0 : index
    %165 = vector.load %arg11[%c0_83, %c0_84] : memref<512x128xbf16, #tpu.memory_space<vmem>>, vector<128x128xbf16>
    %cst_85 = arith.constant dense<0.000000e+00> : vector<128x128xf32>
    %166 = tpu.matmul %164, %165, %cst_85 {dimension_numbers = #tpu.dot_dimension_numbers<[1], [0], [0], [1], [0, 0, 1, 1], [], []>} : vector<128x128xbf16>, vector<128x128xbf16>, vector<128x128xf32> -> vector<128x128xf32>
    %167 = arith.addf %156, %166 : vector<128x128xf32>
    %c0_86 = arith.constant 0 : index
    %c128_87 = arith.constant 128 : index
    %168 = vector.load %arg9[%c0_86, %c128_87] : memref<128x512xbf16, #tpu.memory_space<vmem>>, vector<128x128xbf16>
    %cst_88 = arith.constant dense<0.000000e+00> : vector<128x128xf32>
    %169 = tpu.matmul %153, %168, %cst_88 {dimension_numbers = #tpu.dot_dimension_numbers<[1], [0], [0], [1], [0, 0, 1, 1], [], []>} : vector<128x128xbf16>, vector<128x128xbf16>, vector<128x128xf32> -> vector<128x128xf32>
    %c0_89 = arith.constant 0 : index
    %c128_90 = arith.constant 128 : index
    %170 = vector.load %arg10[%c0_89, %c128_90] : memref<1x512xf32, #tpu.memory_space<vmem>>, vector<1x128xf32>
    %171 = vector.broadcast %170 : vector<1x128xf32> to vector<128x128xf32>
    %172 = arith.addf %169, %171 : vector<128x128xf32>
    %cst_91 = arith.constant 0.000000e+00 : f32
    %173 = vector.broadcast %cst_91 : f32 to vector<128x128xf32>
    %174 = arith.maximumf %172, %173 : vector<128x128xf32>
    %175 = arith.truncf %174 : vector<128x128xf32> to vector<128x128xbf16>
    %c128_92 = arith.constant 128 : index
    %c0_93 = arith.constant 0 : index
    %176 = vector.load %arg11[%c128_92, %c0_93] : memref<512x128xbf16, #tpu.memory_space<vmem>>, vector<128x128xbf16>
    %cst_94 = arith.constant dense<0.000000e+00> : vector<128x128xf32>
    %177 = tpu.matmul %175, %176, %cst_94 {dimension_numbers = #tpu.dot_dimension_numbers<[1], [0], [0], [1], [0, 0, 1, 1], [], []>} : vector<128x128xbf16>, vector<128x128xbf16>, vector<128x128xf32> -> vector<128x128xf32>
    %178 = arith.addf %167, %177 : vector<128x128xf32>
    %c0_95 = arith.constant 0 : index
    %c256_96 = arith.constant 256 : index
    %179 = vector.load %arg9[%c0_95, %c256_96] : memref<128x512xbf16, #tpu.memory_space<vmem>>, vector<128x128xbf16>
    %cst_97 = arith.constant dense<0.000000e+00> : vector<128x128xf32>
    %180 = tpu.matmul %153, %179, %cst_97 {dimension_numbers = #tpu.dot_dimension_numbers<[1], [0], [0], [1], [0, 0, 1, 1], [], []>} : vector<128x128xbf16>, vector<128x128xbf16>, vector<128x128xf32> -> vector<128x128xf32>
    %c0_98 = arith.constant 0 : index
    %c256_99 = arith.constant 256 : index
    %181 = vector.load %arg10[%c0_98, %c256_99] : memref<1x512xf32, #tpu.memory_space<vmem>>, vector<1x128xf32>
    %182 = vector.broadcast %181 : vector<1x128xf32> to vector<128x128xf32>
    %183 = arith.addf %180, %182 : vector<128x128xf32>
    %cst_100 = arith.constant 0.000000e+00 : f32
    %184 = vector.broadcast %cst_100 : f32 to vector<128x128xf32>
    %185 = arith.maximumf %183, %184 : vector<128x128xf32>
    %186 = arith.truncf %185 : vector<128x128xf32> to vector<128x128xbf16>
    %c256_101 = arith.constant 256 : index
    %c0_102 = arith.constant 0 : index
    %187 = vector.load %arg11[%c256_101, %c0_102] : memref<512x128xbf16, #tpu.memory_space<vmem>>, vector<128x128xbf16>
    %cst_103 = arith.constant dense<0.000000e+00> : vector<128x128xf32>
    %188 = tpu.matmul %186, %187, %cst_103 {dimension_numbers = #tpu.dot_dimension_numbers<[1], [0], [0], [1], [0, 0, 1, 1], [], []>} : vector<128x128xbf16>, vector<128x128xbf16>, vector<128x128xf32> -> vector<128x128xf32>
    %189 = arith.addf %178, %188 : vector<128x128xf32>
    %c0_104 = arith.constant 0 : index
    %c384 = arith.constant 384 : index
    %190 = vector.load %arg9[%c0_104, %c384] : memref<128x512xbf16, #tpu.memory_space<vmem>>, vector<128x128xbf16>
    %cst_105 = arith.constant dense<0.000000e+00> : vector<128x128xf32>
    %191 = tpu.matmul %153, %190, %cst_105 {dimension_numbers = #tpu.dot_dimension_numbers<[1], [0], [0], [1], [0, 0, 1, 1], [], []>} : vector<128x128xbf16>, vector<128x128xbf16>, vector<128x128xf32> -> vector<128x128xf32>
    %c0_106 = arith.constant 0 : index
    %c384_107 = arith.constant 384 : index
    %192 = vector.load %arg10[%c0_106, %c384_107] : memref<1x512xf32, #tpu.memory_space<vmem>>, vector<1x128xf32>
    %193 = vector.broadcast %192 : vector<1x128xf32> to vector<128x128xf32>
    %194 = arith.addf %191, %193 : vector<128x128xf32>
    %cst_108 = arith.constant 0.000000e+00 : f32
    %195 = vector.broadcast %cst_108 : f32 to vector<128x128xf32>
    %196 = arith.maximumf %194, %195 : vector<128x128xf32>
    %197 = arith.truncf %196 : vector<128x128xf32> to vector<128x128xbf16>
    %c384_109 = arith.constant 384 : index
    %c0_110 = arith.constant 0 : index
    %198 = vector.load %arg11[%c384_109, %c0_110] : memref<512x128xbf16, #tpu.memory_space<vmem>>, vector<128x128xbf16>
    %cst_111 = arith.constant dense<0.000000e+00> : vector<128x128xf32>
    %199 = tpu.matmul %197, %198, %cst_111 {dimension_numbers = #tpu.dot_dimension_numbers<[1], [0], [0], [1], [0, 0, 1, 1], [], []>} : vector<128x128xbf16>, vector<128x128xbf16>, vector<128x128xf32> -> vector<128x128xf32>
    %200 = arith.addf %189, %199 : vector<128x128xf32>
    %201 = arith.truncf %200 : vector<128x128xf32> to vector<128x128xbf16>
    %c0_112 = arith.constant 0 : index
    %c0_113 = arith.constant 0 : index
    %c0_114 = arith.constant 0 : index
    %202 = vector.load %arg13[%c0_112, %c0_113, %c0_114] : memref<1x128x128xbf16, #tpu.memory_space<vmem>>, vector<1x128x128xbf16>
    %203 = vector.shape_cast %202 : vector<1x128x128xbf16> to vector<128x128xbf16>
    %204 = vector.shape_cast %201 : vector<128x128xbf16> to vector<1x128x128xbf16>
    tpu.vector_store %arg13[%c0_112, %c0_113, %c0_114], %204 {strides = array<i32>} : memref<1x128x128xbf16, #tpu.memory_space<vmem>>, vector<1x128x128xbf16>,
    return
  }
  func.func @transform_0(%arg0: i32) -> (i32, i32, i32) {
    %c0_i32 = arith.constant 0 : i32
    %c0_i32_0 = arith.constant 0 : i32
    %c0_i32_1 = arith.constant 0 : i32
    return %arg0, %c0_i32, %c0_i32_0 : i32, i32, i32
  }
  func.func @transform_1(%arg0: i32) -> (i32, i32) {
    %c0_i32 = arith.constant 0 : i32
    %c0_i32_0 = arith.constant 0 : i32
    %c0_i32_1 = arith.constant 0 : i32
    return %c0_i32, %c0_i32_0 : i32, i32
  }
  func.func @transform_2(%arg0: i32) -> (i32, i32) {
    %c0_i32 = arith.constant 0 : i32
    %c0_i32_0 = arith.constant 0 : i32
    %c0_i32_1 = arith.constant 0 : i32
    return %c0_i32, %c0_i32_0 : i32, i32
  }
  func.func @transform_3(%arg0: i32) -> (i32, i32) {
    %c0_i32 = arith.constant 0 : i32
    %c0_i32_0 = arith.constant 0 : i32
    %c0_i32_1 = arith.constant 0 : i32
    return %c0_i32, %c0_i32_0 : i32, i32
  }
  func.func @transform_4(%arg0: i32) -> (i32, i32) {
    %c0_i32 = arith.constant 0 : i32
    %c0_i32_0 = arith.constant 0 : i32
    %c0_i32_1 = arith.constant 0 : i32
    return %c0_i32, %c0_i32_0 : i32, i32
  }
  func.func @transform_5(%arg0: i32) -> (i32, i32) {
    %c0_i32 = arith.constant 0 : i32
    %c0_i32_0 = arith.constant 0 : i32
    %c0_i32_1 = arith.constant 0 : i32
    return %c0_i32, %c0_i32_0 : i32, i32
  }
  func.func @transform_6(%arg0: i32) -> (i32, i32) {
    %c0_i32 = arith.constant 0 : i32
    %c0_i32_0 = arith.constant 0 : i32
    %c0_i32_1 = arith.constant 0 : i32
    return %c0_i32, %c0_i32_0 : i32, i32
  }
  func.func @transform_7(%arg0: i32) -> (i32, i32) {
    %c0_i32 = arith.constant 0 : i32
    %c0_i32_0 = arith.constant 0 : i32
    %c0_i32_1 = arith.constant 0 : i32
    return %c0_i32, %c0_i32_0 : i32, i32
  }
  func.func @transform_8(%arg0: i32) -> (i32, i32) {
    %c0_i32 = arith.constant 0 : i32
    %c0_i32_0 = arith.constant 0 : i32
    %c0_i32_1 = arith.constant 0 : i32
    return %c0_i32, %c0_i32_0 : i32, i32
  }
  func.func @transform_9(%arg0: i32) -> (i32, i32) {
    %c0_i32 = arith.constant 0 : i32
    %c0_i32_0 = arith.constant 0 : i32
    %c0_i32_1 = arith.constant 0 : i32
    return %c0_i32, %c0_i32_0 : i32, i32
  }
  func.func @transform_10(%arg0: i32) -> (i32, i32) {
    %c0_i32 = arith.constant 0 : i32
    %c0_i32_0 = arith.constant 0 : i32
    %c0_i32_1 = arith.constant 0 : i32
    return %c0_i32, %c0_i32_0 : i32, i32
  }
  func.func @transform_11(%arg0: i32) -> (i32, i32) {
    %c0_i32 = arith.constant 0 : i32
    %c0_i32_0 = arith.constant 0 : i32
    %c0_i32_1 = arith.constant 0 : i32
    return %c0_i32, %c0_i32_0 : i32, i32
  }
  func.func @transform_12(%arg0: i32) -> (i32, i32, i32) {
    %c0_i32 = arith.constant 0 : i32
    %c0_i32_0 = arith.constant 0 : i32
    %c0_i32_1 = arith.constant 0 : i32
    return %arg0, %c0_i32, %c0_i32_0 : i32, i32, i32
  }
}

module attributes {stable_mosaic.version = 11 : i64} {
  func.func @_ln_head_kernel(%arg0: i32, %arg1: memref<128x128xbf16, #tpu.memory_space<vmem>>, %arg2: memref<1x128xf32, #tpu.memory_space<vmem>>, %arg3: memref<1x128xf32, #tpu.memory_space<vmem>>, %arg4: memref<128x128xbf16, #tpu.memory_space<vmem>>, %arg5: memref<1x128xf32, #tpu.memory_space<vmem>>, %arg6: memref<128x128xf32, #tpu.memory_space<vmem>>) attributes {dimension_semantics = [#tpu.dimension_semantics<parallel>], iteration_bounds = array<i64: 2>, scalar_prefetch = 0 : i64, scratch_operands = 0 : i64, tpu.core_type = #tpu.core_type<tc>, window_params = [{transform_indices = @transform_0, window_bounds = array<i64: 128, 128>}, {pipeline_mode = #tpu.pipeline_mode<synchronous>, transform_indices = @transform_1, window_bounds = array<i64: 1, 128>}, {pipeline_mode = #tpu.pipeline_mode<synchronous>, transform_indices = @transform_2, window_bounds = array<i64: 1, 128>}, {pipeline_mode = #tpu.pipeline_mode<synchronous>, transform_indices = @transform_3, window_bounds = array<i64: 128, 128>}, {pipeline_mode = #tpu.pipeline_mode<synchronous>, transform_indices = @transform_4, window_bounds = array<i64: 1, 128>}, {transform_indices = @transform_5, window_bounds = array<i64: 128, 128>}]} {
    %c0 = arith.constant 0 : index
    %c0_0 = arith.constant 0 : index
    %0 = vector.load %arg1[%c0, %c0_0] : memref<128x128xbf16, #tpu.memory_space<vmem>>, vector<128x128xbf16>
    %1 = arith.extf %0 : vector<128x128xbf16> to vector<128x128xf32>
    %c0_1 = arith.constant 0 : index
    %c0_2 = arith.constant 0 : index
    %2 = vector.load %arg2[%c0_1, %c0_2] : memref<1x128xf32, #tpu.memory_space<vmem>>, vector<1x128xf32>
    %c0_3 = arith.constant 0 : index
    %c0_4 = arith.constant 0 : index
    %3 = vector.load %arg3[%c0_3, %c0_4] : memref<1x128xf32, #tpu.memory_space<vmem>>, vector<1x128xf32>
    %cst = arith.constant dense<0.000000e+00> : vector<128xf32>
    %4 = vector.multi_reduction <add>, %1, %cst [1] : vector<128x128xf32> to vector<128xf32>
    %5 = vector.shape_cast %4 : vector<128xf32> to vector<128x1xf32>
    %cst_5 = arith.constant 1.280000e+02 : f32
    %6 = vector.broadcast %cst_5 : f32 to vector<128x1xf32>
    %7 = arith.divf %5, %6 : vector<128x1xf32>
    %8 = vector.broadcast %7 : vector<128x1xf32> to vector<128x128xf32>
    %9 = arith.subf %1, %8 : vector<128x128xf32>
    %10 = arith.mulf %9, %9 : vector<128x128xf32>
    %cst_6 = arith.constant dense<0.000000e+00> : vector<128xf32>
    %11 = vector.multi_reduction <add>, %10, %cst_6 [1] : vector<128x128xf32> to vector<128xf32>
    %12 = vector.shape_cast %11 : vector<128xf32> to vector<128x1xf32>
    %cst_7 = arith.constant 1.280000e+02 : f32
    %13 = vector.broadcast %cst_7 : f32 to vector<128x1xf32>
    %14 = arith.divf %12, %13 : vector<128x1xf32>
    %15 = vector.broadcast %7 : vector<128x1xf32> to vector<128x128xf32>
    %16 = arith.subf %1, %15 : vector<128x128xf32>
    %cst_8 = arith.constant 9.99999974E-6 : f32
    %17 = vector.broadcast %cst_8 : f32 to vector<128x1xf32>
    %18 = arith.addf %14, %17 : vector<128x1xf32>
    %19 = math.rsqrt %18 : vector<128x1xf32>
    %20 = vector.broadcast %19 : vector<128x1xf32> to vector<128x128xf32>
    %21 = arith.mulf %16, %20 : vector<128x128xf32>
    %22 = vector.broadcast %2 : vector<1x128xf32> to vector<128x128xf32>
    %23 = arith.mulf %21, %22 : vector<128x128xf32>
    %24 = vector.broadcast %3 : vector<1x128xf32> to vector<128x128xf32>
    %25 = arith.addf %23, %24 : vector<128x128xf32>
    %26 = arith.truncf %25 : vector<128x128xf32> to vector<128x128xbf16>
    %c0_9 = arith.constant 0 : index
    %c0_10 = arith.constant 0 : index
    %27 = vector.load %arg4[%c0_9, %c0_10] : memref<128x128xbf16, #tpu.memory_space<vmem>>, vector<128x128xbf16>
    %cst_11 = arith.constant dense<0.000000e+00> : vector<128x128xf32>
    %28 = tpu.matmul %26, %27, %cst_11 {dimension_numbers = #tpu.dot_dimension_numbers<[1], [0], [0], [1], [0, 0, 1, 1], [], []>} : vector<128x128xbf16>, vector<128x128xbf16>, vector<128x128xf32> -> vector<128x128xf32>
    %c0_12 = arith.constant 0 : index
    %c0_13 = arith.constant 0 : index
    %29 = vector.load %arg5[%c0_12, %c0_13] : memref<1x128xf32, #tpu.memory_space<vmem>>, vector<1x128xf32>
    %30 = vector.broadcast %29 : vector<1x128xf32> to vector<128x128xf32>
    %31 = arith.addf %28, %30 : vector<128x128xf32>
    %c0_14 = arith.constant 0 : index
    %c0_15 = arith.constant 0 : index
    %32 = vector.load %arg6[%c0_14, %c0_15] : memref<128x128xf32, #tpu.memory_space<vmem>>, vector<128x128xf32>
    tpu.vector_store %arg6[%c0_14, %c0_15], %31 {strides = array<i32>} : memref<128x128xf32, #tpu.memory_space<vmem>>, vector<128x128xf32>,
    return
  }
  func.func @transform_0(%arg0: i32) -> (i32, i32) {
    %c0_i32 = arith.constant 0 : i32
    %c0_i32_0 = arith.constant 0 : i32
    return %arg0, %c0_i32 : i32, i32
  }
  func.func @transform_1(%arg0: i32) -> (i32, i32) {
    %c0_i32 = arith.constant 0 : i32
    %c0_i32_0 = arith.constant 0 : i32
    %c0_i32_1 = arith.constant 0 : i32
    return %c0_i32, %c0_i32_0 : i32, i32
  }
  func.func @transform_2(%arg0: i32) -> (i32, i32) {
    %c0_i32 = arith.constant 0 : i32
    %c0_i32_0 = arith.constant 0 : i32
    %c0_i32_1 = arith.constant 0 : i32
    return %c0_i32, %c0_i32_0 : i32, i32
  }
  func.func @transform_3(%arg0: i32) -> (i32, i32) {
    %c0_i32 = arith.constant 0 : i32
    %c0_i32_0 = arith.constant 0 : i32
    %c0_i32_1 = arith.constant 0 : i32
    return %c0_i32, %c0_i32_0 : i32, i32
  }
  func.func @transform_4(%arg0: i32) -> (i32, i32) {
    %c0_i32 = arith.constant 0 : i32
    %c0_i32_0 = arith.constant 0 : i32
    %c0_i32_1 = arith.constant 0 : i32
    return %c0_i32, %c0_i32_0 : i32, i32
  }
  func.func @transform_5(%arg0: i32) -> (i32, i32) {
    %c0_i32 = arith.constant 0 : i32
    %c0_i32_0 = arith.constant 0 : i32
    return %arg0, %c0_i32 : i32, i32
  }
}

</mosaic_0001>

<bundles_post_ra>
// kernel: gpt_forward.5
= control target key start
LH: loop header
LB: loop body
LE: loop exit
PB: predicated region body
PF: predicated region fallthrough
CT: control target
= control target key end

     0   :  { %10 = vsyncpa [#allocation3], 0  ;;  %s1823_s0 = inlined_call_operand.vmem [shape: bf16[256,128], index: 0, kind: input, shape index: {}]   ;;  %s1824_s1 = inlined_call_operand.vmem [shape: f32[1,128], index: 1, kind: input, shape index: {}]   ;;  %s1825_s2 = inlined_call_operand.vmem [shape: f32[1,128], index: 2, kind: input, shape index: {}]   ;;  %s1826_s3 = inlined_call_operand.vmem [shape: bf16[128,128], index: 3, kind: input, shape index: {}]   ;;  %s1827_s4 = inlined_call_operand.vmem [shape: f32[1,128], index: 4, kind: input, shape index: {}]   ;;  %s1828_s5 = inlined_call_operand.hbm [shape: f32[256,128], index: 5, kind: output, shape index: {}]  }
   0x1   :  { %12 = vsyncpa [#allocation3 + $0x1], 0  ;;  %s1136_s18 = smov 0   ;;  %s1138_s19 = smov 0  }
   0x2   :  { %s1140_s20 = smov 0   ;;  %s1142_s21 = smov 0  }
   0x3 LB: > { %s1157_s22 = sadd.s32 4294967295, %s1101_s21   ;;  %s844_s23 = sadd.s32 4294967294, %s1101_s21   ;;  %s1101_s21 = sphi %s1142_s21, %s1858_s21   ;;  %s1097_s20 = sphi %s1140_s20, %s1857_s20   ;;  %s1093_s19 = sphi %s1138_s19, %s1856_s19   ;;  %s1089_s18 = sphi %s1136_s18, %s1855_s18  }
   0x4   : > { %s1161_s24 = sadd.s32 1, %s1101_s21   ;;  %s135_s25 = sadd.s32 1, %s1097_s20 }
   0x5   : > { %s132_s26 = ssub.s32 %s1101_s21, %s1161_s24  ;;  %p145_p0 = scmp.ne.s32.totalorder %s1097_s20, %s1093_s19 }
   0x6   : > { %p133_p1 = scmp.eq.s32.totalorder %s132_s26, 0  ;;  %p146_p2 = scmp.eq.s32.totalorder %s1157_s22, 1 }
   0x7   : > { %p151_p3 = scmp.ne.s32.totalorder %s1093_s19, %s1089_s18  ;;  %p152_p4 = scmp.eq.s32.totalorder %s844_s23, 1 }
   0x8   : > { %s1172_s27 = scalar_select %p133_p1, %s1097_s20, %s135_s25  }
   0x9   : > { %p1174_p5 = por %p146_p2, %p145_p0  ;;  %p1178_p6 = por %p152_p4, %p151_p3 }
   0xa   : > { %p847_p7 = scmp.ge.s32.totalorder %s1101_s21, 1  ;;  %p191_p8 = scmp.lt.s32.totalorder %s1101_s21, 3 }
   0xc   : > { %p192_p9 = pnand %p847_p7, %p191_p8 }
   0xd   : > { %s849_s30 = sshll.u32 (!%p192_p9), %s1157_s22, 4  ;;  %s216_s14 = sand.u32 (!%p192_p9), 1, %s1093_s19  }
   0xe   : > { %195 = sbr.rel (%p192_p9) target bundleno = 480 (0x1e0), region = 40  ;;  %p220_p10 = scmp.lt.s32.totalorder (!%p192_p9), %s849_s30, 31 }
   0xf   : > { %s848_s15 = sshll.u32 (!%p192_p9), %s216_s14, 7  ;;  %s896_s25 = sshll.u32 (!%p192_p9), %s1157_s22, 7 }
  0x10   : > { %s1771_s23 = scalar_lea.vmem (!%p192_p9), [#allocation2], %s848_s15  ;;  %s767_s22 = scalar_lea.sflag (!%p192_p9), [#allocation3], %s216_s14 }
  0x11   : > { %s779_s7 = sshll.u32 (!%p192_p9), %s1771_s23, 4  ;;  %s1059_s13 = scalar_lea.hbm (!%p192_p9), %s1828_s5, 256  ;;  %s780_s7 = int_to_ptr.vmem [resolvable:$true] %s779_s7 }
  0x13   : > { %s1860_s30 = smov (!%p220_p10, %s849_s30), 31  ;;  %v1103_v24 = vmov 128.0  }
  0x14   : > { %s850_s6 = sshll.u32 %s1860_s30, 2  ;;  %1005 = vrcp.f32 %v1103_v24 }
  0x15   : > { %s1188_s9 = scalar_lea.vmem %s1823_s0, %s850_s6  ;;  %s778_s6 = scalar_lea.hbm %s1828_s5, %s896_s25 }
  0x16   : > { %v1191_v0 = vld [vmem:[%s1188_s9 + $0x30] sm:$0xff]   ;;  %v1194_v1 = vld [vmem:[%s1188_s9 + $0x20] sm:$0xff]   ;;  %v1211_v10 = vld [vmem:[%s1188_s9 + $0x28] sm:$0xff]   ;;  %s781_s8 = sshll.u32 %s778_s6, 4  ;;  %s782_s8 = int_to_ptr.hbm [resolvable:$true] %s781_s8 }
  0x17   : > { %v1197_v2 = vld [vmem:[%s1188_s9] sm:$0xff]   ;;  %v923_v3 = vunpack.c.l.bf16 %v1191_v0  ;;  %v915_v4 = vunpack.c.l.bf16 %v1194_v1  ;;  %v924_v6 = vunpack.c.h.bf16 %v1191_v0  ;;  %v916_v7 = vunpack.c.h.bf16 %v1194_v1  ;;  %v1208_v9 = vld [vmem:[%s1188_s9 + $0x10] sm:$0xff]   ;;  %v1223_v14 = vld [vmem:[%s1188_s9 + $0x38] sm:$0xff]  }
  0x18   : > { %v899_v5 = vunpack.c.l.bf16 %v1197_v2  ;;  %v900_v8 = vunpack.c.h.bf16 %v1197_v2  ;;  %v907_v11 = vunpack.c.l.bf16 %v1208_v9  ;;  %v908_v12 = vunpack.c.h.bf16 %v1208_v9  ;;  %v1235_v18 = vld [vmem:[%s1188_s9 + $0x8] sm:$0xff]   ;;  %v1238_v19 = vld [vmem:[%s1188_s9 + $0x18] sm:$0xff]   ;;  %s1053_s9 = sshra.s32 %s782_s8, 4  ;;  %s1054_s9 = int_to_ptr.hbm [resolvable:$true] %s1053_s9 }
  0x19   : > { %284 = vadd.xlane.f32.xlu1 %v923_v3  ;;  %276 = vadd.xlane.f32.xlu0 %v915_v4  ;;  %v919_v13 = vunpack.c.l.bf16 %v1211_v10  ;;  %v920_v15 = vunpack.c.h.bf16 %v1211_v10  ;;  %v927_v16 = vunpack.c.l.bf16 %v1223_v14  ;;  %v928_v17 = vunpack.c.h.bf16 %v1223_v14  ;;  %s1055_s10 = scalar_lea.hbm %s1054_s9, 128  ;;  %p1060_p0 = scmp.lt.s32.totalorder %s1054_s9, %s1828_s5 }
  0x1a   : > { %260 = vadd.xlane.f32.xlu2 %v899_v5  ;;  %v903_v20 = vunpack.c.l.bf16 %v1235_v18  ;;  %v904_v21 = vunpack.c.h.bf16 %v1235_v18  ;;  %v911_v22 = vunpack.c.l.bf16 %v1238_v19  ;;  %v912_v23 = vunpack.c.h.bf16 %v1238_v19  ;;  %v1006_v25 = vpop.eup %1005  ;;  %v895_v18 = vld [vmem:[%s1826_s3 + $0x38] sm:$0xff]  ;;  %v894_v19 = vld [vmem:[%s1826_s3 + $0x30] sm:$0xff]  ;;  %p1056_p11 = scmp.ne.s32.totalorder %s1054_s9, %s1055_s10  ;;  %p1061_p1 = scmp.lt.s32.totalorder %s1059_s13, %s1055_s10 }
  0x1b   : > { %v293_v26 = vmul.f32 128.0, %v1006_v25  ;;  %vm297_vm0 = vweird.f32 %v1006_v25  ;;  %937 = vmatpush.bf16.msra.mxu2 %v895_v18  ;;  %938 = vmatpush.bf16.msra.mxu3 %v895_v18 }
  0x1c   : > { %701 = vmatpush.bf16.msra.mxu0 %v895_v18  ;;  %936 = vmatpush.bf16.msra.mxu1 %v895_v18  ;;  %p1057_p12 = pnand %p1056_p11, %p1174_p5  ;;  %p1062_p2 = por %p1061_p1, %p1060_p0 }
  0x1d   : > { %v294_v27 = vsub.f32 1.0, %v293_v26 }
  0x1e   : > { %p1058_p13 = pneg %p1057_p12 }
  0x1f   : > { %v295_v28 = vmul.f32 %v1006_v25, %v294_v27  ;;  %940 = vmatpush.bf16.msra.mxu2 %v894_v19  ;;  %941 = vmatpush.bf16.msra.mxu3 %v894_v19 }
  0x20   : > { %702 = vmatpush.bf16.msra.mxu0 %v894_v19  ;;  %939 = vmatpush.bf16.msra.mxu1 %v894_v19  ;;  %p1063_p3 = pnand %p1062_p2, %p1058_p13 }
  0x21   : > { %286 = vadd.xlane.f32.xlu1 %v924_v6  ;;  %278 = vadd.xlane.f32.xlu0 %v916_v7  ;;  %v296_v29 = vadd.f32 %v1006_v25, %v295_v28 }
  0x22   : > { %262 = vadd.xlane.f32.xlu2 %v900_v8 }
  0x23   : > { %v1252_v30 = vsel %vm297_vm0, %v1006_v25, %v296_v29 }
  0x29   : > { %268 = vadd.xlane.f32.xlu0 %v907_v11  ;;  %270 = vadd.xlane.f32.xlu1 %v908_v12 }
  0x2a   : > { %280 = vadd.xlane.f32.xlu2 %v919_v13 }
  0x31   : > { %282 = vadd.xlane.f32.xlu0 %v920_v15  ;;  %288 = vadd.xlane.f32.xlu1 %v927_v16 }
  0x32   : > { %290 = vadd.xlane.f32.xlu2 %v928_v17 }
  0x39   : > { %264 = vadd.xlane.f32.xlu0 %v903_v20  ;;  %266 = vadd.xlane.f32.xlu1 %v904_v21 }
  0x3a   : > { %272 = vadd.xlane.f32.xlu2 %v911_v22 }
  0x41   : > { %274 = vadd.xlane.f32.xlu0 %v912_v23 }
  0x8c   : > { %v285_v31 = vpop.xlane.xlu1 %284  ;;  %v277_v32 = vpop.xlane.xlu0 %276 }
  0x8d   : > { %v311_v33 = vmul.f32 %v1252_v30, %v285_v31  ;;  %v307_v34 = vmul.f32 %v1252_v30, %v277_v32  ;;  %v261_v35 = vpop.xlane.xlu2 %260 }
  0x8e   : > { %v299_v49 = vmul.f32 %v1252_v30, %v261_v35 }
  0x8f   : > { %v1256_v36 = vsub.f32 %v923_v3, %v311_v33  ;;  %v1258_v37 = vsub.f32 %v915_v4, %v307_v34 }
  0x90   : > { %v1282_v55 = vsub.f32 %v899_v5, %v299_v49 }
  0x91   : > { %v339_v38 = vmul.f32 %v1258_v37, %v1258_v37  ;;  %v343_v39 = vmul.f32 %v1256_v36, %v1256_v36 }
  0x92   : > { %v331_v63 = vmul.f32 %v1282_v55, %v1282_v55 }
  0x93   : > { %363 = vadd.xlane.f32.xlu1 %v339_v38  ;;  %371 = vadd.xlane.f32.xlu0 %v343_v39  ;;  %v891_v38 = vld [vmem:[%s1826_s3 + $0x18] sm:$0xff]  ;;  %v890_v39 = vld [vmem:[%s1826_s3 + $0x10] sm:$0xff] }
  0x94   : > { %v287_v40 = vpop.xlane.xlu1 %286  ;;  %v279_v41 = vpop.xlane.xlu0 %278 }
  0x95   : > { %v312_v42 = vmul.f32 %v1252_v30, %v287_v40  ;;  %v308_v43 = vmul.f32 %v1252_v30, %v279_v41  ;;  %v263_v44 = vpop.xlane.xlu2 %262 }
  0x96   : > { %v300_v45 = vmul.f32 %v1252_v30, %v263_v44  ;;  %v889_v44 = vld [vmem:[%s1826_s3 + $0x8] sm:$0xff] }
  0x97   : > { %v1267_v46 = vsub.f32 %v924_v6, %v312_v42  ;;  %v1269_v47 = vsub.f32 %v916_v7, %v308_v43 }
  0x98   : > { %v1271_v48 = vsub.f32 %v900_v8, %v300_v45 }
  0x99   : > { %v344_v50 = vmul.f32 %v1267_v46, %v1267_v46  ;;  %v340_v51 = vmul.f32 %v1269_v47, %v1269_v47 }
  0x9a   : > { %v332_v52 = vmul.f32 %v1271_v48, %v1271_v48 }
  0x9b   : > { %373 = vadd.xlane.f32.xlu1 %v344_v50  ;;  %365 = vadd.xlane.f32.xlu2 %v340_v51  ;;  %v888_v50 = vld [vmem:[%s1826_s3] sm:$0xff] }
  0x9c   : > { %349 = vadd.xlane.f32.xlu0 %v332_v52  ;;  %v269_v53 = vpop.xlane.xlu0 %268  ;;  %v271_v54 = vpop.xlane.xlu1 %270 }
  0x9d   : > { %v303_v56 = vmul.f32 %v1252_v30, %v269_v53  ;;  %v281_v57 = vpop.xlane.xlu2 %280  ;;  %v304_v60 = vmul.f32 %v1252_v30, %v271_v54 }
  0x9e   : > { %v309_v58 = vmul.f32 %v1252_v30, %v281_v57 }
  0x9f   : > { %v1288_v59 = vsub.f32 %v907_v11, %v303_v56  ;;  %v1303_v1 = vsub.f32 %v908_v12, %v304_v60 }
  0xa0   : > { %v1293_v61 = vsub.f32 %v919_v13, %v309_v58 }
  0xa1   : > { %v335_v62 = vmul.f32 %v1288_v59, %v1288_v59  ;;  %v336_v8 = vmul.f32 %v1303_v1, %v1303_v1 }
  0xa2   : > { %v341_v0 = vmul.f32 %v1293_v61, %v1293_v61 }
  0xa3   : > { %355 = vadd.xlane.f32.xlu1 %v335_v62  ;;  %347 = vadd.xlane.f32.xlu2 %v331_v63 }
  0xa4   : > { %367 = vadd.xlane.f32.xlu0 %v341_v0  ;;  %v283_v2 = vpop.xlane.xlu0 %282  ;;  %v289_v3 = vpop.xlane.xlu1 %288 }
  0xa5   : > { %v310_v4 = vmul.f32 %v1252_v30, %v283_v2  ;;  %v291_v5 = vpop.xlane.xlu2 %290  ;;  %v313_v11 = vmul.f32 %v1252_v30, %v289_v3 }
  0xa6   : > { %v314_v6 = vmul.f32 %v1252_v30, %v291_v5 }
  0xa7   : > { %v1309_v7 = vsub.f32 %v920_v15, %v310_v4  ;;  %v1324_v10 = vsub.f32 %v927_v16, %v313_v11 }
  0xa8   : > { %v1316_v9 = vsub.f32 %v928_v17, %v314_v6 }
  0xa9   : > { %v342_v12 = vmul.f32 %v1309_v7, %v1309_v7  ;;  %v345_v28 = vmul.f32 %v1324_v10, %v1324_v10 }
  0xaa   : > { %v346_v13 = vmul.f32 %v1316_v9, %v1316_v9 }
  0xab   : > { %369 = vadd.xlane.f32.xlu1 %v342_v12  ;;  %357 = vadd.xlane.f32.xlu2 %v336_v8 }
  0xac   : > { %377 = vadd.xlane.f32.xlu0 %v346_v13  ;;  %v265_v15 = vpop.xlane.xlu0 %264  ;;  %v267_v24 = vpop.xlane.xlu1 %266 }
  0xad   : > { %v301_v25 = vmul.f32 %v1252_v30, %v265_v15  ;;  %v273_v26 = vpop.xlane.xlu2 %272  ;;  %v302_v29 = vmul.f32 %v1252_v30, %v267_v24 }
  0xae   : > { %v305_v17 = vmul.f32 %v1252_v30, %v273_v26 }
  0xaf   : > { %v1330_v27 = vsub.f32 %v903_v20, %v301_v25  ;;  %v1345_v20 = vsub.f32 %v904_v21, %v302_v29  ;;  %v893_v21 = vld [vmem:[%s1826_s3 + $0x28] sm:$0xff] }
  0xb0   : > { %v1337_v14 = vsub.f32 %v911_v22, %v305_v17  ;;  %943 = vmatpush.bf16.msra.mxu2 %v893_v21  ;;  %944 = vmatpush.bf16.msra.mxu3 %v893_v21 }
  0xb1   : > { %v333_v16 = vmul.f32 %v1330_v27, %v1330_v27  ;;  %v334_v34 = vmul.f32 %v1345_v20, %v1345_v20  ;;  %703 = vmatpush.bf16.msra.mxu0 %v893_v21  ;;  %942 = vmatpush.bf16.msra.mxu1 %v893_v21 }
  0xb2   : > { %v337_v31 = vmul.f32 %v1337_v14, %v1337_v14 }
  0xb3   : > { %351 = vadd.xlane.f32.xlu1 %v333_v16  ;;  %375 = vadd.xlane.f32.xlu2 %v345_v28 }
  0xb4   : > { %359 = vadd.xlane.f32.xlu0 %v337_v31  ;;  %v275_v32 = vpop.xlane.xlu0 %274 }
  0xb5   : > { %v306_v33 = vmul.f32 %v1252_v30, %v275_v32 }
  0xb7   : > { %v1350_v22 = vsub.f32 %v912_v23, %v306_v33  ;;  %v892_v23 = vld [vmem:[%s1826_s3 + $0x20] sm:$0xff] }
  0xb8   : > { %946 = vmatpush.bf16.msra.mxu2 %v892_v23  ;;  %947 = vmatpush.bf16.msra.mxu3 %v892_v23 }
  0xb9   : > { %v338_v35 = vmul.f32 %v1350_v22, %v1350_v22  ;;  %704 = vmatpush.bf16.msra.mxu0 %v892_v23  ;;  %945 = vmatpush.bf16.msra.mxu1 %v892_v23 }
  0xbb   : > { %361 = vadd.xlane.f32.xlu1 %v338_v35  ;;  %353 = vadd.xlane.f32.xlu2 %v334_v34 }
  0xbc   : > { %949 = vmatpush.bf16.msra.mxu2 %v891_v38  ;;  %950 = vmatpush.bf16.msra.mxu3 %v891_v38 }
  0xbd   : > { %705 = vmatpush.bf16.msra.mxu0 %v891_v38  ;;  %948 = vmatpush.bf16.msra.mxu1 %v891_v38 }
  0xc0   : > { %952 = vmatpush.bf16.msra.mxu2 %v890_v39  ;;  %953 = vmatpush.bf16.msra.mxu3 %v890_v39 }
  0xc1   : > { %706 = vmatpush.bf16.msra.mxu0 %v890_v39  ;;  %951 = vmatpush.bf16.msra.mxu1 %v890_v39 }
  0xc4   : > { %955 = vmatpush.bf16.msra.mxu2 %v889_v44  ;;  %956 = vmatpush.bf16.msra.mxu3 %v889_v44 }
  0xc5   : > { %707 = vmatpush.bf16.msra.mxu0 %v889_v44  ;;  %954 = vmatpush.bf16.msra.mxu1 %v889_v44 }
  0xc8   : > { %958 = vmatpush.bf16.msra.mxu2 %v888_v50  ;;  %959 = vmatpush.bf16.msra.mxu3 %v888_v50 }
  0xc9   : > { %708 = vmatpush.bf16.msra.mxu0 %v888_v50  ;;  %957 = vmatpush.bf16.msra.mxu1 %v888_v50 }
 0x106   : > { %v364_v40 = vpop.xlane.xlu1 %363  ;;  %v372_v41 = vpop.xlane.xlu0 %371 }
 0x107   : > { %v387_v42 = vmul.f32 %v364_v40, %v1252_v30  ;;  %v391_v43 = vmul.f32 %v372_v41, %v1252_v30 }
 0x109   : > { %v1379_v45 = vadd.f32 1e-05, %v387_v42  ;;  %v1381_v49 = vadd.f32 1e-05, %v391_v43 }
 0x10b   : > { %1007 = vrsqrt.f32 %v1379_v45  ;;  %vm497_vm2 = vweird.f32 %v1379_v45  ;;  %vm537_vm5 = vweird.f32 %v1381_v49 }
 0x10c   : > { %1009 = vrsqrt.f32 %v1381_v49 }
 0x10e   : > { %v374_v51 = vpop.xlane.xlu1 %373  ;;  %v366_v52 = vpop.xlane.xlu2 %365 }
 0x10f   : > { %v392_v53 = vmul.f32 %v374_v51, %v1252_v30  ;;  %v350_v54 = vpop.xlane.xlu0 %349  ;;  %v388_v56 = vmul.f32 %v366_v52, %v1252_v30 }
 0x110   : > { %v380_v57 = vmul.f32 %v350_v54, %v1252_v30 }
 0x111   : > { %v1391_v58 = vpop.eup %1007  ;;  %v1393_v60 = vadd.f32 1e-05, %v392_v53  ;;  %v1395_v62 = vadd.f32 1e-05, %v388_v56 }
 0x112   : > { %v492_v63 = vmul.f32 %v1391_v58, %v1379_v45  ;;  %v1399_v0 = vadd.f32 1e-05, %v380_v57  ;;  %v1401_v2 = vpop.eup %1009  ;;  %vm498_vm1 = vweird.f32 %v1391_v58 }
 0x113   : > { %1011 = vrsqrt.f32 %v1393_v60  ;;  %v532_v4 = vmul.f32 %v1401_v2, %v1381_v49  ;;  %vm538_vm3 = vweird.f32 %v1401_v2  ;;  %vm1450_vm4 = vmor %vm497_vm2, %vm498_vm1  ;;  %vm547_vm7 = vweird.f32 %v1393_v60 }
 0x114   : > { %v493_v3 = vmul.f32 %v1391_v58, %v492_v63  ;;  %1013 = vrsqrt.f32 %v1399_v0  ;;  %vm507_vm8 = vweird.f32 %v1395_v62  ;;  %vm427_vm11 = vweird.f32 %v1399_v0  ;;  %vm1519_vm13 = vmor %vm537_vm5, %vm538_vm3 }
 0x115   : > { %1015 = vrsqrt.f32 %v1395_v62  ;;  %v533_v17 = vmul.f32 %v1401_v2, %v532_v4 }
 0x116   : > { %v356_v5 = vpop.xlane.xlu1 %355  ;;  %v348_v6 = vpop.xlane.xlu2 %347  ;;  %v494_v8 = vmul.f32 0.5, %v493_v3 }
 0x117   : > { %v383_v11 = vmul.f32 %v356_v5, %v1252_v30  ;;  %v368_v12 = vpop.xlane.xlu0 %367  ;;  %v379_v13 = vmul.f32 %v348_v6, %v1252_v30  ;;  %v534_v35 = vmul.f32 0.5, %v533_v17 }
 0x118   : > { %v389_v15 = vmul.f32 %v368_v12, %v1252_v30  ;;  %v495_v31 = vsub.f32 1.5, %v494_v8 }
 0x119   : > { %v1412_v24 = vpop.eup %1011  ;;  %v1414_v25 = vadd.f32 1e-05, %v383_v11  ;;  %v1421_v29 = vadd.f32 1e-05, %v379_v13  ;;  %v535_v53 = vsub.f32 1.5, %v534_v35 }
 0x11a   : > { %v1416_v26 = vpop.eup %1013  ;;  %v1419_v28 = vadd.f32 1e-05, %v389_v15  ;;  %v542_v32 = vmul.f32 %v1412_v24, %v1393_v60  ;;  %v496_v23 = vmul.f32 %v1391_v58, %v495_v31  ;;  %vm548_vm10 = vweird.f32 %v1412_v24 }
 0x11b   : > { %v1423_v16 = vpop.eup %1015  ;;  %1017 = vrsqrt.f32 %v1414_v25  ;;  %v422_v34 = vmul.f32 %v1416_v26, %v1399_v0  ;;  %vm428_vm12 = vweird.f32 %v1416_v26  ;;  %vm417_vm15 = vweird.f32 %v1421_v29  ;;  %vm1553_vm0 = vmor %vm547_vm7, %vm548_vm10 }
 0x11c   : > { %v502_v33 = vmul.f32 %v1423_v16, %v1395_v62  ;;  %1019 = vrsqrt.f32 %v1419_v28  ;;  %v543_v38 = vmul.f32 %v1412_v24, %v542_v32  ;;  %v500_v4 = vsel %vm1450_vm4, %v1391_v58, %v496_v23  ;;  %v1485_v32 = vld [vmem:[%s1824_s1] ss:$0 sm:$0xff] }
 0x11d   : > { %1021 = vrsqrt.f32 %v1421_v29  ;;  %v423_v50 = vmul.f32 %v1416_v26, %v422_v34  ;;  %vm508_vm6 = vweird.f32 %v1423_v16  ;;  %v579_v31 = vmul.f32 %v500_v4, %v1258_v37 }
 0x11e   : > { %v503_v18 = vmul.f32 %v1423_v16, %v502_v33  ;;  %v370_v19 = vpop.xlane.xlu1 %369  ;;  %v358_v21 = vpop.xlane.xlu2 %357  ;;  %v544_v63 = vmul.f32 0.5, %v543_v38  ;;  %vm1489_vm9 = vmor %vm507_vm8, %vm508_vm6  ;;  %v536_v37 = vmul.f32 %v1401_v2, %v535_v53  ;;  %vm517_vm1 = vweird.f32 %v1419_v28 }
 0x11f   : > { %v390_v39 = vmul.f32 %v370_v19, %v1252_v30  ;;  %v378_v40 = vpop.xlane.xlu0 %377  ;;  %v384_v41 = vmul.f32 %v358_v21, %v1252_v30  ;;  %v424_v12 = vmul.f32 0.5, %v423_v50  ;;  %vm457_vm4 = vweird.f32 %v1414_v25 }
 0x120   : > { %v504_v42 = vmul.f32 0.5, %v503_v18  ;;  %v394_v43 = vmul.f32 %v378_v40, %v1252_v30  ;;  %v545_v33 = vsub.f32 1.5, %v544_v63 }
 0x121   : > { %v1441_v44 = vpop.eup %1017  ;;  %v1446_v51 = vadd.f32 1e-05, %v390_v39  ;;  %v1457_v45 = vadd.f32 1e-05, %v384_v41  ;;  %v425_v40 = vsub.f32 1.5, %v424_v12 }
 0x122   : > { %v505_v54 = vsub.f32 1.5, %v504_v42  ;;  %v452_v56 = vmul.f32 %v1441_v44, %v1414_v25  ;;  %v1459_v57 = vpop.eup %1019  ;;  %v1462_v3 = vadd.f32 1e-05, %v394_v43  ;;  %vm458_vm14 = vweird.f32 %v1441_v44 }
 0x123   : > { %1023 = vrsqrt.f32 %v1446_v51  ;;  %v1467_v5 = vpop.eup %1021  ;;  %v512_v11 = vmul.f32 %v1459_v57, %v1419_v28  ;;  %vm518_vm2 = vweird.f32 %v1459_v57  ;;  %vm467_vm6 = vweird.f32 %v1457_v45 }
 0x124   : > { %v506_v6 = vmul.f32 %v1423_v16, %v505_v54  ;;  %v453_v8 = vmul.f32 %v1441_v44, %v452_v56  ;;  %v412_v13 = vmul.f32 %v1467_v5, %v1421_v29  ;;  %1025 = vrsqrt.f32 %v1462_v3 }
 0x125   : > { %v513_v58 = vmul.f32 %v1459_v57, %v512_v11  ;;  %1027 = vrsqrt.f32 %v1457_v45  ;;  %v546_v56 = vmul.f32 %v1412_v24, %v545_v33  ;;  %vm418_vm3 = vweird.f32 %v1467_v5 }
 0x126   : > { %v352_v15 = vpop.xlane.xlu1 %351  ;;  %v376_v17 = vpop.xlane.xlu2 %375  ;;  %v413_v62 = vmul.f32 %v1467_v5, %v412_v13  ;;  %v454_v21 = vmul.f32 0.5, %v453_v8  ;;  %v510_v38 = vsel %vm1489_vm9, %v1423_v16, %v506_v6  ;;  %v598_v16 = vmul.f32 %v1485_v32, %v579_v31  ;;  %v1531_v6 = vld [vmem:[%s1825_s2] ss:$0 sm:$0xff]  ;;  %vm1602_vm9 = vmor %vm427_vm11, %vm428_vm12 }
 0x127   : > { %v381_v35 = vmul.f32 %v352_v15, %v1252_v30  ;;  %v360_v18 = vpop.xlane.xlu0 %359  ;;  %v393_v19 = vmul.f32 %v376_v17, %v1252_v30  ;;  %v514_v41 = vmul.f32 0.5, %v513_v58  ;;  %v580_v4 = vmul.f32 %v510_v38, %v1269_v47  ;;  %vm1616_vm11 = vmor %vm417_vm15, %vm418_vm3 }
 0x128   : > { %v385_v23 = vmul.f32 %v360_v18, %v1252_v30  ;;  %v414_v43 = vmul.f32 0.5, %v413_v62  ;;  %v455_v49 = vsub.f32 1.5, %v454_v21  ;;  %v540_v13 = vsel %vm1519_vm13, %v1401_v2, %v536_v37  ;;  %vm1638_vm12 = vmor %vm457_vm4, %vm458_vm14 }
 0x129   : > { %v1501_v39 = vpop.eup %1023  ;;  %v1504_v42 = vadd.f32 1e-05, %v381_v35  ;;  %v1510_v52 = vadd.f32 1e-05, %v393_v19  ;;  %v1542_v58 = vmul.f32 %v1416_v26, %v425_v40  ;;  %v515_v47 = vsub.f32 1.5, %v514_v41  ;;  %vm1650_vm3 = vmor %vm517_vm1, %vm518_vm2 }
 0x12a   : > { %v522_v50 = vmul.f32 %v1501_v39, %v1446_v51  ;;  %v1513_v53 = vpop.eup %1025  ;;  %v1525_v63 = vadd.f32 1e-05, %v385_v23  ;;  %v415_v2 = vsub.f32 1.5, %v414_v43  ;;  %v599_v60 = vmul.f32 %v1485_v32, %v580_v4 }
 0x12b   : > { %1029 = vrsqrt.f32 %v1504_v42  ;;  %v1533_v8 = vpop.eup %1027  ;;  %v562_v12 = vmul.f32 %v1513_v53, %v1462_v3  ;;  %v617_v34 = vadd.f32 %v1531_v6, %v598_v16  ;;  %v550_v62 = vsel %vm1553_vm0, %v1412_v24, %v546_v56 }
 0x12c   : > { %v523_v11 = vmul.f32 %v1501_v39, %v522_v50  ;;  %v462_v15 = vmul.f32 %v1533_v8, %v1457_v45  ;;  %1031 = vrsqrt.f32 %v1525_v63  ;;  %v1570_v19 = vmul.f32 %v1441_v44, %v455_v49 }
 0x12d   : > { %v563_v31 = vmul.f32 %v1513_v53, %v562_v12  ;;  %1033 = vrsqrt.f32 %v1510_v52  ;;  %v583_v21 = vmul.f32 %v540_v13, %v1256_v36  ;;  %v584_v23 = vmul.f32 %v550_v62, %v1267_v46 }
 0x12e   : > { %v463_v33 = vmul.f32 %v1533_v8, %v462_v15  ;;  %v362_v35 = vpop.xlane.xlu1 %361  ;;  %v354_v18 = vpop.xlane.xlu2 %353  ;;  %v524_v37 = vmul.f32 0.5, %v523_v11  ;;  %v1577_v40 = vmul.f32 %v1459_v57, %v515_v47  ;;  %vm528_vm5 = vweird.f32 %v1501_v39 }
 0x12f   : > { %v564_v41 = vmul.f32 0.5, %v563_v31  ;;  %v618_v24 = vadd.f32 %v1531_v6, %v599_v60  ;;  %v416_v50 = vmul.f32 %v1467_v5, %v415_v2  ;;  %v386_v46 = vmul.f32 %v362_v35, %v1252_v30 }
 0x130   : > { %v464_v43 = vmul.f32 0.5, %v463_v33  ;;  %v382_v16 = vmul.f32 %v354_v18, %v1252_v30  ;;  %vm527_vm7 = vweird.f32 %v1446_v51  ;;  %v602_v49 = vmul.f32 %v1485_v32, %v583_v21 }
 0x131   : > { %v1574_v38 = vpop.eup %1029  ;;  %v629_v4 = vpack.c.bf16 %v618_v24, %v617_v34  ;;  %v603_v11 = vmul.f32 %v1485_v32, %v584_v23  ;;  %v525_v13 = vsub.f32 1.5, %v524_v37  ;;  %vm468_vm8 = vweird.f32 %v1533_v8  ;;  %vm529_vm2 = vmor %vm527_vm7, %vm528_vm5 }
 0x132   : > { %v432_v36 = vmul.f32 %v1574_v38, %v1504_v42  ;;  %v1587_v54 = vpop.eup %1031  ;;  %v465_v56 = vsub.f32 1.5, %v464_v43  ;;  %v565_v17 = vsub.f32 1.5, %v564_v41  ;;  %vm567_vm10 = vweird.f32 %v1462_v3 }
 0x133   : > { %v1592_v12 = vpop.eup %1033  ;;  %v472_v30 = vmul.f32 %v1587_v54, %v1525_v63  ;;  %vm568_vm13 = vweird.f32 %v1513_v53  ;;  %729 = vmatmul.bf16.vlgmr.msra.gmra.mxu2 %v629_v4  ;;  %v621_v33 = vadd.f32 %v1531_v6, %v602_v49  ;;  %v622_v62 = vadd.f32 %v1531_v6, %v603_v11 }
 0x134   : > { %v433_v47 = vmul.f32 %v1574_v38, %v432_v36  ;;  %v466_v2 = vmul.f32 %v1533_v8, %v465_v56  ;;  %v552_v31 = vmul.f32 %v1592_v12, %v1510_v52  ;;  %v1622_v35 = vadd.f32 1e-05, %v386_v46 }
 0x135   : > { %v473_v34 = vmul.f32 %v1587_v54, %v472_v30  ;;  %v1625_v37 = vadd.f32 1e-05, %v382_v16  ;;  %v420_v21 = vsel %vm1616_vm11, %v1467_v5, %v416_v50  ;;  %v430_v29 = vsel %vm1602_vm9, %v1416_v26, %v1542_v58  ;;  %vm1662_vm9 = vmor %vm467_vm6, %vm468_vm8 }
 0x136   : > { %v434_v60 = vmul.f32 0.5, %v433_v47  ;;  %v553_v18 = vmul.f32 %v1592_v12, %v552_v31  ;;  %v526_v41 = vmul.f32 %v1501_v39, %v525_v13  ;;  %vm477_vm15 = vweird.f32 %v1525_v63  ;;  %vm1703_vm6 = vmor %vm567_vm10, %vm568_vm13 }
 0x137   : > { %v474_v43 = vmul.f32 0.5, %v473_v34  ;;  %vm557_vm0 = vweird.f32 %v1510_v52  ;;  %v631_v5 = vpack.c.bf16 %v622_v62, %v621_v33  ;;  %1035 = vrsqrt.f32 %v1622_v35 }
 0x138   : > { %v566_v26 = vmul.f32 %v1513_v53, %v565_v17  ;;  %vm437_vm14 = vweird.f32 %v1504_v42  ;;  %vm438_vm4 = vweird.f32 %v1574_v38  ;;  %v554_v58 = vmul.f32 0.5, %v553_v18 }
 0x139   : > { %1037 = vrsqrt.f32 %v1625_v37  ;;  %v435_v28 = vsub.f32 1.5, %v434_v60  ;;  %vm558_vm1 = vweird.f32 %v1592_v12  ;;  %739 = vmatmul.bf16.vlgmr.msra.gmra.mxu3 %v631_v5  ;;  %v571_v50 = vmul.f32 %v420_v21, %v1282_v55  ;;  %vm1721_vm8 = vmor %vm437_vm14, %vm438_vm4 }
 0x13a   : > { %v572_v36 = vmul.f32 %v430_v29, %v1271_v48  ;;  %v555_v46 = vsub.f32 1.5, %v554_v58  ;;  %v460_v16 = vsel %vm1638_vm12, %v1441_v44, %v1570_v19  ;;  %v470_v45 = vsel %vm1662_vm9, %v1533_v8, %v466_v2  ;;  %vm559_vm7 = vmor %vm557_vm0, %vm558_vm1 }
 0x13b   : > { %v520_v56 = vsel %vm1650_vm3, %v1459_v57, %v1577_v40  ;;  %v475_v48 = vsub.f32 1.5, %v474_v43  ;;  %v590_v55 = vmul.f32 %v1485_v32, %v571_v50  ;;  %v575_v44 = vmul.f32 %v460_v16, %v1288_v59 }
 0x13c   : > { %v591_v4 = vmul.f32 %v1485_v32, %v572_v36  ;;  %v556_v19 = vmul.f32 %v1592_v12, %v555_v46  ;;  %v576_v8 = vmul.f32 %v470_v45, %v1303_v1  ;;  %v530_v49 = vsel %vm529_vm2, %v1501_v39, %v526_v41 }
 0x13d   : > { %v581_v57 = vmul.f32 %v520_v56, %v1293_v61  ;;  %v1036_v40 = vpop.eup %1035  ;;  %v609_v11 = vadd.f32 %v1531_v6, %v590_v55  ;;  %v594_v13 = vmul.f32 %v1485_v32, %v575_v44  ;;  %v582_v47 = vmul.f32 %v530_v49, %v1309_v7 }
 0x13e   : > { %v610_v51 = vadd.f32 %v1531_v6, %v591_v4  ;;  %vm478_vm5 = vweird.f32 %v1587_v54  ;;  %v482_v59 = vmul.f32 %v1036_v40, %v1622_v35  ;;  %v595_v1 = vmul.f32 %v1485_v32, %v576_v8 }
 0x13f   : > { %v1038_v30 = vpop.eup %1037  ;;  %v600_v39 = vmul.f32 %v1485_v32, %v581_v57  ;;  %v436_v15 = vmul.f32 %v1574_v38, %v435_v28  ;;  %v476_v7 = vmul.f32 %v1587_v54, %v475_v48  ;;  %v613_v33 = vadd.f32 %v1531_v6, %v594_v13  ;;  %vm1734_vm10 = vmor %vm477_vm15, %vm478_vm5 }
 0x140   : > { %v442_v17 = vmul.f32 %v1038_v30, %v1625_v37  ;;  %v625_v2 = vpack.c.bf16 %v610_v51, %v609_v11  ;;  %v483_v31 = vmul.f32 %v1036_v40, %v482_v59  ;;  %v614_v3 = vadd.f32 %v1531_v6, %v595_v1 }
 0x141   : > { %v601_v0 = vmul.f32 %v1485_v32, %v582_v47  ;;  %v619_v52 = vadd.f32 %v1531_v6, %v600_v39  ;;  %v560_v62 = vsel %vm559_vm7, %v1592_v12, %v556_v19  ;;  %v570_v18 = vsel %vm1703_vm6, %v1513_v53, %v566_v26 }
 0x142   : > { %v443_v34 = vmul.f32 %v1038_v30, %v442_v17  ;;  %709 = vmatmul.bf16.vlgmr.msra.gmra.mxu0 %v625_v2  ;;  %v484_v21 = vmul.f32 0.5, %v483_v31  ;;  %v627_v29 = vpack.c.bf16 %v614_v3, %v613_v33  ;;  %v585_v41 = vmul.f32 %v560_v62, %v1324_v10 }
 0x143   : > { %v620_v23 = vadd.f32 %v1531_v6, %v601_v0  ;;  %v586_v12 = vmul.f32 %v570_v18, %v1316_v9  ;;  %v440_v53 = vsel %vm1721_vm8, %v1574_v38, %v436_v15  ;;  %v480_v63 = vsel %vm1734_vm10, %v1587_v54, %v476_v7 }
 0x144   : > { %v444_v43 = vmul.f32 0.5, %v443_v34  ;;  %v485_v5 = vsub.f32 1.5, %v484_v21  ;;  %vm488_vm13 = vweird.f32 %v1036_v40  ;;  %719 = vmatmul.bf16.vlgmr.msra.gmra.mxu1 %v627_v29  ;;  %v604_v26 = vmul.f32 %v1485_v32, %v585_v41 }
 0x145   : > { %v630_v25 = vpack.c.bf16 %v620_v23, %v619_v52  ;;  %vm487_vm11 = vweird.f32 %v1622_v35  ;;  %vm448_vm12 = vweird.f32 %v1038_v30  ;;  %v605_v9 = vmul.f32 %v1485_v32, %v586_v12 }
 0x146   : > { %v445_v10 = vsub.f32 1.5, %v444_v43  ;;  %v486_v58 = vmul.f32 %v1036_v40, %v485_v5  ;;  %v623_v38 = vadd.f32 %v1531_v6, %v604_v26  ;;  %v573_v24 = vmul.f32 %v440_v53, %v1330_v27  ;;  %vm489_vm15 = vmor %vm487_vm11, %vm488_vm13 }
 0x147   : > { %734 = vmatmul.bf16.gmra.mxu2 %v630_v25  ;;  %v577_v54 = vmul.f32 %v480_v63, %v1337_v14  ;;  %vm447_vm0 = vweird.f32 %v1625_v37  ;;  %v624_v50 = vadd.f32 %v1531_v6, %v605_v9 }
 0x148   : > { %v446_v28 = vmul.f32 %v1038_v30, %v445_v10  ;;  %vm449_vm3 = vmor %vm447_vm0, %vm448_vm12  ;;  %v490_v35 = vsel %vm489_vm15, %v1036_v40, %v486_v58  ;;  %v592_v27 = vmul.f32 %v1485_v32, %v573_v24 }
 0x149   : > { %v632_v36 = vpack.c.bf16 %v624_v50, %v623_v38  ;;  %v578_v16 = vmul.f32 %v490_v35, %v1350_v22  ;;  %v596_v14 = vmul.f32 %v1485_v32, %v577_v54 }
 0x14a   : > { %v450_v46 = vsel %vm449_vm3, %v1038_v30, %v446_v28  ;;  %v611_v55 = vadd.f32 %v1531_v6, %v592_v27 }
 0x14b   : > { %v574_v45 = vmul.f32 %v450_v46, %v1345_v20  ;;  %744 = vmatmul.bf16.gmra.mxu3 %v632_v36  ;;  %v597_v56 = vmul.f32 %v1485_v32, %v578_v16  ;;  %v615_v22 = vadd.f32 %v1531_v6, %v596_v14  ;;  %v1004_v20 = vld [vmem:[%s1827_s4] ss:$0 sm:$0xff] }
 0x14d   : > { %v593_v37 = vmul.f32 %v1485_v32, %v574_v45  ;;  %v616_v48 = vadd.f32 %v1531_v6, %v597_v56 }
 0x14f   : > { %v612_v4 = vadd.f32 %v1531_v6, %v593_v37  ;;  %v628_v19 = vpack.c.bf16 %v616_v48, %v615_v22 }
 0x151   : > { %v626_v44 = vpack.c.bf16 %v612_v4, %v611_v55 }
 0x153   : > { %714 = vmatmul.bf16.gmra.mxu0 %v626_v44 }
 0x154   : > { %724 = vmatmul.bf16.gmra.mxu1 %v628_v19 }
 0x1b6   : > { %v730_v32 = vpop.f32.mrf.mxu2 }
 0x1b7   : > { %v731_v8 = vadd.f32 %v1004_v20, %v730_v32 }
 0x1b9   : > { %758 = vst [vmem:[%s1771_s23 + $0x40] sm:$0xff] %v731_v8 }
 0x1bc   : > { %v740_v6 = vpop.f32.mrf.mxu3 }
 0x1bd   : > { %v741_v49 = vadd.f32 %v1004_v20, %v740_v6 }
 0x1be   : > { %v732_v11 = vpop.f32.mrf.mxu2 }
 0x1bf   : > { %v710_v57 = vpop.f32.mrf.mxu0  ;;  %762 = vst [vmem:[%s1771_s23 + $0x60] sm:$0xff] %v741_v49  ;;  %v733_v51 = vadd.f32 %v1004_v20, %v732_v11 }
 0x1c0   : > { %v711_v40 = vadd.f32 %v1004_v20, %v710_v57 }
 0x1c1   : > { %v720_v13 = vpop.f32.mrf.mxu1  ;;  %759 = vst [vmem:[%s1771_s23 + $0x48] sm:$0xff] %v733_v51 }
 0x1c2   : > { %750 = vst [vmem:[%s1771_s23] sm:$0xff] %v711_v40  ;;  %v721_v47 = vadd.f32 %v1004_v20, %v720_v13 }
 0x1c4   : > { %v742_v30 = vpop.f32.mrf.mxu3  ;;  %754 = vst [vmem:[%s1771_s23 + $0x20] sm:$0xff] %v721_v47 }
 0x1c5   : > { %v743_v59 = vadd.f32 %v1004_v20, %v742_v30 }
 0x1c7   : > { %v712_v1 = vpop.f32.mrf.mxu0  ;;  %763 = vst [vmem:[%s1771_s23 + $0x68] sm:$0xff] %v743_v59 }
 0x1c8   : > { %v713_v39 = vadd.f32 %v1004_v20, %v712_v1 }
 0x1c9   : > { %v722_v15 = vpop.f32.mrf.mxu1 }
 0x1ca   : > { %751 = vst [vmem:[%s1771_s23 + $0x8] sm:$0xff] %v713_v39  ;;  %v735_v61 = vpop.f32.mrf.mxu2  ;;  %v723_v17 = vadd.f32 %v1004_v20, %v722_v15 }
 0x1cb   : > { %v736_v7 = vadd.f32 %v1004_v20, %v735_v61 }
 0x1cc   : > { %755 = vst [vmem:[%s1771_s23 + $0x28] sm:$0xff] %v723_v17 }
 0x1cd   : > { %760 = vst [vmem:[%s1771_s23 + $0x50] sm:$0xff] %v736_v7 }
 0x1ce   : > { %v745_v2 = vpop.f32.mrf.mxu3 }
 0x1cf   : > { %v746_v31 = vadd.f32 %v1004_v20, %v745_v2 }
 0x1d0   : > { %v715_v33 = vpop.f32.mrf.mxu0 }
 0x1d1   : > { %v716_v3 = vadd.f32 %v1004_v20, %v715_v33  ;;  %764 = vst [vmem:[%s1771_s23 + $0x70] sm:$0xff] %v746_v31  ;;  %v725_v60 = vpop.f32.mrf.mxu1 }
 0x1d2   : > { %v737_v0 = vpop.f32.mrf.mxu2  ;;  %v726_v52 = vadd.f32 %v1004_v20, %v725_v60 }
 0x1d3   : > { %v738_v34 = vadd.f32 %v1004_v20, %v737_v0  ;;  %752 = vst [vmem:[%s1771_s23 + $0x10] sm:$0xff] %v716_v3 }
 0x1d4   : > { %756 = vst [vmem:[%s1771_s23 + $0x30] sm:$0xff] %v726_v52 }
 0x1d5   : > { %761 = vst [vmem:[%s1771_s23 + $0x58] sm:$0xff] %v738_v34 }
 0x1d6   : > { %v747_v62 = vpop.f32.mrf.mxu3 }
 0x1d7   : > { %v748_v18 = vadd.f32 %v1004_v20, %v747_v62 }
 0x1d8   : > { %v717_v42 = vpop.f32.mrf.mxu0 }
 0x1d9   : > { %v718_v21 = vadd.f32 %v1004_v20, %v717_v42  ;;  %765 = vst [vmem:[%s1771_s23 + $0x78] sm:$0xff] %v748_v18  ;;  %v727_v29 = vpop.f32.mrf.mxu1 }
 0x1da   : > { %v728_v23 = vadd.f32 %v1004_v20, %v727_v29 }
 0x1db   : > { %753 = vst [vmem:[%s1771_s23 + $0x18] sm:$0xff] %v718_v21 }
 0x1dc   : > { %757 = vst [vmem:[%s1771_s23 + $0x38] sm:$0xff] %v728_v23 }
 0x1dd   : > { %1066 = shalt.err (!%p1063_p3)
}
 0x1de   : > { %s1104_s14 = smov 128   ;;  %s1105_s17 = smov 8  }
 0x1df   : > { %960 = dma.vmem_to_hbm [thread:$0]  (%p1174_p5), %s780_s7, 2048, %s782_s8, %s767_s22, %s1104_s14, %s1104_s14, %s1105_s17  }
 0x1e0 PF: > { %p966_p4 = scmp.ge.s32.totalorder %s1101_s21, 2  ;;  %s796_s23 = sand.u32 1, %s1089_s18  }
 0x1e1   : > { %s797_s25 = scalar_lea.sflag [#allocation3], %s796_s23 }
 0x1e2   : > { %p963_p7 = pnand %p966_p4, %p1178_p6 }
 0x1e4   : > { %p964_p8 = pneg %p963_p7 }
 0x1e6   : > { %1084 = dma.done.wait (%p964_p8), %s797_s25, 2048  }
 0x1e7   : > { %1086 = vsyncadd (%p964_p8), %s797_s25, 4294965248  ;;  %p15_p9 = scmp.ge.s32.totalorder %s1161_s24, 4   ;;  %s1855_s18 = smov %s1093_s19 }
 0x1e8   : > { %s1856_s19 = smov %s1097_s20  ;;  %s1857_s20 = smov %s1172_s27 }
 0x1e9   : > { %s1858_s21 = smov %s1161_s24  ;;  %17 = sbr.rel (!%p15_p9) target bundleno = 3 (0x3), region = 75 }
 0x1ee   :  { %803 = vsyncpa [#allocation3], 1 }
 0x1ef   :  { %805 = vsyncpa [#allocation3 + $0x1], 1 }

// kernel: gpt_forward.3
= control target key start
LH: loop header
LB: loop body
LE: loop exit
PB: predicated region body
PF: predicated region fallthrough
CT: control target
= control target key end

     0   :  { %s6149_s21 = smov 0   ;;  %s8972_s0 = inlined_call_operand.vmem [shape: bf16[2,128,128], index: 0, kind: input, shape index: {}]   ;;  %s8973_s1 = inlined_call_operand.vmem [shape: f32[1,128], index: 1, kind: input, shape index: {}]   ;;  %s8974_s2 = inlined_call_operand.vmem [shape: f32[1,128], index: 2, kind: input, shape index: {}]   ;;  %s8975_s3 = inlined_call_operand.vmem [shape: bf16[128,384], index: 3, kind: input, shape index: {}]   ;;  %s8976_s4 = inlined_call_operand.vmem [shape: bf16[128,128], index: 4, kind: input, shape index: {}]   ;;  %s8977_s5 = inlined_call_operand.vmem [shape: f32[1,128], index: 5, kind: input, shape index: {}]   ;;  %s8978_s6 = inlined_call_operand.vmem [shape: f32[1,128], index: 6, kind: input, shape index: {}]   ;;  %s8979_s7 = inlined_call_operand.vmem [shape: f32[1,128], index: 7, kind: input, shape index: {}]   ;;  %s8980_s8 = inlined_call_operand.vmem [shape: bf16[128,512], index: 8, kind: input, shape index: {}]   ;;  %s8981_s9 = inlined_call_operand.vmem [shape: f32[1,512], index: 9, kind: input, shape index: {}]   ;;  %s8982_s10 = inlined_call_operand.vmem [shape: bf16[512,128], index: 10, kind: input, shape index: {}]   ;;  %s8983_s11 = inlined_call_operand.vmem [shape: f32[1,128], index: 11, kind: input, shape index: {}]   ;;  %s8984_s12 = inlined_call_operand.vmem [shape: bf16[2,128,128], index: 12, kind: output, shape index: {}]  }
   0x1 LB: > { %s4950_s22 = sadd.s32 4294967295, %s6078_s21   ;;  %p4954_p0 = scmp.ge.s32.totalorder %s6078_s21, 1  ;;  %s6078_s21 = sphi %s6149_s21, %s22_s21  }
   0x2   : > { %p362_p1 = scmp.lt.s32.totalorder %s6078_s21, 3 }
   0x4   : > { %p363_p2 = pnand %p4954_p0, %p362_p1 }
   0x6   : > { %366 = sbr.rel (%p363_p2) target bundleno = 2940 (0xb7c), region = 68 }
   0xb   : > { %p404_p3 = scmp.lt.s32.totalorder %s4950_s22, 1  ;;  %v6080_v11 = vmov 128.0   ;;  %v4989_v58 = vld [vmem:[%s8975_s3 + $0xa8] sm:$0xf]  ;;  %v5482_v59 = vld [vmem:[%s8975_s3 + $0xb0] sm:$0xf0] }
   0xc   : > { %5750 = vrcp.f32 %v6080_v11  ;;  %v5021_v60 = vld [vmem:[%s8975_s3 + $0xac] sm:$0xf]  ;;  %v4990_v61 = vor.u32 %v5482_v59, %v4989_v58  ;;  %v5490_v62 = vld [vmem:[%s8975_s3 + $0xb4] sm:$0xf0]  ;;  %v5053_v63 = vld [vmem:[%s8975_s3 + $0xb0] sm:$0xf] }
   0xd   : > { %s9068_s22 = smov (!%p404_p3, %s4950_s22), 1  ;;  %s6081_s29 = smov 96  }
   0xe   : > { %s5473_s23 = sshll.u32 %s9068_s22, 6  ;;  %885 = vmatpush.bf16.msra.mxu0 %v4990_v61  ;;  %v5477_v61 = vld [vmem:[%s8975_s3 + $0x38] sm:$0xf0]  ;;  %s6082_s30 = smov 64  }
   0xf   : > { %s6165_s26 = scalar_lea.vmem %s8972_s0, %s5473_s23  ;;  %s6083_s13 = smov 32  }
  0x10   : > { %v5699_v0 = vld [vmem:[%s6165_s26 + $0x8] sm:$0xff]   ;;  %v5596_v1 = vld [vmem:[%s6165_s26] sm:$0xff]   ;;  %v5700_v2 = vld [vmem:[%s6165_s26 + $0x10] sm:$0xff]  }
  0x11   : > { %v5601_v3 = vunpack.c.l.bf16 %v5699_v0  ;;  %v5597_v4 = vunpack.c.l.bf16 %v5596_v1  ;;  %v5605_v5 = vunpack.c.l.bf16 %v5700_v2  ;;  %v5602_v6 = vunpack.c.h.bf16 %v5699_v0  ;;  %v6171_v9 = vld [vmem:[%s6165_s26 + $0x18] sm:$0xff]   ;;  %v6199_v37 = vld [vmem:[%s6165_s26 + $0x20] sm:$0xff]   ;;  %v6214_v44 = vld [vmem:[%s6165_s26 + $0x28] sm:$0xff]  }
  0x12   : > { %v5598_v7 = vunpack.c.h.bf16 %v5596_v1  ;;  %v5606_v8 = vunpack.c.h.bf16 %v5700_v2  ;;  %v5609_v10 = vunpack.c.l.bf16 %v6171_v9  ;;  %v5751_v12 = vpop.eup %5750  ;;  %v5610_v29 = vunpack.c.h.bf16 %v6171_v9  ;;  %v6228_v51 = vld [vmem:[%s6165_s26 + $0x30] sm:$0xff]   ;;  %v6242_v56 = vld [vmem:[%s6165_s26 + $0x38] sm:$0xff]  }
  0x13   : > { %452 = vadd.xlane.f32.xlu1 %v5601_v3  ;;  %448 = vadd.xlane.f32.xlu0 %v5597_v4  ;;  %v481_v13 = vmul.f32 128.0, %v5751_v12  ;;  %vm485_vm0 = vweird.f32 %v5751_v12  ;;  %v5613_v40 = vunpack.c.l.bf16 %v6199_v37  ;;  %v5618_v46 = vunpack.c.h.bf16 %v6214_v44  ;;  %v5498_v0 = vld [vmem:[%s8975_s3 + $0xb8] sm:$0xf0] }
  0x14   : > { %456 = vadd.xlane.f32.xlu2 %v5605_v5  ;;  %v5614_v49 = vunpack.c.h.bf16 %v6199_v37  ;;  %v5621_v52 = vunpack.c.l.bf16 %v6228_v51  ;;  %v5617_v54 = vunpack.c.l.bf16 %v6214_v44  ;;  %v5622_v55 = vunpack.c.h.bf16 %v6228_v51 }
  0x15   : > { %v482_v14 = vsub.f32 1.0, %v481_v13  ;;  %v5625_v57 = vunpack.c.l.bf16 %v6242_v56  ;;  %v5022_v1 = vor.u32 %v5490_v62, %v5021_v60  ;;  %v5054_v2 = vor.u32 %v5498_v0, %v5053_v63  ;;  %v4981_v13 = vld [vmem:[%s8975_s3 + $0x78] sm:$0xf]  ;;  %v4969_v60 = vld [vmem:[%s8975_s3 + $0x30] sm:$0xf] }
  0x16   : > { %v5001_v62 = vld [vmem:[%s8975_s3 + $0x34] sm:$0xf]  ;;  %v4970_v63 = vor.u32 %v5477_v61, %v4969_v60  ;;  %v5485_v0 = vld [vmem:[%s8975_s3 + $0x3c] sm:$0xf0] }
  0x17   : > { %v483_v15 = vmul.f32 %v5751_v12, %v482_v14  ;;  %1030 = vmatpush.bf16.msra.mxu1 %v5022_v1  ;;  %1175 = vmatpush.bf16.msra.mxu2 %v5054_v2  ;;  %v5480_v14 = vld [vmem:[%s8975_s3 + $0x80] sm:$0xf0]  ;;  %v5033_v1 = vld [vmem:[%s8975_s3 + $0x38] sm:$0xf] }
  0x18   : > { %v5493_v2 = vld [vmem:[%s8975_s3 + $0x40] sm:$0xf0] }
  0x19   : > { %v484_v16 = vadd.f32 %v5751_v12, %v483_v15  ;;  %v5013_v15 = vld [vmem:[%s8975_s3 + $0x7c] sm:$0xf] }
  0x1b   : > { %454 = vadd.xlane.f32.xlu1 %v5602_v6  ;;  %450 = vadd.xlane.f32.xlu0 %v5598_v7  ;;  %v6174_v17 = vsel %vm485_vm0, %v5751_v12, %v484_v16  ;;  %v4982_v16 = vor.u32 %v5480_v14, %v4981_v13  ;;  %v5492_v13 = vld [vmem:[%s8975_s3 + $0x28] sm:$0xf0] }
  0x1c   : > { %458 = vadd.xlane.f32.xlu2 %v5606_v8  ;;  %9008 = vst [vmem:[#allocation3_spill] sm:$0xff] %v6174_v17 }
  0x24   : > { %460 = vadd.xlane.f32.xlu2 %v5609_v10 }
  0x86   : > { %v453_v18 = vpop.xlane.xlu1 %452  ;;  %v449_v19 = vpop.xlane.xlu0 %448 }
  0x87   : > { %v487_v20 = vmul.f32 %v6174_v17, %v449_v19  ;;  %v457_v22 = vpop.xlane.xlu2 %456  ;;  %v489_v32 = vmul.f32 %v6174_v17, %v453_v18  ;;  %v5488_v18 = vld [vmem:[%s8975_s3 + $0x84] sm:$0xf0]  ;;  %v5045_v19 = vld [vmem:[%s8975_s3 + $0x80] sm:$0xf] }
  0x88   : > { %v491_v31 = vmul.f32 %v6174_v17, %v457_v22  ;;  %v5014_v22 = vor.u32 %v5488_v18, %v5013_v15 }
  0x89   : > { %v6177_v21 = vsub.f32 %v5597_v4, %v487_v20  ;;  %v6201_v38 = vsub.f32 %v5601_v3, %v489_v32  ;;  %v4985_v3 = vld [vmem:[%s8975_s3 + $0x90] sm:$0xf]  ;;  %v5481_v4 = vld [vmem:[%s8975_s3 + $0x98] sm:$0xf0]  ;;  %v5496_v20 = vld [vmem:[%s8975_s3 + $0x88] sm:$0xf0] }
  0x8a   : > { %v6196_v36 = vsub.f32 %v5605_v5, %v491_v31  ;;  %v5017_v5 = vld [vmem:[%s8975_s3 + $0x94] sm:$0xf]  ;;  %v5487_v31 = vld [vmem:[%s8975_s3 + $0x6c] sm:$0xf0]  ;;  %v5041_v32 = vld [vmem:[%s8975_s3 + $0x68] sm:$0xf] }
  0x8b   : > { %v519_v23 = vmul.f32 %v6177_v21, %v6177_v21  ;;  %v521_v42 = vmul.f32 %v6201_v38, %v6201_v38 }
  0x8c   : > { %v523_v39 = vmul.f32 %v6196_v36, %v6196_v36 }
  0x8d   : > { %535 = vadd.xlane.f32.xlu0 %v519_v23  ;;  %v5046_v23 = vor.u32 %v5496_v20, %v5045_v19  ;;  %v4961_v19 = vld [vmem:[%s8975_s3] sm:$0xf]  ;;  %v5475_v20 = vld [vmem:[%s8975_s3 + $0x8] sm:$0xf0] }
  0x8e   : > { %v455_v24 = vpop.xlane.xlu1 %454  ;;  %v451_v25 = vpop.xlane.xlu0 %450 }
  0x8f   : > { %v490_v26 = vmul.f32 %v6174_v17, %v455_v24  ;;  %v488_v27 = vmul.f32 %v6174_v17, %v451_v25  ;;  %v459_v35 = vpop.xlane.xlu2 %458  ;;  %v4977_v24 = vld [vmem:[%s8975_s3 + $0x60] sm:$0xf]  ;;  %v5479_v25 = vld [vmem:[%s8975_s3 + $0x68] sm:$0xf0] }
  0x90   : > { %v492_v41 = vmul.f32 %v6174_v17, %v459_v35 }
  0x91   : > { %v6183_v28 = vsub.f32 %v5602_v6, %v490_v26  ;;  %v6186_v30 = vsub.f32 %v5598_v7, %v488_v27  ;;  %v4986_v6 = vor.u32 %v5481_v4, %v4985_v3  ;;  %v5489_v7 = vld [vmem:[%s8975_s3 + $0x9c] sm:$0xf0]  ;;  %v5009_v26 = vld [vmem:[%s8975_s3 + $0x64] sm:$0xf]  ;;  %v4978_v27 = vor.u32 %v5479_v25, %v4977_v24  ;;  %v5483_v24 = vld [vmem:[%s8975_s3 + $0xc] sm:$0xf0] }
  0x92   : > { %v6211_v43 = vsub.f32 %v5606_v8, %v492_v41  ;;  %v5049_v8 = vld [vmem:[%s8975_s3 + $0x98] sm:$0xf]  ;;  %v5018_v11 = vor.u32 %v5489_v7, %v5017_v5  ;;  %v5478_v41 = vld [vmem:[%s8975_s3 + $0x50] sm:$0xf0]  ;;  %v5002_v3 = vor.u32 %v5485_v0, %v5001_v62  ;;  %v5034_v4 = vor.u32 %v5493_v2, %v5033_v1  ;;  %v4997_v7 = vld [vmem:[%s8975_s3 + $0x1c] sm:$0xf] }
  0x93   : > { %v522_v33 = vmul.f32 %v6183_v28, %v6183_v28  ;;  %v520_v34 = vmul.f32 %v6186_v30, %v6186_v30  ;;  %886 = vmatpush.bf16.msra.mxu0 %v4986_v6  ;;  %v4965_v5 = vld [vmem:[%s8975_s3 + $0x18] sm:$0xf]  ;;  %v5476_v6 = vld [vmem:[%s8975_s3 + $0x20] sm:$0xf0]  ;;  %v5025_v25 = vld [vmem:[%s8975_s3 + $0x8] sm:$0xf] }
  0x94   : > { %v524_v47 = vmul.f32 %v6211_v43, %v6211_v43  ;;  %1031 = vmatpush.bf16.msra.mxu1 %v5018_v11  ;;  %v5484_v11 = vld [vmem:[%s8975_s3 + $0x24] sm:$0xf0] }
  0x95   : > { %541 = vadd.xlane.f32.xlu2 %v522_v33  ;;  %462 = vadd.xlane.f32.xlu0 %v5610_v29  ;;  %v5495_v33 = vld [vmem:[%s8975_s3 + $0x70] sm:$0xf0]  ;;  %v4998_v15 = vor.u32 %v5484_v11, %v4997_v7 }
  0x96   : > { %537 = vadd.xlane.f32.xlu1 %v520_v34  ;;  %v5010_v34 = vor.u32 %v5487_v31, %v5009_v26  ;;  %v5042_v35 = vor.u32 %v5495_v33, %v5041_v32 }
  0x97   : > { %v461_v45 = vpop.xlane.xlu2 %460  ;;  %887 = vmatpush.bf16.msra.mxu0 %v4982_v16 }
  0x98   : > { %v493_v48 = vmul.f32 %v6174_v17, %v461_v45  ;;  %1032 = vmatpush.bf16.msra.mxu1 %v5014_v22  ;;  %v4962_v22 = vor.u32 %v5475_v20, %v4961_v19 }
  0x9a   : > { %v6223_v50 = vsub.f32 %v5609_v10, %v493_v48  ;;  %v5497_v10 = vld [vmem:[%s8975_s3 + $0xa0] sm:$0xf0]  ;;  %v5037_v48 = vld [vmem:[%s8975_s3 + $0x50] sm:$0xf] }
  0x9b   : > { %v5050_v12 = vor.u32 %v5497_v10, %v5049_v8  ;;  %888 = vmatpush.bf16.msra.mxu0 %v4978_v27  ;;  %v4966_v10 = vor.u32 %v5476_v6, %v4965_v5  ;;  %v5491_v27 = vld [vmem:[%s8975_s3 + $0x10] sm:$0xf0] }
  0x9c   : > { %v525_v53 = vmul.f32 %v6223_v50, %v6223_v50  ;;  %1033 = vmatpush.bf16.msra.mxu1 %v5010_v34  ;;  %v5026_v31 = vor.u32 %v5491_v27, %v5025_v25 }
  0x9d   : > { %543 = vadd.xlane.f32.xlu2 %v523_v39  ;;  %464 = vadd.xlane.f32.xlu0 %v5613_v40  ;;  %v4973_v39 = vld [vmem:[%s8975_s3 + $0x48] sm:$0xf] }
  0x9e   : > { %539 = vadd.xlane.f32.xlu1 %v521_v42  ;;  %1176 = vmatpush.bf16.msra.mxu2 %v5050_v12  ;;  %v5005_v42 = vld [vmem:[%s8975_s3 + $0x4c] sm:$0xf]  ;;  %v4974_v45 = vor.u32 %v5478_v41, %v4973_v39  ;;  %v5029_v12 = vld [vmem:[%s8975_s3 + $0x20] sm:$0xf] }
  0x9f   : > { %v5030_v16 = vor.u32 %v5492_v13, %v5029_v12 }
  0xa0   : > { %889 = vmatpush.bf16.msra.mxu0 %v4974_v45 }
  0xa2   : > { %1177 = vmatpush.bf16.msra.mxu2 %v5046_v23  ;;  %v4993_v23 = vld [vmem:[%s8975_s3 + $0x4] sm:$0xf] }
  0xa3   : > { %v4994_v26 = vor.u32 %v5483_v24, %v4993_v23 }
  0xa4   : > { %890 = vmatpush.bf16.msra.mxu0 %v4970_v63 }
  0xa5   : > { %470 = vadd.xlane.f32.xlu2 %v5618_v46  ;;  %545 = vadd.xlane.f32.xlu0 %v524_v47  ;;  %v5486_v47 = vld [vmem:[%s8975_s3 + $0x54] sm:$0xf0] }
  0xa6   : > { %466 = vadd.xlane.f32.xlu1 %v5614_v49  ;;  %1178 = vmatpush.bf16.msra.mxu2 %v5042_v35  ;;  %v5006_v58 = vor.u32 %v5486_v47, %v5005_v42 }
  0xa8   : > { %1034 = vmatpush.bf16.msra.mxu1 %v5006_v58  ;;  %891 = vmatpush.bf16.msra.mxu0 %v4966_v10 }
  0xac   : > { %1035 = vmatpush.bf16.msra.mxu1 %v5002_v3  ;;  %892 = vmatpush.bf16.msra.mxu0 %v4962_v22 }
  0xad   : > { %472 = vadd.xlane.f32.xlu2 %v5621_v52  ;;  %547 = vadd.xlane.f32.xlu0 %v525_v53  ;;  %v5494_v53 = vld [vmem:[%s8975_s3 + $0x58] sm:$0xf0] }
  0xae   : > { %468 = vadd.xlane.f32.xlu1 %v5617_v54  ;;  %v5038_v59 = vor.u32 %v5494_v53, %v5037_v48 }
  0xb0   : > { %1179 = vmatpush.bf16.msra.mxu2 %v5038_v59  ;;  %1036 = vmatpush.bf16.msra.mxu1 %v4998_v15 }
  0xb4   : > { %1180 = vmatpush.bf16.msra.mxu2 %v5034_v4  ;;  %1037 = vmatpush.bf16.msra.mxu1 %v4994_v26 }
  0xb5   : > { %474 = vadd.xlane.f32.xlu0 %v5622_v55 }
  0xb8   : > { %1181 = vmatpush.bf16.msra.mxu2 %v5030_v16 }
  0xbc   : > { %1182 = vmatpush.bf16.msra.mxu2 %v5026_v31 }
  0xbd   : > { %476 = vadd.xlane.f32.xlu0 %v5625_v57 }
 0x100   : > { %v536_v8 = vpop.xlane.xlu0 %535 }
 0x101   : > { %v567_v14 = vmul.f32 %v536_v8, %v6174_v17 }
 0x103   : > { %v583_v18 = vadd.f32 1e-05, %v567_v14 }
 0x105   : > { %5752 = vrsqrt.f32 %v583_v18  ;;  %vm605_vm2 = vweird.f32 %v583_v18 }
 0x108   : > { %v542_v32 = vpop.xlane.xlu2 %541  ;;  %v463_v33 = vpop.xlane.xlu0 %462 }
 0x109   : > { %v570_v34 = vmul.f32 %v542_v32, %v6174_v17  ;;  %v538_v35 = vpop.xlane.xlu1 %537  ;;  %v494_v39 = vmul.f32 %v6174_v17, %v463_v33  ;;  %v5626_v33 = vunpack.c.h.bf16 %v6242_v56 }
 0x10a   : > { %v568_v41 = vmul.f32 %v538_v35, %v6174_v17 }
 0x10b   : > { %v5753_v42 = vpop.eup %5752  ;;  %v6395_v45 = vadd.f32 1e-05, %v570_v34  ;;  %v6399_v47 = vsub.f32 %v5610_v29, %v494_v39  ;;  %v6455_v39 = vld [vmem:[%s8973_s1] ss:$0 sm:$0xff] }
 0x10c   : > { %v600_v48 = vmul.f32 %v5753_v42, %v583_v18  ;;  %v584_v53 = vadd.f32 1e-05, %v568_v41  ;;  %vm606_vm1 = vweird.f32 %v5753_v42 }
 0x10d   : > { %5754 = vrsqrt.f32 %v6395_v45  ;;  %v526_v58 = vmul.f32 %v6399_v47, %v6399_v47  ;;  %vm6422_vm4 = vmor %vm605_vm2, %vm606_vm1  ;;  %vm635_vm9 = vweird.f32 %v6395_v45 }
 0x10e   : > { %v601_v59 = vmul.f32 %v5753_v42, %v600_v48  ;;  %5756 = vrsqrt.f32 %v584_v53  ;;  %vm615_vm3 = vweird.f32 %v584_v53 }
 0x10f   : > { %549 = vadd.xlane.f32.xlu1 %v526_v58 }
 0x110   : > { %v602_v60 = vmul.f32 0.5, %v601_v59  ;;  %v544_v61 = vpop.xlane.xlu2 %543  ;;  %v465_v62 = vpop.xlane.xlu0 %464 }
 0x111   : > { %v540_v63 = vpop.xlane.xlu1 %539  ;;  %v495_v0 = vmul.f32 %v6174_v17, %v465_v62  ;;  %v571_v4 = vmul.f32 %v544_v61, %v6174_v17 }
 0x112   : > { %v603_v1 = vsub.f32 1.5, %v602_v60  ;;  %v569_v9 = vmul.f32 %v540_v63, %v6174_v17  ;;  %v6474_v63 = vld [vmem:[%s8974_s2] ss:$0 sm:$0xff] }
 0x113   : > { %v6406_v29 = vpop.eup %5754  ;;  %v6410_v2 = vsub.f32 %v5613_v40, %v495_v0  ;;  %v6420_v40 = vadd.f32 1e-05, %v571_v4 }
 0x114   : > { %v5757_v3 = vpop.eup %5756  ;;  %v6413_v5 = vadd.f32 1e-05, %v569_v9  ;;  %v604_v7 = vmul.f32 %v5753_v42, %v603_v1  ;;  %v630_v8 = vmul.f32 %v6406_v29, %v6395_v45  ;;  %vm636_vm10 = vweird.f32 %v6406_v29 }
 0x115   : > { %v610_v6 = vmul.f32 %v5757_v3, %v584_v53  ;;  %v527_v11 = vmul.f32 %v6410_v2, %v6410_v2  ;;  %vm616_vm5 = vweird.f32 %v5757_v3  ;;  %vm6504_vm12 = vmor %vm635_vm9, %vm636_vm10  ;;  %vm645_vm15 = vweird.f32 %v6420_v40 }
 0x116   : > { %5758 = vrsqrt.f32 %v6413_v5  ;;  %v608_v18 = vsel %vm6422_vm4, %v5753_v42, %v604_v7  ;;  %v631_v22 = vmul.f32 %v6406_v29, %v630_v8  ;;  %vm6439_vm6 = vmor %vm615_vm3, %vm616_vm5  ;;  %vm625_vm7 = vweird.f32 %v6413_v5 }
 0x117   : > { %v611_v10 = vmul.f32 %v5757_v3, %v610_v6  ;;  %551 = vadd.xlane.f32.xlu1 %v527_v11  ;;  %5760 = vrsqrt.f32 %v6420_v40 }
 0x118   : > { %v471_v12 = vpop.xlane.xlu2 %470  ;;  %v546_v13 = vpop.xlane.xlu0 %545  ;;  %v632_v41 = vmul.f32 0.5, %v631_v22 }
 0x119   : > { %v612_v15 = vmul.f32 0.5, %v611_v10  ;;  %v498_v16 = vmul.f32 %v6174_v17, %v471_v12  ;;  %v467_v19 = vpop.xlane.xlu1 %466  ;;  %v572_v20 = vmul.f32 %v546_v13, %v6174_v17 }
 0x11a   : > { %v496_v23 = vmul.f32 %v6174_v17, %v467_v19 }
 0x11b   : > { %v613_v24 = vsub.f32 1.5, %v612_v15  ;;  %v6432_v25 = vadd.f32 1e-05, %v572_v20  ;;  %v6436_v26 = vsub.f32 %v5618_v46, %v498_v16  ;;  %v759_v46 = vmul.f32 %v608_v18, %v6177_v21 }
 0x11c   : > { %v5759_v27 = vpop.eup %5758  ;;  %v6446_v32 = vsub.f32 %v5614_v49, %v496_v23 }
 0x11d   : > { %v614_v34 = vmul.f32 %v5757_v3, %v613_v24  ;;  %v620_v35 = vmul.f32 %v5759_v27, %v6413_v5  ;;  %5762 = vrsqrt.f32 %v6432_v25  ;;  %v530_v37 = vmul.f32 %v6436_v26, %v6436_v26  ;;  %v6476_v0 = vpop.eup %5760 }
 0x11e   : > { %v528_v48 = vmul.f32 %v6446_v32, %v6446_v32  ;;  %v778_v62 = vmul.f32 %v6455_v39, %v759_v46  ;;  %vm626_vm8 = vweird.f32 %v5759_v27  ;;  %v640_v13 = vmul.f32 %v6476_v0, %v6420_v40 }
 0x11f   : > { %v618_v49 = vsel %vm6439_vm6, %v5757_v3, %v614_v34  ;;  %v621_v42 = vmul.f32 %v5759_v27, %v620_v35  ;;  %557 = vadd.xlane.f32.xlu0 %v530_v37  ;;  %478 = vadd.xlane.f32.xlu1 %v5626_v33  ;;  %vm6493_vm11 = vmor %vm625_vm7, %vm626_vm8  ;;  %vm655_vm13 = vweird.f32 %v6432_v25  ;;  %vm646_vm0 = vweird.f32 %v6476_v0 }
 0x120   : > { %v473_v53 = vpop.xlane.xlu2 %472  ;;  %v6463_v58 = vpop.xlane.xlu0 %547  ;;  %v760_v21 = vmul.f32 %v618_v49, %v6186_v30  ;;  %553 = vadd.xlane.f32.xlu2 %v528_v48  ;;  %v633_v30 = vsub.f32 1.5, %v632_v41  ;;  %v641_v22 = vmul.f32 %v6476_v0, %v640_v13  ;;  %vm647_vm2 = vmor %vm645_vm15, %vm646_vm0 }
 0x121   : > { %v622_v59 = vmul.f32 0.5, %v621_v42  ;;  %v499_v60 = vmul.f32 %v6174_v17, %v473_v53  ;;  %v469_v61 = vpop.xlane.xlu1 %468 }
 0x122   : > { %v497_v1 = vmul.f32 %v6174_v17, %v469_v61  ;;  %v779_v9 = vmul.f32 %v6455_v39, %v760_v21  ;;  %v634_v45 = vmul.f32 %v6406_v29, %v633_v30  ;;  %v642_v35 = vmul.f32 0.5, %v641_v22 }
 0x123   : > { %v5763_v3 = vpop.eup %5762  ;;  %v623_v4 = vsub.f32 1.5, %v622_v59  ;;  %v6482_v6 = vsub.f32 %v5621_v52, %v499_v60  ;;  %v797_v52 = vadd.f32 %v6474_v63, %v778_v62 }
 0x124   : > { %v650_v7 = vmul.f32 %v5763_v3, %v6432_v25  ;;  %v6489_v8 = vsub.f32 %v5617_v54, %v497_v1  ;;  %v798_v12 = vadd.f32 %v6474_v63, %v779_v9  ;;  %v638_v18 = vsel %vm6504_vm12, %v6406_v29, %v634_v45 }
 0x125   : > { %v624_v10 = vmul.f32 %v5759_v27, %v623_v4  ;;  %v531_v14 = vmul.f32 %v6482_v6, %v6482_v6  ;;  %v762_v34 = vmul.f32 %v638_v18, %v6183_v28  ;;  %vm656_vm14 = vweird.f32 %v5763_v3 }
 0x126   : > { %v529_v44 = vmul.f32 %v6489_v8, %v6489_v8  ;;  %v813_v5 = vpack.c.bf16 %v798_v12, %v797_v52  ;;  %v651_v16 = vmul.f32 %v5763_v3, %v650_v7  ;;  %vm657_vm1 = vmor %vm655_vm13, %vm656_vm14 }
 0x127   : > { %v628_v15 = vsel %vm6493_vm11, %v5759_v27, %v624_v10  ;;  %559 = vadd.xlane.f32.xlu1 %v531_v14  ;;  %v781_v51 = vmul.f32 %v6455_v39, %v762_v34 }
 0x128   : > { %v475_v19 = vpop.xlane.xlu0 %474  ;;  %555 = vadd.xlane.f32.xlu2 %v529_v44  ;;  %893 = vmatmul.bf16.vlgmr.msra.gmra.mxu0 %v813_v5  ;;  %v761_v24 = vmul.f32 %v628_v15, %v6201_v38  ;;  %v652_v27 = vmul.f32 0.5, %v651_v16 }
 0x129   : > { %v500_v20 = vmul.f32 %v6174_v17, %v475_v19  ;;  %1038 = vmatmul.bf16.vlgmr.msra.gmra.mxu1 %v813_v5  ;;  %1183 = vmatmul.bf16.vlgmr.msra.gmra.mxu2 %v813_v5  ;;  %v800_v42 = vadd.f32 %v6474_v63, %v781_v51 }
 0x12a   : > { %v780_v29 = vmul.f32 %v6455_v39, %v761_v24  ;;  %v653_v46 = vsub.f32 1.5, %v652_v27 }
 0x12b   : > { %v6519_v23 = vsub.f32 %v5622_v55, %v500_v20  ;;  %v643_v55 = vsub.f32 1.5, %v642_v35 }
 0x12c   : > { %v799_v38 = vadd.f32 %v6474_v63, %v780_v29  ;;  %v654_v28 = vmul.f32 %v5763_v3, %v653_v46 }
 0x12d   : > { %v532_v31 = vmul.f32 %v6519_v23, %v6519_v23  ;;  %v644_v25 = vmul.f32 %v6476_v0, %v643_v55 }
 0x12e   : > { %v814_v53 = vpack.c.bf16 %v800_v42, %v799_v38  ;;  %v658_v21 = vsel %vm657_vm1, %v5763_v3, %v654_v28 }
 0x12f   : > { %v764_v40 = vmul.f32 %v658_v21, %v6211_v43 }
 0x130   : > { %v477_v41 = vpop.xlane.xlu0 %476  ;;  %561 = vadd.xlane.f32.xlu2 %v532_v31 }
 0x131   : > { %v501_v37 = vmul.f32 %v6174_v17, %v477_v41  ;;  %v783_v60 = vmul.f32 %v6455_v39, %v764_v40 }
 0x133   : > { %v6532_v49 = vsub.f32 %v5625_v57, %v501_v37  ;;  %v648_v57 = vsel %vm647_vm2, %v6476_v0, %v644_v25  ;;  %v802_v62 = vadd.f32 %v6474_v63, %v783_v60  ;;  %v573_v0 = vmul.f32 %v6463_v58, %v6174_v17 }
 0x134   : > { %v763_v59 = vmul.f32 %v648_v57, %v6196_v36 }
 0x135   : > { %v533_v48 = vmul.f32 %v6532_v49, %v6532_v49  ;;  %v589_v9 = vadd.f32 1e-05, %v573_v0 }
 0x136   : > { %v782_v61 = vmul.f32 %v6455_v39, %v763_v59 }
 0x137   : > { %563 = vadd.xlane.f32.xlu0 %v533_v48  ;;  %5764 = vrsqrt.f32 %v589_v9  ;;  %vm665_vm3 = vweird.f32 %v589_v9 }
 0x138   : > { %898 = vmatmul.bf16.gmra.mxu0 %v814_v53  ;;  %v801_v30 = vadd.f32 %v6474_v63, %v782_v61 }
 0x139   : > { %1043 = vmatmul.bf16.gmra.mxu1 %v814_v53  ;;  %1188 = vmatmul.bf16.gmra.mxu2 %v814_v53 }
 0x13a   : > { %v815_v1 = vpack.c.bf16 %v802_v62, %v801_v30 }
 0x13d   : > { %v5765_v43 = vpop.eup %5764 }
 0x13e   : > { %v660_v3 = vmul.f32 %v5765_v43, %v589_v9  ;;  %vm666_vm4 = vweird.f32 %v5765_v43 }
 0x13f   : > { %vm6551_vm5 = vmor %vm665_vm3, %vm666_vm4 }
 0x140   : > { %v661_v4 = vmul.f32 %v5765_v43, %v660_v3 }
 0x142   : > { %v662_v11 = vmul.f32 0.5, %v661_v4 }
 0x144   : > { %v663_v52 = vsub.f32 1.5, %v662_v11 }
 0x146   : > { %v664_v58 = vmul.f32 %v5765_v43, %v663_v52 }
 0x148   : > { %903 = vmatmul.bf16.gmra.mxu0 %v815_v1  ;;  %v668_v16 = vsel %vm6551_vm5, %v5765_v43, %v664_v58 }
 0x149   : > { %1048 = vmatmul.bf16.gmra.mxu1 %v815_v1  ;;  %1193 = vmatmul.bf16.gmra.mxu2 %v815_v1  ;;  %v765_v29 = vmul.f32 %v668_v16, %v6223_v50 }
 0x14b   : > { %v784_v50 = vmul.f32 %v6455_v39, %v765_v29 }
 0x14d   : > { %v803_v40 = vadd.f32 %v6474_v63, %v784_v50 }
 0x182   : > { %v550_v36 = vpop.xlane.xlu1 %549 }
 0x183   : > { %v574_v7 = vmul.f32 %v550_v36, %v6174_v17 }
 0x185   : > { %v590_v10 = vadd.f32 1e-05, %v574_v7 }
 0x187   : > { %5766 = vrsqrt.f32 %v590_v10  ;;  %vm675_vm7 = vweird.f32 %v590_v10 }
 0x18a   : > { %v552_v12 = vpop.xlane.xlu1 %551 }
 0x18b   : > { %v575_v13 = vmul.f32 %v552_v12, %v6174_v17 }
 0x18d   : > { %v5767_v45 = vpop.eup %5766  ;;  %v591_v54 = vadd.f32 1e-05, %v575_v13 }
 0x18e   : > { %v670_v44 = vmul.f32 %v5767_v45, %v590_v10  ;;  %vm676_vm6 = vweird.f32 %v5767_v45 }
 0x18f   : > { %5768 = vrsqrt.f32 %v591_v54  ;;  %vm677_vm8 = vmor %vm675_vm7, %vm676_vm6  ;;  %vm685_vm10 = vweird.f32 %v591_v54 }
 0x190   : > { %v671_v14 = vmul.f32 %v5767_v45, %v670_v44 }
 0x192   : > { %v672_v15 = vmul.f32 0.5, %v671_v14  ;;  %v558_v19 = vpop.xlane.xlu0 %557  ;;  %v479_v22 = vpop.xlane.xlu1 %478 }
 0x193   : > { %v554_v18 = vpop.xlane.xlu2 %553  ;;  %v578_v24 = vmul.f32 %v558_v19, %v6174_v17  ;;  %v502_v31 = vmul.f32 %v6174_v17, %v479_v22 }
 0x194   : > { %v673_v20 = vsub.f32 1.5, %v672_v15  ;;  %v576_v27 = vmul.f32 %v554_v18, %v6174_v17 }
 0x195   : > { %v6560_v35 = vadd.f32 1e-05, %v578_v24  ;;  %v5769_v46 = vpop.eup %5768  ;;  %v6565_v37 = vsub.f32 %v5626_v33, %v502_v31 }
 0x196   : > { %v674_v34 = vmul.f32 %v5767_v45, %v673_v20  ;;  %v592_v41 = vadd.f32 1e-05, %v576_v27  ;;  %v680_v55 = vmul.f32 %v5769_v46, %v591_v54  ;;  %vm686_vm9 = vweird.f32 %v5769_v46 }
 0x197   : > { %5770 = vrsqrt.f32 %v6560_v35  ;;  %v534_v38 = vmul.f32 %v6565_v37, %v6565_v37  ;;  %vm6583_vm11 = vmor %vm685_vm10, %vm686_vm9  ;;  %vm715_vm1 = vweird.f32 %v6560_v35 }
 0x198   : > { %v678_v51 = vsel %vm677_vm8, %v5767_v45, %v674_v34  ;;  %5772 = vrsqrt.f32 %v592_v41  ;;  %v681_v28 = vmul.f32 %v5769_v46, %v680_v55  ;;  %vm695_vm12 = vweird.f32 %v592_v41 }
 0x199   : > { %v766_v42 = vmul.f32 %v678_v51, %v6399_v47  ;;  %565 = vadd.xlane.f32.xlu1 %v534_v38 }
 0x19a   : > { %v682_v48 = vmul.f32 0.5, %v681_v28  ;;  %v560_v57 = vpop.xlane.xlu1 %559 }
 0x19b   : > { %v556_v25 = vpop.xlane.xlu2 %555  ;;  %v785_v56 = vmul.f32 %v6455_v39, %v766_v42  ;;  %v579_v61 = vmul.f32 %v560_v57, %v6174_v17 }
 0x19c   : > { %v577_v33 = vmul.f32 %v556_v25, %v6174_v17  ;;  %v683_v21 = vsub.f32 1.5, %v682_v48 }
 0x19d   : > { %v6574_v53 = vpop.eup %5770  ;;  %v804_v59 = vadd.f32 %v6474_v63, %v785_v56  ;;  %v6581_v43 = vadd.f32 1e-05, %v579_v61 }
 0x19e   : > { %v5773_v60 = vpop.eup %5772  ;;  %v593_v47 = vadd.f32 1e-05, %v577_v33  ;;  %v684_v62 = vmul.f32 %v5769_v46, %v683_v21  ;;  %v710_v1 = vmul.f32 %v6574_v53, %v6560_v35  ;;  %vm716_vm2 = vweird.f32 %v6574_v53 }
 0x19f   : > { %v690_v30 = vmul.f32 %v5773_v60, %v592_v41  ;;  %v816_v0 = vpack.c.bf16 %v804_v59, %v803_v40  ;;  %vm696_vm13 = vweird.f32 %v5773_v60  ;;  %vm6620_vm4 = vmor %vm715_vm1, %vm716_vm2  ;;  %vm725_vm7 = vweird.f32 %v6581_v43 }
 0x1a0   : > { %5774 = vrsqrt.f32 %v593_v47  ;;  %v688_v36 = vsel %vm6583_vm11, %v5769_v46, %v684_v62  ;;  %v711_v7 = vmul.f32 %v6574_v53, %v710_v1  ;;  %vm697_vm14 = vmor %vm695_vm12, %vm696_vm13  ;;  %vm705_vm15 = vweird.f32 %v593_v47 }
 0x1a1   : > { %v691_v9 = vmul.f32 %v5773_v60, %v690_v30  ;;  %908 = vmatmul.bf16.gmra.mxu0 %v816_v0  ;;  %1053 = vmatmul.bf16.gmra.mxu1 %v816_v0  ;;  %5776 = vrsqrt.f32 %v6581_v43  ;;  %v767_v54 = vmul.f32 %v688_v36, %v6410_v2  ;;  %vm8993_vm1 = vcmask 261120  }
 0x1a2   : > { %1198 = vmatmul.bf16.gmra.mxu2 %v816_v0  ;;  %v712_v14 = vmul.f32 0.5, %v711_v7 }
 0x1a3   : > { %v692_v4 = vmul.f32 0.5, %v691_v9  ;;  %v562_v10 = vpop.xlane.xlu2 %561  ;;  %v786_v22 = vmul.f32 %v6455_v39, %v767_v54 }
 0x1a4   : > { %v580_v11 = vmul.f32 %v562_v10, %v6174_v17  ;;  %v713_v27 = vsub.f32 1.5, %v712_v14 }
 0x1a5   : > { %v693_v52 = vsub.f32 1.5, %v692_v4  ;;  %v894_v12 = vpop.f32.mrf.mxu0  ;;  %v805_v42 = vadd.f32 %v6474_v63, %v786_v22 }
 0x1a6   : > { %v5775_v45 = vpop.eup %5774  ;;  %v6592_v13 = vadd.f32 1e-05, %v580_v11  ;;  %v934_v44 = vpack.c.bf16 %v894_v12, %v894_v12  ;;  %v1039_v58 = vpop.f32.mrf.mxu1  ;;  %v714_v48 = vmul.f32 %v6574_v53, %v713_v27 }
 0x1a7   : > { %v694_v5 = vmul.f32 %v5773_v60, %v693_v52  ;;  %v700_v15 = vmul.f32 %v5775_v45, %v593_v47  ;;  %v1079_v16 = vpack.c.bf16 %v1039_v58, %v1039_v58  ;;  %v6598_v24 = vpop.eup %5776  ;;  %vm706_vm0 = vweird.f32 %v5775_v45 }
 0x1a8   : > { %5778 = vrsqrt.f32 %v6592_v13  ;;  %950 = vst [vmem:[#allocation2] sm:$0xf] %v934_v44  ;;  %vm6605_vm3 = vmor %vm705_vm15, %vm706_vm0  ;;  %v720_v55 = vmul.f32 %v6598_v24, %v6581_v43  ;;  %v718_v35 = vsel %vm6620_vm4, %v6574_v53, %v714_v48  ;;  %vm735_vm5 = vweird.f32 %v6592_v13 }
 0x1a9   : > { %v698_v19 = vsel %vm697_vm14, %v5773_v60, %v694_v5  ;;  %v701_v20 = vmul.f32 %v5775_v45, %v700_v15  ;;  %1095 = vst [vmem:[#allocation2 + $0x4] sm:$0xf] %v1079_v16  ;;  %v770_v36 = vmul.f32 %v718_v35, %v6436_v26  ;;  %vm726_vm8 = vweird.f32 %v6598_v24 }
 0x1aa   : > { %v768_v18 = vmul.f32 %v698_v19, %v6446_v32  ;;  %v721_v60 = vmul.f32 %v6598_v24, %v720_v55  ;;  %vm727_vm10 = vmor %vm725_vm7, %vm726_vm8 }
 0x1ab   : > { %v702_v31 = vmul.f32 0.5, %v701_v20  ;;  %v789_v26 = vmul.f32 %v6455_v39, %v770_v36  ;;  %v564_v36 = vpop.xlane.xlu0 %563 }
 0x1ac   : > { %v1184_v2 = vpop.f32.mrf.mxu2  ;;  %v787_v34 = vmul.f32 %v6455_v39, %v768_v18  ;;  %v722_v0 = vmul.f32 0.5, %v721_v60 }
 0x1ad   : > { %v703_v29 = vsub.f32 1.5, %v702_v31  ;;  %v1224_v46 = vpack.c.bf16 %v1184_v2, %v1184_v2  ;;  %v896_v41 = vpop.f32.mrf.mxu0  ;;  %v808_v20 = vadd.f32 %v6474_v63, %v789_v26 }
 0x1ae   : > { %v6603_v51 = vpop.eup %5778  ;;  %v935_v38 = vpack.c.bf16 %v896_v41, %v896_v41  ;;  %v1041_v28 = vpop.f32.mrf.mxu1  ;;  %v806_v50 = vadd.f32 %v6474_v63, %v787_v34  ;;  %v723_v44 = vsub.f32 1.5, %v722_v0 }
 0x1af   : > { %v704_v25 = vmul.f32 %v5775_v45, %v703_v29  ;;  %v730_v56 = vmul.f32 %v6603_v51, %v6592_v13  ;;  %1240 = vst [vmem:[#allocation2 + $0x8] sm:$0xf] %v1224_v46  ;;  %v1080_v21 = vpack.c.bf16 %v1041_v28, %v1041_v28  ;;  %v5057_v7 = vld [vmem:[#allocation2] sm:$0xf]  ;;  %vm736_vm6 = vweird.f32 %v6603_v51 }
 0x1b0   : > { %951 = vst [vmem:[#allocation2 + $0xc] sm:$0xf] %v935_v38  ;;  %v817_v57 = vpack.c.bf16 %v806_v50, %v805_v42  ;;  %v5089_v11 = vld [vmem:[#allocation2 + $0x4] sm:$0xf]  ;;  %vm6651_vm9 = vmor %vm735_vm5, %vm736_vm6  ;;  %v724_v18 = vmul.f32 %v6598_v24, %v723_v44 }
 0x1b1   : > { %v708_v40 = vsel %vm6605_vm3, %v5775_v45, %v704_v25  ;;  %v731_v59 = vmul.f32 %v6603_v51, %v730_v56  ;;  %1096 = vst [vmem:[#allocation2 + $0x10] sm:$0xf] %v1080_v21 }
 0x1b2   : > { %913 = vmatmul.bf16.gmra.mxu0 %v817_v57  ;;  %1058 = vmatmul.bf16.gmra.mxu1 %v817_v57  ;;  %v769_v61 = vmul.f32 %v708_v40, %v6489_v8  ;;  %v728_v31 = vsel %vm727_vm10, %v6598_v24, %v724_v18 }
 0x1b3   : > { %1203 = vmatmul.bf16.gmra.mxu2 %v817_v57  ;;  %v732_v62 = vmul.f32 0.5, %v731_v59  ;;  %v771_v55 = vmul.f32 %v728_v31, %v6482_v6 }
 0x1b4   : > { %v1186_v47 = vpop.f32.mrf.mxu2  ;;  %v788_v53 = vmul.f32 %v6455_v39, %v769_v61 }
 0x1b5   : > { %v1225_v30 = vpack.c.bf16 %v1186_v47, %v1186_v47  ;;  %v899_v1 = vpop.f32.mrf.mxu0  ;;  %v733_v12 = vsub.f32 1.5, %v732_v62  ;;  %v790_v24 = vmul.f32 %v6455_v39, %v771_v55 }
 0x1b6   : > { %v936_v9 = vpack.c.bf16 %v899_v1, %v899_v1  ;;  %v1044_v3 = vpop.f32.mrf.mxu1  ;;  %v807_v54 = vadd.f32 %v6474_v63, %v788_v53 }
 0x1b7   : > { %1241 = vst [vmem:[#allocation2 + $0x14] sm:$0xf] %v1225_v30  ;;  %v1081_v4 = vpack.c.bf16 %v1044_v3, %v1044_v3  ;;  %v5499_v10 = vld [vmem:[#allocation2 + $0x8] sm:$0xf0]  ;;  %v734_v5 = vmul.f32 %v6603_v51, %v733_v12  ;;  %v809_v57 = vadd.f32 %v6474_v63, %v790_v24 }
 0x1b8   : > { %952 = vst [vmem:[#allocation2 + $0x18] sm:$0xf] %v936_v9  ;;  %v6633_v52 = vor.u32 %v5499_v10, %v5057_v7  ;;  %v5507_v8 = vld [vmem:[#allocation2 + $0xc] sm:$0xf0]  ;;  %v818_v43 = vpack.c.bf16 %v808_v20, %v807_v54 }
 0x1b9   : > { %1097 = vst [vmem:[#allocation2 + $0x1c] sm:$0xf] %v1081_v4  ;;  %v6636_v45 = vor.u32 %v5507_v8, %v5089_v11  ;;  %v738_v27 = vsel %vm6651_vm9, %v6603_v51, %v734_v5  ;;  %v581_v4 = vmul.f32 %v564_v36, %v6174_v17 }
 0x1ba   : > { %1798 = vrot.lane.b32.xlu2 %v6633_v52, %s6081_s29  ;;  %v772_v34 = vmul.f32 %v738_v27, %v6519_v23 }
 0x1bb   : > { %2200 = vrot.lane.b32.xlu1 %v6636_v45, %s6082_s30  ;;  %1814 = vrot.lane.b32.xlu0 %v6636_v45, %s6081_s29  ;;  %v597_v7 = vadd.f32 1e-05, %v581_v4 }
 0x1bc   : > { %v1189_v58 = vpop.f32.mrf.mxu2  ;;  %v791_v42 = vmul.f32 %v6455_v39, %v772_v34 }
 0x1bd   : > { %v1226_v14 = vpack.c.bf16 %v1189_v58, %v1189_v58  ;;  %v901_v13 = vpop.f32.mrf.mxu0  ;;  %5780 = vrsqrt.f32 %v597_v7  ;;  %vm745_vm11 = vweird.f32 %v597_v7 }
 0x1be   : > { %v937_v16 = vpack.c.bf16 %v901_v13, %v901_v13  ;;  %v1046_v19 = vpop.f32.mrf.mxu1  ;;  %v810_v23 = vadd.f32 %v6474_v63, %v791_v42 }
 0x1bf   : > { %1242 = vst [vmem:[#allocation2 + $0x20] sm:$0xf] %v1226_v14  ;;  %v1082_v22 = vpack.c.bf16 %v1046_v19, %v1046_v19  ;;  %v5061_v59 = vld [vmem:[#allocation2 + $0x18] sm:$0xf] }
 0x1c0   : > { %953 = vst [vmem:[#allocation2 + $0x24] sm:$0xf] %v937_v16  ;;  %v5093_v28 = vld [vmem:[#allocation2 + $0x1c] sm:$0xf]  ;;  %v819_v60 = vpack.c.bf16 %v810_v23, %v809_v57 }
 0x1c1   : > { %1098 = vst [vmem:[#allocation2 + $0x28] sm:$0xf] %v1082_v22 }
 0x1c2   : > { %918 = vmatmul.bf16.gmra.mxu0 %v818_v43  ;;  %1063 = vmatmul.bf16.gmra.mxu1 %v818_v43 }
 0x1c3   : > { %1208 = vmatmul.bf16.gmra.mxu2 %v818_v43  ;;  %v5781_v10 = vpop.eup %5780 }
 0x1c4   : > { %v1191_v2 = vpop.f32.mrf.mxu2  ;;  %v740_v11 = vmul.f32 %v5781_v10, %v597_v7  ;;  %vm746_vm12 = vweird.f32 %v5781_v10 }
 0x1c5   : > { %v1227_v29 = vpack.c.bf16 %v1191_v2, %v1191_v2  ;;  %v904_v46 = vpop.f32.mrf.mxu0  ;;  %vm747_vm13 = vmor %vm745_vm11, %vm746_vm12 }
 0x1c6   : > { %v938_v41 = vpack.c.bf16 %v904_v46, %v904_v46  ;;  %v1049_v32 = vpop.f32.mrf.mxu1  ;;  %v741_v53 = vmul.f32 %v5781_v10, %v740_v11 }
 0x1c7   : > { %1243 = vst [vmem:[#allocation2 + $0x2c] sm:$0xf] %v1227_v29  ;;  %v1083_v38 = vpack.c.bf16 %v1049_v32, %v1049_v32  ;;  %v5500_v21 = vld [vmem:[#allocation2 + $0x20] sm:$0xf0] }
 0x1c8   : > { %954 = vst [vmem:[#allocation2 + $0x30] sm:$0xf] %v938_v41  ;;  %v5508_v51 = vld [vmem:[#allocation2 + $0x24] sm:$0xf0]  ;;  %v6673_v35 = vor.u32 %v5500_v21, %v5061_v59  ;;  %v742_v44 = vmul.f32 0.5, %v741_v53 }
 0x1c9   : > { %1099 = vst [vmem:[#allocation2 + $0x34] sm:$0xf] %v1083_v38  ;;  %v6664_v50 = vor.u32 %v5508_v51, %v5093_v28 }
 0x1ca   : > { %v743_v58 = vsub.f32 1.5, %v742_v44 }
 0x1cb   : > { %1816 = vrot.lane.b32.xlu1 %v6664_v50, %s6081_s29  ;;  %2588 = vrot.lane.b32.xlu2 %v6664_v50, %s6083_s13 }
 0x1cc   : > { %v1194_v6 = vpop.f32.mrf.mxu2  ;;  %v744_v5 = vmul.f32 %v5781_v10, %v743_v58 }
 0x1cd   : > { %v1228_v48 = vpack.c.bf16 %v1194_v6, %v1194_v6  ;;  %v906_v25 = vpop.f32.mrf.mxu0 }
 0x1ce   : > { %v939_v56 = vpack.c.bf16 %v906_v25, %v906_v25  ;;  %v1051_v33 = vpop.f32.mrf.mxu1  ;;  %v748_v15 = vsel %vm747_vm13, %v5781_v10, %v744_v5 }
 0x1cf   : > { %1244 = vst [vmem:[#allocation2 + $0x38] sm:$0xf] %v1228_v48  ;;  %v1084_v40 = vpack.c.bf16 %v1051_v33, %v1051_v33  ;;  %v5065_v62 = vld [vmem:[#allocation2 + $0x30] sm:$0xf]  ;;  %v773_v27 = vmul.f32 %v748_v15, %v6532_v49 }
 0x1d0   : > { %955 = vst [vmem:[#allocation2 + $0x3c] sm:$0xf] %v939_v56  ;;  %v5097_v1 = vld [vmem:[#allocation2 + $0x34] sm:$0xf] }
 0x1d1   : > { %1100 = vst [vmem:[#allocation2 + $0x40] sm:$0xf] %v1084_v40  ;;  %v792_v29 = vmul.f32 %v6455_v39, %v773_v27 }
 0x1d2   : > { %923 = vmatmul.bf16.gmra.mxu0 %v819_v60  ;;  %1068 = vmatmul.bf16.gmra.mxu1 %v819_v60 }
 0x1d3   : > { %1800 = vrot.lane.b32.xlu1 %v6673_v35, %s6081_s29  ;;  %1213 = vmatmul.bf16.gmra.mxu2 %v819_v60  ;;  %v811_v49 = vadd.f32 %v6474_v63, %v792_v29 }
 0x1d4   : > { %v1196_v47 = vpop.f32.mrf.mxu2 }
 0x1d5   : > { %v1229_v61 = vpack.c.bf16 %v1196_v47, %v1196_v47 }
 0x1d7   : > { %1245 = vst [vmem:[#allocation2 + $0x44] sm:$0xf] %v1229_v61  ;;  %v5501_v30 = vld [vmem:[#allocation2 + $0x38] sm:$0xf0] }
 0x1d8   : > { %v5509_v0 = vld [vmem:[#allocation2 + $0x3c] sm:$0xf0]  ;;  %v6677_v9 = vor.u32 %v5501_v30, %v5065_v62 }
 0x1d9   : > { %v6679_v3 = vor.u32 %v5509_v0, %v5097_v1 }
 0x1da   : > { %1802 = vrot.lane.b32.xlu0 %v6677_v9, %s6081_s29 }
 0x1db   : > { %2202 = vrot.lane.b32.xlu1 %v6664_v50, %s6082_s30  ;;  %1818 = vrot.lane.b32.xlu2 %v6679_v3, %s6081_s29 }
 0x1e2   : > { %2204 = vrot.lane.b32.xlu0 %v6679_v3, %s6082_s30 }
 0x1e3   : > { %2590 = vrot.lane.b32.xlu2 %v6679_v3, %s6083_s13 }
 0x20c   : > { %v566_v12 = vpop.xlane.xlu1 %565 }
 0x20d   : > { %v582_v8 = vmul.f32 %v566_v12, %v6174_v17 }
 0x20f   : > { %v598_v26 = vadd.f32 1e-05, %v582_v8 }
 0x211   : > { %5782 = vrsqrt.f32 %v598_v26  ;;  %vm755_vm15 = vweird.f32 %v598_v26 }
 0x217   : > { %v5783_v54 = vpop.eup %5782 }
 0x218   : > { %v750_v14 = vmul.f32 %v5783_v54, %v598_v26  ;;  %vm756_vm14 = vweird.f32 %v5783_v54 }
 0x219   : > { %vm757_vm0 = vmor %vm755_vm15, %vm756_vm14 }
 0x21a   : > { %v751_v13 = vmul.f32 %v5783_v54, %v750_v14 }
 0x21c   : > { %v752_v16 = vmul.f32 0.5, %v751_v13 }
 0x21e   : > { %v909_v19 = vpop.f32.mrf.mxu0  ;;  %v1054_v20 = vpop.f32.mrf.mxu1  ;;  %v753_v18 = vsub.f32 1.5, %v752_v16 }
 0x21f   : > { %v940_v22 = vpack.c.bf16 %v909_v19, %v909_v19  ;;  %v1085_v43 = vpack.c.bf16 %v1054_v20, %v1054_v20 }
 0x220   : > { %v754_v31 = vmul.f32 %v5783_v54, %v753_v18 }
 0x221   : > { %956 = vst [vmem:[#allocation2 + $0x48] sm:$0xf] %v940_v22 }
 0x222   : > { %1101 = vst [vmem:[#allocation2 + $0x4c] sm:$0xf] %v1085_v43  ;;  %v758_v2 = vsel %vm757_vm0, %v5783_v54, %v754_v31 }
 0x223   : > { %v774_v34 = vmul.f32 %v758_v2, %v6565_v37 }
 0x225   : > { %v1199_v46 = vpop.f32.mrf.mxu2  ;;  %v793_v38 = vmul.f32 %v6455_v39, %v774_v34 }
 0x226   : > { %v1230_v41 = vpack.c.bf16 %v1199_v46, %v1199_v46  ;;  %v911_v32 = vpop.f32.mrf.mxu0  ;;  %v1056_v55 = vpop.f32.mrf.mxu1 }
 0x227   : > { %v941_v28 = vpack.c.bf16 %v911_v32, %v911_v32  ;;  %v1086_v51 = vpack.c.bf16 %v1056_v55, %v1056_v55  ;;  %v812_v42 = vadd.f32 %v6474_v63, %v793_v38 }
 0x228   : > { %1246 = vst [vmem:[#allocation2 + $0x50] sm:$0xf] %v1230_v41  ;;  %v5069_v56 = vld [vmem:[#allocation2 + $0x48] sm:$0xf] }
 0x229   : > { %957 = vst [vmem:[#allocation2 + $0x54] sm:$0xf] %v941_v28  ;;  %v820_v24 = vpack.c.bf16 %v812_v42, %v811_v49  ;;  %v5101_v21 = vld [vmem:[#allocation2 + $0x4c] sm:$0xf] }
 0x22a   : > { %1102 = vst [vmem:[#allocation2 + $0x58] sm:$0xf] %v1086_v51 }
 0x22b   : > { %928 = vmatmul.bf16.gmra.mxu0 %v820_v24  ;;  %1073 = vmatmul.bf16.gmra.mxu1 %v820_v24 }
 0x22c   : > { %1218 = vmatmul.bf16.gmra.mxu2 %v820_v24 }
 0x22d   : > { %v1201_v37 = vpop.f32.mrf.mxu2 }
 0x22e   : > { %v1231_v6 = vpack.c.bf16 %v1201_v37, %v1201_v37 }
 0x22f   : > { %v914_v23 = vpop.f32.mrf.mxu0  ;;  %v1059_v48 = vpop.f32.mrf.mxu1 }
 0x230   : > { %1247 = vst [vmem:[#allocation2 + $0x5c] sm:$0xf] %v1231_v6  ;;  %v942_v25 = vpack.c.bf16 %v914_v23, %v914_v23  ;;  %v1087_v39 = vpack.c.bf16 %v1059_v48, %v1059_v48  ;;  %v5502_v33 = vld [vmem:[#allocation2 + $0x50] sm:$0xf0] }
 0x231   : > { %v5510_v57 = vld [vmem:[#allocation2 + $0x54] sm:$0xf0]  ;;  %v6699_v40 = vor.u32 %v5502_v33, %v5069_v56 }
 0x232   : > { %958 = vst [vmem:[#allocation2 + $0x60] sm:$0xf] %v942_v25  ;;  %v6701_v63 = vor.u32 %v5510_v57, %v5101_v21 }
 0x233   : > { %1103 = vst [vmem:[#allocation2 + $0x64] sm:$0xf] %v1087_v39  ;;  %1804 = vrot.lane.b32.xlu2 %v6699_v40, %s6081_s29 }
 0x234   : > { %2592 = vrot.lane.b32.xlu1 %v6701_v63, %s6083_s13  ;;  %1820 = vrot.lane.b32.xlu0 %v6701_v63, %s6081_s29 }
 0x236   : > { %v1204_v59 = vpop.f32.mrf.mxu2 }
 0x237   : > { %v1232_v60 = vpack.c.bf16 %v1204_v59, %v1204_v59  ;;  %v916_v47 = vpop.f32.mrf.mxu0  ;;  %v1061_v61 = vpop.f32.mrf.mxu1 }
 0x238   : > { %v943_v62 = vpack.c.bf16 %v916_v47, %v916_v47  ;;  %v1088_v30 = vpack.c.bf16 %v1061_v61, %v1061_v61  ;;  %v5141_v47 = vld [vmem:[#allocation2 + $0x50] sm:$0xf]  ;;  %v6773_v61 = vpop.permute.xlu1 %2200 }
 0x239   : > { %1248 = vst [vmem:[#allocation2 + $0x68] sm:$0xf] %v1232_v60  ;;  %v5073_v11 = vld [vmem:[#allocation2 + $0x60] sm:$0xf]  ;;  %v5518_v60 = vld [vmem:[#allocation2 + $0x58] sm:$0xf0] }
 0x23a   : > { %959 = vst [vmem:[#allocation2 + $0x6c] sm:$0xf] %v943_v62  ;;  %v5105_v12 = vld [vmem:[#allocation2 + $0x64] sm:$0xf]  ;;  %v6775_v62 = vor.u32 %v5518_v60, %v5141_v47  ;;  %v5137_v47 = vld [vmem:[#allocation2 + $0x38] sm:$0xf] }
 0x23b   : > { %1104 = vst [vmem:[#allocation2 + $0x70] sm:$0xf] %v1088_v30  ;;  %v5515_v30 = vld [vmem:[#allocation2 + $0x10] sm:$0xf0]  ;;  %v5517_v60 = vld [vmem:[#allocation2 + $0x40] sm:$0xf0] }
 0x23c   : > { %2206 = vrot.lane.b32.xlu0 %v6701_v63, %s6082_s30 }
 0x23e   : > { %v1206_v1 = vpop.f32.mrf.mxu2 }
 0x23f   : > { %v1233_v0 = vpack.c.bf16 %v1206_v1, %v1206_v1  ;;  %v919_v36 = vpop.f32.mrf.mxu0  ;;  %v1064_v4 = vpop.f32.mrf.mxu1  ;;  %v5129_v1 = vld [vmem:[#allocation2 + $0x8] sm:$0xf] }
 0x240   : > { %v944_v7 = vpack.c.bf16 %v919_v36, %v919_v36  ;;  %v1089_v10 = vpack.c.bf16 %v1064_v4, %v1064_v4  ;;  %v5145_v57 = vld [vmem:[#allocation2 + $0x68] sm:$0xf]  ;;  %v6783_v36 = vor.u32 %v5515_v30, %v5129_v1  ;;  %v6860_v1 = vor.u32 %v5517_v60, %v5137_v47 }
 0x241   : > { %1249 = vst [vmem:[#allocation2 + $0x74] sm:$0xf] %v1233_v0  ;;  %v5503_v53 = vld [vmem:[#allocation2 + $0x68] sm:$0xf0]  ;;  %v6781_v0 = vpop.permute.xlu1 %1816 }
 0x242   : > { %960 = vst [vmem:[#allocation2 + $0x78] sm:$0xf] %v944_v7  ;;  %v5511_v8 = vld [vmem:[#allocation2 + $0x6c] sm:$0xf0]  ;;  %v6711_v26 = vor.u32 %v5503_v53, %v5073_v11  ;;  %v5516_v53 = vld [vmem:[#allocation2 + $0x28] sm:$0xf0] }
 0x243   : > { %1105 = vst [vmem:[#allocation2 + $0x7c] sm:$0xf] %v1089_v10  ;;  %v6713_v44 = vor.u32 %v5511_v8, %v5105_v12 }
 0x244   : > { %1806 = vrot.lane.b32.xlu0 %v6711_v26, %s6081_s29  ;;  %9027 = vst [vmem:[#allocation4_spill] sm:$0xff] %v6783_v36 }
 0x245   : > { %2594 = vrot.lane.b32.xlu1 %v6713_v44, %s6083_s13  ;;  %1822 = vrot.lane.b32.xlu2 %v6713_v44, %s6081_s29 }
 0x246   : > { %v1209_v58 = vpop.f32.mrf.mxu2 }
 0x247   : > { %v1234_v54 = vpack.c.bf16 %v1209_v58, %v1209_v58  ;;  %v921_v5 = vpop.f32.mrf.mxu0  ;;  %v1066_v14 = vpop.f32.mrf.mxu1 }
 0x248   : > { %v945_v13 = vpack.c.bf16 %v921_v5, %v921_v5  ;;  %v1090_v15 = vpack.c.bf16 %v1066_v14, %v1066_v14  ;;  %v5519_v21 = vld [vmem:[#allocation2 + $0x70] sm:$0xf0]  ;;  %v5133_v5 = vld [vmem:[#allocation2 + $0x20] sm:$0xf] }
 0x249   : > { %1250 = vst [vmem:[#allocation2 + $0x80] sm:$0xf] %v1234_v54  ;;  %v5077_v28 = vld [vmem:[#allocation2 + $0x78] sm:$0xf]  ;;  %v6767_v59 = vor.u32 %v5519_v21, %v5145_v57  ;;  %v6793_v11 = vpop.permute.xlu1 %1800  ;;  %v6797_v14 = vor.u32 %v5516_v53, %v5133_v5 }
 0x24a   : > { %961 = vst [vmem:[#allocation2 + $0x84] sm:$0xf] %v945_v13  ;;  %v5109_v27 = vld [vmem:[#allocation2 + $0x7c] sm:$0xf] }
 0x24b   : > { %1106 = vst [vmem:[#allocation2 + $0x88] sm:$0xf] %v1090_v15 }
 0x24c   : > { %9028 = vst [vmem:[#allocation5_spill] sm:$0xff] %v6797_v14 }
 0x24d   : > { %2208 = vrot.lane.b32.xlu2 %v6713_v44, %s6082_s30 }
 0x24e   : > { %v1211_v16 = vpop.f32.mrf.mxu2 }
 0x24f   : > { %v1235_v19 = vpack.c.bf16 %v1211_v16, %v1211_v16  ;;  %v924_v20 = vpop.f32.mrf.mxu0  ;;  %v1069_v18 = vpop.f32.mrf.mxu1 }
 0x250   : > { %v946_v22 = vpack.c.bf16 %v924_v20, %v924_v20  ;;  %v1091_v43 = vpack.c.bf16 %v1069_v18, %v1069_v18  ;;  %v5149_v56 = vld [vmem:[#allocation2 + $0x80] sm:$0xf] }
 0x251   : > { %1251 = vst [vmem:[#allocation2 + $0x8c] sm:$0xf] %v1235_v19  ;;  %v5504_v38 = vld [vmem:[#allocation2 + $0x80] sm:$0xf0]  ;;  %v6801_v13 = vpop.permute.xlu1 %2202 }
 0x252   : > { %962 = vst [vmem:[#allocation2 + $0x90] sm:$0xf] %v946_v22  ;;  %v5512_v31 = vld [vmem:[#allocation2 + $0x84] sm:$0xf0]  ;;  %v6731_v51 = vor.u32 %v5504_v38, %v5077_v28 }
 0x253   : > { %1107 = vst [vmem:[#allocation2 + $0x94] sm:$0xf] %v1091_v43  ;;  %v6723_v2 = vor.u32 %v5512_v31, %v5109_v27  ;;  %v6803_v43 = vpop.permute.xlu2 %1798 }
 0x255   : > { %2596 = vrot.lane.b32.xlu0 %v6723_v2, %s6083_s13  ;;  %2210 = vrot.lane.b32.xlu2 %v6723_v2, %s6082_s30 }
 0x256   : > { %1824 = vrot.lane.b32.xlu1 %v6723_v2, %s6081_s29  ;;  %v1214_v34 = vpop.f32.mrf.mxu2 }
 0x257   : > { %v1236_v29 = vpack.c.bf16 %v1214_v34, %v1214_v34  ;;  %v926_v46 = vpop.f32.mrf.mxu0  ;;  %v1071_v41 = vpop.f32.mrf.mxu1 }
 0x258   : > { %v947_v32 = vpack.c.bf16 %v926_v46, %v926_v46  ;;  %v1092_v55 = vpack.c.bf16 %v1071_v41, %v1071_v41  ;;  %v5520_v39 = vld [vmem:[#allocation2 + $0x88] sm:$0xf0] }
 0x259   : > { %1252 = vst [vmem:[#allocation2 + $0x98] sm:$0xf] %v1236_v29  ;;  %v5081_v48 = vld [vmem:[#allocation2 + $0x90] sm:$0xf]  ;;  %v6761_v33 = vor.u32 %v5520_v39, %v5149_v56 }
 0x25a   : > { %963 = vst [vmem:[#allocation2 + $0x9c] sm:$0xf] %v947_v32  ;;  %v5113_v24 = vld [vmem:[#allocation2 + $0x94] sm:$0xf] }
 0x25b   : > { %1108 = vst [vmem:[#allocation2 + $0xa0] sm:$0xf] %v1092_v55  ;;  %v6809_v41 = vpop.permute.xlu2 %2588 }
 0x25d   : > { %2184 = vrot.lane.b32.xlu2 %v6633_v52, %s6082_s30 }
 0x25e   : > { %1808 = vrot.lane.b32.xlu1 %v6731_v51, %s6081_s29  ;;  %v1216_v49 = vpop.f32.mrf.mxu2 }
 0x25f   : > { %v1237_v42 = vpack.c.bf16 %v1216_v49, %v1216_v49 }
 0x260   : > { %v5153_v7 = vld [vmem:[#allocation2 + $0x98] sm:$0xf] }
 0x261   : > { %1253 = vst [vmem:[#allocation2 + $0xa4] sm:$0xf] %v1237_v42  ;;  %v5505_v23 = vld [vmem:[#allocation2 + $0x98] sm:$0xf0] }
 0x262   : > { %v5513_v37 = vld [vmem:[#allocation2 + $0x9c] sm:$0xf0]  ;;  %v6745_v25 = vor.u32 %v5505_v23, %v5081_v48 }
 0x263   : > { %v6737_v6 = vor.u32 %v5513_v37, %v5113_v24  ;;  %v6825_v24 = vpop.permute.xlu2 %1818 }
 0x265   : > { %2572 = vrot.lane.b32.xlu2 %v6673_v35, %s6083_s13  ;;  %1826 = vrot.lane.b32.xlu0 %v6737_v6, %s6081_s29  ;;  %v1463_v37 = vsel %vm8993_vm1, %v6737_v6, 0 }
 0x266   : > { %2570 = vrot.lane.b32.xlu1 %v6633_v52, %s6083_s13 }
 0x268   : > { %v5521_v4 = vld [vmem:[#allocation2 + $0xa0] sm:$0xf0] }
 0x269   : > { %v6789_v10 = vor.u32 %v5521_v4, %v5153_v7  ;;  %v6862_v4 = vpop.permute.xlu0 %1814 }
 0x26b   : > { %v6842_v21 = vpop.permute.xlu2 %2590 }
 0x26d   : > { %2586 = vrot.lane.b32.xlu0 %v6636_v45, %s6083_s13  ;;  %1810 = vrot.lane.b32.xlu2 %v6745_v25, %s6081_s29 }
 0x26e   : > { %2188 = vrot.lane.b32.xlu1 %v6677_v9, %s6082_s30 }
 0x275   : > { %2186 = vrot.lane.b32.xlu0 %v6673_v35, %s6082_s30 }
 0x276   : > { %2192 = vrot.lane.b32.xlu1 %v6711_v26, %s6082_s30 }
 0x27d   : > { %2574 = vrot.lane.b32.xlu0 %v6677_v9, %s6083_s13 }
 0x27e   : > { %2212 = vrot.lane.b32.xlu1 %v6737_v6, %s6082_s30 }
 0x285   : > { %2190 = vrot.lane.b32.xlu0 %v6699_v40, %s6082_s30 }
 0x286   : > { %2105 = vrot.lane.b32.xlu1 %v6761_v33, %s6081_s29 }
 0x28d   : > { %2576 = vrot.lane.b32.xlu0 %v6699_v40, %s6083_s13  ;;  %v6854_v30 = vpop.permute.xlu2 %1804 }
 0x28e   : > { %2103 = vrot.lane.b32.xlu1 %v6767_v59, %s6081_s29 }
 0x295   : > { %2598 = vrot.lane.b32.xlu0 %v6737_v6, %s6083_s13  ;;  %v1460_v6 = vsel %vm8993_vm1, %v6723_v2, 0  ;;  %v1457_v2 = vsel %vm8993_vm1, %v6713_v44, 0 }
 0x296   : > { %2101 = vrot.lane.b32.xlu1 %v6775_v62, %s6081_s29 }
 0x29d   : > { %2194 = vrot.lane.b32.xlu0 %v6731_v51, %s6082_s30 }
 0x29e   : > { %2095 = vrot.lane.b32.xlu1 %v6783_v36, %s6081_s29 }
 0x29f   : > { %v1823_v53 = vpop.permute.xlu2 %1822 }
 0x2a0   : > { %v1867_v60 = vsel %vm8993_vm1, %v1823_v53, 0  ;;  %v1861_v53 = vsel %vm8993_vm1, %v6825_v24, 0 }
 0x2a5   : > { %2582 = vrot.lane.b32.xlu0 %v6745_v25, %s6083_s13 }
 0x2a6   : > { %2493 = vrot.lane.b32.xlu1 %v6789_v10, %s6082_s30  ;;  %v6807_v27 = vpop.permute.xlu1 %2592 }
 0x2a8   : > { %v929_v12 = vpop.f32.mrf.mxu0  ;;  %v1074_v8 = vpop.f32.mrf.mxu1 }
 0x2a9   : > { %v948_v58 = vpack.c.bf16 %v929_v12, %v929_v12  ;;  %v1093_v54 = vpack.c.bf16 %v1074_v8, %v1074_v8  ;;  %v6872_v12 = vpop.permute.xlu0 %1802  ;;  %v1451_v8 = vsel %vm8993_vm1, %v6679_v3, 0  ;;  %v1445_v3 = vsel %vm8993_vm1, %v6636_v45, 0 }
 0x2ab   : > { %964 = vst [vmem:[#allocation2 + $0xa8] sm:$0xf] %v948_v58  ;;  %v6881_v58 = vpop.permute.xlu2 %2208 }
 0x2ac   : > { %1109 = vst [vmem:[#allocation2 + $0xac] sm:$0xf] %v1093_v54 }
 0x2ad   : > { %2097 = vrot.lane.b32.xlu0 %v6797_v14, %s6081_s29 }
 0x2af   : > { %v1219_v15 = vpop.f32.mrf.mxu2 }
 0x2b0   : > { %v1238_v16 = vpack.c.bf16 %v1219_v15, %v1219_v15  ;;  %v931_v19 = vpop.f32.mrf.mxu0  ;;  %v1076_v20 = vpop.f32.mrf.mxu1 }
 0x2b1   : > { %v949_v18 = vpack.c.bf16 %v931_v19, %v931_v19  ;;  %v1094_v22 = vpack.c.bf16 %v1076_v20, %v1076_v20  ;;  %v6883_v54 = vpop.permute.xlu0 %2204 }
 0x2b2   : > { %1254 = vst [vmem:[#allocation2 + $0xb0] sm:$0xf] %v1238_v16  ;;  %v5085_v39 = vld [vmem:[#allocation2 + $0xa8] sm:$0xf] }
 0x2b3   : > { %965 = vst [vmem:[#allocation2 + $0xb4] sm:$0xf] %v949_v18  ;;  %v5117_v29 = vld [vmem:[#allocation2 + $0xac] sm:$0xf]  ;;  %v2211_v16 = vpop.permute.xlu2 %2210 }
 0x2b4   : > { %1110 = vst [vmem:[#allocation2 + $0xb8] sm:$0xf] %v1094_v22 }
 0x2b5   : > { %2879 = vrot.lane.b32.xlu0 %v6789_v10, %s6083_s13 }
 0x2b7   : > { %v1221_v31 = vpop.f32.mrf.mxu2  ;;  %v6821_v38 = vpop.permute.xlu1 %2594 }
 0x2b8   : > { %v1239_v34 = vpack.c.bf16 %v1221_v31, %v1221_v31 }
 0x2b9   : > { %v5157_v28 = vld [vmem:[#allocation2 + $0xb0] sm:$0xf]  ;;  %v1821_v15 = vpop.permute.xlu0 %1820 }
 0x2ba   : > { %1255 = vst [vmem:[#allocation2 + $0xbc] sm:$0xf] %v1239_v34  ;;  %v5506_v48 = vld [vmem:[#allocation2 + $0xb0] sm:$0xf0] }
 0x2bb   : > { %v5514_v46 = vld [vmem:[#allocation2 + $0xb4] sm:$0xf0]  ;;  %v6837_v56 = vor.u32 %v5506_v48, %v5085_v39  ;;  %v6895_v18 = vpop.permute.xlu2 %2184 }
 0x2bc   : > { %v6813_v32 = vor.u32 %v5514_v46, %v5117_v29 }
 0x2bd   : > { %2873 = vrot.lane.b32.xlu0 %v6775_v62, %s6083_s13 }
 0x2be   : > { %2214 = vrot.lane.b32.xlu1 %v6813_v32, %s6082_s30  ;;  %1828 = vrot.lane.b32.xlu2 %v6813_v32, %s6081_s29  ;;  %v1466_v55 = vsel %vm8993_vm1, %v6813_v32, 0 }
 0x2bf   : > { %1468 = vmatpush.bf16.xpose.msra.mxu3 %v1466_v55 }
 0x2c1   : > { %v5522_v49 = vld [vmem:[#allocation2 + $0xb8] sm:$0xf0]  ;;  %v2207_v20 = vpop.permute.xlu0 %2206 }
 0x2c2   : > { %v6823_v42 = vor.u32 %v5522_v49, %v5157_v28 }
 0x2c3   : > { %v6905_v31 = vpop.permute.xlu2 %2572 }
 0x2c4   : > { %1733 = vmatpush.bf16.msrb.mxu0 %v6823_v42 }
 0x2c5   : > { %2489 = vrot.lane.b32.xlu0 %v6767_v59, %s6082_s30 }
 0x2c6   : > { %2578 = vrot.lane.b32.xlu2 %v6711_v26, %s6083_s13 }
 0x2c7   : > { %1469 = vmatpush.bf16.xpose.msra.mxu3 %v1463_v37 }
 0x2c8   : > { %v6834_v23 = vpop.permute.xlu1 %1824  ;;  %1734 = vmatpush.bf16.msrb.mxu0 %v6789_v10 }
 0x2c9   : > { %v6903_v22 = vpop.permute.xlu0 %1806 }
 0x2cc   : > { %1735 = vmatpush.bf16.msrb.mxu0 %v6761_v33 }
 0x2cd   : > { %1812 = vrot.lane.b32.xlu0 %v6837_v56, %s6081_s29 }
 0x2ce   : > { %2580 = vrot.lane.b32.xlu2 %v6731_v51, %s6083_s13 }
 0x2cf   : > { %1470 = vmatpush.bf16.xpose.msra.mxu3 %v1460_v6 }
 0x2d0   : > { %v6848_v57 = vpop.permute.xlu1 %1808  ;;  %1736 = vmatpush.bf16.msrb.mxu0 %v6767_v59 }
 0x2d4   : > { %1737 = vmatpush.bf16.msrb.mxu0 %v6775_v62 }
 0x2d5   : > { %2198 = vrot.lane.b32.xlu0 %v6837_v56, %s6082_s30 }
 0x2d6   : > { %2107 = vrot.lane.b32.xlu2 %v6789_v10, %s6081_s29  ;;  %v1454_v10 = vsel %vm8993_vm1, %v6701_v63, 0  ;;  %v1448_v63 = vsel %vm8993_vm1, %v6664_v50, 0 }
 0x2d7   : > { %1471 = vmatpush.bf16.xpose.msra.mxu3 %v1457_v2 }
 0x2d8   : > { %v6864_v7 = vpop.permute.xlu1 %2570  ;;  %1738 = vmatpush.bf16.msrb.mxu0 %v6860_v1 }
 0x2dc   : > { %1739 = vmatpush.bf16.msrb.mxu0 %v6797_v14 }
 0x2de   : > { %2196 = vrot.lane.b32.xlu2 %v6745_v25, %s6082_s30 }
 0x2df   : > { %1472 = vmatpush.bf16.xpose.msra.mxu3 %v1454_v10  ;;  %v1864_v10 = vsel %vm8993_vm1, %v1821_v15, 0 }
 0x2e0   : > { %1740 = vmatpush.bf16.msrb.mxu0 %v6783_v36  ;;  %v6875_v44 = vpop.permute.xlu1 %2188 }
 0x2e6   : > { %2099 = vrot.lane.b32.xlu2 %v6860_v1, %s6081_s29 }
 0x2e7   : > { %1473 = vmatpush.bf16.xpose.msra.mxu3 %v1451_v8 }
 0x2e8   : > { %v6885_v5 = vpop.permute.xlu1 %2192 }
 0x2ee   : > { %2877 = vrot.lane.b32.xlu2 %v6761_v33, %s6083_s13 }
 0x2ef   : > { %1474 = vmatpush.bf16.xpose.msra.mxu3 %v1448_v63  ;;  %v2256_v63 = vsel %vm8993_vm1, %v2211_v16, 0  ;;  %v1855_v16 = vsel %vm8993_vm1, %v6862_v4, 0 }
 0x2f0   : > { %v2213_v19 = vpop.permute.xlu1 %2212 }
 0x2f6   : > { %2875 = vrot.lane.b32.xlu2 %v6767_v59, %s6083_s13  ;;  %v6911_v59 = vpop.permute.xlu0 %2596 }
 0x2f7   : > { %1475 = vmatpush.bf16.xpose.msra.mxu3 %v1445_v3 }
 0x2f8   : > { %v6901_v50 = vpop.permute.xlu1 %2105 }
 0x2fe   : > { %2491 = vrot.lane.b32.xlu2 %v6761_v33, %s6082_s30  ;;  %5119 = vmatmul.msk.bf16.vlgmr.msra.gmra.mxu3 %vm8993_vm1, %v6633_v52  ;;  %v6917_v52 = vpop.permute.xlu2 %1810  ;;  %v1827_v34 = vpop.permute.xlu0 %1826 }
 0x2ff   : > { %v1873_v28 = vsel %vm8993_vm1, %v1827_v34, 0  ;;  %v2253_v34 = vsel %vm8993_vm1, %v6881_v58, 0 }
 0x300   : > { %v6909_v45 = vpop.permute.xlu1 %2103 }
 0x306   : > { %2600 = vrot.lane.b32.xlu2 %v6813_v32, %s6083_s13 }
 0x308   : > { %v6919_v33 = vpop.permute.xlu1 %2101 }
 0x30e   : > { %5120 = vmatmul.msk.bf16.gmra.mxu3 %vm8993_vm1, %v6673_v35  ;;  %2584 = vrot.lane.b32.xlu2 %v6837_v56, %s6083_s13  ;;  %v6930_v35 = vpop.permute.xlu0 %2586 }
 0x310   : > { %v6924_v32 = vpop.permute.xlu1 %2095 }
 0x316   : > { %2109 = vrot.lane.b32.xlu2 %v6823_v42, %s6081_s29  ;;  %v6941_v48 = vpop.permute.xlu0 %2186 }
 0x318   : > { %v1829_v29 = vpop.permute.xlu2 %1828  ;;  %v6937_v49 = vpop.permute.xlu1 %2493 }
 0x319   : > { %v1876_v46 = vsel %vm8993_vm1, %v1829_v29, 0  ;;  %v2250_v29 = vsel %vm8993_vm1, %v2207_v20, 0  ;;  %v2244_v20 = vsel %vm8993_vm1, %v6801_v13, 0 }
 0x31a   : > { %1878 = vmatpush.bf16.xpose.msrb.mxu1 %v1876_v46 }
 0x31e   : > { %5121 = vmatmul.msk.bf16.gmra.mxu3 %vm8993_vm1, %v6677_v9  ;;  %2881 = vrot.lane.b32.xlu2 %v6823_v42, %s6083_s13  ;;  %v1870_v9 = vsel %vm8993_vm1, %v6834_v23, 0  ;;  %v2259_v23 = vsel %vm8993_vm1, %v2213_v19, 0  ;;  %v1858_v19 = vsel %vm8993_vm1, %v6781_v0, 0  ;;  %v2247_v0 = vsel %vm8993_vm1, %v6883_v54, 0 }
 0x31f   : > { %v2241_v54 = vsel %vm8993_vm1, %v6773_v61, 0  ;;  %v2639_v61 = vsel %vm8993_vm1, %v6821_v38, 0  ;;  %v2636_v38 = vsel %vm8993_vm1, %v6807_v27, 0 }
 0x320   : > { %v6932_v55 = vpop.permute.xlu2 %2578 }
 0x322   : > { %1879 = vmatpush.bf16.xpose.msrb.mxu1 %v1873_v28 }
 0x326   : > { %2495 = vrot.lane.b32.xlu2 %v6823_v42, %s6082_s30  ;;  %v6949_v42 = vpop.permute.xlu0 %2574 }
 0x328   : > { %v6939_v37 = vpop.permute.xlu2 %2580 }
 0x32a   : > { %1880 = vmatpush.bf16.xpose.msrb.mxu1 %v1870_v9 }
 0x32e   : > { %5122 = vmatmul.msk.bf16.gmra.mxu3 %vm8993_vm1, %v6699_v40  ;;  %v6955_v8 = vpop.permute.xlu0 %2190 }
 0x330   : > { %v2215_v39 = vpop.permute.xlu1 %2214  ;;  %v2108_v6 = vpop.permute.xlu2 %2107 }
 0x331   : > { %v2262_v47 = vsel %vm8993_vm1, %v2215_v39, 0  ;;  %v2642_v39 = vsel %vm8993_vm1, %v6911_v59, 0 }
 0x332   : > { %1881 = vmatpush.bf16.xpose.msrb.mxu1 %v1867_v60  ;;  %2264 = vmatpush.bf16.xpose.msrb.mxu3 %v2262_v47  ;;  %v1256_v60 = vlaneseq }
 0x336   : > { %v6964_v3 = vpop.permute.xlu0 %2576 }
 0x338   : > { %v6951_v2 = vpop.permute.xlu2 %2196 }
 0x33a   : > { %1882 = vmatpush.bf16.xpose.msrb.mxu1 %v1864_v10  ;;  %2265 = vmatpush.bf16.xpose.msrb.mxu3 %v2259_v23  ;;  %v7010_v10 = vand.u32 127, %v1256_v60 }
 0x33e   : > { %5123 = vmatmul.msk.bf16.gmra.mxu3 %vm8993_vm1, %v6711_v26  ;;  %v2599_v24 = vpop.permute.xlu0 %2598 }
 0x340   : > { %v6959_v40 = vpop.permute.xlu2 %2099 }
 0x342   : > { %1883 = vmatpush.bf16.xpose.msrb.mxu1 %v1861_v53  ;;  %2266 = vmatpush.bf16.xpose.msrb.mxu3 %v2256_v63 }
 0x346   : > { %v6983_v58 = vpop.permute.xlu0 %2194 }
 0x348   : > { %v6966_v15 = vpop.permute.xlu2 %2877 }
 0x34a   : > { %1884 = vmatpush.bf16.xpose.msrb.mxu1 %v1858_v19  ;;  %2267 = vmatpush.bf16.xpose.msrb.mxu3 %v2253_v34 }
 0x34e   : > { %5124 = vmatmul.msk.bf16.gmra.mxu3 %vm8993_vm1, %v6731_v51  ;;  %v6990_v28 = vpop.permute.xlu0 %2582 }
 0x350   : > { %v6974_v26 = vpop.permute.xlu2 %2875 }
 0x352   : > { %1885 = vmatpush.bf16.xpose.msrb.mxu1 %v1855_v16  ;;  %2268 = vmatpush.bf16.xpose.msrb.mxu3 %v2250_v29 }
 0x356   : > { %v2098_v13 = vpop.permute.xlu0 %2097 }
 0x358   : > { %v2492_v46 = vpop.permute.xlu2 %2491 }
 0x359   : > { %5159 = vmatmul.msk.bf16.vlgmr.msrb.gmra.mxu1 %vm8993_vm1, %v6803_v43 }
 0x35a   : > { %2269 = vmatpush.bf16.xpose.msrb.mxu3 %v2247_v0 }
 0x35e   : > { %5125 = vmatmul.msk.bf16.gmra.mxu3 %vm8993_vm1, %v6745_v25  ;;  %v2645_v25 = vsel %vm8993_vm1, %v2599_v24, 0  ;;  %v2880_v47 = vpop.permute.xlu0 %2879 }
 0x360   : > { %v2601_v51 = vpop.permute.xlu2 %2600 }
 0x361   : > { %v2648_v4 = vsel %vm8993_vm1, %v2601_v51, 0 }
 0x362   : > { %2270 = vmatpush.bf16.xpose.msrb.mxu3 %v2244_v20  ;;  %2650 = vmatpush.bf16.xpose.msra.mxu1 %v2648_v4 }
 0x368   : > { %v6992_v43 = vpop.permute.xlu2 %2584 }
 0x369   : > { %5160 = vmatmul.msk.bf16.gmra.mxu1 %vm8993_vm1, %v6793_v11 }
 0x36a   : > { %2271 = vmatpush.bf16.xpose.msrb.mxu3 %v2241_v54  ;;  %2651 = vmatpush.bf16.xpose.msra.mxu1 %v2645_v25 }
 0x36e   : > { %5126 = vmatmul.msk.bf16.gmra.mxu3 %vm8993_vm1, %v6837_v56  ;;  %v7008_v56 = vshrl.u32 %v1256_v60, 7 }
 0x370   : > { %v2110_v9 = vpop.permute.xlu2 %2109  ;;  %vm1275_vm2 = vcmp.le.s32.totalorder %v7010_v10, %v7008_v56  ;;  %v7077_v63 = vadd.s32 32, %v7008_v56  ;;  %v7103_v34 = vadd.s32 48, %v7008_v56  ;;  %v7116_v24 = vadd.s32 56, %v7008_v56 }
 0x371   : > { %2119 = vmatpush.bf16.msrb.mxu2 %v2110_v9  ;;  %v7129_v29 = vadd.s32 64, %v7008_v56  ;;  %v7142_v0 = vadd.s32 72, %v7008_v56  ;;  %v7154_v20 = vadd.s32 80, %v7008_v56  ;;  %v7180_v60 = vadd.s32 96, %v7008_v56 }
 0x372   : > { %2652 = vmatpush.bf16.xpose.msra.mxu1 %v2642_v39  ;;  %vm1279_vm6 = vcmp.le.s32.totalorder %v7010_v10, %v7077_v63  ;;  %vm1281_vm8 = vcmp.le.s32.totalorder %v7010_v10, %v7103_v34  ;;  %vm1282_vm9 = vcmp.le.s32.totalorder %v7010_v10, %v7116_v24 }
 0x373   : > { %vm1283_vm10 = vcmp.le.s32.totalorder %v7010_v10, %v7129_v29  ;;  %vm1284_vm11 = vcmp.le.s32.totalorder %v7010_v10, %v7142_v0  ;;  %vm1285_vm12 = vcmp.le.s32.totalorder %v7010_v10, %v7154_v20  ;;  %9029 = vst [vmem:[#allocation6_spill] sm:$0xff] %v7180_v60  ;;  %vm8985_vm14 = vcmp.le.s32.totalorder %v7010_v10, %v7180_v60 }
 0x375   : > { %2120 = vmatpush.bf16.msrb.mxu2 %v2108_v6 }
 0x378   : > { %v2882_v11 = vpop.permute.xlu2 %2881 }
 0x379   : > { %5161 = vmatmul.msk.bf16.gmra.mxu1 %vm8993_vm1, %v6872_v12  ;;  %2121 = vmatpush.bf16.msrb.mxu2 %v6901_v50 }
 0x37a   : > { %2653 = vmatpush.bf16.xpose.msra.mxu1 %v2639_v61  ;;  %v7193_v61 = vadd.s32 104, %v7008_v56 }
 0x37c   : > { %9030 = vst [vmem:[#allocation7_spill] sm:$0xff] %v7193_v61  ;;  %vm1288_vm15 = vcmp.le.s32.totalorder %v7010_v10, %v7193_v61 }
 0x37d   : > { %2122 = vmatpush.bf16.msrb.mxu2 %v6909_v45  ;;  %v2874_v45 = vpop.permute.xlu0 %2873 }
 0x37e   : > { %5167 = vmatmul.msk.bf16.vlgmr.msrb.gmra.mxu3 %vm8993_vm1, %v6895_v18  ;;  %v7027_v18 = vadd.s32 8, %v7008_v56 }
 0x380   : > { %v2496_v59 = vpop.permute.xlu2 %2495  ;;  %vm1276_vm3 = vcmp.le.s32.totalorder %v7010_v10, %v7027_v18 }
 0x381   : > { %v1477_v12 = vpop.f32.mrf.mxu3  ;;  %2123 = vmatpush.bf16.msrb.mxu2 %v6919_v33  ;;  %2505 = vmatpush.bf16.msra.mxu0 %v2496_v59  ;;  %v2633_v33 = vsel %vm8993_vm1, %v6842_v21, 0 }
 0x382   : > { %2654 = vmatpush.bf16.xpose.msra.mxu1 %v2636_v38  ;;  %v7023_v50 = vsel %vm1275_vm2, %v1477_v12, -inf }
 0x383   : > { %1533 = vmax.xlane.f32.xlu0 %v7023_v50 }
 0x385   : > { %2124 = vmatpush.bf16.msrb.mxu2 %v6959_v40  ;;  %2506 = vmatpush.bf16.msra.mxu0 %v6937_v49  ;;  %v7044_v49 = vadd.s32 16, %v7008_v56  ;;  %v2490_v23 = vpop.permute.xlu0 %2489 }
 0x387   : > { %vm1277_vm4 = vcmp.le.s32.totalorder %v7010_v10, %v7044_v49 }
 0x389   : > { %v1479_v27 = vpop.f32.mrf.mxu3  ;;  %5162 = vmatmul.msk.bf16.gmra.mxu1 %vm8993_vm1, %v6854_v30  ;;  %2125 = vmatpush.bf16.msrb.mxu2 %v2098_v13  ;;  %v2630_v30 = vsel %vm8993_vm1, %v6809_v41, 0  ;;  %v2627_v41 = vsel %vm8993_vm1, %v6930_v35, 0  ;;  %v7167_v13 = vadd.s32 88, %v7008_v56 }
 0x38a   : > { %2507 = vmatpush.bf16.msra.mxu0 %v2492_v46  ;;  %2655 = vmatpush.bf16.xpose.msra.mxu1 %v2633_v33  ;;  %v7040_v6 = vsel %vm1276_vm3, %v1479_v27, -inf }
 0x38b   : > { %1535 = vmax.xlane.f32.xlu2 %v7040_v6  ;;  %vm1286_vm13 = vcmp.le.s32.totalorder %v7010_v10, %v7167_v13 }
 0x38d   : > { %2126 = vmatpush.bf16.msrb.mxu2 %v6924_v32  ;;  %v7060_v32 = vadd.s32 24, %v7008_v56  ;;  %v1813_v51 = vpop.permute.xlu0 %1812 }
 0x38e   : > { %2508 = vmatpush.bf16.msra.mxu0 %v2490_v23  ;;  %5168 = vmatmul.msk.bf16.gmra.mxu3 %vm8993_vm1, %v6941_v48 }
 0x38f   : > { %vm1278_vm5 = vcmp.le.s32.totalorder %v7010_v10, %v7060_v32 }
 0x391   : > { %2891 = vmatpush.bf16.msra.mxu2 %v2882_v11  ;;  %v1482_v21 = vpop.f32.mrf.mxu3 }
 0x392   : > { %2656 = vmatpush.bf16.xpose.msra.mxu1 %v2630_v30  ;;  %v7056_v40 = vsel %vm1277_vm4, %v1482_v21, -inf  ;;  %v7224_v21 = vadd.s32 120, %v7008_v56 }
 0x393   : > { %1537 = vmax.xlane.f32.xlu0 %v7056_v40 }
 0x394   : > { %9032 = vst [vmem:[#allocation9_spill] sm:$0xff] %v7224_v21 }
 0x395   : > { %2892 = vmatpush.bf16.msra.mxu2 %v2880_v47  ;;  %v2199_v27 = vpop.permute.xlu0 %2198 }
 0x399   : > { %2893 = vmatpush.bf16.msra.mxu2 %v6966_v15  ;;  %v1484_v48 = vpop.f32.mrf.mxu3  ;;  %5163 = vmatmul.msk.bf16.gmra.mxu1 %vm8993_vm1, %v6903_v22  ;;  %v7090_v15 = vadd.s32 40, %v7008_v56 }
 0x39a   : > { %2657 = vmatpush.bf16.xpose.msra.mxu1 %v2627_v41  ;;  %v7072_v53 = vsel %vm1278_vm5, %v1484_v48, -inf }
 0x39b   : > { %1539 = vmax.xlane.f32.xlu0 %v7072_v53  ;;  %vm1280_vm7 = vcmp.le.s32.totalorder %v7010_v10, %v7090_v15 }
 0x39d   : > { %2894 = vmatpush.bf16.msra.mxu2 %v6974_v26 }
 0x39e   : > { %5169 = vmatmul.msk.bf16.gmra.mxu3 %vm8993_vm1, %v6875_v44 }
 0x3a1   : > { %2895 = vmatpush.bf16.msra.mxu2 %v2874_v45  ;;  %v1487_v22 = vpop.f32.mrf.mxu3  ;;  %v7212_v45 = vadd.s32 112, %v7008_v56 }
 0x3a2   : > { %v7086_v35 = vsel %vm1279_vm6, %v1487_v22, -inf }
 0x3a3   : > { %1541 = vmax.xlane.f32.xlu2 %v7086_v35  ;;  %9031 = vst [vmem:[#allocation8_spill] sm:$0xff] %v7212_v45  ;;  %vm1289_vm0 = vcmp.le.s32.totalorder %v7010_v10, %v7212_v45 }
 0x3a9   : > { %v1489_v19 = vpop.f32.mrf.mxu3  ;;  %5164 = vmatmul.msk.bf16.gmra.mxu1 %vm8993_vm1, %v6848_v57 }
 0x3aa   : > { %v7099_v44 = vsel %vm1280_vm7, %v1489_v19, -inf }
 0x3ab   : > { %1543 = vmax.xlane.f32.xlu0 %v7099_v44 }
 0x3ae   : > { %5170 = vmatmul.msk.bf16.gmra.mxu3 %vm8993_vm1, %v6955_v8 }
 0x3b1   : > { %v1492_v26 = vpop.f32.mrf.mxu3 }
 0x3b2   : > { %v7112_v57 = vsel %vm1281_vm8, %v1492_v26, -inf }
 0x3b3   : > { %1545 = vmax.xlane.f32.xlu2 %v7112_v57 }
 0x3b9   : > { %v1494_v16 = vpop.f32.mrf.mxu3  ;;  %5165 = vmatmul.msk.bf16.gmra.mxu1 %vm8993_vm1, %v6917_v52 }
 0x3ba   : > { %v7125_v8 = vsel %vm1282_vm9, %v1494_v16, -inf }
 0x3bb   : > { %1547 = vmax.xlane.f32.xlu1 %v7125_v8 }
 0x3be   : > { %5171 = vmatmul.msk.bf16.gmra.mxu3 %vm8993_vm1, %v6885_v5 }
 0x3c1   : > { %v1497_v46 = vpop.f32.mrf.mxu3 }
 0x3c2   : > { %v7138_v52 = vsel %vm1283_vm10, %v1497_v46, -inf }
 0x3c3   : > { %1549 = vmax.xlane.f32.xlu2 %v7138_v52 }
 0x3c9   : > { %v1499_v4 = vpop.f32.mrf.mxu3  ;;  %5166 = vmatmul.msk.bf16.gmra.mxu1 %vm8993_vm1, %v1813_v51 }
 0x3ca   : > { %v7150_v5 = vsel %vm1284_vm11, %v1499_v4, -inf }
 0x3cb   : > { %1551 = vmax.xlane.f32.xlu0 %v7150_v5 }
 0x3ce   : > { %5172 = vmatmul.msk.bf16.gmra.mxu3 %vm8993_vm1, %v6983_v58 }
 0x3d1   : > { %v1502_v54 = vpop.f32.mrf.mxu3 }
 0x3d2   : > { %v7163_v25 = vsel %vm1285_vm12, %v1502_v54, -inf }
 0x3d3   : > { %1553 = vmax.xlane.f32.xlu0 %v7163_v25 }
 0x3d6   : > { %v1887_v9 = vpop.f32.mrf.mxu1 }
 0x3d7   : > { %v7207_v38 = vsel %vm1275_vm2, %v1887_v9, -inf }
 0x3d9   : > { %v1504_v39 = vpop.f32.mrf.mxu3  ;;  %5175 = vmatmul.msk.bf16.vlgmr.msra.gmra.mxu1 %vm8993_vm1, %v6864_v7 }
 0x3da   : > { %v7176_v58 = vsel %vm1286_vm13, %v1504_v39, -inf }
 0x3db   : > { %1555 = vmax.xlane.f32.xlu1 %v7176_v58 }
 0x3de   : > { %v1889_v11 = vpop.f32.mrf.mxu1  ;;  %5173 = vmatmul.msk.bf16.gmra.mxu3 %vm8993_vm1, %v6951_v2 }
 0x3df   : > { %v7238_v19 = vsel %vm1276_vm3, %v1889_v11, -inf }
 0x3e1   : > { %v1507_v47 = vpop.f32.mrf.mxu3 }
 0x3e2   : > { %v7189_v7 = vsel %vm8985_vm14, %v1507_v47, -inf  ;;  %vm1290_vm14 = vcmp.le.s32.totalorder %v7010_v10, %v7224_v21 }
 0x3e3   : > { %1557 = vmax.xlane.f32.xlu2 %v7189_v7 }
 0x3e6   : > { %v1892_v59 = vpop.f32.mrf.mxu1 }
 0x3e7   : > { %v7251_v54 = vsel %vm1277_vm4, %v1892_v59, -inf }
 0x3e9   : > { %v1509_v12 = vpop.f32.mrf.mxu3  ;;  %5176 = vmatmul.msk.bf16.gmra.mxu1 %vm8993_vm1, %v6905_v31 }
 0x3ea   : > { %v7202_v2 = vsel %vm1288_vm15, %v1509_v12, -inf }
 0x3eb   : > { %1559 = vmax.xlane.f32.xlu0 %v7202_v2  ;;  %1943 = vmax.xlane.f32.xlu2 %v7207_v38 }
 0x3ee   : > { %v1894_v33 = vpop.f32.mrf.mxu1  ;;  %5174 = vmatmul.msk.bf16.gmra.mxu3 %vm8993_vm1, %v2199_v27 }
 0x3f1   : > { %v1512_v31 = vpop.f32.mrf.mxu3 }
 0x3f2   : > { %v7220_v23 = vsel %vm1289_vm0, %v1512_v31, -inf }
 0x3f3   : > { %1561 = vmax.xlane.f32.xlu1 %v7220_v23 }
 0x3f6   : > { %v1897_v30 = vpop.f32.mrf.mxu1  ;;  %v1534_v48 = vpop.xlane.xlu0 %1533 }
 0x3f7   : > { %v1565_v26 = vsub.f32 %v7023_v50, %v1534_v48  ;;  %v7258_v50 = vsel %vm1278_vm5, %v1894_v33, -inf }
 0x3f9   : > { %v1514_v41 = vpop.f32.mrf.mxu3  ;;  %5177 = vmatmul.msk.bf16.gmra.mxu1 %vm8993_vm1, %v6949_v42  ;;  %v1581_v46 = vmul.f32 1.442695, %v1565_v26 }
 0x3fa   : > { %v7233_v22 = vsel %vm1290_vm14, %v1514_v41, -inf }
 0x3fb   : > { %1563 = vmax.xlane.f32.xlu2 %v7233_v22  ;;  %1945 = vmax.xlane.f32.xlu1 %v7238_v19  ;;  %5784 = vpow2.f32 %v1581_v46 }
 0x3fe   : > { %v1899_v16 = vpop.f32.mrf.mxu1  ;;  %v1536_v51 = vpop.xlane.xlu2 %1535 }
 0x3ff   : > { %v1566_v9 = vsub.f32 %v7040_v6, %v1536_v51  ;;  %v7269_v27 = vsel %vm1280_vm7, %v1899_v16, -inf }
 0x401   : > { %v2273_v42 = vpop.f32.mrf.mxu3  ;;  %v1583_v47 = vmul.f32 1.442695, %v1566_v9  ;;  %v7264_v59 = vpop.eup %5784 }
 0x402   : > { %v7246_v4 = vsel %vm1275_vm2, %v2273_v42, -inf }
 0x403   : > { %2329 = vmax.xlane.f32.xlu0 %v7246_v4  ;;  %1947 = vmax.xlane.f32.xlu1 %v7251_v54  ;;  %5786 = vpow2.f32 %v1583_v47 }
 0x404   : > { %1949 = vmax.xlane.f32.xlu2 %v7258_v50 }
 0x406   : > { %v1902_v39 = vpop.f32.mrf.mxu1  ;;  %v1538_v11 = vpop.xlane.xlu0 %1537 }
 0x407   : > { %v7292_v9 = vsel %vm1281_vm8, %v1902_v39, -inf }
 0x409   : > { %v2275_v12 = vpop.f32.mrf.mxu3  ;;  %5178 = vmatmul.msk.bf16.gmra.mxu1 %vm8993_vm1, %v6964_v3  ;;  %v7274_v26 = vpop.eup %5786 }
 0x40a   : > { %v7297_v47 = vsel %vm1276_vm3, %v2275_v12, -inf  ;;  %v7313_v12 = vsel %vm1279_vm6, %v1897_v30, -inf }
 0x40b   : > { %1953 = vmax.xlane.f32.xlu0 %v7269_v27  ;;  %1613 = vadd.xlane.f32.xlu1 %v7264_v59 }
 0x40e   : > { %v1904_v6 = vpop.f32.mrf.mxu1  ;;  %v1540_v33 = vpop.xlane.xlu0 %1539 }
 0x40f   : > { %v1568_v31 = vsub.f32 %v7072_v53, %v1540_v33 }
 0x411   : > { %v1587_v48 = vmul.f32 1.442695, %v1568_v31  ;;  %v2278_v41 = vpop.f32.mrf.mxu3 }
 0x412   : > { %v7279_v3 = vsel %vm1277_vm4, %v2278_v41, -inf }
 0x413   : > { %5788 = vpow2.f32 %v1587_v48  ;;  %2333 = vmax.xlane.f32.xlu2 %v7279_v3  ;;  %1615 = vadd.xlane.f32.xlu1 %v7274_v26 }
 0x416   : > { %v1542_v16 = vpop.xlane.xlu2 %1541  ;;  %v1907_v46 = vpop.f32.mrf.mxu1 }
 0x417   : > { %v1569_v51 = vsub.f32 %v7086_v35, %v1542_v16  ;;  %v1567_v35 = vsub.f32 %v7056_v40, %v1538_v11 }
 0x419   : > { %v7284_v42 = vpop.eup %5788  ;;  %v1589_v53 = vmul.f32 1.442695, %v1569_v51  ;;  %5179 = vmatmul.msk.bf16.gmra.mxu1 %vm8993_vm1, %v6932_v55  ;;  %v2280_v55 = vpop.f32.mrf.mxu3  ;;  %v1585_v31 = vmul.f32 1.442695, %v1567_v35  ;;  %v7323_v51 = vsel %vm1282_vm9, %v1904_v6, -inf }
 0x41a   : > { %1619 = vadd.xlane.f32.xlu0 %v7284_v42  ;;  %v7307_v39 = vsel %vm1278_vm5, %v2280_v55, -inf }
 0x41b   : > { %5790 = vpow2.f32 %v1589_v53  ;;  %1955 = vmax.xlane.f32.xlu2 %v7292_v9  ;;  %2331 = vmax.xlane.f32.xlu1 %v7297_v47 }
 0x41c   : > { %5792 = vpow2.f32 %v1585_v31 }
 0x41e   : > { %v1909_v33 = vpop.f32.mrf.mxu1  ;;  %v1544_v48 = vpop.xlane.xlu0 %1543 }
 0x41f   : > { %v1570_v40 = vsub.f32 %v7099_v44, %v1544_v48  ;;  %v7331_v44 = vsel %vm1283_vm10, %v1907_v46, -inf  ;;  %v7342_v46 = vsel %vm1284_vm11, %v1909_v33, -inf }
 0x421   : > { %v7302_v41 = vpop.eup %5790  ;;  %v1591_v16 = vmul.f32 1.442695, %v1570_v40 }
 0x422   : > { %2335 = vmax.xlane.f32.xlu0 %v7307_v39  ;;  %v7325_v53 = vpop.eup %5792 }
 0x423   : > { %1621 = vadd.xlane.f32.xlu2 %v7302_v41  ;;  %1951 = vmax.xlane.f32.xlu1 %v7313_v12  ;;  %5794 = vpow2.f32 %v1591_v16 }
 0x426   : > { %v1912_v11 = vpop.f32.mrf.mxu1  ;;  %v1546_v30 = vpop.xlane.xlu2 %1545 }
 0x429   : > { %5180 = vmatmul.msk.bf16.gmra.mxu1 %vm8993_vm1, %v6939_v37  ;;  %v2283_v37 = vpop.f32.mrf.mxu3  ;;  %v7336_v31 = vpop.eup %5794 }
 0x42a   : > { %1957 = vmax.xlane.f32.xlu0 %v7323_v51  ;;  %v7347_v40 = vsel %vm1279_vm6, %v2283_v37, -inf }
 0x42b   : > { %1959 = vmax.xlane.f32.xlu2 %v7331_v44  ;;  %1617 = vadd.xlane.f32.xlu1 %v7325_v53  ;;  %9033 = vst [vmem:[#allocation10_spill] sm:$0xff] %v7347_v40 }
 0x42e   : > { %v1548_v35 = vpop.xlane.xlu1 %1547  ;;  %v1914_v55 = vpop.f32.mrf.mxu1 }
 0x42f   : > { %v1572_v6 = vsub.f32 %v7125_v8, %v1548_v35  ;;  %v1571_v8 = vsub.f32 %v7112_v57, %v1546_v30 }
 0x431   : > { %v1595_v48 = vmul.f32 1.442695, %v1572_v6  ;;  %v2285_v6 = vpop.f32.mrf.mxu3  ;;  %v1593_v36 = vmul.f32 1.442695, %v1571_v8 }
 0x432   : > { %1623 = vadd.xlane.f32.xlu0 %v7336_v31  ;;  %v7360_v37 = vsel %vm1280_vm7, %v2285_v6, -inf }
 0x433   : > { %5796 = vpow2.f32 %v1595_v48  ;;  %1961 = vmax.xlane.f32.xlu2 %v7342_v46  ;;  %2337 = vmax.xlane.f32.xlu1 %v7347_v40 }
 0x436   : > { %v1550_v16 = vpop.xlane.xlu2 %1549  ;;  %v1917_v35 = vpop.f32.mrf.mxu1 }
 0x437   : > { %v1573_v17 = vsub.f32 %v7138_v52, %v1550_v16 }
 0x439   : > { %v7353_v33 = vpop.eup %5796  ;;  %v1597_v14 = vmul.f32 1.442695, %v1573_v17  ;;  %5181 = vmatmul.msk.bf16.gmra.mxu1 %vm8993_vm1, %v6990_v28 }
 0x43b   : > { %5798 = vpow2.f32 %v1597_v14  ;;  %1627 = vadd.xlane.f32.xlu2 %v7353_v33  ;;  %2339 = vmax.xlane.f32.xlu1 %v7360_v37 }
 0x43c   : > { %5800 = vpow2.f32 %v1593_v36  ;;  %v7377_v36 = vsel %vm1286_vm13, %v1914_v55, -inf }
 0x43e   : > { %v1919_v57 = vpop.f32.mrf.mxu1  ;;  %v1552_v52 = vpop.xlane.xlu0 %1551 }
 0x43f   : > { %v1574_v17 = vsub.f32 %v7150_v5, %v1552_v52  ;;  %v7383_v5 = vsel %vm1285_vm12, %v1912_v11, -inf }
 0x440   : > { %9034 = vst [vmem:[#allocation11_spill] sm:$0xff] %v7383_v5 }
 0x441   : > { %v7364_v30 = vpop.eup %5798  ;;  %v1599_v16 = vmul.f32 1.442695, %v1574_v17 }
 0x442   : > { %v7366_v48 = vpop.eup %5800  ;;  %1629 = vadd.xlane.f32.xlu0 %v7364_v30 }
 0x443   : > { %1625 = vadd.xlane.f32.xlu1 %v7366_v48 }
 0x446   : > { %v1922_v28 = vpop.f32.mrf.mxu1  ;;  %v1554_v8 = vpop.xlane.xlu0 %1553 }
 0x447   : > { %v1575_v14 = vsub.f32 %v7163_v25, %v1554_v8 }
 0x449   : > { %v1601_v6 = vmul.f32 1.442695, %v1575_v14  ;;  %5182 = vmatmul.msk.bf16.gmra.mxu1 %vm8993_vm1, %v6992_v43  ;;  %vm9036_vm1 = vcmp.le.s32.totalorder %v7010_v10, %v7180_v60 }
 0x44a   : > { %1965 = vmax.xlane.f32.xlu0 %v7377_v36 }
 0x44b   : > { %5802 = vpow2.f32 %v1601_v6  ;;  %1963 = vmax.xlane.f32.xlu1 %v7383_v5 }
 0x44c   : > { %5804 = vpow2.f32 %v1599_v16 }
 0x44e   : > { %v1556_v25 = vpop.xlane.xlu1 %1555  ;;  %v1924_v43 = vpop.f32.mrf.mxu1 }
 0x44f   : > { %v1576_v52 = vsub.f32 %v7176_v58, %v1556_v25  ;;  %v7399_v58 = vsel %vm1288_vm15, %v1919_v57, -inf  ;;  %v7406_v25 = vsel %vm9036_vm1, %v1917_v35, -inf  ;;  %v7415_v57 = vsel %vm1289_vm0, %v1922_v28, -inf }
 0x450   : > { %9035 = vst [vmem:[#allocation12_spill] sm:$0xff] %v7399_v58  ;;  %v7426_v28 = vsel %vm1290_vm14, %v1924_v43, -inf }
 0x451   : > { %v7387_v17 = vpop.eup %5802  ;;  %v1603_v8 = vmul.f32 1.442695, %v1576_v52  ;;  %9037 = vst [vmem:[#allocation13_spill] sm:$0xff] %v7426_v28 }
 0x452   : > { %v7389_v55 = vpop.eup %5804  ;;  %1633 = vadd.xlane.f32.xlu2 %v7387_v17 }
 0x453   : > { %5806 = vpow2.f32 %v1603_v8  ;;  %1631 = vadd.xlane.f32.xlu1 %v7389_v55 }
 0x456   : > { %v1558_v11 = vpop.xlane.xlu2 %1557  ;;  %v2659_v40 = vpop.f32.mrf.mxu1 }
 0x457   : > { %v1577_v14 = vsub.f32 %v7189_v7, %v1558_v11 }
 0x459   : > { %v7394_v6 = vpop.eup %5806  ;;  %v1605_v16 = vmul.f32 1.442695, %v1577_v14 }
 0x45a   : > { %1635 = vadd.xlane.f32.xlu0 %v7394_v6  ;;  %1969 = vmax.xlane.f32.xlu2 %v7399_v58 }
 0x45b   : > { %5808 = vpow2.f32 %v1605_v16  ;;  %1967 = vmax.xlane.f32.xlu1 %v7406_v25 }
 0x45e   : > { %v1560_v7 = vpop.xlane.xlu0 %1559  ;;  %v1944_v11 = vpop.xlane.xlu2 %1943 }
 0x45f   : > { %v1578_v52 = vsub.f32 %v7202_v2, %v1560_v7  ;;  %v2661_v58 = vpop.f32.mrf.mxu1  ;;  %v1975_v35 = vsub.f32 %v7207_v38, %v1944_v11 }
 0x460   : > { %v7464_v32 = vsel %vm1276_vm3, %v2661_v58, -inf  ;;  %vm9058_vm3 = vcmask 261120  }
 0x461   : > { %v7410_v8 = vpop.eup %5808  ;;  %v1607_v14 = vmul.f32 1.442695, %v1578_v52  ;;  %v1991_v7 = vmul.f32 1.442695, %v1975_v35 }
 0x462   : > { %1971 = vmax.xlane.f32.xlu0 %v7415_v57 }
 0x463   : > { %1637 = vadd.xlane.f32.xlu1 %v7410_v8  ;;  %5810 = vpow2.f32 %v1607_v14 }
 0x466   : > { %v1562_v16 = vpop.xlane.xlu1 %1561 }
 0x467   : > { %v1579_v2 = vsub.f32 %v7220_v23, %v1562_v16  ;;  %v2664_v38 = vpop.f32.mrf.mxu1 }
 0x469   : > { %v1609_v60 = vmul.f32 1.442695, %v1579_v2  ;;  %v7421_v61 = vpop.eup %5810 }
 0x46a   : > { %1639 = vadd.xlane.f32.xlu2 %v7421_v61 }
 0x46b   : > { %5812 = vpow2.f32 %v1609_v60  ;;  %1973 = vmax.xlane.f32.xlu1 %v7426_v28  ;;  %v7439_v60 = vsel %vm1275_vm2, %v2659_v40, -inf  ;;  %vm9056_vm2 = vmmov %vm9036_vm1 }
 0x46c   : > { %5814 = vpow2.f32 %v1991_v7 }
 0x46e   : > { %v1564_v52 = vpop.xlane.xlu2 %1563  ;;  %v1946_v11 = vpop.xlane.xlu1 %1945 }
 0x46f   : > { %v1580_v23 = vsub.f32 %v7233_v22, %v1564_v52  ;;  %v1976_v14 = vsub.f32 %v7238_v19, %v1946_v11  ;;  %v2666_v43 = vpop.f32.mrf.mxu1 }
 0x470   : > { %v7454_v40 = vsel %vm1278_vm5, %v2666_v43, -inf  ;;  %vm3205_vm5 = vcmask 785408  }
 0x471   : > { %v7432_v35 = vpop.eup %5812  ;;  %v1611_v16 = vmul.f32 1.442695, %v1580_v23  ;;  %v1993_v2 = vmul.f32 1.442695, %v1976_v14  ;;  %9038 = vst [vmem:[#allocation14_spill] sm:$0xff] %v7454_v40 }
 0x472   : > { %v7434_v21 = vpop.eup %5814  ;;  %1641 = vadd.xlane.f32.xlu0 %v7432_v35  ;;  %2715 = vmax.xlane.f32.xlu2 %v7439_v60 }
 0x473   : > { %5816 = vpow2.f32 %v1611_v16  ;;  %2023 = vadd.xlane.f32.xlu1 %v7434_v21 }
 0x474   : > { %5818 = vpow2.f32 %v1993_v2 }
 0x476   : > { %v1948_v22 = vpop.xlane.xlu1 %1947  ;;  %v7444_v19 = vpop.xlane.xlu0 %2329 }
 0x477   : > { %v1950_v52 = vpop.xlane.xlu2 %1949  ;;  %v1977_v56 = vsub.f32 %v7251_v54, %v1948_v22  ;;  %v7469_v22 = vsel %vm1277_vm4, %v2664_v38, -inf  ;;  %vm3188_vm4 = vcmask 523264  }
 0x478   : > { %v1978_v23 = vsub.f32 %v7258_v50, %v1950_v52 }
 0x479   : > { %v7446_v7 = vpop.eup %5816  ;;  %v1995_v14 = vmul.f32 1.442695, %v1977_v56 }
 0x47a   : > { %v7448_v11 = vpop.eup %5818  ;;  %2721 = vmax.xlane.f32.xlu2 %v7454_v40  ;;  %v1997_v45 = vmul.f32 1.442695, %v1978_v23 }
 0x47b   : > { %2025 = vadd.xlane.f32.xlu0 %v7448_v11  ;;  %1643 = vadd.xlane.f32.xlu1 %v7446_v7  ;;  %5820 = vpow2.f32 %v1995_v14  ;;  %v2669_v14 = vpop.f32.mrf.mxu1 }
 0x47e   : > { %v1614_v16 = vpop.xlane.xlu1 %1613  ;;  %v1954_v2 = vpop.xlane.xlu0 %1953 }
 0x47f   : > { %v1980_v28 = vsub.f32 %v7269_v27, %v1954_v2 }
 0x481   : > { %v2001_v54 = vmul.f32 1.442695, %v1980_v28  ;;  %v7475_v28 = vpop.eup %5820 }
 0x483   : > { %5822 = vpow2.f32 %v2001_v54  ;;  %2717 = vmax.xlane.f32.xlu0 %v7464_v32  ;;  %2719 = vmax.xlane.f32.xlu1 %v7469_v22 }
 0x484   : > { %5824 = vpow2.f32 %v1997_v45 }
 0x485   : > { %5826 = vrcp.f32 %v1614_v16 }
 0x486   : > { %v7473_v50 = vpop.xlane.xlu2 %2333  ;;  %v1616_v27 = vpop.xlane.xlu1 %1615 }
 0x487   : > { %5828 = vrcp.f32 %v1616_v27  ;;  %v7490_v27 = vsel %vm1279_vm6, %v2669_v14, -inf  ;;  %vm9059_vm6 = vmmov %vm9058_vm3 }
 0x489   : > { %v7477_v18 = vpop.eup %5822 }
 0x48a   : > { %v7479_v58 = vpop.eup %5824  ;;  %2033 = vadd.xlane.f32.xlu2 %v7477_v18 }
 0x48b   : > { %v5827_v49 = vpop.eup %5826  ;;  %2027 = vadd.xlane.f32.xlu0 %v7475_v28  ;;  %2029 = vadd.xlane.f32.xlu1 %v7479_v58 }
 0x48c   : > { %v1661_v56 = vmul.f32 %v5827_v49, %v7264_v59 }
 0x48d   : > { %v5829_v45 = vpop.eup %5828  ;;  %v1620_v38 = vpop.xlane.xlu0 %1619 }
 0x48e   : > { %v1956_v43 = vpop.xlane.xlu2 %1955  ;;  %v2332_v52 = vpop.xlane.xlu1 %2331  ;;  %v1662_v23 = vmul.f32 %v5829_v45, %v7274_v26 }
 0x48f   : > { %v1981_v16 = vsub.f32 %v7292_v9, %v1956_v43  ;;  %v2362_v40 = vsub.f32 %v7297_v47, %v2332_v52 }
 0x490   : > { %v1677_v2 = vpack.c.bf16 %v1662_v23, %v1661_v56 }
 0x491   : > { %v2003_v54 = vmul.f32 1.442695, %v1981_v16  ;;  %v2379_v9 = vmul.f32 1.442695, %v2362_v40  ;;  %v2288_v40 = vpop.f32.mrf.mxu3 }
 0x492   : > { %1741 = vmatmul.bf16.vlgmr.msrb.gmra.mxu0 %v1677_v2 }
 0x493   : > { %5830 = vpow2.f32 %v2003_v54  ;;  %2723 = vmax.xlane.f32.xlu0 %v7490_v27 }
 0x495   : > { %v7494_v5 = vpop.xlane.xlu0 %2335 }
 0x496   : > { %v1622_v59 = vpop.xlane.xlu2 %1621  ;;  %v1952_v26 = vpop.xlane.xlu1 %1951 }
 0x497   : > { %v1979_v49 = vsub.f32 %v7313_v12, %v1952_v26 }
 0x499   : > { %v7497_v45 = vpop.eup %5830  ;;  %v1999_v43 = vmul.f32 1.442695, %v1979_v49 }
 0x49b   : > { %5832 = vpow2.f32 %v1999_v43  ;;  %2035 = vadd.xlane.f32.xlu0 %v7497_v45  ;;  %v7518_v43 = vsel %vm1281_vm8, %v2288_v40, -inf }
 0x49c   : > { %5834 = vpow2.f32 %v2379_v9 }
 0x49d   : > { %5836 = vrcp.f32 %v1620_v38  ;;  %v7500_v63 = vpop.xlane.xlu0 %1957 }
 0x49e   : > { %v1960_v56 = vpop.xlane.xlu2 %1959  ;;  %v1618_v23 = vpop.xlane.xlu1 %1617 }
 0x49f   : > { %5838 = vrcp.f32 %v1618_v23 }
 0x4a1   : > { %v7502_v47 = vpop.eup %5832 }
 0x4a2   : > { %v7504_v52 = vpop.eup %5834  ;;  %2031 = vadd.xlane.f32.xlu1 %v7502_v47  ;;  %2871 = vrot.lane.b32.xlu2 %v6860_v1, %s6083_s13 }
 0x4a3   : > { %v5837_v12 = vpop.eup %5836  ;;  %2411 = vadd.xlane.f32.xlu0 %v7504_v52 }
 0x4a4   : > { %v1664_v54 = vmul.f32 %v5837_v12, %v7284_v42 }
 0x4a5   : > { %v5839_v14 = vpop.eup %5838  ;;  %v1624_v26 = vpop.xlane.xlu0 %1623 }
 0x4a6   : > { %v1962_v38 = vpop.xlane.xlu2 %1961  ;;  %v7510_v16 = vpop.xlane.xlu1 %2337  ;;  %v1663_v2 = vmul.f32 %v5839_v14, %v7325_v53  ;;  %5840 = vrcp.f32 %v1624_v26 }
 0x4a7   : > { %9039 = vst [vmem:[#allocation15_spill] sm:$0xff] %v7510_v16  ;;  %v1984_v49 = vsub.f32 %v7342_v46, %v1962_v38  ;;  %v2290_v16 = vpop.f32.mrf.mxu3  ;;  %v7534_v26 = vpop.f32.mrf.mxu1 }
 0x4a8   : > { %v1678_v9 = vpack.c.bf16 %v1664_v54, %v1663_v2  ;;  %v7528_v46 = vsel %vm1282_vm9, %v2290_v16, -inf }
 0x4a9   : > { %v2009_v23 = vmul.f32 1.442695, %v1984_v49  ;;  %9041 = vst [vmem:[#allocation17_spill] sm:$0xff] %v7528_v46 }
 0x4aa   : > { %2341 = vmax.xlane.f32.xlu1 %v7518_v43  ;;  %1746 = vmatmul.bf16.gmra.mxu0 %v1678_v9 }
 0x4ab   : > { %5842 = vpow2.f32 %v2009_v23 }
 0x4ac   : > { %5844 = vrcp.f32 %v1622_v59  ;;  %v5841_v42 = vpop.eup %5840 }
 0x4ad   : > { %v1666_v14 = vmul.f32 %v5841_v42, %v7336_v31 }
 0x4ae   : > { %v7521_v53 = vpop.xlane.xlu1 %2339  ;;  %v1628_v54 = vpop.xlane.xlu2 %1627 }
 0x4b1   : > { %v7523_v12 = vpop.eup %5842 }
 0x4b2   : > { %9040 = vst [vmem:[#allocation16_spill] sm:$0xff] %v7523_v12  ;;  %2041 = vadd.xlane.f32.xlu0 %v7523_v12  ;;  %2343 = vmax.xlane.f32.xlu1 %v7528_v46  ;;  %v5845_v40 = vpop.eup %5844  ;;  %v1983_v46 = vsub.f32 %v7331_v44, %v1960_v56  ;;  %v2361_v44 = vsub.f32 %v7246_v4, %v7444_v19 }
 0x4b3   : > { %v1665_v59 = vmul.f32 %v5845_v40, %v7302_v41  ;;  %v2674_v41 = vpop.f32.mrf.mxu1 }
 0x4b4   : > { %v2007_v40 = vmul.f32 1.442695, %v1983_v46  ;;  %v2377_v34 = vmul.f32 1.442695, %v2361_v44 }
 0x4b5   : > { %v1679_v2 = vpack.c.bf16 %v1666_v14, %v1665_v59  ;;  %v1630_v9 = vpop.xlane.xlu0 %1629 }
 0x4b6   : > { %v1626_v38 = vpop.xlane.xlu1 %1625 }
 0x4b7   : > { %5846 = vrcp.f32 %v1626_v38  ;;  %v7544_v38 = vsel %vm1281_vm8, %v2674_v41, -inf  ;;  %vm9061_vm8 = vmmov %vm9058_vm3 }
 0x4b8   : > { %5848 = vrcp.f32 %v1628_v54 }
 0x4ba   : > { %1751 = vmatmul.bf16.gmra.mxu0 %v1679_v2 }
 0x4bd   : > { %v5847_v16 = vpop.eup %5846  ;;  %v1966_v59 = vpop.xlane.xlu0 %1965 }
 0x4be   : > { %v7536_v49 = vpop.xlane.xlu1 %1963  ;;  %v5849_v23 = vpop.eup %5848  ;;  %v1667_v12 = vmul.f32 %v5847_v16, %v7366_v48 }
 0x4bf   : > { %v1668_v42 = vmul.f32 %v5849_v23, %v7353_v33 }
 0x4c1   : > { %v1680_v14 = vpack.c.bf16 %v1668_v42, %v1667_v12 }
 0x4c5   : > { %v1634_v48 = vpop.xlane.xlu2 %1633 }
 0x4c6   : > { %v1632_v31 = vpop.xlane.xlu1 %1631 }
 0x4c7   : > { %5850 = vrcp.f32 %v1632_v31 }
 0x4c8   : > { %5852 = vpow2.f32 %v2007_v40 }
 0x4c9   : > { %5854 = vrcp.f32 %v1630_v9 }
 0x4ca   : > { %1756 = vmatmul.bf16.gmra.mxu0 %v1680_v14 }
 0x4cb   : > { %2487 = vrot.lane.b32.xlu1 %v6775_v62, %s6082_s30  ;;  %2727 = vmax.xlane.f32.xlu2 %v7544_v38  ;;  %v1986_v62 = vsub.f32 %v7377_v36, %v1966_v59  ;;  %v7566_v36 = vpop.f32.mrf.mxu1 }
 0x4cd   : > { %v5851_v12 = vpop.eup %5850  ;;  %v1636_v16 = vpop.xlane.xlu0 %1635  ;;  %v2013_v23 = vmul.f32 1.442695, %v1986_v62 }
 0x4ce   : > { %v1968_v33 = vpop.xlane.xlu1 %1967  ;;  %v7552_v2 = vpop.eup %5852  ;;  %v1670_v4 = vmul.f32 %v5851_v12, %v7389_v55 }
 0x4cf   : > { %v1987_v56 = vsub.f32 %v7406_v25, %v1968_v33  ;;  %v5855_v54 = vpop.eup %5854  ;;  %v7560_v42 = vpop.xlane.xlu2 %1969 }
 0x4d0   : > { %v1669_v9 = vmul.f32 %v5855_v54, %v7364_v30  ;;  %v2293_v62 = vpop.f32.mrf.mxu3 }
 0x4d1   : > { %v2015_v46 = vmul.f32 1.442695, %v1987_v56 }
 0x4d2   : > { %v1681_v25 = vpack.c.bf16 %v1670_v4, %v1669_v9 }
 0x4d3   : > { %5856 = vpow2.f32 %v2015_v46  ;;  %2039 = vadd.xlane.f32.xlu2 %v7552_v2  ;;  %v2679_v46 = vpop.f32.mrf.mxu1 }
 0x4d4   : > { %5858 = vpow2.f32 %v2377_v34 }
 0x4d5   : > { %5860 = vrcp.f32 %v1636_v16  ;;  %v7568_v55 = vpop.xlane.xlu0 %1971 }
 0x4d6   : > { %v1638_v19 = vpop.xlane.xlu1 %1637  ;;  %5862 = vpow2.f32 %v2013_v23  ;;  %v1989_v24 = vsub.f32 %v7415_v57, %v7568_v55 }
 0x4d7   : > { %5864 = vrcp.f32 %v1634_v48  ;;  %v7580_v48 = vsel %vm1283_vm10, %v2679_v46, -inf }
 0x4d9   : > { %v7558_v31 = vpop.eup %5856 }
 0x4da   : > { %v7562_v41 = vpop.eup %5858  ;;  %2047 = vadd.xlane.f32.xlu0 %v7558_v31  ;;  %1761 = vmatmul.bf16.gmra.mxu0 %v1681_v25  ;;  %v7592_v25 = vsel %vm1283_vm10, %v2293_v62, -inf  ;;  %vm9063_vm10 = vmmov %vm9058_vm3 }
 0x4db   : > { %2409 = vadd.xlane.f32.xlu2 %v7562_v41  ;;  %v5861_v40 = vpop.eup %5860 }
 0x4dc   : > { %v7572_v59 = vpop.eup %5862  ;;  %v1672_v33 = vmul.f32 %v5861_v40, %v7394_v6  ;;  %v1982_v6 = vsub.f32 %v7323_v51, %v7500_v63  ;;  %v2363_v51 = vsub.f32 %v7279_v3, %v7473_v50 }
 0x4dd   : > { %v1640_v14 = vpop.xlane.xlu2 %1639  ;;  %v5865_v44 = vpop.eup %5864 }
 0x4de   : > { %v7570_v30 = vpop.xlane.xlu1 %1973  ;;  %v1671_v12 = vmul.f32 %v5865_v44, %v7387_v17  ;;  %5866 = vrcp.f32 %v1640_v14  ;;  %v2005_v40 = vmul.f32 1.442695, %v1982_v6 }
 0x4df   : > { %5868 = vrcp.f32 %v1638_v19 }
 0x4e0   : > { %v1682_v54 = vpack.c.bf16 %v1672_v33, %v1671_v12 }
 0x4e3   : > { %2045 = vadd.xlane.f32.xlu2 %v7572_v59 }
 0x4e4   : > { %v5867_v9 = vpop.eup %5866 }
 0x4e5   : > { %v1642_v56 = vpop.xlane.xlu0 %1641  ;;  %v7582_v16 = vpop.xlane.xlu2 %2715  ;;  %v1674_v63 = vmul.f32 %v5867_v9, %v7421_v61 }
 0x4e6   : > { %v2024_v34 = vpop.xlane.xlu1 %2023  ;;  %v5869_v23 = vpop.eup %5868 }
 0x4e7   : > { %5870 = vrcp.f32 %v2024_v34  ;;  %v1673_v50 = vmul.f32 %v5869_v23, %v7410_v8  ;;  %v2295_v34 = vpop.f32.mrf.mxu3  ;;  %v2364_v8 = vsub.f32 %v7307_v39, %v7494_v5  ;;  %v2681_v23 = vpop.f32.mrf.mxu1  ;;  %v2747_v39 = vsub.f32 %v7439_v60, %v7582_v16 }
 0x4e8   : > { %v7615_v61 = vsel %vm1284_vm11, %v2295_v34, -inf  ;;  %v7632_v5 = vsel %vm1282_vm9, %v7566_v36, -inf  ;;  %vm9062_vm9 = vmmov %vm9058_vm3 }
 0x4e9   : > { %v1683_v46 = vpack.c.bf16 %v1674_v63, %v1673_v50  ;;  %v2383_v6 = vmul.f32 1.442695, %v2364_v8  ;;  %v2763_v16 = vmul.f32 1.442695, %v2747_v39  ;;  %v2019_v50 = vmul.f32 1.442695, %v1989_v24 }
 0x4ea   : > { %1766 = vmatmul.bf16.gmra.mxu0 %v1682_v54 }
 0x4eb   : > { %2731 = vmax.xlane.f32.xlu2 %v7580_v48 }
 0x4ed   : > { %v5871_v19 = vpop.eup %5870  ;;  %v7604_v44 = vpop.xlane.xlu2 %2721 }
 0x4ee   : > { %v2026_v17 = vpop.xlane.xlu0 %2025  ;;  %2485 = vrot.lane.b32.xlu0 %v6860_v1, %s6082_s30  ;;  %v1644_v4 = vpop.xlane.xlu1 %1643  ;;  %v7601_v1 = vsel %vm1280_vm7, %v7534_v26, -inf  ;;  %v2071_v33 = vmul.f32 %v5871_v19, %v7434_v21  ;;  %v2381_v26 = vmul.f32 1.442695, %v2363_v51  ;;  %vm9060_vm7 = vmmov %vm9058_vm3 }
 0x4ef   : > { %5872 = vrcp.f32 %v2026_v17 }
 0x4f0   : > { %5874 = vpow2.f32 %v2005_v40 }
 0x4f1   : > { %5876 = vrcp.f32 %v1644_v4 }
 0x4f2   : > { %5878 = vpow2.f32 %v2381_v26  ;;  %v2298_v26 = vpop.f32.mrf.mxu3 }
 0x4f3   : > { %2345 = vmax.xlane.f32.xlu2 %v7592_v25  ;;  %5880 = vrcp.f32 %v1642_v56  ;;  %v7680_v0 = vsel %vm1285_vm12, %v2298_v26, -inf }
 0x4f5   : > { %v5873_v14 = vpop.eup %5872  ;;  %2725 = vmax.xlane.f32.xlu1 %v7601_v1 }
 0x4f6   : > { %v7607_v29 = vpop.xlane.xlu0 %2717  ;;  %v2072_v3 = vmul.f32 %v5873_v14, %v7448_v11  ;;  %v2720_v15 = vpop.xlane.xlu1 %2719 }
 0x4f7   : > { %v7618_v21 = vpop.eup %5874 }
 0x4f8   : > { %v2087_v12 = vpack.c.bf16 %v2072_v3, %v2071_v33  ;;  %v5877_v17 = vpop.eup %5876 }
 0x4f9   : > { %v7623_v9 = vpop.eup %5878  ;;  %v1676_v56 = vmul.f32 %v5877_v17, %v7446_v7  ;;  %v2684_v7 = vpop.f32.mrf.mxu1 }
 0x4fa   : > { %2127 = vmatmul.bf16.vlgmr.msrb.gmra.mxu2 %v2087_v12  ;;  %1771 = vmatmul.bf16.gmra.mxu0 %v1683_v46  ;;  %v5881_v4 = vpop.eup %5880  ;;  %v2748_v12 = vsub.f32 %v7464_v32, %v7607_v29  ;;  %v7666_v32 = vsel %vm1284_vm11, %v2681_v23, -inf  ;;  %v2300_v17 = vpop.f32.mrf.mxu3  ;;  %vm9064_vm11 = vmmov %vm9058_vm3 }
 0x4fb   : > { %2347 = vmax.xlane.f32.xlu2 %v7615_v61  ;;  %v1675_v63 = vmul.f32 %v5881_v4, %v7432_v35 }
 0x4fd   : > { %v2034_v11 = vpop.xlane.xlu2 %2033  ;;  %2037 = vadd.xlane.f32.xlu1 %v7618_v21  ;;  %v1684_v33 = vpack.c.bf16 %v1676_v56, %v1675_v63  ;;  %v9043_v63 = vld [vmem:[#allocation11_spill] sm:$0xff] }
 0x4fe   : > { %v2028_v54 = vpop.xlane.xlu0 %2027  ;;  %v2030_v62 = vpop.xlane.xlu1 %2029  ;;  %v1985_v20 = vsub.f32 %v9043_v63, %v7536_v49 }
 0x4ff   : > { %5882 = vrcp.f32 %v2028_v54 }
 0x500   : > { %5884 = vrcp.f32 %v2030_v62  ;;  %v9042_v62 = vld [vmem:[#allocation5_spill] sm:$0xff]  ;;  %v2011_v24 = vmul.f32 1.442695, %v1985_v20 }
 0x501   : > { %5886 = vpow2.f32 %v2383_v6  ;;  %v2686_v55 = vpop.f32.mrf.mxu1 }
 0x502   : > { %5888 = vpow2.f32 %v2763_v16  ;;  %v7656_v8 = vsel %vm1286_vm13, %v2686_v55, -inf  ;;  %v7683_v39 = vpop.f32.mrf.mxu3 }
 0x503   : > { %2413 = vadd.xlane.f32.xlu2 %v7623_v9  ;;  %5890 = vpow2.f32 %v2019_v50 }
 0x504   : > { %5892 = vrcp.f32 %v2034_v11 }
 0x505   : > { %v5883_v40 = vpop.eup %5882  ;;  %v2872_v19 = vpop.permute.xlu2 %2871  ;;  %2729 = vmax.xlane.f32.xlu1 %v7632_v5 }
 0x506   : > { %v5885_v51 = vpop.eup %5884  ;;  %2896 = vmatpush.bf16.msra.mxu2 %v2872_v19  ;;  %v2073_v14 = vmul.f32 %v5883_v40, %v7475_v28  ;;  %v2749_v28 = vsub.f32 %v7469_v22, %v2720_v15  ;;  %v2765_v15 = vmul.f32 1.442695, %v2748_v12  ;;  %v2724_v56 = vpop.xlane.xlu0 %2723 }
 0x507   : > { %v2074_v60 = vmul.f32 %v5885_v51, %v7479_v58  ;;  %v7641_v3 = vpop.eup %5886  ;;  %v7699_v51 = vsel %vm1286_vm13, %v2300_v17, -inf }
 0x508   : > { %v7644_v35 = vpop.eup %5888  ;;  %v2767_v34 = vmul.f32 1.442695, %v2749_v28 }
 0x509   : > { %v2088_v36 = vpack.c.bf16 %v2074_v60, %v2073_v14  ;;  %v7648_v57 = vpop.eup %5890  ;;  %v2751_v14 = vsub.f32 %v7490_v27, %v2724_v56  ;;  %v2689_v60 = vpop.f32.mrf.mxu1 }
 0x50a   : > { %1776 = vmatmul.bf16.gmra.mxu0 %v1684_v33  ;;  %v5893_v46 = vpop.eup %5892  ;;  %v2305_v19 = vpop.f32.mrf.mxu3  ;;  %v7714_v28 = vsel %vm9036_vm1, %v2689_v60, -inf }
 0x50b   : > { %2132 = vmatmul.bf16.gmra.mxu2 %v2088_v36  ;;  %2415 = vadd.xlane.f32.xlu2 %v7641_v3  ;;  %v2076_v54 = vmul.f32 %v5893_v46, %v7477_v18  ;;  %v2366_v18 = vsub.f32 %v7360_v37, %v7521_v53  ;;  %v7688_v37 = vsel %vm1285_vm12, %v2684_v7, -inf  ;;  %v7708_v33 = vsel %vm1288_vm15, %v2305_v19, -inf  ;;  %vm9065_vm12 = vmmov %vm9058_vm3 }
 0x50c   : > { %v2771_v36 = vmul.f32 1.442695, %v2751_v14 }
 0x50d   : > { %v2387_v4 = vmul.f32 1.442695, %v2366_v18 }
 0x50e   : > { %v2036_v7 = vpop.xlane.xlu0 %2035 }
 0x513   : > { %2795 = vadd.xlane.f32.xlu2 %v7644_v35 }
 0x515   : > { %v2032_v58 = vpop.xlane.xlu1 %2031 }
 0x516   : > { %5894 = vrcp.f32 %v2032_v58 }
 0x517   : > { %5896 = vpow2.f32 %v2767_v34  ;;  %v7719_v34 = vpop.f32.mrf.mxu1 }
 0x518   : > { %2051 = vadd.xlane.f32.xlu0 %v7648_v57  ;;  %5898 = vpow2.f32 %v2765_v15  ;;  %v2412_v15 = vpop.xlane.xlu0 %2411 }
 0x519   : > { %5900 = vpow2.f32 %v2387_v4 }
 0x51a   : > { %5902 = vpow2.f32 %v2011_v24 }
 0x51b   : > { %2737 = vmax.xlane.f32.xlu2 %v7656_v8  ;;  %5904 = vpow2.f32 %v2771_v36  ;;  %v9047_v36 = vld [vmem:[#allocation4_spill] sm:$0xff] }
 0x51c   : > { %v5895_v22 = vpop.eup %5894 }
 0x51d   : > { %v2075_v11 = vmul.f32 %v5895_v22, %v7502_v47  ;;  %v7669_v6 = vpop.eup %5896  ;;  %v2342_v23 = vpop.xlane.xlu1 %2341 }
 0x51e   : > { %2869 = vrot.lane.b32.xlu1 %v9042_v62, %s6083_s13  ;;  %v7674_v47 = vpop.eup %5898  ;;  %v2367_v58 = vsub.f32 %v7518_v43, %v2342_v23 }
 0x51f   : > { %v2089_v29 = vpack.c.bf16 %v2076_v54, %v2075_v11  ;;  %v7691_v53 = vpop.eup %5900  ;;  %v2694_v43 = vpop.f32.mrf.mxu1 }
 0x520   : > { %2733 = vmax.xlane.f32.xlu0 %v7666_v32  ;;  %v2389_v26 = vmul.f32 1.442695, %v2367_v58  ;;  %v7721_v12 = vpop.eup %5902  ;;  %v7736_v18 = vsel %vm1289_vm0, %v2694_v43, -inf }
 0x521   : > { %2137 = vmatmul.bf16.gmra.mxu2 %v2089_v29  ;;  %v7723_v22 = vpop.eup %5904 }
 0x523   : > { %2799 = vadd.xlane.f32.xlu2 %v7669_v6 }
 0x525   : > { %v7694_v40 = vpop.xlane.xlu1 %2343  ;;  %v2042_v29 = vpop.xlane.xlu0 %2041 }
 0x528   : > { %2797 = vadd.xlane.f32.xlu0 %v7674_v47 }
 0x52b   : > { %2349 = vmax.xlane.f32.xlu2 %v7680_v0 }
 0x530   : > { %2735 = vmax.xlane.f32.xlu0 %v7688_v37 }
 0x533   : > { %2419 = vadd.xlane.f32.xlu2 %v7691_v53 }
 0x538   : > { %2351 = vmax.xlane.f32.xlu0 %v7699_v51 }
 0x53b   : > { %2355 = vmax.xlane.f32.xlu2 %v7708_v33 }
 0x53d   : > { %v2488_v13 = vpop.permute.xlu1 %2487 }
 0x53e   : > { %2509 = vmatpush.bf16.msra.mxu0 %v2488_v13  ;;  %v2728_v50 = vpop.xlane.xlu2 %2727 }
 0x53f   : > { %v2753_v27 = vsub.f32 %v7544_v38, %v2728_v50 }
 0x540   : > { %2739 = vmax.xlane.f32.xlu0 %v7714_v28 }
 0x541   : > { %v2775_v55 = vmul.f32 1.442695, %v2753_v27 }
 0x543   : > { %5906 = vpow2.f32 %v2775_v55 }
 0x544   : > { %5908 = vpow2.f32 %v2389_v26 }
 0x545   : > { %5910 = vrcp.f32 %v2412_v15 }
 0x546   : > { %v2040_v46 = vpop.xlane.xlu2 %2039 }
 0x548   : > { %2043 = vadd.xlane.f32.xlu1 %v7721_v12  ;;  %2803 = vadd.xlane.f32.xlu0 %v7723_v22 }
 0x549   : > { %v7727_v38 = vpop.eup %5906 }
 0x54a   : > { %2807 = vadd.xlane.f32.xlu2 %v7727_v38  ;;  %v7730_v54 = vpop.eup %5908 }
 0x54b   : > { %v5911_v4 = vpop.eup %5910 }
 0x54c   : > { %v7740_v56 = vmul.f32 %v5911_v4, %v7504_v52 }
 0x54d   : > { %v7747_v20 = vpop.xlane.xlu0 %2047 }
 0x54e   : > { %v2410_v11 = vpop.xlane.xlu2 %2409 }
 0x54f   : > { %5912 = vrcp.f32 %v2410_v11 }
 0x550   : > { %2421 = vadd.xlane.f32.xlu0 %v7730_v54  ;;  %5914 = vrcp.f32 %v2036_v7 }
 0x552   : > { %2743 = vmax.xlane.f32.xlu2 %v7736_v18 }
 0x555   : > { %v5913_v23 = vpop.eup %5912 }
 0x556   : > { %v7743_v19 = vmul.f32 %v5913_v23, %v7562_v41  ;;  %v7745_v63 = vpop.xlane.xlu2 %2045  ;;  %v5915_v27 = vpop.eup %5914 }
 0x557   : > { %v2077_v15 = vmul.f32 %v5915_v27, %v7497_v45  ;;  %v9048_v45 = vld [vmem:[#allocation12_spill] sm:$0xff] }
 0x558   : > { %v1988_v27 = vsub.f32 %v9048_v45, %v7560_v42 }
 0x55e   : > { %v7751_v60 = vpop.xlane.xlu2 %2731 }
 0x560   : > { %v2486_v24 = vpop.permute.xlu0 %2485 }
 0x561   : > { %2867 = vrot.lane.b32.xlu1 %v9047_v36, %s6083_s13  ;;  %2510 = vmatpush.bf16.msra.mxu0 %v2486_v24 }
 0x566   : > { %v7755_v13 = vpop.xlane.xlu2 %2345 }
 0x568   : > { %v7757_v52 = vpop.xlane.xlu1 %2725 }
 0x569   : > { %2483 = vrot.lane.b32.xlu1 %v9042_v62, %s6082_s30 }
 0x56e   : > { %v2348_v41 = vpop.xlane.xlu2 %2347 }
 0x570   : > { %v2038_v50 = vpop.xlane.xlu1 %2037 }
 0x571   : > { %5916 = vrcp.f32 %v2038_v50 }
 0x572   : > { %5918 = vrcp.f32 %v2040_v46 }
 0x576   : > { %v2414_v58 = vpop.xlane.xlu2 %2413 }
 0x577   : > { %v5917_v55 = vpop.eup %5916  ;;  %5920 = vrcp.f32 %v2414_v58 }
 0x578   : > { %v2730_v26 = vpop.xlane.xlu1 %2729  ;;  %v2078_v43 = vmul.f32 %v5917_v55, %v7618_v21  ;;  %v5919_v7 = vpop.eup %5918  ;;  %v2017_v55 = vmul.f32 1.442695, %v1988_v27 }
 0x579   : > { %v2754_v11 = vsub.f32 %v7632_v5, %v2730_v26  ;;  %v2079_v46 = vmul.f32 %v5919_v7, %v7552_v2  ;;  %v2696_v26 = vpop.f32.mrf.mxu1  ;;  %v2308_v7 = vpop.f32.mrf.mxu3 }
 0x57a   : > { %v2090_v4 = vpack.c.bf16 %v2078_v43, %v2077_v15  ;;  %v9049_v15 = vld [vmem:[#allocation16_spill] sm:$0xff]  ;;  %v7784_v2 = vsel %vm1290_vm14, %v2696_v26, -inf  ;;  %v2369_v26 = vsub.f32 %v7592_v25, %v7755_v13 }
 0x57b   : > { %v2777_v23 = vmul.f32 1.442695, %v2754_v11 }
 0x57c   : > { %2142 = vmatmul.bf16.gmra.mxu2 %v2090_v4 }
 0x57d   : > { %5922 = vpow2.f32 %v2777_v23  ;;  %v5921_v24 = vpop.eup %5920 }
 0x57e   : > { %5924 = vrcp.f32 %v2042_v29  ;;  %v2416_v62 = vpop.xlane.xlu2 %2415  ;;  %v7771_v58 = vmul.f32 %v5921_v24, %v7623_v9  ;;  %v9051_v9 = vld [vmem:[#allocation13_spill] sm:$0xff] }
 0x57f   : > { %5926 = vrcp.f32 %v2416_v62 }
 0x580   : > { %5928 = vpow2.f32 %v2017_v55 }
 0x583   : > { %v7764_v50 = vpop.eup %5922 }
 0x584   : > { %v5925_v14 = vpop.eup %5924  ;;  %2809 = vadd.xlane.f32.xlu0 %v7764_v50 }
 0x585   : > { %v5927_v21 = vpop.eup %5926  ;;  %v2080_v43 = vmul.f32 %v5925_v14, %v9049_v15  ;;  %v2370_v14 = vsub.f32 %v7615_v61, %v2348_v41 }
 0x586   : > { %v2796_v5 = vpop.xlane.xlu2 %2795  ;;  %v7774_v29 = vmul.f32 %v5927_v21, %v7641_v3  ;;  %v1990_v3 = vsub.f32 %v9051_v9, %v7570_v30  ;;  %v7790_v21 = vpop.eup %5928 }
 0x587   : > { %v2091_v42 = vpack.c.bf16 %v2080_v43, %v2079_v46  ;;  %v2395_v27 = vmul.f32 1.442695, %v2370_v14  ;;  %v7795_v46 = vsel %vm1289_vm0, %v2308_v7, -inf }
 0x588   : > { %v2474_v11 = vpack.c.bf16 %v7774_v29, %v7771_v58  ;;  %v2021_v24 = vmul.f32 1.442695, %v1990_v3 }
 0x58a   : > { %5930 = vpow2.f32 %v2021_v24 }
 0x58b   : > { %v7779_v4 = vpop.xlane.xlu0 %2051  ;;  %5932 = vpow2.f32 %v2395_v27 }
 0x58c   : > { %2745 = vmax.xlane.f32.xlu0 %v7784_v2  ;;  %2147 = vmatmul.bf16.gmra.mxu2 %v2091_v42  ;;  %v2393_v42 = vmul.f32 1.442695, %v2369_v26 }
 0x58e   : > { %v2738_v62 = vpop.xlane.xlu2 %2737 }
 0x58f   : > { %v2758_v13 = vsub.f32 %v7656_v8, %v2738_v62 }
 0x590   : > { %v2870_v45 = vpop.permute.xlu1 %2869  ;;  %v7804_v15 = vpop.eup %5930 }
 0x591   : > { %2897 = vmatpush.bf16.msra.mxu2 %v2870_v45  ;;  %v7806_v17 = vpop.eup %5932  ;;  %v2785_v27 = vmul.f32 1.442695, %v2758_v13 }
 0x593   : > { %2049 = vadd.xlane.f32.xlu1 %v7790_v21  ;;  %v2734_v30 = vpop.xlane.xlu0 %2733 }
 0x594   : > { %v2756_v55 = vsub.f32 %v7666_v32, %v2734_v30  ;;  %2357 = vmax.xlane.f32.xlu0 %v7795_v46 }
 0x596   : > { %v2781_v61 = vmul.f32 1.442695, %v2756_v55  ;;  %v7800_v41 = vpop.xlane.xlu2 %2799 }
 0x598   : > { %5934 = vpow2.f32 %v2781_v61 }
 0x599   : > { %5936 = vrcp.f32 %v2796_v5 }
 0x59b   : > { %2053 = vadd.xlane.f32.xlu1 %v7804_v15  ;;  %v2798_v43 = vpop.xlane.xlu0 %2797 }
 0x59c   : > { %5938 = vrcp.f32 %v2798_v43  ;;  %2427 = vadd.xlane.f32.xlu0 %v7806_v17 }
 0x59d   : > { %5940 = vpow2.f32 %v2393_v42 }
 0x59e   : > { %v7810_v32 = vpop.eup %5934  ;;  %v2350_v9 = vpop.xlane.xlu2 %2349 }
 0x59f   : > { %v2371_v3 = vsub.f32 %v7680_v0, %v2350_v9  ;;  %2813 = vadd.xlane.f32.xlu2 %v7810_v32  ;;  %v5937_v25 = vpop.eup %5936 }
 0x5a0   : > { %v7816_v7 = vmul.f32 %v5937_v25, %v7644_v35 }
 0x5a1   : > { %v2397_v5 = vmul.f32 1.442695, %v2371_v3 }
 0x5a2   : > { %v5939_v14 = vpop.eup %5938 }
 0x5a3   : > { %v7819_v24 = vmul.f32 %v5939_v14, %v7674_v47  ;;  %5942 = vpow2.f32 %v2397_v5  ;;  %v7821_v45 = vpop.xlane.xlu0 %2735  ;;  %v7825_v30 = vpop.eup %5940 }
 0x5a4   : > { %5944 = vpow2.f32 %v2785_v27 }
 0x5a5   : > { %v2859_v0 = vpack.c.bf16 %v7819_v24, %v7816_v7 }
 0x5a6   : > { %v7831_v35 = vpop.xlane.xlu2 %2419 }
 0x5a7   : > { %2425 = vadd.xlane.f32.xlu2 %v7825_v30 }
 0x5a9   : > { %v7828_v8 = vpop.eup %5942 }
 0x5aa   : > { %2429 = vadd.xlane.f32.xlu0 %v7828_v8  ;;  %v7835_v62 = vpop.eup %5944 }
 0x5ab   : > { %v7833_v47 = vpop.xlane.xlu0 %2351 }
 0x5ae   : > { %v2356_v26 = vpop.xlane.xlu2 %2355 }
 0x5af   : > { %2817 = vadd.xlane.f32.xlu2 %v7835_v62  ;;  %v2374_v42 = vsub.f32 %v7708_v33, %v2356_v26  ;;  %v9052_v33 = vld [vmem:[#allocation14_spill] sm:$0xff]  ;;  %v9053_v26 = vld [vmem:[#allocation15_spill] sm:$0xff] }
 0x5b1   : > { %v2403_v3 = vmul.f32 1.442695, %v2374_v42 }
 0x5b3   : > { %v2740_v55 = vpop.xlane.xlu0 %2739 }
 0x5b4   : > { %v2759_v61 = vsub.f32 %v7714_v28, %v2740_v55  ;;  %2481 = vrot.lane.b32.xlu1 %v9047_v36, %s6082_s30 }
 0x5b6   : > { %v2787_v43 = vmul.f32 1.442695, %v2759_v61 }
 0x5b8   : > { %5946 = vpow2.f32 %v2787_v43  ;;  %v9054_v43 = vld [vmem:[#allocation10_spill] sm:$0xff] }
 0x5b9   : > { %5948 = vrcp.f32 %v7745_v63  ;;  %v2750_v63 = vsub.f32 %v9052_v33, %v7604_v44  ;;  %v2365_v42 = vsub.f32 %v9054_v43, %v9053_v26  ;;  %v7897_v43 = vpop.f32.mrf.mxu0 }
 0x5bb   : > { %v2044_v9 = vpop.xlane.xlu1 %2043  ;;  %v2769_v55 = vmul.f32 1.442695, %v2750_v63 }
 0x5bc   : > { %5950 = vrcp.f32 %v2044_v9  ;;  %v2385_v9 = vmul.f32 1.442695, %v2365_v42 }
 0x5bd   : > { %5952 = vpow2.f32 %v2403_v3  ;;  %v2752_v3 = vsub.f32 %v7601_v1, %v7757_v52  ;;  %v9055_v1 = vld [vmem:[#allocation17_spill] sm:$0xff] }
 0x5be   : > { %v7843_v25 = vpop.eup %5946  ;;  %5954 = vpow2.f32 %v2769_v55  ;;  %v2368_v52 = vsub.f32 %v9055_v1, %v7694_v40  ;;  %v7885_v55 = vsel %vm9056_vm2, %v7683_v39, -inf }
 0x5bf   : > { %2819 = vadd.xlane.f32.xlu2 %v7843_v25  ;;  %v5949_v13 = vpop.eup %5948  ;;  %5956 = vpow2.f32 %v2385_v9 }
 0x5c0   : > { %v2082_v36 = vmul.f32 %v5949_v13, %v7572_v59  ;;  %v2773_v13 = vmul.f32 1.442695, %v2752_v3  ;;  %v2391_v63 = vmul.f32 1.442695, %v2368_v52  ;;  %v2757_v3 = vsub.f32 %v7688_v37, %v7821_v45  ;;  %v2310_v52 = vpop.f32.mrf.mxu3 }
 0x5c1   : > { %v2372_v37 = vsub.f32 %v7699_v51, %v7833_v47 }
 0x5c2   : > { %v5951_v28 = vpop.eup %5950  ;;  %5958 = vpow2.f32 %v2773_v13 }
 0x5c3   : > { %v2081_v5 = vmul.f32 %v5951_v28, %v7721_v12  ;;  %v7848_v27 = vpop.eup %5952  ;;  %v7862_v28 = vpop.xlane.xlu0 %2803  ;;  %5960 = vpow2.f32 %v2391_v63  ;;  %v2783_v63 = vmul.f32 1.442695, %v2757_v3 }
 0x5c4   : > { %v7855_v59 = vpop.eup %5954  ;;  %5962 = vrcp.f32 %v7747_v20 }
 0x5c5   : > { %v2092_v14 = vpack.c.bf16 %v2082_v36, %v2081_v5  ;;  %v7860_v44 = vpop.eup %5956 }
 0x5c7   : > { %2152 = vmatmul.bf16.gmra.mxu2 %v2092_v14  ;;  %2435 = vadd.xlane.f32.xlu2 %v7848_v27  ;;  %v7874_v14 = vsel %vm1288_vm15, %v7719_v34, -inf }
 0x5c8   : > { %v7865_v5 = vpop.eup %5958 }
 0x5c9   : > { %v7892_v26 = vpop.eup %5960 }
 0x5cb   : > { %v7868_v36 = vpop.xlane.xlu0 %2421 }
 0x5d3   : > { %v2868_v61 = vpop.permute.xlu1 %2867 }
 0x5d4   : > { %2898 = vmatpush.bf16.msra.mxu2 %v2868_v61  ;;  %v2755_v61 = vsub.f32 %v7580_v48, %v7751_v60  ;;  %v5963_v60 = vpop.eup %5962 }
 0x5d5   : > { %v2083_v20 = vmul.f32 %v5963_v60, %v7558_v31  ;;  %v7915_v31 = vsel %vm1290_vm14, %v2310_v52, -inf }
 0x5d6   : > { %v2779_v34 = vmul.f32 1.442695, %v2755_v61  ;;  %v7909_v61 = vpop.f32.mrf.mxu0 }
 0x5d8   : > { %5964 = vpow2.f32 %v2779_v34  ;;  %v2399_v34 = vmul.f32 1.442695, %v2372_v37 }
 0x5db   : > { %v2484_v12 = vpop.permute.xlu1 %2483 }
 0x5dc   : > { %2511 = vmatpush.bf16.msra.mxu0 %v2484_v12 }
 0x5de   : > { %2801 = vadd.xlane.f32.xlu1 %v7855_v59  ;;  %v7899_v42 = vpop.eup %5964 }
 0x5e6   : > { %2417 = vadd.xlane.f32.xlu1 %v7860_v44 }
 0x5ee   : > { %2805 = vadd.xlane.f32.xlu1 %v7865_v5 }
 0x5f6   : > { %2741 = vmax.xlane.f32.xlu1 %v7874_v14 }
 0x5f7   : > { %v7879_v33 = vpop.xlane.xlu0 %2809 }
 0x5fe   : > { %2353 = vmax.xlane.f32.xlu1 %v7885_v55 }
 0x5ff   : > { %v7890_v16 = vpop.xlane.xlu0 %2745 }
 0x606   : > { %2423 = vadd.xlane.f32.xlu1 %v7892_v26  ;;  %v2050_v40 = vpop.xlane.xlu1 %2049 }
 0x607   : > { %5966 = vrcp.f32 %v2050_v40  ;;  %v2358_v39 = vpop.xlane.xlu0 %2357  ;;  %v7920_v40 = vpop.f32.mrf.mxu0 }
 0x608   : > { %v2375_v49 = vsub.f32 %v7795_v46, %v2358_v39 }
 0x60a   : > { %v2405_v48 = vmul.f32 1.442695, %v2375_v49 }
 0x60c   : > { %5968 = vpow2.f32 %v2405_v48  ;;  %v7929_v48 = vpop.f32.mrf.mxu2 }
 0x60d   : > { %v5967_v9 = vpop.eup %5966 }
 0x60e   : > { %2811 = vadd.xlane.f32.xlu1 %v7899_v42  ;;  %v2084_v12 = vmul.f32 %v5967_v9, %v7790_v21  ;;  %v2054_v13 = vpop.xlane.xlu1 %2053 }
 0x60f   : > { %5970 = vrcp.f32 %v2054_v13  ;;  %v7931_v51 = vpop.f32.mrf.mxu0 }
 0x610   : > { %v2093_v1 = vpack.c.bf16 %v2084_v12, %v2083_v20  ;;  %5972 = vrcp.f32 %v7779_v4 }
 0x611   : > { %5974 = vpow2.f32 %v2783_v63 }
 0x612   : > { %v7906_v46 = vpop.eup %5968  ;;  %2157 = vmatmul.bf16.gmra.mxu2 %v2093_v1  ;;  %5976 = vpow2.f32 %v2399_v34 }
 0x613   : > { %2437 = vadd.xlane.f32.xlu2 %v7906_v46  ;;  %5978 = vrcp.f32 %v7800_v41 }
 0x614   : > { %v7937_v60 = vpop.f32.mrf.mxu2 }
 0x615   : > { %v5971_v21 = vpop.eup %5970 }
 0x616   : > { %2359 = vmax.xlane.f32.xlu1 %v7915_v31  ;;  %v5973_v45 = vpop.eup %5972  ;;  %v2086_v39 = vmul.f32 %v5971_v21, %v7804_v15  ;;  %v9057_v15 = vpack.c.bf16 %v7740_v56, %v7743_v19  ;;  %v2808_v21 = vpop.xlane.xlu2 %2807 }
 0x617   : > { %v7923_v49 = vpop.eup %5974  ;;  %v2085_v10 = vmul.f32 %v5973_v45, %v7648_v57  ;;  %v7939_v57 = vpop.f32.mrf.mxu0 }
 0x618   : > { %v7927_v23 = vpop.eup %5976 }
 0x619   : > { %v2094_v4 = vpack.c.bf16 %v2086_v39, %v2085_v10 }
 0x61c   : > { %v7944_v9 = vpop.f32.mrf.mxu2 }
 0x61e   : > { %2815 = vadd.xlane.f32.xlu1 %v7923_v49 }
 0x61f   : > { %v7946_v20 = vpop.f32.mrf.mxu0 }
 0x622   : > { %2162 = vmatmul.bf16.gmra.mxu2 %v2094_v4 }
 0x624   : > { %v7951_v12 = vpop.f32.mrf.mxu2 }
 0x626   : > { %v2482_v47 = vpop.permute.xlu1 %2481  ;;  %2431 = vadd.xlane.f32.xlu1 %v7927_v23 }
 0x627   : > { %2512 = vmatpush.bf16.msra.mxu0 %v2482_v47  ;;  %v7953_v56 = vpop.f32.mrf.mxu0 }
 0x62a   : > { %2513 = vmatmul.bf16.vlgmr.msra.gmra.mxu0 %v9057_v15 }
 0x62c   : > { %v7955_v19 = vpop.f32.mrf.mxu2 }
 0x62f   : > { %v7957_v3 = vpop.f32.mrf.mxu0 }
 0x632   : > { %2899 = vmatmul.bf16.vlgmr.msra.gmra.mxu2 %v2859_v0  ;;  %v5979_v0 = vpop.eup %5978 }
 0x633   : > { %v2845_v29 = vmul.f32 %v5979_v0, %v7669_v6 }
 0x634   : > { %v7960_v24 = vpop.f32.mrf.mxu2 }
 0x637   : > { %v7962_v1 = vpop.f32.mrf.mxu0 }
 0x63a   : > { %2518 = vmatmul.bf16.gmra.mxu0 %v2474_v11 }
 0x63c   : > { %v7967_v63 = vpop.f32.mrf.mxu2 }
 0x63f   : > { %v7972_v39 = vpop.f32.mrf.mxu0 }
 0x644   : > { %v7974_v10 = vpop.f32.mrf.mxu2 }
 0x651   : > { %v2802_v7 = vpop.xlane.xlu1 %2801 }
 0x652   : > { %5980 = vrcp.f32 %v2802_v7  ;;  %v2744_v7 = vpop.xlane.xlu2 %2743 }
 0x653   : > { %5982 = vrcp.f32 %v7831_v35 }
 0x658   : > { %v5981_v13 = vpop.eup %5980 }
 0x659   : > { %v2418_v58 = vpop.xlane.xlu1 %2417  ;;  %v2846_v11 = vmul.f32 %v5981_v13, %v7855_v59  ;;  %v5983_v41 = vpop.eup %5982 }
 0x65a   : > { %5984 = vrcp.f32 %v2418_v58  ;;  %v2462_v35 = vmul.f32 %v5983_v41, %v7691_v53  ;;  %v7979_v13 = vpop.f32.mrf.mxu0  ;;  %v2761_v58 = vsub.f32 %v7736_v18, %v2744_v7  ;;  %v2762_v18 = vsub.f32 %v7784_v2, %v7890_v16 }
 0x65b   : > { %v2860_v52 = vpack.c.bf16 %v2846_v11, %v2845_v29  ;;  %5986 = vrcp.f32 %v7862_v28  ;;  %v7983_v11 = vpop.f32.mrf.mxu2 }
 0x65c   : > { %v2791_v29 = vmul.f32 1.442695, %v2761_v58 }
 0x65d   : > { %2904 = vmatmul.bf16.gmra.mxu2 %v2860_v52 }
 0x660   : > { %v5985_v37 = vpop.eup %5984 }
 0x661   : > { %v2806_v45 = vpop.xlane.xlu1 %2805  ;;  %v2461_v34 = vmul.f32 %v5985_v37, %v7860_v44  ;;  %v5987_v59 = vpop.eup %5986 }
 0x662   : > { %5988 = vrcp.f32 %v2806_v45  ;;  %v2847_v15 = vmul.f32 %v5987_v59, %v7723_v22  ;;  %v7989_v37 = vpop.f32.mrf.mxu0  ;;  %v2814_v45 = vpop.xlane.xlu2 %2813 }
 0x663   : > { %v2475_v6 = vpack.c.bf16 %v2462_v35, %v2461_v34  ;;  %v2793_v34 = vmul.f32 1.442695, %v2762_v18  ;;  %v7998_v59 = vpop.f32.mrf.mxu2 }
 0x665   : > { %2523 = vmatmul.bf16.gmra.mxu0 %v2475_v6 }
 0x668   : > { %v5989_v4 = vpop.eup %5988 }
 0x669   : > { %v2742_v47 = vpop.xlane.xlu1 %2741  ;;  %v2848_v28 = vmul.f32 %v5989_v4, %v7865_v5 }
 0x66a   : > { %v2760_v0 = vsub.f32 %v7874_v14, %v2742_v47 }
 0x66b   : > { %v2861_v44 = vpack.c.bf16 %v2848_v28, %v2847_v15  ;;  %v2426_v28 = vpop.xlane.xlu2 %2425  ;;  %v8008_v7 = vpop.f32.mrf.mxu2 }
 0x66c   : > { %v2789_v53 = vmul.f32 1.442695, %v2760_v0 }
 0x66d   : > { %2909 = vmatmul.bf16.gmra.mxu2 %v2861_v44 }
 0x66e   : > { %5990 = vpow2.f32 %v2789_v53  ;;  %v2428_v53 = vpop.xlane.xlu0 %2427 }
 0x66f   : > { %5992 = vrcp.f32 %v7879_v33 }
 0x670   : > { %5994 = vrcp.f32 %v2808_v21 }
 0x671   : > { %v2354_v22 = vpop.xlane.xlu1 %2353  ;;  %5996 = vpow2.f32 %v2791_v29 }
 0x672   : > { %v2373_v5 = vsub.f32 %v7885_v55, %v2354_v22 }
 0x674   : > { %v7986_v52 = vpop.eup %5990  ;;  %v2401_v14 = vmul.f32 1.442695, %v2373_v5 }
 0x675   : > { %v5993_v41 = vpop.eup %5992  ;;  %2821 = vadd.xlane.f32.xlu0 %v7986_v52 }
 0x676   : > { %5998 = vpow2.f32 %v2401_v14  ;;  %v5995_v33 = vpop.eup %5994  ;;  %v2850_v21 = vmul.f32 %v5993_v41, %v7764_v50 }
 0x677   : > { %6000 = vrcp.f32 %v7868_v36  ;;  %v2849_v35 = vmul.f32 %v5995_v33, %v7727_v38  ;;  %v7996_v6 = vpop.eup %5996  ;;  %v8004_v36 = vpop.f32.mrf.mxu0 }
 0x679   : > { %v2424_v55 = vpop.xlane.xlu1 %2423  ;;  %v2862_v47 = vpack.c.bf16 %v2850_v21, %v2849_v35  ;;  %v2818_v21 = vpop.xlane.xlu2 %2817 }
 0x67a   : > { %6002 = vrcp.f32 %v2424_v55 }
 0x67b   : > { %6004 = vpow2.f32 %v2793_v34 }
 0x67c   : > { %v8000_v4 = vpop.eup %5998  ;;  %6006 = vrcp.f32 %v2814_v45  ;;  %v8018_v45 = vpop.f32.mrf.mxu2 }
 0x67d   : > { %2823 = vadd.xlane.f32.xlu0 %v7996_v6  ;;  %2433 = vadd.xlane.f32.xlu1 %v8000_v4  ;;  %v6001_v2 = vpop.eup %6000 }
 0x67e   : > { %2914 = vmatmul.bf16.gmra.mxu2 %v2862_v47  ;;  %v2463_v38 = vmul.f32 %v6001_v2, %v7730_v54 }
 0x67f   : > { %v8015_v5 = vpop.f32.mrf.mxu0 }
 0x680   : > { %v6003_v50 = vpop.eup %6002 }
 0x681   : > { %v2812_v16 = vpop.xlane.xlu1 %2811  ;;  %v2464_v15 = vmul.f32 %v6003_v50, %v7892_v26  ;;  %v8010_v44 = vpop.eup %6004 }
 0x682   : > { %6008 = vrcp.f32 %v2812_v16  ;;  %v6007_v58 = vpop.eup %6006  ;;  %v2430_v50 = vpop.xlane.xlu0 %2429 }
 0x683   : > { %v2476_v0 = vpack.c.bf16 %v2464_v15, %v2463_v38  ;;  %6010 = vrcp.f32 %v2426_v28  ;;  %v2852_v26 = vmul.f32 %v6007_v58, %v7810_v32  ;;  %v2168_v38 = vpack.c.bf16 %v7929_v48, %v7929_v48 }
 0x684   : > { %6012 = vrcp.f32 %v2428_v53  ;;  %v2170_v48 = vpack.c.bf16 %v7944_v9, %v7944_v9  ;;  %v2172_v9 = vpack.c.bf16 %v7955_v19, %v7955_v19 }
 0x685   : > { %2528 = vmatmul.bf16.gmra.mxu0 %v2476_v0  ;;  %2825 = vadd.xlane.f32.xlu1 %v8010_v44  ;;  %v3012_v53 = vunpack.c.l.b16 %v2168_v38 }
 0x687   : > { %v8026_v2 = vpop.f32.mrf.mxu0 }
 0x688   : > { %v6009_v29 = vpop.eup %6008 }
 0x689   : > { %v2360_v22 = vpop.xlane.xlu1 %2359  ;;  %v2851_v54 = vmul.f32 %v6009_v29, %v7899_v42  ;;  %v6011_v18 = vpop.eup %6010 }
 0x68a   : > { %v2376_v14 = vsub.f32 %v7915_v31, %v2360_v22  ;;  %v6013_v55 = vpop.eup %6012  ;;  %v2465_v34 = vmul.f32 %v6011_v18, %v7825_v30  ;;  %v2169_v31 = vpack.c.bf16 %v7937_v60, %v7937_v60  ;;  %v2171_v22 = vpack.c.bf16 %v7951_v12, %v7951_v12 }
 0x68b   : > { %v2863_v41 = vpack.c.bf16 %v2852_v26, %v2851_v54  ;;  %v2466_v42 = vmul.f32 %v6013_v55, %v7806_v17  ;;  %v2173_v55 = vpack.c.bf16 %v7960_v24, %v7960_v24 }
 0x68c   : > { %v2407_v33 = vmul.f32 1.442695, %v2376_v14  ;;  %v3013_v15 = vunpack.c.l.b16 %v2169_v31 }
 0x68d   : > { %v2477_v32 = vpack.c.bf16 %v2466_v42, %v2465_v34  ;;  %v3017_v42 = vunpack.c.l.b16 %v2173_v55 }
 0x68e   : > { %6014 = vpow2.f32 %v2407_v33  ;;  %2919 = vmatmul.bf16.gmra.mxu2 %v2863_v41  ;;  %v3028_v29 = vpack.c.b16 %v3013_v15, %v3012_v53  ;;  %v3014_v33 = vunpack.c.l.b16 %v2170_v48 }
 0x68f   : > { %6016 = vrcp.f32 %v2818_v21  ;;  %v8042_v14 = vpop.f32.mrf.mxu0 }
 0x691   : > { %v2816_v35 = vpop.xlane.xlu1 %2815 }
 0x692   : > { %6018 = vrcp.f32 %v2816_v35 }
 0x693   : > { %6020 = vrcp.f32 %v2430_v50  ;;  %v2174_v50 = vpack.c.bf16 %v7967_v63, %v7967_v63  ;;  %v5530_v63 = vld [vmem:[%s8976_s4 + $0x38] sm:$0xff] }
 0x694   : > { %v8022_v47 = vpop.eup %6014  ;;  %3298 = vmatpush.bf16.msra.mxu3 %v5530_v63 }
 0x695   : > { %2439 = vadd.xlane.f32.xlu0 %v8022_v47  ;;  %v8029_v16 = vpop.f32.mrf.mxu2  ;;  %2533 = vmatmul.bf16.gmra.mxu0 %v2477_v32  ;;  %v6017_v30 = vpop.eup %6016  ;;  %v3016_v32 = vunpack.c.l.b16 %v2172_v9  ;;  %v3018_v19 = vunpack.c.l.b16 %v2174_v50 }
 0x696   : > { %v2854_v60 = vmul.f32 %v6017_v30, %v7835_v62  ;;  %v3015_v62 = vunpack.c.l.b16 %v2171_v22 }
 0x698   : > { %v6019_v17 = vpop.eup %6018  ;;  %v3029_v12 = vpack.c.b16 %v3015_v62, %v3014_v33 }
 0x699   : > { %v2432_v28 = vpop.xlane.xlu1 %2431  ;;  %v2853_v0 = vmul.f32 %v6019_v17, %v7923_v49  ;;  %v6021_v26 = vpop.eup %6020 }
 0x69a   : > { %6022 = vrcp.f32 %v2432_v28  ;;  %v2467_v41 = vmul.f32 %v6021_v26, %v7828_v8  ;;  %v3030_v8 = vpack.c.b16 %v3017_v42, %v3016_v32 }
 0x69b   : > { %v2864_v58 = vpack.c.bf16 %v2854_v60, %v2853_v0  ;;  %v2177_v60 = vpack.c.bf16 %v7998_v59, %v7998_v59  ;;  %v2179_v59 = vpack.c.bf16 %v8018_v45, %v8018_v45 }
 0x69d   : > { %v8037_v54 = vpop.f32.mrf.mxu2  ;;  %v3021_v22 = vunpack.c.l.b16 %v2177_v60  ;;  %v3023_v33 = vunpack.c.l.b16 %v2179_v59  ;;  %v2820_v60 = vpop.xlane.xlu2 %2819 }
 0x69e   : > { %2924 = vmatmul.bf16.gmra.mxu2 %v2864_v58  ;;  %3036 = vrot.lane.b32.xlu1 %v3028_v29, %s6083_s13  ;;  %v2181_v32 = vpack.c.bf16 %v8037_v54, %v8037_v54  ;;  %6024 = vrcp.f32 %v2820_v60 }
 0x6a0   : > { %v6023_v49 = vpop.eup %6022 }
 0x6a1   : > { %v2468_v18 = vmul.f32 %v6023_v49, %v7927_v23  ;;  %v2175_v23 = vpack.c.bf16 %v7974_v10, %v7974_v10  ;;  %v2176_v10 = vpack.c.bf16 %v7983_v11, %v7983_v11  ;;  %v2178_v11 = vpack.c.bf16 %v8008_v7, %v8008_v7 }
 0x6a2   : > { %v2180_v7 = vpack.c.bf16 %v8029_v16, %v8029_v16  ;;  %v5529_v16 = vld [vmem:[%s8976_s4 + $0x30] sm:$0xff] }
 0x6a3   : > { %v2478_v21 = vpack.c.bf16 %v2468_v18, %v2467_v41  ;;  %v3019_v38 = vunpack.c.l.b16 %v2175_v23  ;;  %v3020_v26 = vunpack.c.l.b16 %v2176_v10  ;;  %v3022_v55 = vunpack.c.l.b16 %v2178_v11  ;;  %3299 = vmatpush.bf16.msra.mxu3 %v5529_v16 }
 0x6a4   : > { %v3025_v23 = vunpack.c.l.b16 %v2181_v32 }
 0x6a5   : > { %v8048_v34 = vpop.f32.mrf.mxu2  ;;  %2538 = vmatmul.bf16.gmra.mxu0 %v2478_v21  ;;  %v3031_v0 = vpack.c.b16 %v3019_v38, %v3018_v19  ;;  %v3032_v48 = vpack.c.b16 %v3021_v22, %v3020_v26  ;;  %v3033_v42 = vpack.c.b16 %v3023_v33, %v3022_v55 }
 0x6a6   : > { %3038 = vrot.lane.b32.xlu1 %v3029_v12, %s6083_s13  ;;  %v2182_v54 = vpack.c.bf16 %v8048_v34, %v8048_v34 }
 0x6a7   : > { %v2514_v35 = vpop.f32.mrf.mxu0 }
 0x6a8   : > { %v2554_v24 = vpack.c.bf16 %v2514_v35, %v2514_v35 }
 0x6aa   : > { %v3068_v15 = vunpack.c.l.b16 %v2554_v24  ;;  %v3024_v24 = vunpack.c.l.b16 %v2180_v7 }
 0x6ac   : > { %v3034_v38 = vpack.c.b16 %v3025_v23, %v3024_v24 }
 0x6ad   : > { %v2165_v31 = vpop.f32.mrf.mxu2 }
 0x6ae   : > { %3040 = vrot.lane.b32.xlu1 %v3030_v8, %s6083_s13 }
 0x6af   : > { %v2516_v30 = vpop.f32.mrf.mxu0 }
 0x6b0   : > { %v2555_v17 = vpack.c.bf16 %v2516_v30, %v2516_v30 }
 0x6b2   : > { %v3069_v28 = vunpack.c.l.b16 %v2555_v17  ;;  %v2183_v17 = vpack.c.bf16 %v2165_v31, %v2165_v31  ;;  %v5528_v31 = vld [vmem:[%s8976_s4 + $0x28] sm:$0xff] }
 0x6b3   : > { %3300 = vmatpush.bf16.msra.mxu3 %v5528_v31 }
 0x6b4   : > { %v3084_v53 = vpack.c.b16 %v3069_v28, %v3068_v15  ;;  %v3027_v19 = vunpack.c.l.b16 %v2183_v17  ;;  %v3026_v15 = vunpack.c.l.b16 %v2182_v54 }
 0x6b5   : > { %v2900_v58 = vpop.f32.mrf.mxu2 }
 0x6b6   : > { %3042 = vrot.lane.b32.xlu1 %v3031_v0, %s6083_s13  ;;  %3092 = vrot.lane.b32.xlu2 %v3084_v53, %s6082_s30  ;;  %v2940_v49 = vpack.c.bf16 %v2900_v58, %v2900_v58  ;;  %v3035_v28 = vpack.c.b16 %v3027_v19, %v3026_v15 }
 0x6b7   : > { %v2519_v29 = vpop.f32.mrf.mxu0 }
 0x6b8   : > { %v3124_v21 = vunpack.c.l.b16 %v2940_v49  ;;  %v2556_v45 = vpack.c.bf16 %v2519_v29, %v2519_v29  ;;  %v2436_v49 = vpop.xlane.xlu2 %2435 }
 0x6ba   : > { %v3070_v50 = vunpack.c.l.b16 %v2556_v45 }
 0x6bd   : > { %v2902_v62 = vpop.f32.mrf.mxu2 }
 0x6be   : > { %v2941_v41 = vpack.c.bf16 %v2902_v62, %v2902_v62  ;;  %3044 = vrot.lane.b32.xlu1 %v3032_v48, %s6083_s13  ;;  %v6025_v62 = vpop.eup %6024 }
 0x6bf   : > { %v2521_v18 = vpop.f32.mrf.mxu0 }
 0x6c0   : > { %v3125_v12 = vunpack.c.l.b16 %v2941_v41  ;;  %v2557_v35 = vpack.c.bf16 %v2521_v18, %v2521_v18 }
 0x6c2   : > { %v3140_v9 = vpack.c.b16 %v3125_v12, %v3124_v21  ;;  %v3071_v8 = vunpack.c.l.b16 %v2557_v35  ;;  %v5527_v12 = vld [vmem:[%s8976_s4 + $0x20] sm:$0xff]  ;;  %v2855_v35 = vmul.f32 %v6025_v62, %v7843_v25  ;;  %v5525_v62 = vld [vmem:[%s8976_s4 + $0x10] sm:$0xff] }
 0x6c3   : > { %3301 = vmatpush.bf16.msra.mxu3 %v5527_v12 }
 0x6c4   : > { %3148 = vrot.lane.b32.xlu0 %v3140_v9, %s6081_s29  ;;  %v3085_v30 = vpack.c.b16 %v3071_v8, %v3070_v50 }
 0x6c6   : > { %3046 = vrot.lane.b32.xlu1 %v3033_v42, %s6083_s13 }
 0x6cc   : > { %3094 = vrot.lane.b32.xlu0 %v3085_v30, %s6082_s30 }
 0x6ce   : > { %3048 = vrot.lane.b32.xlu1 %v3034_v38, %s6083_s13 }
 0x6d6   : > { %3050 = vrot.lane.b32.xlu1 %v3035_v28, %s6083_s13  ;;  %v5526_v28 = vld [vmem:[%s8976_s4 + $0x18] sm:$0xff] }
 0x6d7   : > { %3302 = vmatpush.bf16.msra.mxu3 %v5526_v28 }
 0x6db   : > { %3303 = vmatpush.bf16.msra.mxu3 %v5525_v62 }
 0x6e0   : > { %v2905_v0 = vpop.f32.mrf.mxu2 }
 0x6e1   : > { %v2942_v53 = vpack.c.bf16 %v2905_v0, %v2905_v0 }
 0x6e2   : > { %v2524_v34 = vpop.f32.mrf.mxu0 }
 0x6e3   : > { %v2558_v63 = vpack.c.bf16 %v2524_v34, %v2524_v34  ;;  %v3126_v26 = vunpack.c.l.b16 %v2942_v53  ;;  %v2438_v34 = vpop.xlane.xlu2 %2437 }
 0x6e5   : > { %v3072_v11 = vunpack.c.l.b16 %v2558_v63 }
 0x6e8   : > { %v2907_v58 = vpop.f32.mrf.mxu2  ;;  %v2822_v10 = vpop.xlane.xlu0 %2821 }
 0x6e9   : > { %v2943_v29 = vpack.c.bf16 %v2907_v58, %v2907_v58  ;;  %6026 = vrcp.f32 %v2822_v10 }
 0x6ea   : > { %v2526_v22 = vpop.f32.mrf.mxu0  ;;  %6028 = vrcp.f32 %v2436_v49 }
 0x6eb   : > { %v3127_v48 = vunpack.c.l.b16 %v2943_v29  ;;  %v2559_v59 = vpack.c.bf16 %v2526_v22, %v2526_v22 }
 0x6ed   : > { %v3141_v41 = vpack.c.b16 %v3127_v48, %v3126_v26  ;;  %v3073_v18 = vunpack.c.l.b16 %v2559_v59 }
 0x6ef   : > { %v6027_v33 = vpop.eup %6026  ;;  %v3086_v21 = vpack.c.b16 %v3073_v18, %v3072_v11  ;;  %3150 = vrot.lane.b32.xlu2 %v3141_v41, %s6081_s29 }
 0x6f0   : > { %v2434_v55 = vpop.xlane.xlu1 %2433  ;;  %v2910_v9 = vpop.f32.mrf.mxu2  ;;  %v2856_v42 = vmul.f32 %v6027_v33, %v7986_v52 }
 0x6f1   : > { %6030 = vrcp.f32 %v2434_v55  ;;  %3096 = vrot.lane.b32.xlu0 %v3086_v21, %s6082_s30  ;;  %v2824_v45 = vpop.xlane.xlu0 %2823  ;;  %v6029_v7 = vpop.eup %6028  ;;  %v2944_v23 = vpack.c.bf16 %v2910_v9, %v2910_v9  ;;  %v5524_v55 = vld [vmem:[%s8976_s4 + $0x8] sm:$0xff] }
 0x6f2   : > { %v2865_v32 = vpack.c.bf16 %v2856_v42, %v2855_v35  ;;  %6032 = vrcp.f32 %v2824_v45  ;;  %v2470_v38 = vmul.f32 %v6029_v7, %v7848_v27  ;;  %3304 = vmatpush.bf16.msra.mxu3 %v5524_v55  ;;  %v5523_v42 = vld [vmem:[%s8976_s4] sm:$0xff] }
 0x6f3   : > { %v3128_v17 = vunpack.c.l.b16 %v2944_v23 }
 0x6f4   : > { %2929 = vmatmul.bf16.gmra.mxu2 %v2865_v32 }
 0x6f6   : > { %3305 = vmatpush.bf16.msra.mxu3 %v5523_v42 }
 0x6f7   : > { %v6031_v8 = vpop.eup %6030 }
 0x6f8   : > { %v2912_v50 = vpop.f32.mrf.mxu2  ;;  %v2826_v24 = vpop.xlane.xlu1 %2825  ;;  %v2469_v30 = vmul.f32 %v6031_v8, %v8000_v4 }
 0x6f9   : > { %v2945_v25 = vpack.c.bf16 %v2912_v50, %v2912_v50  ;;  %6034 = vrcp.f32 %v2826_v24  ;;  %v6033_v16 = vpop.eup %6032 }
 0x6fa   : > { %v2479_v52 = vpack.c.bf16 %v2470_v38, %v2469_v30  ;;  %v2857_v31 = vmul.f32 %v6033_v16, %v7996_v6  ;;  %6036 = vrcp.f32 %v2438_v34  ;;  %v1783_v16 = vpack.c.bf16 %v7909_v61, %v7909_v61 }
 0x6fb   : > { %v3129_v54 = vunpack.c.l.b16 %v2945_v25 }
 0x6fc   : > { %2543 = vmatmul.bf16.gmra.mxu0 %v2479_v52  ;;  %v2973_v34 = vunpack.c.l.b16 %v1783_v16 }
 0x6fd   : > { %v3142_v19 = vpack.c.b16 %v3129_v54, %v3128_v17 }
 0x6ff   : > { %v6035_v15 = vpop.eup %6034  ;;  %3152 = vrot.lane.b32.xlu2 %v3142_v19, %s6081_s29 }
 0x700   : > { %v2858_v4 = vmul.f32 %v6035_v15, %v8010_v44  ;;  %v6037_v6 = vpop.eup %6036 }
 0x701   : > { %v2915_v27 = vpop.f32.mrf.mxu2  ;;  %v2471_v33 = vmul.f32 %v6037_v6, %v7906_v46 }
 0x702   : > { %v2529_v0 = vpop.f32.mrf.mxu0  ;;  %v2866_v60 = vpack.c.bf16 %v2858_v4, %v2857_v31  ;;  %v2946_v53 = vpack.c.bf16 %v2915_v27, %v2915_v27  ;;  %v1782_v4 = vpack.c.bf16 %v7897_v43, %v7897_v43 }
 0x703   : > { %v2560_v10 = vpack.c.bf16 %v2529_v0, %v2529_v0 }
 0x704   : > { %2934 = vmatmul.bf16.gmra.mxu2 %v2866_v60  ;;  %v3130_v48 = vunpack.c.l.b16 %v2946_v53 }
 0x705   : > { %v3074_v49 = vunpack.c.l.b16 %v2560_v10 }
 0x708   : > { %v2440_v58 = vpop.xlane.xlu0 %2439 }
 0x709   : > { %v2917_v63 = vpop.f32.mrf.mxu2  ;;  %6038 = vrcp.f32 %v2440_v58 }
 0x70a   : > { %v2947_v29 = vpack.c.bf16 %v2917_v63, %v2917_v63  ;;  %v2531_v22 = vpop.f32.mrf.mxu0  ;;  %v2972_v63 = vunpack.c.l.b16 %v1782_v4 }
 0x70b   : > { %v2561_v26 = vpack.c.bf16 %v2531_v22, %v2531_v22 }
 0x70c   : > { %v3131_v59 = vunpack.c.l.b16 %v2947_v29  ;;  %v2988_v61 = vpack.c.b16 %v2973_v34, %v2972_v63 }
 0x70d   : > { %v3075_v44 = vunpack.c.l.b16 %v2561_v26 }
 0x70e   : > { %v3143_v11 = vpack.c.b16 %v3131_v59, %v3130_v48 }
 0x70f   : > { %v6039_v41 = vpop.eup %6038  ;;  %v3087_v18 = vpack.c.b16 %v3075_v44, %v3074_v49  ;;  %v1785_v49 = vpack.c.bf16 %v7931_v51, %v7931_v51  ;;  %v1784_v44 = vpack.c.bf16 %v7920_v40, %v7920_v40  ;;  %v1786_v51 = vpack.c.bf16 %v7939_v57, %v7939_v57 }
 0x710   : > { %3154 = vrot.lane.b32.xlu2 %v3143_v11, %s6081_s29  ;;  %v2472_v21 = vmul.f32 %v6039_v41, %v8022_v47  ;;  %v3037_v22 = vpop.permute.xlu1 %3036  ;;  %v3093_v48 = vpop.permute.xlu2 %3092  ;;  %v1788_v57 = vpack.c.bf16 %v7953_v56, %v7953_v56 }
 0x711   : > { %v2920_v12 = vpop.f32.mrf.mxu2  ;;  %3098 = vrot.lane.b32.xlu0 %v3087_v18, %s6082_s30  ;;  %v3166_v26 = vsel %vm9058_vm3, %v2988_v61, %v3037_v22  ;;  %v2975_v62 = vunpack.c.l.b16 %v1785_v49  ;;  %v2974_v11 = vunpack.c.l.b16 %v1784_v44  ;;  %v2976_v42 = vunpack.c.l.b16 %v1786_v51 }
 0x712   : > { %v2534_v9 = vpop.f32.mrf.mxu0  ;;  %v2480_v35 = vpack.c.bf16 %v2472_v21, %v2471_v33  ;;  %v2948_v32 = vpack.c.bf16 %v2920_v12, %v2920_v12  ;;  %v3190_v43 = vsel %vm3188_vm4, %v3166_v26, %v3093_v48  ;;  %v1790_v22 = vpack.c.bf16 %v7962_v1, %v7962_v1 }
 0x713   : > { %v2562_v46 = vpack.c.bf16 %v2534_v9, %v2534_v9  ;;  %v2989_v18 = vpack.c.b16 %v2975_v62, %v2974_v11  ;;  %v1792_v51 = vpack.c.bf16 %v7979_v13, %v7979_v13  ;;  %v5628_v13 = vld [vmem:[%s6165_s26] sm:$0xff]  }
 0x714   : > { %2548 = vmatmul.bf16.gmra.mxu0 %v2480_v35  ;;  %v3132_v23 = vunpack.c.l.b16 %v2948_v32  ;;  %v1787_v35 = vpack.c.bf16 %v7946_v20, %v7946_v20  ;;  %v1789_v20 = vpack.c.bf16 %v7957_v3, %v7957_v3  ;;  %v2980_v48 = vunpack.c.l.b16 %v1790_v22 }
 0x715   : > { %v3076_v24 = vunpack.c.l.b16 %v2562_v46 }
 0x716   : > { %v2977_v40 = vunpack.c.l.b16 %v1787_v35 }
 0x718   : > { %v3039_v41 = vpop.permute.xlu1 %3038  ;;  %v2990_v46 = vpack.c.b16 %v2977_v40, %v2976_v42 }
 0x719   : > { %v2922_v45 = vpop.f32.mrf.mxu2  ;;  %v3169_v21 = vsel %vm9059_vm6, %v2989_v18, %v3039_v41 }
 0x71a   : > { %v2949_v47 = vpack.c.bf16 %v2922_v45, %v2922_v45  ;;  %v2536_v7 = vpop.f32.mrf.mxu0 }
 0x71b   : > { %v2563_v8 = vpack.c.bf16 %v2536_v7, %v2536_v7 }
 0x71c   : > { %v3133_v50 = vunpack.c.l.b16 %v2949_v47 }
 0x71d   : > { %v3077_v30 = vunpack.c.l.b16 %v2563_v8 }
 0x71e   : > { %v3144_v38 = vpack.c.b16 %v3133_v50, %v3132_v23 }
 0x71f   : > { %v3088_v25 = vpack.c.b16 %v3077_v30, %v3076_v24  ;;  %v2979_v30 = vunpack.c.l.b16 %v1789_v20 }
 0x720   : > { %3156 = vrot.lane.b32.xlu2 %v3144_v38, %s6081_s29  ;;  %v3041_v32 = vpop.permute.xlu1 %3040 }
 0x721   : > { %v2925_v52 = vpop.f32.mrf.mxu2  ;;  %3100 = vrot.lane.b32.xlu0 %v3088_v25, %s6082_s30  ;;  %v3172_v45 = vsel %vm9060_vm7, %v2990_v46, %v3041_v32  ;;  %v2978_v25 = vunpack.c.l.b16 %v1788_v57  ;;  %v5629_v57 = vunpack.c.l.bf16 %v5628_v13 }
 0x722   : > { %v2539_v17 = vpop.f32.mrf.mxu0  ;;  %v2950_v54 = vpack.c.bf16 %v2925_v52, %v2925_v52 }
 0x723   : > { %v2564_v19 = vpack.c.bf16 %v2539_v17, %v2539_v17 }
 0x724   : > { %v3134_v0 = vunpack.c.l.b16 %v2950_v54 }
 0x725   : > { %v3078_v53 = vunpack.c.l.b16 %v2564_v19  ;;  %v2991_v19 = vpack.c.b16 %v2979_v30, %v2978_v25 }
 0x728   : > { %v3043_v17 = vpop.permute.xlu1 %3042 }
 0x729   : > { %v2927_v15 = vpop.f32.mrf.mxu2 }
 0x72a   : > { %v2951_v28 = vpack.c.bf16 %v2927_v15, %v2927_v15  ;;  %v2541_v31 = vpop.f32.mrf.mxu0 }
 0x72b   : > { %v2565_v27 = vpack.c.bf16 %v2541_v31, %v2541_v31 }
 0x72c   : > { %v3135_v60 = vunpack.c.l.b16 %v2951_v28 }
 0x72d   : > { %v3079_v58 = vunpack.c.l.b16 %v2565_v27  ;;  %v3175_v27 = vsel %vm9061_vm8, %v2991_v19, %v3043_v17  ;;  %v5706_v19 = vld [vmem:[%s6165_s26 + $0x8] sm:$0xff]  }
 0x72e   : > { %v3145_v10 = vpack.c.b16 %v3135_v60, %v3134_v0 }
 0x72f   : > { %v3089_v29 = vpack.c.b16 %v3079_v58, %v3078_v53 }
 0x730   : > { %3158 = vrot.lane.b32.xlu2 %v3145_v10, %s6081_s29 }
 0x731   : > { %3102 = vrot.lane.b32.xlu0 %v3089_v29, %s6082_s30  ;;  %v1791_v29 = vpack.c.bf16 %v7972_v39, %v7972_v39 }
 0x733   : > { %v2981_v61 = vunpack.c.l.b16 %v1791_v29 }
 0x735   : > { %v2992_v49 = vpack.c.b16 %v2981_v61, %v2980_v48  ;;  %v1794_v61 = vpack.c.bf16 %v8004_v36, %v8004_v36  ;;  %v5708_v36 = vld [vmem:[%s6165_s26 + $0x18] sm:$0xff]  }
 0x736   : > { %v3149_v59 = vpop.permute.xlu0 %3148 }
 0x737   : > { %v3207_v6 = vsel %vm3205_vm5, %v3190_v43, %v3149_v59  ;;  %v3045_v59 = vpop.permute.xlu1 %3044 }
 0x738   : > { %3306 = vmatmul.bf16.vlgmr.msra.gmra.mxu3 %v3207_v6  ;;  %v3178_v41 = vsel %vm9062_vm9, %v2992_v49, %v3045_v59  ;;  %v2984_v59 = vunpack.c.l.b16 %v1794_v61 }
 0x73e   : > { %v3095_v33 = vpop.permute.xlu0 %3094 }
 0x73f   : > { %v3192_v12 = vsel %vm3188_vm4, %v3169_v21, %v3095_v33 }
 0x749   : > { %v3151_v55 = vpop.permute.xlu2 %3150 }
 0x74a   : > { %v3210_v9 = vsel %vm3205_vm5, %v3192_v12, %v3151_v55  ;;  %v1793_v55 = vpack.c.bf16 %v7989_v37, %v7989_v37 }
 0x74b   : > { %3311 = vmatmul.bf16.gmra.mxu3 %v3210_v9 }
 0x74c   : > { %v2983_v32 = vunpack.c.l.b16 %v1793_v55 }
 0x759   : > { %v3153_v7 = vpop.permute.xlu2 %3152 }
 0x763   : > { %v3097_v47 = vpop.permute.xlu0 %3096 }
 0x764   : > { %v3194_v8 = vsel %vm3188_vm4, %v3172_v45, %v3097_v47  ;;  %v2982_v45 = vunpack.c.l.b16 %v1792_v51  ;;  %v3047_v47 = vpop.permute.xlu1 %3046 }
 0x765   : > { %v3213_v23 = vsel %vm3205_vm5, %v3194_v8, %v3153_v7 }
 0x766   : > { %3316 = vmatmul.bf16.gmra.mxu3 %v3213_v23  ;;  %v2993_v7 = vpack.c.b16 %v2983_v32, %v2982_v45  ;;  %v9066_v45 = vld [vmem:[#allocation3_spill] sm:$0xff] }
 0x768   : > { %v3181_v8 = vsel %vm9063_vm10, %v2993_v7, %v3047_v47 }
 0x76a   : > { %v3155_v3 = vpop.permute.xlu2 %3154 }
 0x777   : > { %v2930_v50 = vpop.f32.mrf.mxu2 }
 0x778   : > { %v2952_v38 = vpack.c.bf16 %v2930_v50, %v2930_v50 }
 0x779   : > { %v2544_v24 = vpop.f32.mrf.mxu0 }
 0x77a   : > { %v2566_v54 = vpack.c.bf16 %v2544_v24, %v2544_v24  ;;  %v3136_v28 = vunpack.c.l.b16 %v2952_v38  ;;  %v3157_v33 = vpop.permute.xlu2 %3156  ;;  %v8171_v24 = vld [vmem:[%s8977_s5] ss:$0 sm:$0xff] }
 0x77c   : > { %v3080_v60 = vunpack.c.l.b16 %v2566_v54  ;;  %v5630_v54 = vunpack.c.h.bf16 %v5628_v13 }
 0x77f   : > { %v2932_v52 = vpop.f32.mrf.mxu2 }
 0x780   : > { %v2953_v16 = vpack.c.bf16 %v2932_v52, %v2932_v52 }
 0x781   : > { %v2546_v15 = vpop.f32.mrf.mxu0 }
 0x782   : > { %v3137_v31 = vunpack.c.l.b16 %v2953_v16  ;;  %v2567_v4 = vpack.c.bf16 %v2546_v15, %v2546_v15  ;;  %v5633_v15 = vunpack.c.l.bf16 %v5706_v19 }
 0x783   : > { %v3099_v0 = vpop.permute.xlu0 %3098 }
 0x784   : > { %v3146_v34 = vpack.c.b16 %v3137_v31, %v3136_v28  ;;  %v3081_v53 = vunpack.c.l.b16 %v2567_v4  ;;  %v3196_v56 = vsel %vm3188_vm4, %v3175_v27, %v3099_v0  ;;  %v5634_v27 = vunpack.c.h.bf16 %v5706_v19 }
 0x785   : > { %v3216_v58 = vsel %vm3205_vm5, %v3196_v56, %v3155_v3 }
 0x786   : > { %v3090_v10 = vpack.c.b16 %v3081_v53, %v3080_v60  ;;  %3160 = vrot.lane.b32.xlu2 %v3146_v34, %s6081_s29  ;;  %3321 = vmatmul.bf16.gmra.mxu3 %v3216_v58  ;;  %v5707_v34 = vld [vmem:[%s6165_s26 + $0x10] sm:$0xff]  }
 0x787   : > { %v2935_v63 = vpop.f32.mrf.mxu2  ;;  %v5637_v53 = vunpack.c.l.bf16 %v5707_v34  ;;  %v5638_v29 = vunpack.c.h.bf16 %v5707_v34 }
 0x788   : > { %3104 = vrot.lane.b32.xlu0 %v3090_v10, %s6082_s30  ;;  %v2954_v26 = vpack.c.bf16 %v2935_v63, %v2935_v63  ;;  %v1795_v63 = vpack.c.bf16 %v8015_v5, %v8015_v5 }
 0x78a   : > { %v3138_v62 = vunpack.c.l.b16 %v2954_v26  ;;  %v3159_v50 = vpop.permute.xlu2 %3158  ;;  %v2985_v48 = vunpack.c.l.b16 %v1795_v63 }
 0x78c   : > { %v2994_v49 = vpack.c.b16 %v2985_v48, %v2984_v59 }
 0x78f   : > { %v2937_v43 = vpop.f32.mrf.mxu2 }
 0x790   : > { %v2955_v6 = vpack.c.bf16 %v2937_v43, %v2937_v43 }
 0x791   : > { %v2549_v44 = vpop.f32.mrf.mxu0 }
 0x792   : > { %v3139_v11 = vunpack.c.l.b16 %v2955_v6  ;;  %v2568_v1 = vpack.c.bf16 %v2549_v44, %v2549_v44  ;;  %v3049_v6 = vpop.permute.xlu1 %3048 }
 0x793   : > { %v3101_v18 = vpop.permute.xlu0 %3100  ;;  %v3184_v44 = vsel %vm9064_vm11, %v2994_v49, %v3049_v6 }
 0x794   : > { %v3147_v21 = vpack.c.b16 %v3139_v11, %v3138_v62  ;;  %v3198_v39 = vsel %vm3188_vm4, %v3178_v41, %v3101_v18  ;;  %v3082_v40 = vunpack.c.l.b16 %v2568_v1  ;;  %v1797_v18 = vpack.c.bf16 %v8042_v14, %v8042_v14 }
 0x795   : > { %v3219_v12 = vsel %vm3205_vm5, %v3198_v39, %v3157_v33  ;;  %v5641_v33 = vunpack.c.l.bf16 %v5708_v36  ;;  %v1796_v39 = vpack.c.bf16 %v8026_v2, %v8026_v2 }
 0x796   : > { %3162 = vrot.lane.b32.xlu2 %v3147_v21, %s6081_s29  ;;  %3326 = vmatmul.bf16.gmra.mxu3 %v3219_v12  ;;  %v2987_v1 = vunpack.c.l.b16 %v1797_v18  ;;  %s8936_s29 = scalar_lea.vmem %s8984_s12, %s5473_s23 }
 0x799   : > { %v2551_v9 = vpop.f32.mrf.mxu0 }
 0x79a   : > { %v2569_v35 = vpack.c.bf16 %v2551_v9, %v2551_v9  ;;  %v2986_v9 = vunpack.c.l.b16 %v1796_v39 }
 0x79c   : > { %v3083_v42 = vunpack.c.l.b16 %v2569_v35  ;;  %v3051_v35 = vpop.permute.xlu1 %3050  ;;  %v2995_v51 = vpack.c.b16 %v2987_v1, %v2986_v9  ;;  %v5711_v1 = vld [vmem:[%s6165_s26 + $0x30] sm:$0xff]  }
 0x79d   : > { %v5653_v9 = vunpack.c.l.bf16 %v5711_v1 }
 0x79e   : > { %v3091_v46 = vpack.c.b16 %v3083_v42, %v3082_v40  ;;  %v3187_v40 = vsel %vm9065_vm12, %v2995_v51, %v3051_v35 }
 0x7a0   : > { %3106 = vrot.lane.b32.xlu0 %v3091_v46, %s6082_s30 }
 0x7a3   : > { %v3103_v23 = vpop.permute.xlu0 %3102 }
 0x7a4   : > { %v3200_v37 = vsel %vm3188_vm4, %v3181_v8, %v3103_v23 }
 0x7a5   : > { %v3222_v20 = vsel %vm3205_vm5, %v3200_v37, %v3159_v50  ;;  %v5642_v37 = vunpack.c.h.bf16 %v5708_v36 }
 0x7a6   : > { %3331 = vmatmul.bf16.gmra.mxu3 %v3222_v20 }
 0x7bb   : > { %v3307_v30 = vpop.f32.mrf.mxu3 }
 0x7bc   : > { %v3308_v38 = vadd.f32 %v8171_v24, %v3307_v30 }
 0x7be   : > { %v8174_v25 = vadd.f32 %v5629_v57, %v3308_v38 }
 0x7c0   : > { %3397 = vadd.xlane.f32.xlu1 %v8174_v25 }
 0x7c3   : > { %v3309_v52 = vpop.f32.mrf.mxu3 }
 0x7c4   : > { %v3310_v17 = vadd.f32 %v8171_v24, %v3309_v52  ;;  %v5709_v52 = vld [vmem:[%s6165_s26 + $0x20] sm:$0xff]  }
 0x7c5   : > { %v5645_v19 = vunpack.c.l.bf16 %v5709_v52 }
 0x7c6   : > { %v8178_v16 = vadd.f32 %v5630_v54, %v3310_v17 }
 0x7ca   : > { %3399 = vadd.xlane.f32.xlu0 %v8178_v16 }
 0x7ce   : > { %v3312_v28 = vpop.f32.mrf.mxu3 }
 0x7cf   : > { %v3313_v31 = vadd.f32 %v8171_v24, %v3312_v28 }
 0x7d1   : > { %v8183_v4 = vadd.f32 %v5633_v15, %v3313_v31 }
 0x7d3   : > { %3401 = vadd.xlane.f32.xlu2 %v8183_v4 }
 0x7d6   : > { %v3314_v0 = vpop.f32.mrf.mxu3 }
 0x7d7   : > { %v3315_v3 = vadd.f32 %v8171_v24, %v3314_v0 }
 0x7d9   : > { %v8187_v60 = vadd.f32 %v5634_v27, %v3315_v3 }
 0x7db   : > { %3403 = vadd.xlane.f32.xlu1 %v8187_v60 }
 0x7e0   : > { %v3161_v5 = vpop.permute.xlu2 %3160 }
 0x7e9   : > { %v3317_v56 = vpop.f32.mrf.mxu3 }
 0x7ea   : > { %v3318_v58 = vadd.f32 %v8171_v24, %v3317_v56  ;;  %v5646_v56 = vunpack.c.h.bf16 %v5709_v52 }
 0x7ec   : > { %v8192_v10 = vadd.f32 %v5637_v53, %v3318_v58 }
 0x7ee   : > { %3405 = vadd.xlane.f32.xlu2 %v8192_v10 }
 0x7f0   : > { %v3163_v32 = vpop.permute.xlu2 %3162 }
 0x7f1   : > { %v3319_v22 = vpop.f32.mrf.mxu3 }
 0x7f2   : > { %v3320_v26 = vadd.f32 %v8171_v24, %v3319_v22 }
 0x7f4   : > { %v8200_v43 = vadd.f32 %v5638_v29, %v3320_v26  ;;  %v5710_v26 = vld [vmem:[%s6165_s26 + $0x28] sm:$0xff]  }
 0x7f5   : > { %v5649_v59 = vunpack.c.l.bf16 %v5710_v26  ;;  %v5650_v18 = vunpack.c.h.bf16 %v5710_v26  ;;  %v5301_v26 = vld [vmem:[%s8980_s8 + $0xa4] sm:$0xf] }
 0x7f6   : > { %3407 = vadd.xlane.f32.xlu0 %v8200_v43 }
 0x7fa   : > { %v3105_v62 = vpop.permute.xlu0 %3104 }
 0x7fb   : > { %v3202_v11 = vsel %vm3188_vm4, %v3184_v44, %v3105_v62 }
 0x7fc   : > { %v3225_v41 = vsel %vm3205_vm5, %v3202_v11, %v3161_v5 }
 0x7fd   : > { %3336 = vmatmul.bf16.gmra.mxu3 %v3225_v41 }
 0x809   : > { %v3322_v21 = vpop.f32.mrf.mxu3 }
 0x80a   : > { %v3323_v12 = vadd.f32 %v8171_v24, %v3322_v21 }
 0x80c   : > { %v8212_v55 = vadd.f32 %v5641_v33, %v3323_v12 }
 0x80e   : > { %3409 = vadd.xlane.f32.xlu0 %v8212_v55 }
 0x811   : > { %v3324_v7 = vpop.f32.mrf.mxu3 }
 0x812   : > { %v3107_v42 = vpop.permute.xlu0 %3106  ;;  %v3325_v50 = vadd.f32 %v8171_v24, %v3324_v7  ;;  %v5654_v7 = vunpack.c.h.bf16 %v5711_v1  ;;  %v5293_v1 = vld [vmem:[%s8980_s8 + $0x64] sm:$0xf] }
 0x813   : > { %v3204_v14 = vsel %vm3188_vm4, %v3187_v40, %v3107_v42 }
 0x814   : > { %v3228_v46 = vsel %vm3205_vm5, %v3204_v14, %v3163_v32  ;;  %v8226_v57 = vadd.f32 %v5642_v37, %v3325_v50  ;;  %v8292_v50 = vld [vmem:[%s6165_s26 + $0x38] sm:$0xff]   ;;  %v5245_v37 = vld [vmem:[%s8980_s8 + $0xe0] sm:$0xf] }
 0x815   : > { %3341 = vmatmul.bf16.gmra.mxu3 %v3228_v46 }
 0x819   : > { %v3327_v30 = vpop.f32.mrf.mxu3 }
 0x81a   : > { %v3328_v54 = vadd.f32 %v8171_v24, %v3327_v30  ;;  %v5657_v30 = vunpack.c.l.bf16 %v8292_v50 }
 0x81c   : > { %v8237_v31 = vadd.f32 %v5645_v19, %v3328_v54 }
 0x821   : > { %v3329_v0 = vpop.f32.mrf.mxu3 }
 0x822   : > { %v3330_v53 = vadd.f32 %v8171_v24, %v3329_v0  ;;  %v5537_v0 = vld [vmem:[%s8980_s8 + $0xcc] sm:$0xf0] }
 0x824   : > { %v8250_v29 = vadd.f32 %v5646_v56, %v3330_v53  ;;  %v5553_v56 = vld [vmem:[%s8980_s8 + $0xd0] sm:$0xf0] }
 0x829   : > { %v3332_v61 = vpop.f32.mrf.mxu3 }
 0x82a   : > { %v3333_v48 = vadd.f32 %v8171_v24, %v3332_v61  ;;  %v5536_v61 = vld [vmem:[%s8980_s8 + $0xac] sm:$0xf0] }
 0x82c   : > { %v8257_v6 = vadd.f32 %v5649_v59, %v3333_v48  ;;  %v5552_v59 = vld [vmem:[%s8980_s8 + $0xb0] sm:$0xf0] }
 0x831   : > { %v3334_v11 = vpop.f32.mrf.mxu3 }
 0x832   : > { %v3335_v36 = vadd.f32 %v8171_v24, %v3334_v11  ;;  %v5297_v11 = vld [vmem:[%s8980_s8 + $0x84] sm:$0xf] }
 0x833   : > { %v3398_v2 = vpop.xlane.xlu1 %3397 }
 0x834   : > { %v3429_v47 = vmul.f32 %v3398_v2, %v9066_v45  ;;  %v8271_v39 = vadd.f32 %v5650_v18, %v3335_v36  ;;  %v5551_v36 = vld [vmem:[%s8980_s8 + $0x90] sm:$0xf0] }
 0x835   : > { %v5298_v18 = vor.u32 %v5551_v36, %v5297_v11 }
 0x836   : > { %v8220_v8 = vsub.f32 %v8174_v25, %v3429_v47 }
 0x838   : > { %v3461_v23 = vmul.f32 %v8220_v8, %v8220_v8 }
 0x83a   : > { %3477 = vadd.xlane.f32.xlu1 %v3461_v23 }
 0x83d   : > { %v3400_v20 = vpop.xlane.xlu0 %3399 }
 0x83e   : > { %v3430_v13 = vmul.f32 %v3400_v20, %v9066_v45  ;;  %v5538_v20 = vld [vmem:[%s8980_s8 + $0xec] sm:$0xf0] }
 0x83f   : > { %v5246_v52 = vor.u32 %v5538_v20, %v5245_v37 }
 0x840   : > { %v8229_v38 = vsub.f32 %v8178_v16, %v3430_v13  ;;  %v5309_v13 = vld [vmem:[%s8980_s8 + $0xe4] sm:$0xf] }
 0x841   : > { %3851 = vmatpush.bf16.msrb.mxu0 %v5246_v52  ;;  %v5285_v52 = vld [vmem:[%s8980_s8 + $0x24] sm:$0xf] }
 0x842   : > { %3411 = vadd.xlane.f32.xlu1 %v8226_v57  ;;  %v3462_v17 = vmul.f32 %v8229_v38, %v8229_v38 }
 0x844   : > { %3479 = vadd.xlane.f32.xlu2 %v3462_v17  ;;  %v5554_v17 = vld [vmem:[%s8980_s8 + $0xf0] sm:$0xf0] }
 0x845   : > { %v5310_v19 = vor.u32 %v5554_v17, %v5309_v13  ;;  %v5221_v13 = vld [vmem:[%s8980_s8 + $0x20] sm:$0xf] }
 0x846   : > { %v3402_v15 = vpop.xlane.xlu2 %3401 }
 0x847   : > { %v3431_v28 = vmul.f32 %v3402_v15, %v9066_v45  ;;  %4121 = vmatpush.bf16.msrb.mxu2 %v5310_v19 }
 0x849   : > { %v8240_v27 = vsub.f32 %v8183_v4, %v3431_v28  ;;  %v5241_v28 = vld [vmem:[%s8980_s8 + $0xc0] sm:$0xf] }
 0x84a   : > { %3413 = vadd.xlane.f32.xlu1 %v8237_v31  ;;  %v5242_v53 = vor.u32 %v5537_v0, %v5241_v28  ;;  %v5217_v28 = vld [vmem:[%s8980_s8] sm:$0xf]  ;;  %v5531_v0 = vld [vmem:[%s8980_s8 + $0xc] sm:$0xf0] }
 0x84b   : > { %v3463_v3 = vmul.f32 %v8240_v27, %v8240_v27 }
 0x84c   : > { %3852 = vmatpush.bf16.msrb.mxu0 %v5242_v53  ;;  %v5218_v53 = vor.u32 %v5531_v0, %v5217_v28 }
 0x84d   : > { %3481 = vadd.xlane.f32.xlu2 %v3463_v3  ;;  %v5305_v3 = vld [vmem:[%s8980_s8 + $0xc4] sm:$0xf] }
 0x84e   : > { %v3404_v34 = vpop.xlane.xlu1 %3403 }
 0x84f   : > { %v3432_v58 = vmul.f32 %v3404_v34, %v9066_v45 }
 0x851   : > { %v8248_v63 = vsub.f32 %v8187_v60, %v3432_v58  ;;  %v5306_v58 = vor.u32 %v5553_v56, %v5305_v3  ;;  %v5281_v3 = vld [vmem:[%s8980_s8 + $0x4] sm:$0xf]  ;;  %v5547_v56 = vld [vmem:[%s8980_s8 + $0x10] sm:$0xf0] }
 0x853   : > { %v3464_v22 = vmul.f32 %v8248_v63, %v8248_v63  ;;  %4122 = vmatpush.bf16.msrb.mxu2 %v5306_v58  ;;  %v5282_v58 = vor.u32 %v5547_v56, %v5281_v3 }
 0x855   : > { %3483 = vadd.xlane.f32.xlu0 %v3464_v22  ;;  %3415 = vadd.xlane.f32.xlu2 %v8250_v29  ;;  %v5237_v22 = vld [vmem:[%s8980_s8 + $0xa0] sm:$0xf] }
 0x856   : > { %v5238_v48 = vor.u32 %v5536_v61, %v5237_v22 }
 0x858   : > { %3853 = vmatpush.bf16.msrb.mxu0 %v5238_v48 }
 0x85d   : > { %3417 = vadd.xlane.f32.xlu2 %v8257_v6 }
 0x861   : > { %v3406_v49 = vpop.xlane.xlu2 %3405 }
 0x862   : > { %v3433_v44 = vmul.f32 %v3406_v49, %v9066_v45  ;;  %v5302_v49 = vor.u32 %v5552_v59, %v5301_v26 }
 0x864   : > { %v8262_v62 = vsub.f32 %v8192_v10, %v3433_v44  ;;  %4123 = vmatpush.bf16.msrb.mxu2 %v5302_v49  ;;  %v5233_v44 = vld [vmem:[%s8980_s8 + $0x80] sm:$0xf] }
 0x866   : > { %v3465_v5 = vmul.f32 %v8262_v62, %v8262_v62 }
 0x868   : > { %3485 = vadd.xlane.f32.xlu0 %v3465_v5  ;;  %v5535_v5 = vld [vmem:[%s8980_s8 + $0x8c] sm:$0xf0]  ;;  %4124 = vmatpush.bf16.msrb.mxu2 %v5298_v18 }
 0x869   : > { %v3408_v41 = vpop.xlane.xlu0 %3407 }
 0x86a   : > { %v3434_v33 = vmul.f32 %v3408_v41, %v9066_v45  ;;  %v5234_v41 = vor.u32 %v5535_v5, %v5233_v44 }
 0x86c   : > { %v8269_v21 = vsub.f32 %v8200_v43, %v3434_v33  ;;  %3854 = vmatpush.bf16.msrb.mxu0 %v5234_v41  ;;  %v5229_v33 = vld [vmem:[%s8980_s8 + $0x60] sm:$0xf] }
 0x86e   : > { %v3466_v12 = vmul.f32 %v8269_v21, %v8269_v21 }
 0x870   : > { %3419 = vadd.xlane.f32.xlu0 %v8271_v39  ;;  %3487 = vadd.xlane.f32.xlu1 %v3466_v12  ;;  %v5534_v12 = vld [vmem:[%s8980_s8 + $0x6c] sm:$0xf0] }
 0x880   : > { %v3337_v35 = vpop.f32.mrf.mxu3 }
 0x881   : > { %v3338_v51 = vadd.f32 %v8171_v24, %v3337_v35  ;;  %v3410_v40 = vpop.xlane.xlu0 %3409  ;;  %v5550_v35 = vld [vmem:[%s8980_s8 + $0x70] sm:$0xf0] }
 0x882   : > { %v3435_v42 = vmul.f32 %v3410_v40, %v9066_v45  ;;  %v5225_v40 = vld [vmem:[%s8980_s8 + $0x40] sm:$0xf] }
 0x883   : > { %v8279_v32 = vadd.f32 %v5653_v9, %v3338_v51  ;;  %v5230_v9 = vor.u32 %v5534_v12, %v5229_v33  ;;  %v5294_v51 = vor.u32 %v5550_v35, %v5293_v1 }
 0x884   : > { %v8282_v14 = vsub.f32 %v8212_v55, %v3435_v42  ;;  %v5533_v42 = vld [vmem:[%s8980_s8 + $0x4c] sm:$0xf0] }
 0x885   : > { %3421 = vadd.xlane.f32.xlu0 %v8279_v32  ;;  %3855 = vmatpush.bf16.msrb.mxu0 %v5230_v9 }
 0x886   : > { %v3467_v46 = vmul.f32 %v8282_v14, %v8282_v14  ;;  %4125 = vmatpush.bf16.msrb.mxu2 %v5294_v51 }
 0x888   : > { %v3339_v2 = vpop.f32.mrf.mxu3  ;;  %3489 = vadd.xlane.f32.xlu1 %v3467_v46  ;;  %v5289_v46 = vld [vmem:[%s8980_s8 + $0x44] sm:$0xf] }
 0x889   : > { %v3340_v47 = vadd.f32 %v8171_v24, %v3339_v2  ;;  %v5226_v2 = vor.u32 %v5533_v42, %v5225_v40 }
 0x88b   : > { %v8288_v23 = vadd.f32 %v5654_v7, %v3340_v47  ;;  %v5549_v47 = vld [vmem:[%s8980_s8 + $0x50] sm:$0xf0]  ;;  %3856 = vmatpush.bf16.msrb.mxu0 %v5226_v2 }
 0x88c   : > { %v5290_v7 = vor.u32 %v5549_v47, %v5289_v46 }
 0x88e   : > { %4126 = vmatpush.bf16.msrb.mxu2 %v5290_v7 }
 0x890   : > { %3423 = vadd.xlane.f32.xlu1 %v8288_v23 }
 0x898   : > { %v3342_v54 = vpop.f32.mrf.mxu3 }
 0x899   : > { %v3343_v15 = vadd.f32 %v8171_v24, %v3342_v54  ;;  %v5548_v54 = vld [vmem:[%s8980_s8 + $0x30] sm:$0xf0] }
 0x89b   : > { %v8317_v34 = vadd.f32 %v5657_v30, %v3343_v15  ;;  %v5532_v30 = vld [vmem:[%s8980_s8 + $0x2c] sm:$0xf0]  ;;  %v5286_v15 = vor.u32 %v5548_v54, %v5285_v52 }
 0x89c   : > { %v5222_v17 = vor.u32 %v5532_v30, %v5221_v13 }
 0x89d   : > { %3425 = vadd.xlane.f32.xlu1 %v8317_v34  ;;  %4127 = vmatpush.bf16.msrb.mxu2 %v5286_v15 }
 0x89e   : > { %3857 = vmatpush.bf16.msrb.mxu0 %v5222_v17 }
 0x8a0   : > { %v3344_v42 = vpop.f32.mrf.mxu3 }
 0x8a1   : > { %4128 = vmatpush.bf16.msrb.mxu2 %v5282_v58 }
 0x8a2   : > { %3858 = vmatpush.bf16.msrb.mxu0 %v5218_v53 }
 0x8ad   : > { %v3478_v37 = vpop.xlane.xlu1 %3477 }
 0x8ae   : > { %v3509_v20 = vmul.f32 %v3478_v37, %v9066_v45  ;;  %v3345_v37 = vadd.f32 %v8171_v24, %v3344_v42 }
 0x8b0   : > { %v3525_v19 = vadd.f32 1e-05, %v3509_v20  ;;  %v5658_v20 = vunpack.c.h.bf16 %v8292_v50 }
 0x8b2   : > { %6040 = vrsqrt.f32 %v3525_v19  ;;  %vm3547_vm14 = vweird.f32 %v3525_v19  ;;  %v8414_v0 = vadd.f32 %v5658_v20, %v3345_v37 }
 0x8b5   : > { %v3412_v22 = vpop.xlane.xlu1 %3411 }
 0x8b6   : > { %v3436_v61 = vmul.f32 %v3412_v22, %v9066_v45 }
 0x8b7   : > { %v3480_v26 = vpop.xlane.xlu2 %3479 }
 0x8b8   : > { %v6041_v48 = vpop.eup %6040  ;;  %v8398_v59 = vsub.f32 %v8226_v57, %v3436_v61  ;;  %v3510_v49 = vmul.f32 %v3480_v26, %v9066_v45 }
 0x8b9   : > { %v3542_v44 = vmul.f32 %v6041_v48, %v3525_v19  ;;  %vm3548_vm13 = vweird.f32 %v6041_v48  ;;  %v8419_v19 = vld [vmem:[%s8978_s6] ss:$0 sm:$0xff] }
 0x8ba   : > { %v3526_v5 = vadd.f32 1e-05, %v3510_v49  ;;  %v3468_v11 = vmul.f32 %v8398_v59, %v8398_v59  ;;  %vm3549_vm15 = vmor %vm3547_vm14, %vm3548_vm13 }
 0x8bb   : > { %v3543_v41 = vmul.f32 %v6041_v48, %v3542_v44 }
 0x8bc   : > { %6042 = vrsqrt.f32 %v3526_v5  ;;  %3491 = vadd.xlane.f32.xlu2 %v3468_v11  ;;  %vm3557_vm1 = vweird.f32 %v3526_v5 }
 0x8bd   : > { %v3544_v36 = vmul.f32 0.5, %v3543_v41  ;;  %v3414_v18 = vpop.xlane.xlu1 %3413 }
 0x8be   : > { %v3437_v33 = vmul.f32 %v3414_v18, %v9066_v45 }
 0x8bf   : > { %v3545_v12 = vsub.f32 1.5, %v3544_v36 }
 0x8c0   : > { %v8405_v1 = vsub.f32 %v8237_v31, %v3437_v33  ;;  %v3482_v9 = vpop.xlane.xlu2 %3481 }
 0x8c1   : > { %v3511_v35 = vmul.f32 %v3482_v9, %v9066_v45  ;;  %v3546_v46 = vmul.f32 %v6041_v48, %v3545_v12 }
 0x8c2   : > { %v6043_v51 = vpop.eup %6042  ;;  %v3469_v40 = vmul.f32 %v8405_v1, %v8405_v1 }
 0x8c3   : > { %v3552_v2 = vmul.f32 %v6043_v51, %v3526_v5  ;;  %v3527_v47 = vadd.f32 1e-05, %v3511_v35  ;;  %v3550_v13 = vsel %vm3549_vm15, %v6041_v48, %v3546_v46  ;;  %vm3558_vm0 = vweird.f32 %v6043_v51 }
 0x8c4   : > { %3493 = vadd.xlane.f32.xlu2 %v3469_v40  ;;  %v3701_v24 = vmul.f32 %v3550_v13, %v8220_v8  ;;  %vm3559_vm2 = vmor %vm3557_vm1, %vm3558_vm0  ;;  %v8431_v8 = vld [vmem:[%s8979_s7] ss:$0 sm:$0xff] }
 0x8c5   : > { %v3553_v7 = vmul.f32 %v6043_v51, %v3552_v2  ;;  %6044 = vrsqrt.f32 %v3527_v47  ;;  %vm3567_vm4 = vweird.f32 %v3527_v47 }
 0x8c6   : > { %v3720_v26 = vmul.f32 %v8419_v19, %v3701_v24 }
 0x8c7   : > { %v3554_v30 = vmul.f32 0.5, %v3553_v7 }
 0x8c8   : > { %v3416_v52 = vpop.xlane.xlu2 %3415  ;;  %v3484_v17 = vpop.xlane.xlu0 %3483  ;;  %v3739_v36 = vadd.f32 %v8431_v8, %v3720_v26 }
 0x8c9   : > { %v3555_v54 = vsub.f32 1.5, %v3554_v30  ;;  %v3438_v15 = vmul.f32 %v3416_v52, %v9066_v45  ;;  %v3512_v28 = vmul.f32 %v3484_v17, %v9066_v45 }
 0x8cb   : > { %v6045_v50 = vpop.eup %6044  ;;  %v3556_v3 = vmul.f32 %v6043_v51, %v3555_v54  ;;  %v8423_v53 = vsub.f32 %v8250_v29, %v3438_v15  ;;  %v3528_v56 = vadd.f32 1e-05, %v3512_v28 }
 0x8cc   : > { %v3562_v58 = vmul.f32 %v6045_v50, %v3527_v47  ;;  %3427 = vadd.xlane.f32.xlu2 %v8414_v0  ;;  %vm3568_vm3 = vweird.f32 %v6045_v50 }
 0x8cd   : > { %v3560_v22 = vsel %vm3559_vm2, %v6043_v51, %v3556_v3  ;;  %6046 = vrsqrt.f32 %v3528_v56  ;;  %v3470_v61 = vmul.f32 %v8423_v53, %v8423_v53  ;;  %vm3569_vm5 = vmor %vm3567_vm4, %vm3568_vm3  ;;  %vm3577_vm7 = vweird.f32 %v3528_v56 }
 0x8ce   : > { %v3702_v48 = vmul.f32 %v3560_v22, %v8229_v38  ;;  %v3563_v49 = vmul.f32 %v6045_v50, %v3562_v58 }
 0x8cf   : > { %3495 = vadd.xlane.f32.xlu0 %v3470_v61 }
 0x8d0   : > { %v3721_v44 = vmul.f32 %v8419_v19, %v3702_v48  ;;  %v3564_v5 = vmul.f32 0.5, %v3563_v49  ;;  %v3418_v11 = vpop.xlane.xlu2 %3417 }
 0x8d1   : > { %v3439_v41 = vmul.f32 %v3418_v11, %v9066_v45 }
 0x8d2   : > { %v3740_v18 = vadd.f32 %v8431_v8, %v3721_v44  ;;  %v3565_v33 = vsub.f32 1.5, %v3564_v5 }
 0x8d3   : > { %v6047_v12 = vpop.eup %6046  ;;  %v8440_v9 = vsub.f32 %v8257_v6, %v3439_v41 }
 0x8d4   : > { %v3566_v35 = vmul.f32 %v6045_v50, %v3565_v33  ;;  %v3572_v38 = vmul.f32 %v6047_v12, %v3528_v56  ;;  %v8442_v51 = vpack.c.bf16 %v3740_v18, %v3739_v36  ;;  %vm3578_vm6 = vweird.f32 %v6047_v12 }
 0x8d5   : > { %v3471_v40 = vmul.f32 %v8440_v9, %v8440_v9  ;;  %vm3579_vm8 = vmor %vm3577_vm7, %vm3578_vm6 }
 0x8d6   : > { %v3573_v42 = vmul.f32 %v6047_v12, %v3572_v38  ;;  %3859 = vmatmul.bf16.vlgmr.msrb.gmra.mxu0 %v8442_v51  ;;  %4129 = vmatmul.bf16.vlgmr.msrb.gmra.mxu2 %v8442_v51  ;;  %v3570_v46 = vsel %vm3569_vm5, %v6045_v50, %v3566_v35 }
 0x8d7   : > { %3497 = vadd.xlane.f32.xlu0 %v3471_v40  ;;  %v3703_v37 = vmul.f32 %v3570_v46, %v8240_v27 }
 0x8d8   : > { %v3574_v2 = vmul.f32 0.5, %v3573_v42 }
 0x8d9   : > { %v3722_v54 = vmul.f32 %v8419_v19, %v3703_v37 }
 0x8da   : > { %v3575_v7 = vsub.f32 1.5, %v3574_v2 }
 0x8db   : > { %v3486_v20 = vpop.xlane.xlu0 %3485  ;;  %v3741_v50 = vadd.f32 %v8431_v8, %v3722_v54 }
 0x8dc   : > { %v3576_v13 = vmul.f32 %v6047_v12, %v3575_v7  ;;  %v3513_v30 = vmul.f32 %v3486_v20, %v9066_v45 }
 0x8de   : > { %v3580_v47 = vsel %vm3579_vm8, %v6047_v12, %v3576_v13  ;;  %v3529_v52 = vadd.f32 1e-05, %v3513_v30 }
 0x8df   : > { %v3704_v17 = vmul.f32 %v3580_v47, %v8248_v63 }
 0x8e0   : > { %6048 = vrsqrt.f32 %v3529_v52  ;;  %vm3587_vm10 = vweird.f32 %v3529_v52 }
 0x8e1   : > { %v3723_v15 = vmul.f32 %v8419_v19, %v3704_v17 }
 0x8e3   : > { %v3488_v28 = vpop.xlane.xlu1 %3487  ;;  %v3420_v24 = vpop.xlane.xlu0 %3419  ;;  %v3742_v27 = vadd.f32 %v8431_v8, %v3723_v15 }
 0x8e4   : > { %v3514_v3 = vmul.f32 %v3488_v28, %v9066_v45  ;;  %v3440_v56 = vmul.f32 %v3420_v24, %v9066_v45 }
 0x8e5   : > { %v8457_v58 = vpack.c.bf16 %v3742_v27, %v3741_v50 }
 0x8e6   : > { %v6049_v22 = vpop.eup %6048  ;;  %v3530_v61 = vadd.f32 1e-05, %v3514_v3  ;;  %v8460_v63 = vsub.f32 %v8271_v39, %v3440_v56 }
 0x8e7   : > { %v3582_v26 = vmul.f32 %v6049_v22, %v3529_v52  ;;  %3864 = vmatmul.bf16.gmra.mxu0 %v8457_v58  ;;  %4134 = vmatmul.bf16.gmra.mxu2 %v8457_v58  ;;  %vm3588_vm9 = vweird.f32 %v6049_v22 }
 0x8e8   : > { %6050 = vrsqrt.f32 %v3530_v61  ;;  %v3472_v48 = vmul.f32 %v8460_v63, %v8460_v63  ;;  %vm3589_vm11 = vmor %vm3587_vm10, %vm3588_vm9  ;;  %vm3597_vm13 = vweird.f32 %v3530_v61 }
 0x8e9   : > { %v3583_v49 = vmul.f32 %v6049_v22, %v3582_v26  ;;  %v5545_v26 = vld [vmem:[%s8982_s10 + $0x30] sm:$0xff] }
 0x8ea   : > { %3499 = vadd.xlane.f32.xlu1 %v3472_v48 }
 0x8eb   : > { %v3584_v44 = vmul.f32 0.5, %v3583_v49  ;;  %v5562_v49 = vld [vmem:[%s8982_s10 + $0x78] sm:$0xff] }
 0x8ec   : > { %4258 = vmatpush.bf16.msrb.mxu3 %v5562_v49 }
 0x8ed   : > { %v3585_v5 = vsub.f32 1.5, %v3584_v44 }
 0x8ee   : > { %v6051_v11 = vpop.eup %6050 }
 0x8ef   : > { %v3586_v41 = vmul.f32 %v6049_v22, %v3585_v5  ;;  %v3592_v36 = vmul.f32 %v6051_v11, %v3530_v61  ;;  %vm3598_vm12 = vweird.f32 %v6051_v11  ;;  %v5546_v61 = vld [vmem:[%s8982_s10 + $0x38] sm:$0xff]  ;;  %v5544_v5 = vld [vmem:[%s8982_s10 + $0x28] sm:$0xff] }
 0x8f0   : > { %vm3599_vm14 = vmor %vm3597_vm13, %vm3598_vm12  ;;  %3988 = vmatpush.bf16.msrb.mxu1 %v5546_v61 }
 0x8f1   : > { %v3593_v18 = vmul.f32 %v6051_v11, %v3592_v36  ;;  %v3590_v33 = vsel %vm3589_vm11, %v6049_v22, %v3586_v41 }
 0x8f2   : > { %v3705_v38 = vmul.f32 %v3590_v33, %v8262_v62 }
 0x8f3   : > { %v3594_v12 = vmul.f32 0.5, %v3593_v18  ;;  %v5543_v18 = vld [vmem:[%s8982_s10 + $0x20] sm:$0xff] }
 0x8f4   : > { %v3724_v37 = vmul.f32 %v8419_v19, %v3705_v38  ;;  %3989 = vmatpush.bf16.msrb.mxu1 %v5545_v26 }
 0x8f5   : > { %v3595_v35 = vsub.f32 1.5, %v3594_v12  ;;  %v5560_v12 = vld [vmem:[%s8982_s10 + $0x68] sm:$0xff] }
 0x8f6   : > { %v3743_v47 = vadd.f32 %v8431_v8, %v3724_v37 }
 0x8f7   : > { %v3596_v40 = vmul.f32 %v6051_v11, %v3595_v35 }
 0x8f8   : > { %v3422_v42 = vpop.xlane.xlu0 %3421  ;;  %3990 = vmatpush.bf16.msrb.mxu1 %v5544_v5 }
 0x8f9   : > { %v3600_v46 = vsel %vm3599_vm14, %v6051_v11, %v3596_v40  ;;  %v3441_v2 = vmul.f32 %v3422_v42, %v9066_v45  ;;  %v5561_v11 = vld [vmem:[%s8982_s10 + $0x70] sm:$0xff]  ;;  %v5542_v40 = vld [vmem:[%s8982_s10 + $0x18] sm:$0xff]  ;;  %v5559_v42 = vld [vmem:[%s8982_s10 + $0x60] sm:$0xff] }
 0x8fa   : > { %v3706_v7 = vmul.f32 %v3600_v46, %v8269_v21  ;;  %4259 = vmatpush.bf16.msrb.mxu3 %v5561_v11 }
 0x8fb   : > { %v8471_v20 = vsub.f32 %v8279_v32, %v3441_v2  ;;  %v3490_v13 = vpop.xlane.xlu1 %3489 }
 0x8fc   : > { %v3725_v30 = vmul.f32 %v8419_v19, %v3706_v7  ;;  %v3515_v56 = vmul.f32 %v3490_v13, %v9066_v45  ;;  %3991 = vmatpush.bf16.msrb.mxu1 %v5543_v18  ;;  %v5541_v7 = vld [vmem:[%s8982_s10 + $0x10] sm:$0xff]  ;;  %v5558_v13 = vld [vmem:[%s8982_s10 + $0x58] sm:$0xff] }
 0x8fd   : > { %v3473_v62 = vmul.f32 %v8471_v20, %v8471_v20 }
 0x8fe   : > { %v3744_v52 = vadd.f32 %v8431_v8, %v3725_v30  ;;  %v3531_v22 = vadd.f32 1e-05, %v3515_v56  ;;  %4260 = vmatpush.bf16.msrb.mxu3 %v5560_v12  ;;  %v5539_v56 = vld [vmem:[%s8982_s10] sm:$0xff] }
 0x8ff   : > { %3501 = vadd.xlane.f32.xlu2 %v3473_v62 }
 0x900   : > { %v8478_v17 = vpack.c.bf16 %v3744_v52, %v3743_v47  ;;  %6052 = vrsqrt.f32 %v3531_v22  ;;  %3992 = vmatpush.bf16.msrb.mxu1 %v5542_v40  ;;  %vm3607_vm0 = vweird.f32 %v3531_v22 }
 0x902   : > { %3869 = vmatmul.bf16.gmra.mxu0 %v8478_v17  ;;  %4139 = vmatmul.bf16.gmra.mxu2 %v8478_v17 }
 0x903   : > { %v3424_v21 = vpop.xlane.xlu1 %3423  ;;  %4261 = vmatpush.bf16.msrb.mxu3 %v5559_v42 }
 0x904   : > { %v3442_v54 = vmul.f32 %v3424_v21, %v9066_v45  ;;  %3993 = vmatpush.bf16.msrb.mxu1 %v5541_v7  ;;  %v5540_v21 = vld [vmem:[%s8982_s10 + $0x8] sm:$0xff] }
 0x906   : > { %v8484_v15 = vsub.f32 %v8288_v23, %v3442_v54  ;;  %v6053_v48 = vpop.eup %6052 }
 0x907   : > { %v3602_v44 = vmul.f32 %v6053_v48, %v3531_v22  ;;  %vm3608_vm15 = vweird.f32 %v6053_v48  ;;  %4262 = vmatpush.bf16.msrb.mxu3 %v5558_v13  ;;  %v5556_v22 = vld [vmem:[%s8982_s10 + $0x48] sm:$0xff] }
 0x908   : > { %v3474_v28 = vmul.f32 %v8484_v15, %v8484_v15  ;;  %3994 = vmatpush.bf16.msrb.mxu1 %v5540_v21  ;;  %vm3609_vm1 = vmor %vm3607_vm0, %vm3608_vm15 }
 0x909   : > { %v3603_v41 = vmul.f32 %v6053_v48, %v3602_v44 }
 0x90a   : > { %3503 = vadd.xlane.f32.xlu0 %v3474_v28  ;;  %v5557_v28 = vld [vmem:[%s8982_s10 + $0x50] sm:$0xff] }
 0x90b   : > { %v3604_v38 = vmul.f32 0.5, %v3603_v41  ;;  %4263 = vmatpush.bf16.msrb.mxu3 %v5557_v28 }
 0x90c   : > { %3995 = vmatpush.bf16.msrb.mxu1 %v5539_v56 }
 0x90d   : > { %v3605_v46 = vsub.f32 1.5, %v3604_v38 }
 0x90f   : > { %v3606_v47 = vmul.f32 %v6053_v48, %v3605_v46  ;;  %4264 = vmatpush.bf16.msrb.mxu3 %v5556_v22 }
 0x910   : > { %v3426_v24 = vpop.xlane.xlu1 %3425 }
 0x911   : > { %v3443_v50 = vmul.f32 %v3426_v24, %v9066_v45  ;;  %v3610_v24 = vsel %vm3609_vm1, %v6053_v48, %v3606_v47 }
 0x912   : > { %v3707_v44 = vmul.f32 %v3610_v24, %v8282_v14  ;;  %v5555_v14 = vld [vmem:[%s8982_s10 + $0x40] sm:$0xff] }
 0x913   : > { %v8490_v27 = vsub.f32 %v8317_v34, %v3443_v50  ;;  %4265 = vmatpush.bf16.msrb.mxu3 %v5555_v14 }
 0x915   : > { %v3475_v3 = vmul.f32 %v8490_v27, %v8490_v27 }
 0x917   : > { %3505 = vadd.xlane.f32.xlu1 %v3475_v3 }
 0x92f   : > { %v3492_v36 = vpop.xlane.xlu2 %3491 }
 0x930   : > { %v3516_v33 = vmul.f32 %v3492_v36, %v9066_v45 }
 0x932   : > { %v3532_v35 = vadd.f32 1e-05, %v3516_v33 }
 0x934   : > { %6054 = vrsqrt.f32 %v3532_v35  ;;  %vm3617_vm3 = vweird.f32 %v3532_v35 }
 0x937   : > { %v3494_v2 = vpop.xlane.xlu2 %3493 }
 0x938   : > { %v3517_v37 = vmul.f32 %v3494_v2, %v9066_v45 }
 0x93a   : > { %v6055_v30 = vpop.eup %6054  ;;  %v3533_v62 = vadd.f32 1e-05, %v3517_v37 }
 0x93b   : > { %v3612_v52 = vmul.f32 %v6055_v30, %v3532_v35  ;;  %vm3618_vm2 = vweird.f32 %v6055_v30  ;;  %v3726_v35 = vmul.f32 %v8419_v19, %v3707_v44  ;;  %v8570_v44 = vld [vmem:[%s8981_s9] ss:$0 sm:$0xff] }
 0x93c   : > { %6056 = vrsqrt.f32 %v3533_v62  ;;  %vm3619_vm4 = vmor %vm3617_vm3, %vm3618_vm2  ;;  %vm3627_vm6 = vweird.f32 %v3533_v62 }
 0x93d   : > { %v3613_v54 = vmul.f32 %v6055_v30, %v3612_v52  ;;  %v3745_v37 = vadd.f32 %v8431_v8, %v3726_v35 }
 0x93f   : > { %v3614_v50 = vmul.f32 0.5, %v3613_v54  ;;  %v3428_v3 = vpop.xlane.xlu2 %3427 }
 0x940   : > { %v3444_v61 = vmul.f32 %v3428_v3, %v9066_v45 }
 0x941   : > { %v3615_v26 = vsub.f32 1.5, %v3614_v50 }
 0x942   : > { %v6057_v49 = vpop.eup %6056  ;;  %v8545_v48 = vsub.f32 %v8414_v0, %v3444_v61  ;;  %v3496_v5 = vpop.xlane.xlu0 %3495 }
 0x943   : > { %v3616_v11 = vmul.f32 %v6055_v30, %v3615_v26  ;;  %v3622_v41 = vmul.f32 %v6057_v49, %v3533_v62  ;;  %v3518_v36 = vmul.f32 %v3496_v5, %v9066_v45  ;;  %vm3628_vm5 = vweird.f32 %v6057_v49 }
 0x944   : > { %v3476_v18 = vmul.f32 %v8545_v48, %v8545_v48  ;;  %vm3629_vm7 = vmor %vm3627_vm6, %vm3628_vm5 }
 0x945   : > { %v3620_v33 = vsel %vm3619_vm4, %v6055_v30, %v3616_v11  ;;  %v3623_v12 = vmul.f32 %v6057_v49, %v3622_v41  ;;  %v3534_v38 = vadd.f32 1e-05, %v3518_v36 }
 0x946   : > { %v3708_v40 = vmul.f32 %v3620_v33, %v8398_v59  ;;  %3507 = vadd.xlane.f32.xlu2 %v3476_v18  ;;  %v8580_v33 = vld [vmem:[%s8981_s9 + $0x1] ss:$0 sm:$0xff] }
 0x947   : > { %v3624_v42 = vmul.f32 0.5, %v3623_v12  ;;  %6058 = vrsqrt.f32 %v3534_v38  ;;  %vm3637_vm9 = vweird.f32 %v3534_v38 }
 0x948   : > { %v3727_v46 = vmul.f32 %v8419_v19, %v3708_v40 }
 0x949   : > { %v3625_v2 = vsub.f32 1.5, %v3624_v42 }
 0x94a   : > { %v3498_v7 = vpop.xlane.xlu0 %3497  ;;  %v3746_v13 = vadd.f32 %v8431_v8, %v3727_v46 }
 0x94b   : > { %v3519_v30 = vmul.f32 %v3498_v7, %v9066_v45  ;;  %v3626_v21 = vmul.f32 %v6057_v49, %v3625_v2 }
 0x94c   : > { %v8559_v47 = vpack.c.bf16 %v3746_v13, %v3745_v37 }
 0x94d   : > { %v6059_v52 = vpop.eup %6058  ;;  %v8561_v59 = vadd.f32 1e-05, %v3519_v30  ;;  %v3630_v24 = vsel %vm3629_vm7, %v6057_v49, %v3626_v21 }
 0x94e   : > { %v3632_v54 = vmul.f32 %v6059_v52, %v3534_v38  ;;  %3874 = vmatmul.bf16.gmra.mxu0 %v8559_v47  ;;  %4144 = vmatmul.bf16.gmra.mxu2 %v8559_v47  ;;  %vm3638_vm8 = vweird.f32 %v6059_v52  ;;  %v3709_v61 = vmul.f32 %v3630_v24, %v8405_v1 }
 0x94f   : > { %6060 = vrsqrt.f32 %v8561_v59  ;;  %vm3639_vm10 = vmor %vm3637_vm9, %vm3638_vm8  ;;  %vm3647_vm12 = vweird.f32 %v8561_v59 }
 0x950   : > { %v3633_v28 = vmul.f32 %v6059_v52, %v3632_v54  ;;  %v3728_v41 = vmul.f32 %v8419_v19, %v3709_v61 }
 0x952   : > { %v3634_v50 = vmul.f32 0.5, %v3633_v28 }
 0x953   : > { %v3860_v3 = vpop.f32.mrf.mxu0 }
 0x954   : > { %v3635_v56 = vsub.f32 1.5, %v3634_v50  ;;  %v3861_v36 = vadd.f32 %v8570_v44, %v3860_v3 }
 0x955   : > { %v6061_v26 = vpop.eup %6060 }
 0x956   : > { %v3636_v22 = vmul.f32 %v6059_v52, %v3635_v56  ;;  %v3642_v49 = vmul.f32 %v6061_v26, %v8561_v59  ;;  %v3900_v35 = vmax.f32 %v3861_v36, 0.0  ;;  %vm3648_vm11 = vweird.f32 %v6061_v26 }
 0x957   : > { %vm3649_vm13 = vmor %vm3647_vm12, %vm3648_vm11 }
 0x958   : > { %v3640_v62 = vsel %vm3639_vm10, %v6059_v52, %v3636_v22  ;;  %v3643_v38 = vmul.f32 %v6061_v26, %v3642_v49 }
 0x959   : > { %v3710_v5 = vmul.f32 %v3640_v62, %v8423_v53  ;;  %v4130_v11 = vpop.f32.mrf.mxu2  ;;  %v3747_v53 = vadd.f32 %v8431_v8, %v3728_v41 }
 0x95a   : > { %v4131_v7 = vadd.f32 %v8580_v33, %v4130_v11  ;;  %v3644_v30 = vmul.f32 0.5, %v3643_v38 }
 0x95b   : > { %v3862_v1 = vpop.f32.mrf.mxu0  ;;  %v3729_v18 = vmul.f32 %v8419_v19, %v3710_v5 }
 0x95c   : > { %v3863_v12 = vadd.f32 %v8570_v44, %v3862_v1  ;;  %v4170_v54 = vmax.f32 %v4131_v7, 0.0  ;;  %v3645_v50 = vsub.f32 1.5, %v3644_v30 }
 0x95d   : > { %v3500_v14 = vpop.xlane.xlu1 %3499  ;;  %v3748_v40 = vadd.f32 %v8431_v8, %v3729_v18 }
 0x95e   : > { %v3901_v42 = vmax.f32 %v3863_v12, 0.0  ;;  %v3520_v46 = vmul.f32 %v3500_v14, %v9066_v45  ;;  %v3646_v61 = vmul.f32 %v6061_v26, %v3645_v50 }
 0x95f   : > { %v8586_v2 = vpack.c.bf16 %v3748_v40, %v3747_v53 }
 0x960   : > { %v3916_v37 = vpack.c.bf16 %v3901_v42, %v3900_v35  ;;  %v3536_v13 = vadd.f32 1e-05, %v3520_v46  ;;  %v3650_v41 = vsel %vm3649_vm13, %v6061_v26, %v3646_v61 }
 0x961   : > { %3879 = vmatmul.bf16.gmra.mxu0 %v8586_v2  ;;  %v4132_v52 = vpop.f32.mrf.mxu2  ;;  %4149 = vmatmul.bf16.gmra.mxu2 %v8586_v2  ;;  %v3711_v14 = vmul.f32 %v3650_v41, %v8440_v9  ;;  %v5373_v41 = vld [vmem:[%s8980_s8 + $0xe8] sm:$0xf] }
 0x962   : > { %6062 = vrsqrt.f32 %v3536_v13  ;;  %v4133_v21 = vadd.f32 %v8580_v33, %v4132_v52  ;;  %3996 = vmatmul.bf16.vlgmr.msrb.gmra.mxu1 %v3916_v37  ;;  %vm3657_vm15 = vweird.f32 %v3536_v13 }
 0x963   : > { %v3730_v30 = vmul.f32 %v8419_v19, %v3711_v14  ;;  %v5585_v14 = vld [vmem:[%s8980_s8 + $0xd8] sm:$0xf0] }
 0x964   : > { %v4171_v28 = vmax.f32 %v4133_v21, 0.0  ;;  %v3865_v24 = vpop.f32.mrf.mxu0 }
 0x965   : > { %v3866_v49 = vadd.f32 %v8570_v44, %v3865_v24 }
 0x966   : > { %v4186_v3 = vpack.c.bf16 %v4171_v28, %v4170_v54  ;;  %v3749_v28 = vadd.f32 %v8431_v8, %v3730_v30  ;;  %v5365_v30 = vld [vmem:[%s8980_s8 + $0xa8] sm:$0xf] }
 0x967   : > { %v3902_v12 = vmax.f32 %v3866_v49, 0.0  ;;  %v5437_v49 = vld [vmem:[%s8980_s8 + $0xec] sm:$0xf] }
 0x968   : > { %v6063_v56 = vpop.eup %6062  ;;  %4266 = vmatmul.bf16.vlgmr.msrb.gmra.mxu3 %v4186_v3 }
 0x969   : > { %v3652_v22 = vmul.f32 %v6063_v56, %v3536_v13  ;;  %vm3658_vm14 = vweird.f32 %v6063_v56 }
 0x96a   : > { %v4135_v62 = vpop.f32.mrf.mxu2  ;;  %vm3659_vm0 = vmor %vm3657_vm15, %vm3658_vm14 }
 0x96b   : > { %v3653_v5 = vmul.f32 %v6063_v56, %v3652_v22  ;;  %v4136_v40 = vadd.f32 %v8580_v33, %v4135_v62 }
 0x96c   : > { %v3867_v11 = vpop.f32.mrf.mxu0 }
 0x96d   : > { %v3654_v36 = vmul.f32 0.5, %v3653_v5  ;;  %v3868_v1 = vadd.f32 %v8570_v44, %v3867_v11  ;;  %v4172_v52 = vmax.f32 %v4136_v40, 0.0  ;;  %v5586_v11 = vld [vmem:[%s8980_s8 + $0xf8] sm:$0xf0]  ;;  %v5569_v40 = vld [vmem:[%s8980_s8 + $0xd4] sm:$0xf0] }
 0x96f   : > { %v3655_v18 = vsub.f32 1.5, %v3654_v36  ;;  %v3903_v38 = vmax.f32 %v3868_v1, 0.0  ;;  %v5570_v1 = vld [vmem:[%s8980_s8 + $0xf4] sm:$0xf0] }
 0x971   : > { %v3656_v53 = vmul.f32 %v6063_v56, %v3655_v18  ;;  %v3917_v59 = vpack.c.bf16 %v3903_v38, %v3902_v12  ;;  %v5433_v18 = vld [vmem:[%s8980_s8 + $0xcc] sm:$0xf]  ;;  %v5438_v12 = vor.u32 %v5586_v11, %v5437_v49  ;;  %v5374_v38 = vor.u32 %v5570_v1, %v5373_v41 }
 0x972   : > { %v4137_v35 = vpop.f32.mrf.mxu2  ;;  %v3502_v42 = vpop.xlane.xlu2 %3501 }
 0x973   : > { %v3660_v46 = vsel %vm3659_vm0, %v6063_v56, %v3656_v53  ;;  %v4138_v26 = vadd.f32 %v8580_v33, %v4137_v35  ;;  %v3521_v7 = vmul.f32 %v3502_v42, %v9066_v45  ;;  %4001 = vmatmul.bf16.gmra.mxu1 %v3917_v59  ;;  %v5369_v53 = vld [vmem:[%s8980_s8 + $0xc8] sm:$0xf]  ;;  %4661 = vmatpush.bf16.msra.mxu2 %v5438_v12 }
 0x974   : > { %v3712_v37 = vmul.f32 %v3660_v46, %v8460_v63  ;;  %4391 = vmatpush.bf16.msra.mxu0 %v5374_v38  ;;  %v5434_v42 = vor.u32 %v5585_v14, %v5433_v18  ;;  %v5370_v46 = vor.u32 %v5569_v40, %v5369_v53 }
 0x975   : > { %v4173_v9 = vmax.f32 %v4138_v26, 0.0  ;;  %v3537_v21 = vadd.f32 1e-05, %v3521_v7  ;;  %v5429_v26 = vld [vmem:[%s8980_s8 + $0xac] sm:$0xf] }
 0x976   : > { %v3731_v13 = vmul.f32 %v8419_v19, %v3712_v37  ;;  %v5584_v7 = vld [vmem:[%s8980_s8 + $0xb8] sm:$0xf0] }
 0x977   : > { %6064 = vrsqrt.f32 %v3537_v21  ;;  %v4187_v54 = vpack.c.bf16 %v4173_v9, %v4172_v52  ;;  %v5568_v52 = vld [vmem:[%s8980_s8 + $0xb4] sm:$0xf0]  ;;  %4662 = vmatpush.bf16.msra.mxu2 %v5434_v42  ;;  %vm3667_vm2 = vweird.f32 %v3537_v21 }
 0x978   : > { %v3750_v24 = vadd.f32 %v8431_v8, %v3731_v13  ;;  %4392 = vmatpush.bf16.msra.mxu0 %v5370_v46 }
 0x979   : > { %4271 = vmatmul.bf16.gmra.mxu3 %v4187_v54 }
 0x97a   : > { %v8604_v50 = vpack.c.bf16 %v3750_v24, %v3749_v28  ;;  %v5430_v28 = vor.u32 %v5584_v7, %v5429_v26 }
 0x97c   : > { %3884 = vmatmul.bf16.gmra.mxu0 %v8604_v50  ;;  %4154 = vmatmul.bf16.gmra.mxu2 %v8604_v50 }
 0x97d   : > { %v6065_v63 = vpop.eup %6064  ;;  %v3504_v3 = vpop.xlane.xlu0 %3503  ;;  %4663 = vmatpush.bf16.msra.mxu2 %v5430_v28  ;;  %v5582_v28 = vld [vmem:[%s8980_s8 + $0x78] sm:$0xf0] }
 0x97e   : > { %v3662_v56 = vmul.f32 %v6065_v63, %v3537_v21  ;;  %v3522_v61 = vmul.f32 %v3504_v3, %v9066_v45  ;;  %vm3668_vm1 = vweird.f32 %v6065_v63 }
 0x97f   : > { %v3870_v22 = vpop.f32.mrf.mxu0  ;;  %vm3669_vm3 = vmor %vm3667_vm2, %vm3668_vm1 }
 0x980   : > { %v3663_v62 = vmul.f32 %v6065_v63, %v3662_v56  ;;  %v3538_v5 = vadd.f32 1e-05, %v3522_v61  ;;  %v3871_v37 = vadd.f32 %v8570_v44, %v3870_v22  ;;  %v5366_v56 = vor.u32 %v5568_v52, %v5365_v30  ;;  %v5583_v30 = vld [vmem:[%s8980_s8 + $0x98] sm:$0xf0]  ;;  %v5361_v52 = vld [vmem:[%s8980_s8 + $0x88] sm:$0xf] }
 0x982   : > { %v3664_v36 = vmul.f32 0.5, %v3663_v62  ;;  %6066 = vrsqrt.f32 %v3538_v5  ;;  %v3904_v61 = vmax.f32 %v3871_v37, 0.0  ;;  %4393 = vmatpush.bf16.msra.mxu0 %v5366_v56  ;;  %vm3677_vm5 = vweird.f32 %v3538_v5 }
 0x984   : > { %v3665_v59 = vsub.f32 1.5, %v3664_v36 }
 0x985   : > { %v4140_v35 = vpop.f32.mrf.mxu2 }
 0x986   : > { %v3666_v24 = vmul.f32 %v6065_v63, %v3665_v59  ;;  %v4141_v49 = vadd.f32 %v8580_v33, %v4140_v35 }
 0x987   : > { %v3872_v9 = vpop.f32.mrf.mxu0 }
 0x988   : > { %v6067_v13 = vpop.eup %6066  ;;  %v3873_v54 = vadd.f32 %v8570_v44, %v3872_v9  ;;  %v3670_v41 = vsel %vm3669_vm3, %v6065_v63, %v3666_v24  ;;  %v4174_v14 = vmax.f32 %v4141_v49, 0.0 }
 0x989   : > { %v3672_v3 = vmul.f32 %v6067_v13, %v3538_v5  ;;  %vm3678_vm4 = vweird.f32 %v6067_v13  ;;  %v3713_v38 = vmul.f32 %v3670_v41, %v8471_v20 }
 0x98a   : > { %v3905_v22 = vmax.f32 %v3873_v54, 0.0  ;;  %vm3679_vm6 = vmor %vm3677_vm5, %vm3678_vm4  ;;  %v3506_v20 = vpop.xlane.xlu1 %3505  ;;  %v5421_v54 = vld [vmem:[%s8980_s8 + $0x6c] sm:$0xf] }
 0x98b   : > { %v3673_v62 = vmul.f32 %v6067_v13, %v3672_v3  ;;  %v3732_v35 = vmul.f32 %v8419_v19, %v3713_v38  ;;  %v3523_v5 = vmul.f32 %v3506_v20, %v9066_v45  ;;  %v5422_v56 = vor.u32 %v5582_v28, %v5421_v54  ;;  %v5579_v54 = vld [vmem:[%s8980_s8 + $0x18] sm:$0xf0] }
 0x98c   : > { %v3918_v11 = vpack.c.bf16 %v3905_v22, %v3904_v61  ;;  %v5357_v22 = vld [vmem:[%s8980_s8 + $0x68] sm:$0xf] }
 0x98d   : > { %v3674_v36 = vmul.f32 0.5, %v3673_v62  ;;  %v4142_v1 = vpop.f32.mrf.mxu2  ;;  %v3751_v46 = vadd.f32 %v8431_v8, %v3732_v35  ;;  %v3539_v37 = vadd.f32 1e-05, %v3523_v5  ;;  %v5566_v62 = vld [vmem:[%s8980_s8 + $0x74] sm:$0xf0] }
 0x98e   : > { %v4143_v18 = vadd.f32 %v8580_v33, %v4142_v1  ;;  %4006 = vmatmul.bf16.gmra.mxu1 %v3918_v11  ;;  %v5358_v41 = vor.u32 %v5566_v62, %v5357_v22  ;;  %v5345_v5 = vld [vmem:[%s8980_s8 + $0x8] sm:$0xf] }
 0x98f   : > { %v3675_v12 = vsub.f32 1.5, %v3674_v36  ;;  %6068 = vrsqrt.f32 %v3539_v37  ;;  %vm3687_vm8 = vweird.f32 %v3539_v37 }
 0x990   : > { %v4175_v53 = vmax.f32 %v4143_v18, 0.0  ;;  %v5353_v18 = vld [vmem:[%s8980_s8 + $0x48] sm:$0xf] }
 0x991   : > { %v3676_v21 = vmul.f32 %v6067_v13, %v3675_v12  ;;  %v5565_v12 = vld [vmem:[%s8980_s8 + $0x54] sm:$0xf0] }
 0x992   : > { %v4188_v40 = vpack.c.bf16 %v4175_v53, %v4174_v14  ;;  %v5354_v14 = vor.u32 %v5565_v12, %v5353_v18  ;;  %v5417_v53 = vld [vmem:[%s8980_s8 + $0x4c] sm:$0xf] }
 0x993   : > { %v3680_v59 = vsel %vm3679_vm6, %v6067_v13, %v3676_v21  ;;  %v5567_v13 = vld [vmem:[%s8980_s8 + $0x94] sm:$0xf0] }
 0x994   : > { %v3714_v63 = vmul.f32 %v3680_v59, %v8484_v15  ;;  %4276 = vmatmul.bf16.gmra.mxu3 %v4188_v40  ;;  %v5425_v15 = vld [vmem:[%s8980_s8 + $0x8c] sm:$0xf]  ;;  %v5362_v3 = vor.u32 %v5567_v13, %v5361_v52  ;;  %v5349_v40 = vld [vmem:[%s8980_s8 + $0x28] sm:$0xf]  ;;  %v5564_v59 = vld [vmem:[%s8980_s8 + $0x34] sm:$0xf0] }
 0x995   : > { %v5426_v9 = vor.u32 %v5583_v30, %v5425_v15  ;;  %v6069_v24 = vpop.eup %6068  ;;  %v5563_v15 = vld [vmem:[%s8980_s8 + $0x14] sm:$0xf0]  ;;  %v5409_v30 = vld [vmem:[%s8980_s8 + $0xc] sm:$0xf] }
 0x996   : > { %v3733_v42 = vmul.f32 %v8419_v19, %v3714_v63  ;;  %4394 = vmatpush.bf16.msra.mxu0 %v5362_v3  ;;  %v3682_v61 = vmul.f32 %v6069_v24, %v3539_v37  ;;  %v5413_v63 = vld [vmem:[%s8980_s8 + $0x2c] sm:$0xf]  ;;  %vm3688_vm7 = vweird.f32 %v6069_v24  ;;  %v5346_v13 = vor.u32 %v5563_v15, %v5345_v5 }
 0x997   : > { %4664 = vmatpush.bf16.msra.mxu2 %v5426_v9  ;;  %v5410_v28 = vor.u32 %v5579_v54, %v5409_v30  ;;  %vm3689_vm9 = vmor %vm3687_vm8, %vm3688_vm7 }
 0x998   : > { %v3752_v26 = vadd.f32 %v8431_v8, %v3733_v42  ;;  %v3683_v49 = vmul.f32 %v6069_v24, %v3682_v61  ;;  %v5350_v42 = vor.u32 %v5564_v59, %v5349_v40 }
 0x99a   : > { %v8655_v7 = vpack.c.bf16 %v3752_v26, %v3751_v46  ;;  %4395 = vmatpush.bf16.msra.mxu0 %v5358_v41  ;;  %v3684_v38 = vmul.f32 0.5, %v3683_v49  ;;  %v5580_v46 = vld [vmem:[%s8980_s8 + $0x38] sm:$0xf0] }
 0x99b   : > { %4665 = vmatpush.bf16.msra.mxu2 %v5422_v56  ;;  %v5414_v26 = vor.u32 %v5580_v46, %v5413_v63 }
 0x99c   : > { %3889 = vmatmul.bf16.gmra.mxu0 %v8655_v7  ;;  %4159 = vmatmul.bf16.gmra.mxu2 %v8655_v7  ;;  %v3685_v35 = vsub.f32 1.5, %v3684_v38 }
 0x99e   : > { %4396 = vmatpush.bf16.msra.mxu0 %v5354_v14  ;;  %v3686_v52 = vmul.f32 %v6069_v24, %v3685_v35 }
 0x9a0   : > { %v3690_v56 = vsel %vm3689_vm9, %v6069_v24, %v3686_v52 }
 0x9a1   : > { %v3715_v49 = vmul.f32 %v3690_v56, %v8490_v27 }
 0x9a2   : > { %4397 = vmatpush.bf16.msra.mxu0 %v5350_v42 }
 0x9a3   : > { %v3734_v18 = vmul.f32 %v8419_v19, %v3715_v49 }
 0x9a6   : > { %4398 = vmatpush.bf16.msra.mxu0 %v5346_v13 }
 0x9b9   : > { %v3508_v11 = vpop.xlane.xlu2 %3507 }
 0x9ba   : > { %v3524_v36 = vmul.f32 %v3508_v11, %v9066_v45  ;;  %v5581_v45 = vld [vmem:[%s8980_s8 + $0x58] sm:$0xf0] }
 0x9bb   : > { %v5418_v21 = vor.u32 %v5581_v45, %v5417_v53  ;;  %v3753_v53 = vadd.f32 %v8431_v8, %v3734_v18 }
 0x9bc   : > { %v3540_v1 = vadd.f32 1e-05, %v3524_v36 }
 0x9bd   : > { %4666 = vmatpush.bf16.msra.mxu2 %v5418_v21 }
 0x9be   : > { %6070 = vrsqrt.f32 %v3540_v1  ;;  %vm3697_vm11 = vweird.f32 %v3540_v1 }
 0x9c1   : > { %4667 = vmatpush.bf16.msra.mxu2 %v5414_v26 }
 0x9c4   : > { %v6071_v20 = vpop.eup %6070 }
 0x9c5   : > { %v3692_v9 = vmul.f32 %v6071_v20, %v3540_v1  ;;  %4668 = vmatpush.bf16.msra.mxu2 %v5410_v28  ;;  %vm3698_vm10 = vweird.f32 %v6071_v20 }
 0x9c6   : > { %vm3699_vm12 = vmor %vm3697_vm11, %vm3698_vm10 }
 0x9c7   : > { %v3693_v3 = vmul.f32 %v6071_v20, %v3692_v9 }
 0x9c9   : > { %v3694_v61 = vmul.f32 0.5, %v3693_v3 }
 0x9cb   : > { %v3695_v22 = vsub.f32 1.5, %v3694_v61  ;;  %v3875_v62 = vpop.f32.mrf.mxu0 }
 0x9cc   : > { %v3876_v12 = vadd.f32 %v8570_v44, %v3875_v62 }
 0x9cd   : > { %v3696_v11 = vmul.f32 %v6071_v20, %v3695_v22 }
 0x9ce   : > { %v3906_v45 = vmax.f32 %v3876_v12, 0.0 }
 0x9cf   : > { %v3700_v41 = vsel %vm3699_vm12, %v6071_v20, %v3696_v11 }
 0x9d0   : > { %v3716_v36 = vmul.f32 %v3700_v41, %v8545_v48 }
 0x9d1   : > { %v4145_v37 = vpop.f32.mrf.mxu2 }
 0x9d2   : > { %v3735_v38 = vmul.f32 %v8419_v19, %v3716_v36  ;;  %v4146_v48 = vadd.f32 %v8580_v33, %v4145_v37 }
 0x9d3   : > { %v3877_v24 = vpop.f32.mrf.mxu0 }
 0x9d4   : > { %v3878_v14 = vadd.f32 %v8570_v44, %v3877_v24  ;;  %v3754_v27 = vadd.f32 %v8431_v8, %v3735_v38  ;;  %v4176_v63 = vmax.f32 %v4146_v48, 0.0  ;;  %v8738_v8 = vld [vmem:[%s8983_s11] ss:$0 sm:$0xff] }
 0x9d5   : > { %v3767_v52 = vadd.f32 %v8738_v8, %v8174_v25  ;;  %v3769_v18 = vadd.f32 %v8738_v8, %v8183_v4  ;;  %v5578_v4 = vld [vmem:[%s8982_s10 + $0xb8] sm:$0xff] }
 0x9d6   : > { %v3907_v1 = vmax.f32 %v3878_v14, 0.0  ;;  %v8729_v21 = vpack.c.bf16 %v3754_v27, %v3753_v53  ;;  %4528 = vmatpush.bf16.msra.mxu1 %v5578_v4  ;;  %v5587_v4 = vld [vmem:[%s8982_s10 + $0xc0] sm:$0xff] }
 0x9d8   : > { %3894 = vmatmul.bf16.gmra.mxu0 %v8729_v21  ;;  %4164 = vmatmul.bf16.gmra.mxu2 %v8729_v21  ;;  %v3919_v40 = vpack.c.bf16 %v3907_v1, %v3906_v45 }
 0x9d9   : > { %v4147_v59 = vpop.f32.mrf.mxu2 }
 0x9da   : > { %v4148_v19 = vadd.f32 %v8580_v33, %v4147_v59  ;;  %4011 = vmatmul.bf16.gmra.mxu1 %v3919_v40 }
 0x9dc   : > { %v4177_v35 = vmax.f32 %v4148_v19, 0.0 }
 0x9de   : > { %v3880_v42 = vpop.f32.mrf.mxu0  ;;  %v4189_v46 = vpack.c.bf16 %v4177_v35, %v4176_v63 }
 0x9df   : > { %v3997_v26 = vpop.f32.mrf.mxu1  ;;  %v3881_v5 = vadd.f32 %v8570_v44, %v3880_v42 }
 0x9e0   : > { %4281 = vmatmul.bf16.gmra.mxu3 %v4189_v46  ;;  %v4037_v54 = vadd.f32 %v3997_v26, %v3767_v52  ;;  %v5594_v26 = vld [vmem:[%s8982_s10 + $0xf8] sm:$0xff] }
 0x9e1   : > { %v3908_v9 = vmax.f32 %v3881_v5, 0.0  ;;  %5720 = vmatpush.bf16.msra.mxu3 %v5594_v26  ;;  %4798 = vmatpush.bf16.msrb.mxu0 %v5594_v26 }
 0x9e4   : > { %v4150_v20 = vpop.f32.mrf.mxu2 }
 0x9e5   : > { %v4151_v28 = vadd.f32 %v8580_v33, %v4150_v20  ;;  %v5577_v20 = vld [vmem:[%s8982_s10 + $0xb0] sm:$0xff] }
 0x9e6   : > { %v3882_v15 = vpop.f32.mrf.mxu0  ;;  %4529 = vmatpush.bf16.msra.mxu1 %v5577_v20 }
 0x9e7   : > { %v3883_v30 = vadd.f32 %v8570_v44, %v3882_v15  ;;  %v8750_v49 = vpop.f32.mrf.mxu1  ;;  %v4178_v25 = vmax.f32 %v4151_v28, 0.0  ;;  %v3771_v15 = vadd.f32 %v8738_v8, %v8192_v10  ;;  %v5576_v28 = vld [vmem:[%s8982_s10 + $0xa8] sm:$0xff] }
 0x9e8   : > { %4399 = vmatmul.bf16.vlgmr.msra.gmra.mxu0 %v8442_v51  ;;  %4669 = vmatmul.bf16.vlgmr.msra.gmra.mxu2 %v8442_v51 }
 0x9e9   : > { %v3909_v13 = vmax.f32 %v3883_v30, 0.0 }
 0x9ea   : > { %4530 = vmatpush.bf16.msra.mxu1 %v5576_v28 }
 0x9eb   : > { %v4267_v3 = vpop.f32.mrf.mxu3  ;;  %v3920_v56 = vpack.c.bf16 %v3909_v13, %v3908_v9 }
 0x9ec   : > { %v8747_v61 = vadd.f32 %v4267_v3, %v4037_v54  ;;  %v4152_v22 = vpop.f32.mrf.mxu2  ;;  %v5593_v54 = vld [vmem:[%s8982_s10 + $0xf0] sm:$0xff] }
 0x9ed   : > { %v4153_v62 = vadd.f32 %v8580_v33, %v4152_v22  ;;  %4016 = vmatmul.bf16.gmra.mxu1 %v3920_v56  ;;  %5721 = vmatpush.bf16.msra.mxu3 %v5593_v54 }
 0x9ee   : > { %4799 = vmatpush.bf16.msrb.mxu0 %v5593_v54 }
 0x9ef   : > { %v4179_v11 = vmax.f32 %v4153_v62, 0.0 }
 0x9f0   : > { %v4002_v51 = vpop.f32.mrf.mxu1 }
 0x9f1   : > { %v4190_v41 = vpack.c.bf16 %v4179_v11, %v4178_v25  ;;  %v4039_v12 = vadd.f32 %v4002_v51, %v3769_v18  ;;  %v5592_v18 = vld [vmem:[%s8982_s10 + $0xe8] sm:$0xff] }
 0x9f2   : > { %5722 = vmatpush.bf16.msra.mxu3 %v5592_v18  ;;  %4800 = vmatpush.bf16.msrb.mxu0 %v5592_v18 }
 0x9f3   : > { %v8752_v36 = vpop.f32.mrf.mxu3  ;;  %4286 = vmatmul.bf16.gmra.mxu3 %v4190_v41 }
 0x9f8   : > { %4404 = vmatmul.bf16.gmra.mxu0 %v8457_v58  ;;  %4674 = vmatmul.bf16.gmra.mxu2 %v8457_v58  ;;  %v8769_v42 = vpop.f32.mrf.mxu1 }
 0x9f9   : > { %v3885_v37 = vpop.f32.mrf.mxu0 }
 0x9fa   : > { %v3886_v53 = vadd.f32 %v8570_v44, %v3885_v37  ;;  %v5575_v37 = vld [vmem:[%s8982_s10 + $0xa0] sm:$0xff] }
 0x9fb   : > { %4531 = vmatpush.bf16.msra.mxu1 %v5575_v37 }
 0x9fc   : > { %v4272_v38 = vpop.f32.mrf.mxu3  ;;  %v3910_v1 = vmax.f32 %v3886_v53, 0.0  ;;  %v5574_v53 = vld [vmem:[%s8982_s10 + $0x98] sm:$0xff] }
 0x9fd   : > { %v8758_v24 = vadd.f32 %v4272_v38, %v4039_v12 }
 0x9ff   : > { %v4155_v14 = vpop.f32.mrf.mxu2  ;;  %4532 = vmatpush.bf16.msra.mxu1 %v5574_v53 }
 0xa00   : > { %v4156_v40 = vadd.f32 %v8580_v33, %v4155_v14 }
 0xa01   : > { %v3887_v27 = vpop.f32.mrf.mxu0 }
 0xa02   : > { %v3888_v45 = vadd.f32 %v8570_v44, %v3887_v27  ;;  %v4180_v63 = vmax.f32 %v4156_v40, 0.0  ;;  %v5573_v27 = vld [vmem:[%s8982_s10 + $0x90] sm:$0xff] }
 0xa03   : > { %4533 = vmatpush.bf16.msra.mxu1 %v5573_v27 }
 0xa04   : > { %v3911_v48 = vmax.f32 %v3888_v45, 0.0  ;;  %v8777_v5 = vpop.f32.mrf.mxu3  ;;  %v5572_v45 = vld [vmem:[%s8982_s10 + $0x88] sm:$0xff] }
 0xa06   : > { %v3921_v59 = vpack.c.bf16 %v3911_v48, %v3910_v1  ;;  %v5589_v1 = vld [vmem:[%s8982_s10 + $0xd0] sm:$0xff]  ;;  %v5588_v48 = vld [vmem:[%s8982_s10 + $0xc8] sm:$0xff] }
 0xa07   : > { %v4157_v58 = vpop.f32.mrf.mxu2  ;;  %4534 = vmatpush.bf16.msra.mxu1 %v5572_v45 }
 0xa08   : > { %v4158_v19 = vadd.f32 %v8580_v33, %v4157_v58  ;;  %4021 = vmatmul.bf16.gmra.mxu1 %v3921_v59  ;;  %4409 = vmatmul.bf16.gmra.mxu0 %v8478_v17 }
 0xa09   : > { %4679 = vmatmul.bf16.gmra.mxu2 %v8478_v17 }
 0xa0a   : > { %v4181_v35 = vmax.f32 %v4158_v19, 0.0 }
 0xa0b   : > { %v4007_v17 = vpop.f32.mrf.mxu1 }
 0xa0c   : > { %v4191_v46 = vpack.c.bf16 %v4181_v35, %v4180_v63  ;;  %v4041_v30 = vadd.f32 %v4007_v17, %v3771_v15  ;;  %v3773_v17 = vadd.f32 %v8738_v8, %v8212_v55  ;;  %v8853_v55 = vld [vmem:[%s8981_s9 + $0x2] ss:$0 sm:$0xff] }
 0xa0e   : > { %4291 = vmatmul.bf16.gmra.mxu3 %v4191_v46 }
 0xa13   : > { %v8831_v59 = vpop.f32.mrf.mxu1 }
 0xa17   : > { %v4277_v52 = vpop.f32.mrf.mxu3 }
 0xa18   : > { %v8781_v9 = vadd.f32 %v4277_v52, %v4041_v30  ;;  %4414 = vmatmul.bf16.gmra.mxu0 %v8559_v47 }
 0xa19   : > { %4684 = vmatmul.bf16.gmra.mxu2 %v8559_v47  ;;  %v3890_v13 = vpop.f32.mrf.mxu0 }
 0xa1a   : > { %v3891_v3 = vadd.f32 %v8570_v44, %v3890_v13 }
 0xa1c   : > { %v3912_v62 = vmax.f32 %v3891_v3, 0.0 }
 0xa1f   : > { %v4160_v10 = vpop.f32.mrf.mxu2  ;;  %v8838_v58 = vpop.f32.mrf.mxu3 }
 0xa20   : > { %v4161_v25 = vadd.f32 %v8580_v33, %v4160_v10 }
 0xa21   : > { %v3892_v56 = vpop.f32.mrf.mxu0 }
 0xa22   : > { %v3893_v22 = vadd.f32 %v8570_v44, %v3892_v56  ;;  %v4182_v12 = vmax.f32 %v4161_v25, 0.0 }
 0xa24   : > { %v3913_v47 = vmax.f32 %v3893_v22, 0.0 }
 0xa26   : > { %v3922_v11 = vpack.c.bf16 %v3913_v47, %v3912_v62 }
 0xa27   : > { %v4162_v41 = vpop.f32.mrf.mxu2 }
 0xa28   : > { %v4163_v51 = vadd.f32 %v8580_v33, %v4162_v41  ;;  %4026 = vmatmul.bf16.gmra.mxu1 %v3922_v11  ;;  %4419 = vmatmul.bf16.gmra.mxu0 %v8586_v2  ;;  %v8861_v41 = vld [vmem:[%s8981_s9 + $0x3] ss:$0 sm:$0xff] }
 0xa29   : > { %4689 = vmatmul.bf16.gmra.mxu2 %v8586_v2  ;;  %v5591_v2 = vld [vmem:[%s8982_s10 + $0xe0] sm:$0xff] }
 0xa2a   : > { %v4183_v38 = vmax.f32 %v4163_v51, 0.0  ;;  %5723 = vmatpush.bf16.msra.mxu3 %v5591_v2  ;;  %4801 = vmatpush.bf16.msrb.mxu0 %v5591_v2  ;;  %v3775_v2 = vadd.f32 %v8738_v8, %v8237_v31 }
 0xa2c   : > { %v4192_v14 = vpack.c.bf16 %v4183_v38, %v4182_v12 }
 0xa2e   : > { %4296 = vmatmul.bf16.gmra.mxu3 %v4192_v14 }
 0xa38   : > { %4424 = vmatmul.bf16.gmra.mxu0 %v8604_v50 }
 0xa39   : > { %4694 = vmatmul.bf16.gmra.mxu2 %v8604_v50  ;;  %v5590_v50 = vld [vmem:[%s8982_s10 + $0xd8] sm:$0xff] }
 0xa3a   : > { %4802 = vmatpush.bf16.msrb.mxu0 %v5590_v50  ;;  %5724 = vmatpush.bf16.msra.mxu3 %v5590_v50 }
 0xa3e   : > { %4803 = vmatpush.bf16.msrb.mxu0 %v5589_v1  ;;  %5725 = vmatpush.bf16.msra.mxu3 %v5589_v1 }
 0xa42   : > { %4804 = vmatpush.bf16.msrb.mxu0 %v5588_v48  ;;  %5726 = vmatpush.bf16.msra.mxu3 %v5588_v48 }
 0xa46   : > { %4805 = vmatpush.bf16.msrb.mxu0 %v5587_v4  ;;  %5727 = vmatpush.bf16.msra.mxu3 %v5587_v4 }
 0xa48   : > { %4429 = vmatmul.bf16.gmra.mxu0 %v8655_v7 }
 0xa49   : > { %4699 = vmatmul.bf16.gmra.mxu2 %v8655_v7  ;;  %v5571_v7 = vld [vmem:[%s8982_s10 + $0x80] sm:$0xff] }
 0xa4a   : > { %4535 = vmatpush.bf16.msra.mxu1 %v5571_v7 }
 0xa55   : > { %v3895_v40 = vpop.f32.mrf.mxu0 }
 0xa56   : > { %v3896_v63 = vadd.f32 %v8570_v44, %v3895_v40 }
 0xa57   : > { %v4012_v46 = vpop.f32.mrf.mxu1 }
 0xa58   : > { %4434 = vmatmul.bf16.gmra.mxu0 %v8729_v21  ;;  %v3914_v20 = vmax.f32 %v3896_v63, 0.0  ;;  %v4043_v30 = vadd.f32 %v4012_v46, %v3773_v17  ;;  %v3776_v63 = vadd.f32 %v8738_v8, %v8250_v29 }
 0xa59   : > { %4704 = vmatmul.bf16.gmra.mxu2 %v8729_v21 }
 0xa5b   : > { %v4165_v19 = vpop.f32.mrf.mxu2 }
 0xa5c   : > { %v4166_v52 = vadd.f32 %v8580_v33, %v4165_v19 }
 0xa5d   : > { %v3897_v35 = vpop.f32.mrf.mxu0 }
 0xa5e   : > { %v3898_v26 = vadd.f32 %v8570_v44, %v3897_v35  ;;  %v4184_v56 = vmax.f32 %v4166_v52, 0.0 }
 0xa5f   : > { %v8848_v44 = vpop.f32.mrf.mxu1 }
 0xa60   : > { %v3915_v15 = vmax.f32 %v3898_v26, 0.0 }
 0xa62   : > { %v3923_v21 = vpack.c.bf16 %v3915_v15, %v3914_v20 }
 0xa63   : > { %v4167_v13 = vpop.f32.mrf.mxu2  ;;  %v4282_v54 = vpop.f32.mrf.mxu3 }
 0xa64   : > { %v4168_v28 = vadd.f32 %v8580_v33, %v4167_v13  ;;  %v8846_v10 = vadd.f32 %v4282_v54, %v4043_v30  ;;  %4031 = vmatmul.bf16.gmra.mxu1 %v3923_v21 }
 0xa65   : > { %v4400_v3 = vpop.f32.mrf.mxu0 }
 0xa66   : > { %v4185_v22 = vmax.f32 %v4168_v28, 0.0  ;;  %v4401_v25 = vadd.f32 %v8853_v55, %v4400_v3 }
 0xa68   : > { %v4193_v62 = vpack.c.bf16 %v4185_v22, %v4184_v56  ;;  %v4440_v18 = vmax.f32 %v4401_v25, 0.0 }
 0xa6a   : > { %4301 = vmatmul.bf16.gmra.mxu3 %v4193_v62  ;;  %v4017_v37 = vpop.f32.mrf.mxu1 }
 0xa6b   : > { %v4670_v47 = vpop.f32.mrf.mxu2  ;;  %v8856_v33 = vpop.f32.mrf.mxu3  ;;  %v4045_v50 = vadd.f32 %v4017_v37, %v3775_v2 }
 0xa6c   : > { %v4671_v38 = vadd.f32 %v8861_v41, %v4670_v47 }
 0xa6d   : > { %v4402_v11 = vpop.f32.mrf.mxu0 }
 0xa6e   : > { %v4403_v51 = vadd.f32 %v8853_v55, %v4402_v11  ;;  %v4710_v1 = vmax.f32 %v4671_v38, 0.0 }
 0xa70   : > { %v4441_v12 = vmax.f32 %v4403_v51, 0.0  ;;  %v3777_v51 = vadd.f32 %v8738_v8, %v8257_v6  ;;  %v3778_v6 = vadd.f32 %v8738_v8, %v8271_v39 }
 0xa72   : > { %v4456_v14 = vpack.c.bf16 %v4441_v12, %v4440_v18  ;;  %v4019_v19 = vpop.f32.mrf.mxu1 }
 0xa73   : > { %v4672_v53 = vpop.f32.mrf.mxu2  ;;  %v4046_v46 = vadd.f32 %v4019_v19, %v3776_v63 }
 0xa74   : > { %v4673_v27 = vadd.f32 %v8861_v41, %v4672_v53  ;;  %4536 = vmatmul.bf16.vlgmr.msra.gmra.mxu1 %v4456_v14 }
 0xa75   : > { %v4405_v45 = vpop.f32.mrf.mxu0 }
 0xa76   : > { %v4711_v7 = vmax.f32 %v4673_v27, 0.0  ;;  %v4287_v48 = vpop.f32.mrf.mxu3  ;;  %v4406_v31 = vadd.f32 %v8853_v55, %v4405_v45 }
 0xa77   : > { %v8868_v40 = vadd.f32 %v4287_v48, %v4045_v50 }
 0xa78   : > { %v4726_v4 = vpack.c.bf16 %v4711_v7, %v4710_v1  ;;  %v4442_v30 = vmax.f32 %v4406_v31, 0.0 }
 0xa7a   : > { %4806 = vmatmul.bf16.vlgmr.msrb.gmra.mxu0 %v4726_v4 }
 0xa7b   : > { %v4675_v35 = vpop.f32.mrf.mxu2 }
 0xa7c   : > { %v4676_v21 = vadd.f32 %v8861_v41, %v4675_v35 }
 0xa7d   : > { %v4407_v26 = vpop.f32.mrf.mxu0 }
 0xa7e   : > { %v4408_v20 = vadd.f32 %v8853_v55, %v4407_v26  ;;  %v4289_v17 = vpop.f32.mrf.mxu3  ;;  %v4712_v3 = vmax.f32 %v4676_v21, 0.0 }
 0xa7f   : > { %v8874_v15 = vadd.f32 %v4289_v17, %v4046_v46 }
 0xa80   : > { %v4443_v52 = vmax.f32 %v4408_v20, 0.0 }
 0xa82   : > { %v4457_v13 = vpack.c.bf16 %v4443_v52, %v4442_v30 }
 0xa83   : > { %v4677_v54 = vpop.f32.mrf.mxu2 }
 0xa84   : > { %v4678_v28 = vadd.f32 %v8861_v41, %v4677_v54  ;;  %4541 = vmatmul.bf16.gmra.mxu1 %v4457_v13 }
 0xa85   : > { %v4410_v29 = vpop.f32.mrf.mxu0  ;;  %v4022_v62 = vpop.f32.mrf.mxu1 }
 0xa86   : > { %v4713_v56 = vmax.f32 %v4678_v28, 0.0  ;;  %v4411_v47 = vadd.f32 %v8853_v55, %v4410_v29  ;;  %v4047_v37 = vadd.f32 %v4022_v62, %v3777_v51 }
 0xa88   : > { %v4727_v22 = vpack.c.bf16 %v4713_v56, %v4712_v3  ;;  %v4444_v12 = vmax.f32 %v4411_v47, 0.0 }
 0xa8a   : > { %4811 = vmatmul.bf16.vlgmr.msra.gmra.mxu3 %v4727_v22 }
 0xa8c   : > { %v4680_v25 = vpop.f32.mrf.mxu2 }
 0xa8d   : > { %v4412_v11 = vpop.f32.mrf.mxu0  ;;  %v4681_v27 = vadd.f32 %v8861_v41, %v4680_v25  ;;  %v4024_v45 = vpop.f32.mrf.mxu1 }
 0xa8e   : > { %v4413_v18 = vadd.f32 %v8853_v55, %v4412_v11  ;;  %v4048_v19 = vadd.f32 %v4024_v45, %v3778_v6  ;;  %v3779_v11 = vadd.f32 %v8738_v8, %v8279_v32  ;;  %v3780_v32 = vadd.f32 %v8738_v8, %v8288_v23 }
 0xa8f   : > { %v4714_v48 = vmax.f32 %v4681_v27, 0.0 }
 0xa90   : > { %v4445_v38 = vmax.f32 %v4413_v18, 0.0 }
 0xa91   : > { %v4292_v14 = vpop.f32.mrf.mxu3 }
 0xa92   : > { %v4458_v2 = vpack.c.bf16 %v4445_v38, %v4444_v12  ;;  %v8882_v53 = vadd.f32 %v4292_v14, %v4047_v37 }
 0xa94   : > { %v4682_v50 = vpop.f32.mrf.mxu2  ;;  %4546 = vmatmul.bf16.gmra.mxu1 %v4458_v2 }
 0xa95   : > { %v4683_v1 = vadd.f32 %v8861_v41, %v4682_v50  ;;  %v4415_v7 = vpop.f32.mrf.mxu0 }
 0xa96   : > { %v4416_v46 = vadd.f32 %v8853_v55, %v4415_v7 }
 0xa97   : > { %v4715_v4 = vmax.f32 %v4683_v1, 0.0 }
 0xa98   : > { %v4446_v30 = vmax.f32 %v4416_v46, 0.0 }
 0xa99   : > { %v4728_v63 = vpack.c.bf16 %v4715_v4, %v4714_v48  ;;  %v4294_v35 = vpop.f32.mrf.mxu3 }
 0xa9a   : > { %v8888_v31 = vadd.f32 %v4294_v35, %v4048_v19 }
 0xa9b   : > { %4816 = vmatmul.bf16.gmra.mxu3 %v4728_v63 }
 0xa9c   : > { %v4685_v26 = vpop.f32.mrf.mxu2 }
 0xa9d   : > { %v4417_v20 = vpop.f32.mrf.mxu0  ;;  %v4686_v13 = vadd.f32 %v8861_v41, %v4685_v26 }
 0xa9e   : > { %v4418_v17 = vadd.f32 %v8853_v55, %v4417_v20 }
 0xa9f   : > { %v4716_v29 = vmax.f32 %v4686_v13, 0.0 }
 0xaa0   : > { %v4447_v52 = vmax.f32 %v4418_v17, 0.0 }
 0xaa2   : > { %v4459_v21 = vpack.c.bf16 %v4447_v52, %v4446_v30 }
 0xaa4   : > { %v4687_v39 = vpop.f32.mrf.mxu2  ;;  %4551 = vmatmul.bf16.gmra.mxu1 %v4459_v21 }
 0xaa5   : > { %v4688_v54 = vadd.f32 %v8861_v41, %v4687_v39  ;;  %v4420_v28 = vpop.f32.mrf.mxu0  ;;  %v4027_v22 = vpop.f32.mrf.mxu1 }
 0xaa6   : > { %v4421_v62 = vadd.f32 %v8853_v55, %v4420_v28  ;;  %v4049_v18 = vadd.f32 %v4027_v22, %v3779_v11 }
 0xaa7   : > { %v4717_v3 = vmax.f32 %v4688_v54, 0.0 }
 0xaa8   : > { %v4448_v37 = vmax.f32 %v4421_v62, 0.0 }
 0xaa9   : > { %v4729_v56 = vpack.c.bf16 %v4717_v3, %v4716_v29 }
 0xaab   : > { %4821 = vmatmul.bf16.gmra.mxu3 %v4729_v56 }
 0xaac   : > { %v4690_v47 = vpop.f32.mrf.mxu2 }
 0xaad   : > { %v4422_v25 = vpop.f32.mrf.mxu0  ;;  %v4691_v27 = vadd.f32 %v8861_v41, %v4690_v47  ;;  %v4029_v45 = vpop.f32.mrf.mxu1 }
 0xaae   : > { %v4423_v51 = vadd.f32 %v8853_v55, %v4422_v25  ;;  %v4050_v4 = vadd.f32 %v4029_v45, %v3780_v32 }
 0xaaf   : > { %v4718_v6 = vmax.f32 %v4691_v27, 0.0 }
 0xab0   : > { %v4449_v12 = vmax.f32 %v4423_v51, 0.0 }
 0xab1   : > { %v4297_v38 = vpop.f32.mrf.mxu3 }
 0xab2   : > { %v4460_v14 = vpack.c.bf16 %v4449_v12, %v4448_v37  ;;  %v8898_v2 = vadd.f32 %v4297_v38, %v4049_v18 }
 0xab4   : > { %v4692_v50 = vpop.f32.mrf.mxu2  ;;  %4556 = vmatmul.bf16.gmra.mxu1 %v4460_v14 }
 0xab5   : > { %v4693_v1 = vadd.f32 %v8861_v41, %v4692_v50  ;;  %v4425_v7 = vpop.f32.mrf.mxu0 }
 0xab6   : > { %v4426_v46 = vadd.f32 %v8853_v55, %v4425_v7 }
 0xab7   : > { %v4719_v48 = vmax.f32 %v4693_v1, 0.0 }
 0xab8   : > { %v4450_v30 = vmax.f32 %v4426_v46, 0.0 }
 0xab9   : > { %v4730_v19 = vpack.c.bf16 %v4719_v48, %v4718_v6  ;;  %v4299_v63 = vpop.f32.mrf.mxu3 }
 0xaba   : > { %v8904_v35 = vadd.f32 %v4299_v63, %v4050_v4 }
 0xabb   : > { %4826 = vmatmul.bf16.gmra.mxu3 %v4730_v19 }
 0xabc   : > { %v4695_v26 = vpop.f32.mrf.mxu2 }
 0xabd   : > { %v4427_v20 = vpop.f32.mrf.mxu0  ;;  %v4696_v13 = vadd.f32 %v8861_v41, %v4695_v26 }
 0xabe   : > { %v4428_v17 = vadd.f32 %v8853_v55, %v4427_v20 }
 0xabf   : > { %v4720_v28 = vmax.f32 %v4696_v13, 0.0 }
 0xac0   : > { %v4451_v52 = vmax.f32 %v4428_v17, 0.0 }
 0xac2   : > { %v4461_v21 = vpack.c.bf16 %v4451_v52, %v4450_v30 }
 0xac4   : > { %v4697_v23 = vpop.f32.mrf.mxu2  ;;  %4561 = vmatmul.bf16.gmra.mxu1 %v4461_v21  ;;  %v3781_v21 = vadd.f32 %v8738_v8, %v8317_v34 }
 0xac5   : > { %v4698_v39 = vadd.f32 %v8861_v41, %v4697_v23  ;;  %v4430_v54 = vpop.f32.mrf.mxu0 }
 0xac6   : > { %v4431_v56 = vadd.f32 %v8853_v55, %v4430_v54  ;;  %v3782_v54 = vadd.f32 %v8738_v8, %v8414_v0 }
 0xac7   : > { %v4721_v29 = vmax.f32 %v4698_v39, 0.0 }
 0xac8   : > { %v4452_v25 = vmax.f32 %v4431_v56, 0.0  ;;  %v3768_v56 = vadd.f32 %v8738_v8, %v8178_v16 }
 0xac9   : > { %v4731_v3 = vpack.c.bf16 %v4721_v29, %v4720_v28 }
 0xaca   : > { %v4038_v34 = vadd.f32 %v8750_v49, %v3768_v56 }
 0xacb   : > { %4831 = vmatmul.bf16.gmra.mxu3 %v4731_v3 }
 0xacc   : > { %v4700_v22 = vpop.f32.mrf.mxu2 }
 0xacd   : > { %v4432_v62 = vpop.f32.mrf.mxu0  ;;  %v4701_v18 = vadd.f32 %v8861_v41, %v4700_v22 }
 0xace   : > { %v4433_v47 = vadd.f32 %v8853_v55, %v4432_v62  ;;  %v4308_v62 = vadd.f32 %v8752_v36, %v4038_v34 }
 0xacf   : > { %v4722_v14 = vmax.f32 %v4701_v18, 0.0 }
 0xad0   : > { %v4453_v11 = vmax.f32 %v4433_v47, 0.0 }
 0xad2   : > { %v4462_v51 = vpack.c.bf16 %v4453_v11, %v4452_v25 }
 0xad4   : > { %v4702_v37 = vpop.f32.mrf.mxu2  ;;  %4566 = vmatmul.bf16.gmra.mxu1 %v4462_v51 }
 0xad5   : > { %v4703_v12 = vadd.f32 %v8861_v41, %v4702_v37  ;;  %v4435_v38 = vpop.f32.mrf.mxu0 }
 0xad6   : > { %v4436_v45 = vadd.f32 %v8853_v55, %v4435_v38 }
 0xad7   : > { %v4723_v27 = vmax.f32 %v4703_v12, 0.0 }
 0xad8   : > { %v4454_v6 = vmax.f32 %v4436_v45, 0.0 }
 0xad9   : > { %v4732_v50 = vpack.c.bf16 %v4723_v27, %v4722_v14 }
 0xadb   : > { %4836 = vmatmul.bf16.gmra.mxu3 %v4732_v50 }
 0xadc   : > { %v4705_v1 = vpop.f32.mrf.mxu2 }
 0xadd   : > { %v4437_v7 = vpop.f32.mrf.mxu0  ;;  %v4706_v63 = vadd.f32 %v8861_v41, %v4705_v1 }
 0xade   : > { %v4438_v32 = vadd.f32 %v8853_v55, %v4437_v7 }
 0xadf   : > { %v4724_v20 = vmax.f32 %v4706_v63, 0.0 }
 0xae0   : > { %v4455_v48 = vmax.f32 %v4438_v32, 0.0 }
 0xae1   : > { %v4032_v4 = vpop.f32.mrf.mxu1 }
 0xae2   : > { %v4463_v19 = vpack.c.bf16 %v4455_v48, %v4454_v6  ;;  %v4051_v13 = vadd.f32 %v4032_v4, %v3781_v21  ;;  %v3772_v48 = vadd.f32 %v8738_v8, %v8200_v43 }
 0xae4   : > { %v4707_v46 = vpop.f32.mrf.mxu2  ;;  %4571 = vmatmul.bf16.gmra.mxu1 %v4463_v19 }
 0xae5   : > { %v4708_v26 = vadd.f32 %v8861_v41, %v4707_v46 }
 0xae7   : > { %v4725_v17 = vmax.f32 %v4708_v26, 0.0 }
 0xae9   : > { %v4733_v30 = vpack.c.bf16 %v4725_v17, %v4724_v20  ;;  %v4034_v52 = vpop.f32.mrf.mxu1 }
 0xaea   : > { %v4052_v28 = vadd.f32 %v4034_v52, %v3782_v54 }
 0xaeb   : > { %4841 = vmatmul.bf16.gmra.mxu3 %v4733_v30  ;;  %v3774_v30 = vadd.f32 %v8738_v8, %v8226_v57 }
 0xaed   : > { %v4302_v55 = vpop.f32.mrf.mxu3  ;;  %v4044_v43 = vadd.f32 %v8848_v44, %v3774_v30 }
 0xaee   : > { %v8920_v23 = vadd.f32 %v4302_v55, %v4051_v13 }
 0xaef   : > { %v4314_v52 = vadd.f32 %v8856_v33, %v4044_v43 }
 0xaf1   : > { %v4537_v39 = vpop.f32.mrf.mxu1 }
 0xaf2   : > { %v4577_v47 = vadd.f32 %v4537_v39, %v8747_v61  ;;  %v3770_v61 = vadd.f32 %v8738_v8, %v8187_v60  ;;  %v4042_v60 = vadd.f32 %v8831_v59, %v3772_v48 }
 0xaf4   : > { %v4040_v36 = vadd.f32 %v8769_v42, %v3770_v61  ;;  %v4312_v4 = vadd.f32 %v8838_v58, %v4042_v60 }
 0xaf5   : > { %v4304_v29 = vpop.f32.mrf.mxu3 }
 0xaf6   : > { %v8924_v41 = vadd.f32 %v4304_v29, %v4052_v28  ;;  %v4310_v38 = vadd.f32 %v8777_v5, %v4040_v36 }
 0xaf7   : > { %v4807_v3 = vpop.f32.mrf.mxu0 }
 0xaf8   : > { %v4847_v51 = vadd.f32 %v4807_v3, %v4577_v47 }
 0xaf9   : > { %v4539_v22 = vpop.f32.mrf.mxu1 }
 0xafa   : > { %v4578_v25 = vadd.f32 %v4539_v22, %v4308_v62 }
 0xaff   : > { %v4809_v11 = vpop.f32.mrf.mxu0 }
 0xb00   : > { %v4848_v18 = vadd.f32 %v4809_v11, %v4578_v25 }
 0xb01   : > { %v4542_v0 = vpop.f32.mrf.mxu1 }
 0xb02   : > { %v5662_v16 = vpack.c.bf16 %v4848_v18, %v4847_v51  ;;  %v4579_v14 = vadd.f32 %v4542_v0, %v8758_v24 }
 0xb04   : > { %5663 = vst [vmem:[%s8936_s29] sm:$0xff] %v5662_v16  }
 0xb09   : > { %v4544_v49 = vpop.f32.mrf.mxu1 }
 0xb0a   : > { %v4580_v27 = vadd.f32 %v4544_v49, %v4310_v38 }
 0xb0d   : > { %v4812_v37 = vpop.f32.mrf.mxu3 }
 0xb0e   : > { %v4849_v45 = vadd.f32 %v4812_v37, %v4579_v14 }
 0xb11   : > { %v4547_v12 = vpop.f32.mrf.mxu1 }
 0xb12   : > { %v4581_v5 = vadd.f32 %v4547_v12, %v8781_v9 }
 0xb15   : > { %v4814_v50 = vpop.f32.mrf.mxu3 }
 0xb16   : > { %v4850_v1 = vadd.f32 %v4814_v50, %v4580_v27 }
 0xb18   : > { %v5667_v7 = vpack.c.bf16 %v4850_v1, %v4849_v45 }
 0xb19   : > { %v4549_v32 = vpop.f32.mrf.mxu1 }
 0xb1a   : > { %5713 = vst [vmem:[%s8936_s29 + $0x8] sm:$0xff] %v5667_v7   ;;  %v4582_v24 = vadd.f32 %v4549_v32, %v4312_v4 }
 0xb1e   : > { %v4817_v6 = vpop.f32.mrf.mxu3 }
 0xb1f   : > { %v4851_v63 = vadd.f32 %v4817_v6, %v4581_v5 }
 0xb21   : > { %v4552_v42 = vpop.f32.mrf.mxu1 }
 0xb22   : > { %v4583_v58 = vadd.f32 %v4552_v42, %v8846_v10 }
 0xb26   : > { %v4819_v19 = vpop.f32.mrf.mxu3 }
 0xb27   : > { %v4852_v46 = vadd.f32 %v4819_v19, %v4582_v24 }
 0xb29   : > { %v5672_v26 = vpack.c.bf16 %v4852_v46, %v4851_v63  ;;  %v4554_v20 = vpop.f32.mrf.mxu1 }
 0xb2a   : > { %v4584_v9 = vadd.f32 %v4554_v20, %v4314_v52 }
 0xb2b   : > { %5714 = vst [vmem:[%s8936_s29 + $0x10] sm:$0xff] %v5672_v26  }
 0xb2e   : > { %v4822_v17 = vpop.f32.mrf.mxu3 }
 0xb2f   : > { %v4853_v13 = vadd.f32 %v4822_v17, %v4583_v58 }
 0xb31   : > { %v4557_v59 = vpop.f32.mrf.mxu1 }
 0xb32   : > { %v4585_v3 = vadd.f32 %v4557_v59, %v8868_v40 }
 0xb36   : > { %v4824_v21 = vpop.f32.mrf.mxu3 }
 0xb37   : > { %v4854_v55 = vadd.f32 %v4824_v21, %v4584_v9 }
 0xb39   : > { %v5677_v39 = vpack.c.bf16 %v4854_v55, %v4853_v13  ;;  %v4559_v54 = vpop.f32.mrf.mxu1 }
 0xb3a   : > { %v4586_v57 = vadd.f32 %v4559_v54, %v8874_v15 }
 0xb3b   : > { %5715 = vst [vmem:[%s8936_s29 + $0x18] sm:$0xff] %v5677_v39  }
 0xb3e   : > { %v4827_v28 = vpop.f32.mrf.mxu3 }
 0xb3f   : > { %v4855_v44 = vadd.f32 %v4827_v28, %v4585_v3 }
 0xb41   : > { %v4562_v29 = vpop.f32.mrf.mxu1 }
 0xb42   : > { %v4587_v62 = vadd.f32 %v4562_v29, %v8882_v53 }
 0xb46   : > { %v4829_v8 = vpop.f32.mrf.mxu3 }
 0xb47   : > { %v4856_v33 = vadd.f32 %v4829_v8, %v4586_v57 }
 0xb49   : > { %v5682_v56 = vpack.c.bf16 %v4856_v33, %v4855_v44  ;;  %v4564_v10 = vpop.f32.mrf.mxu1 }
 0xb4a   : > { %v4588_v47 = vadd.f32 %v4564_v10, %v8888_v31 }
 0xb4b   : > { %5716 = vst [vmem:[%s8936_s29 + $0x20] sm:$0xff] %v5682_v56  }
 0xb4e   : > { %v4832_v22 = vpop.f32.mrf.mxu3 }
 0xb4f   : > { %v4857_v11 = vadd.f32 %v4832_v22, %v4587_v62 }
 0xb51   : > { %v4567_v34 = vpop.f32.mrf.mxu1 }
 0xb52   : > { %v4589_v0 = vadd.f32 %v4567_v34, %v8898_v2 }
 0xb56   : > { %v4834_v25 = vpop.f32.mrf.mxu3 }
 0xb57   : > { %v4858_v51 = vadd.f32 %v4834_v25, %v4588_v47 }
 0xb59   : > { %v5687_v40 = vpack.c.bf16 %v4858_v51, %v4857_v11  ;;  %v4569_v18 = vpop.f32.mrf.mxu1 }
 0xb5a   : > { %v4590_v16 = vadd.f32 %v4569_v18, %v8904_v35 }
 0xb5b   : > { %5717 = vst [vmem:[%s8936_s29 + $0x28] sm:$0xff] %v5687_v40  }
 0xb5e   : > { %v4837_v15 = vpop.f32.mrf.mxu3 }
 0xb5f   : > { %v4859_v37 = vadd.f32 %v4837_v15, %v4589_v0 }
 0xb61   : > { %v4572_v36 = vpop.f32.mrf.mxu1 }
 0xb62   : > { %v4591_v38 = vadd.f32 %v4572_v36, %v8920_v23 }
 0xb66   : > { %v4839_v49 = vpop.f32.mrf.mxu3 }
 0xb67   : > { %v4860_v61 = vadd.f32 %v4839_v49, %v4590_v16 }
 0xb69   : > { %v5692_v53 = vpack.c.bf16 %v4860_v61, %v4859_v37  ;;  %v4574_v31 = vpop.f32.mrf.mxu1 }
 0xb6a   : > { %v4592_v14 = vadd.f32 %v4574_v31, %v8924_v41 }
 0xb6b   : > { %5718 = vst [vmem:[%s8936_s29 + $0x30] sm:$0xff] %v5692_v53  }
 0xb6e   : > { %v4842_v12 = vpop.f32.mrf.mxu3 }
 0xb6f   : > { %v4861_v50 = vadd.f32 %v4842_v12, %v4591_v38 }
 0xb76   : > { %v4844_v27 = vpop.f32.mrf.mxu3 }
 0xb77   : > { %v4862_v45 = vadd.f32 %v4844_v27, %v4592_v14 }
 0xb79   : > { %v5697_v1 = vpack.c.bf16 %v4862_v45, %v4861_v50 }
 0xb7b   : > { %5719 = vst [vmem:[%s8936_s29 + $0x38] sm:$0xff] %v5697_v1  }
 0xb7c PF: > { %s22_s21 = sadd.s32 1, %s6078_s21  }
 0xb7d   : > { %p19_p4 = scmp.ge.s32.totalorder %s22_s21, 4  }
 0xb7f   :  { %21 = sbr.rel (!%p19_p4) target bundleno = 1 (0x1), region = 98 }

</bundles_post_ra>
